<compile_context>
chip_gen: v7x
topology: tpu7x:2x2x1
jax: 0.10.0
libtpu: 0.0.40
codegen_flags: <defaults>
</compile_context>

<pallas_src>
import functools

import jax
import jax.numpy as jnp
from jax import lax
from jax.experimental import pallas as pl
from jax.experimental.pallas import tpu as pltpu

NUM_FRAMES = 8          # module hardcodes 64; reduced for a small runnable example
SHIFT_DIV = 8           # self.shift_div
BACKBONE_OUT = 1280     # mobilenet_v2 feature channels
EMB_DIM = 256
N_CLS = 10
N_CLS_PAD = 128         # lane-dense padded fc width; sliced to N_CLS in the wrapper
BN_EPS = 1e-5


# ----------------------------------------------------------------------------
# Fused kernel.  Grid = (B, n_hw_chunks):
#   * every (b, h) step: TSM shift on one spatial chunk, pointwise conv
#     (C -> 1280) + bias + ReLU6, per-frame spatial SUM accumulated into a
#     (T, 1280) f32 scratch,
#   * on the last chunk: finish the mean (AdaptiveAvgPool2d(1)), then run the
#     whole head (proj, BN eval, ReLU, attention softmax over T, weighted sum,
#     fc) and write the padded logits block.
# ----------------------------------------------------------------------------
def _fused_kernel(x_ref, wbb_ref, bbb_ref, wp_ref, bns_ref, bnb_ref,
                  wa_ref, ba_ref, wfc_ref, bfc_ref, o_ref, acc_ref,
                  *, fold, inv_hw):
    hi = pl.program_id(1)

    @pl.when(hi == 0)
    def _():
        acc_ref[...] = jnp.zeros_like(acc_ref)

    # --- TSM temporal shift on this spatial chunk (2 selects, f32) ----------
    #   c <  fold         : frame t+1 (zero at t = T-1)
    #   fold <= c < 2fold : frame t-1 (zero at t = 0)
    #   c >= 2fold        : frame t
    xc = x_ref[0]                                            # (T, HWc, C) f32
    T, hwc, C = xc.shape
    zero = jnp.zeros((1, hwc, C), xc.dtype)
    x_next = jnp.concatenate([xc[1:], zero], axis=0)
    x_prev = jnp.concatenate([zero, xc[:-1]], axis=0)
    c_idx = lax.broadcasted_iota(jnp.int32, (1, 1, C), 2)
    xs = jnp.where(c_idx < fold, x_next,
                   jnp.where(c_idx < 2 * fold, x_prev, xc))

    # --- pointwise conv (C -> 1280) + bias + ReLU6 + spatial SUM, per chunk --
    # bf16 operands, f32 accumulation on the MXU; epilogue stays f32 (v5e-safe).
    xs2 = xs.reshape(T * hwc, C).astype(jnp.bfloat16)
    y = jnp.dot(xs2, wbb_ref[...], preferred_element_type=jnp.float32)
    y = jnp.clip(y + bbb_ref[...], 0.0, 6.0)                 # ReLU6
    acc_ref[...] += jnp.sum(y.reshape(T, hwc, BACKBONE_OUT), axis=1)

    # --- head on the final chunk ---------------------------------------------
    @pl.when(hi == pl.num_programs(1) - 1)
    def _():
        pooled = acc_ref[...] * inv_hw                        # (T, 1280) f32
        h = jnp.dot(pooled.astype(jnp.bfloat16), wp_ref[...],
                    preferred_element_type=jnp.float32)       # (T, E)
        h = jnp.maximum(h * bns_ref[...] + bnb_ref[...], 0.0)  # BN(eval) + ReLU

        # attention logits via a lane reduce; scalar bias lives in SMEM
        logits = (jnp.sum(h * wa_ref[...], axis=-1, keepdims=True)
                  + ba_ref[0, 0])                             # (T, 1)
        m = jnp.max(logits, axis=0, keepdims=True)
        e = jnp.exp(logits - m)
        w = e / jnp.sum(e, axis=0, keepdims=True)             # softmax over T

        emb = jnp.sum(w * h, axis=0, keepdims=True)           # (1, E)
        out = (jnp.dot(emb, wfc_ref[...], preferred_element_type=jnp.float32)
               + bfc_ref[...])                                # (1, 128) padded
        o_ref[0] = out.astype(o_ref.dtype)


# ----------------------------------------------------------------------------
# Full forward (glue in plain JAX, everything hot in the single Pallas call)
# ----------------------------------------------------------------------------
def tsm_attn_forward(x, params):
    """x: (B, C, T, H, W) float32 — same axis convention as the PyTorch module."""
    B, C, T, H, W = x.shape
    HW = H * W
    fold = C // SHIFT_DIV
    # permute(0,2,1,3,4).reshape(B*T, C, H, W) in torch  ==  channel-last here
    xt = jnp.transpose(x, (0, 2, 3, 4, 1)).reshape(B, T, HW, C)

    hw_chunk = 64 if HW % 64 == 0 else HW      # spatial chunk (multiple of 8)
    n_chunks = HW // hw_chunk

    # lane-dense padded fc weights (extra columns are zero; sliced off below)
    w_fc_p = jnp.zeros((EMB_DIM, N_CLS_PAD), jnp.float32).at[:, :N_CLS].set(params["w_fc"])
    b_fc_p = jnp.zeros((1, N_CLS_PAD), jnp.float32).at[:, :N_CLS].set(params["b_fc"])

    flops = (2 * B * T * HW * C * BACKBONE_OUT
             + 2 * B * T * BACKBONE_OUT * EMB_DIM
             + 2 * B * EMB_DIM * N_CLS_PAD)
    bytes_accessed = (xt.size * 4 + C * BACKBONE_OUT * 2
                      + BACKBONE_OUT * EMB_DIM * 2
                      + EMB_DIM * N_CLS_PAD * 4 + B * N_CLS_PAD * 4)

    out = pl.pallas_call(
        functools.partial(_fused_kernel, fold=fold, inv_hw=1.0 / HW),
        out_shape=jax.ShapeDtypeStruct((B, 1, N_CLS_PAD), jnp.float32),
        grid_spec=pltpu.PrefetchScalarGridSpec(
            num_scalar_prefetch=0,
            grid=(B, n_chunks),                       # reduction (HW) axis last
            in_specs=[
                pl.BlockSpec((1, T, hw_chunk, C), lambda b, h: (b, 0, h, 0)),
                pl.BlockSpec((C, BACKBONE_OUT), lambda b, h: (0, 0)),
                pl.BlockSpec((1, BACKBONE_OUT), lambda b, h: (0, 0)),
                pl.BlockSpec((BACKBONE_OUT, EMB_DIM), lambda b, h: (0, 0)),
                pl.BlockSpec((1, EMB_DIM), lambda b, h: (0, 0)),
                pl.BlockSpec((1, EMB_DIM), lambda b, h: (0, 0)),
                pl.BlockSpec((1, EMB_DIM), lambda b, h: (0, 0)),    # w_attn row
                pl.BlockSpec(memory_space=pltpu.MemorySpace.SMEM),  # b_attn scalar
                pl.BlockSpec((EMB_DIM, N_CLS_PAD), lambda b, h: (0, 0)),
                pl.BlockSpec((1, N_CLS_PAD), lambda b, h: (0, 0)),
            ],
            out_specs=pl.BlockSpec((1, 1, N_CLS_PAD), lambda b, h: (b, 0, 0)),
            scratch_shapes=[pltpu.VMEM((T, BACKBONE_OUT), jnp.float32)]),
        compiler_params=pltpu.CompilerParams(
            dimension_semantics=("parallel", "arbitrary"),
            vmem_limit_bytes=24 * 1024 * 1024),
        cost_estimate=pl.CostEstimate(flops=flops, transcendentals=B * T,
                                      bytes_accessed=bytes_accessed),
    )(xt,
      params["w_bb"].astype(jnp.bfloat16), params["b_bb"],
      params["w_proj"].astype(jnp.bfloat16), params["bn_scale"], params["bn_shift"],
      params["w_attn"].reshape(1, EMB_DIM), params["b_attn"],
      w_fc_p, b_fc_p)
    return out.reshape(B, N_CLS_PAD)[:, :N_CLS]


# ----------------------------------------------------------------------------
# Pure-JAX reference (for correctness check only)
# ----------------------------------------------------------------------------
def reference_forward(x, params):
    B, C, T, H, W = x.shape
    hp = jax.lax.Precision.HIGHEST
    xt = jnp.transpose(x, (0, 2, 3, 4, 1))                  # (B,T,H,W,C)
    fold = C // SHIFT_DIV
    out = jnp.zeros_like(xt)
    out = out.at[:, :-1, ..., :fold].set(xt[:, 1:, ..., :fold])
    out = out.at[:, 1:, ..., fold:2 * fold].set(xt[:, :-1, ..., fold:2 * fold])
    out = out.at[:, :, ..., 2 * fold:].set(xt[:, :, ..., 2 * fold:])
    x2 = out.reshape(B * T, H * W, C)
    y = jnp.clip(jnp.dot(x2, params["w_bb"], precision=hp) + params["b_bb"], 0.0, 6.0)
    f = jnp.mean(y, axis=1)                                 # (B*T, 1280)
    h = jnp.dot(f, params["w_proj"], precision=hp)
    h = h * params["bn_scale"] + params["bn_shift"]
    h = jax.nn.relu(h).reshape(B, T, -1)
    logits = jnp.dot(h, params["w_attn"], precision=hp).squeeze(-1) + params["b_attn"][0, 0]
    w = jax.nn.softmax(logits, axis=1)[..., None]
    emb = jnp.sum(w * h, axis=1)
    return jnp.dot(emb, params["w_fc"], precision=hp) + params["b_fc"]


def make_params(key, c_in):
    ks = jax.random.split(key, 10)
    s = 0.05
    gamma = 1.0 + 0.1 * jax.random.normal(ks[3], (EMB_DIM,), jnp.float32)
    beta = 0.1 * jax.random.normal(ks[4], (EMB_DIM,), jnp.float32)
    r_mean = 0.1 * jax.random.normal(ks[5], (EMB_DIM,), jnp.float32)
    r_var = 1.0 + 0.1 * jnp.abs(jax.random.normal(ks[6], (EMB_DIM,), jnp.float32))
    inv_std = gamma / jnp.sqrt(r_var + BN_EPS)
    return {
        "w_bb": s * jax.random.normal(ks[0], (c_in, BACKBONE_OUT), jnp.float32),
        "b_bb": s * jax.random.normal(ks[1], (1, BACKBONE_OUT), jnp.float32),
        "w_proj": s * jax.random.normal(ks[2], (BACKBONE_OUT, EMB_DIM), jnp.float32),
        "bn_scale": inv_std.reshape(1, EMB_DIM),
        "bn_shift": (beta - r_mean * inv_std).reshape(1, EMB_DIM),
        "w_attn": s * jax.random.normal(ks[7], (EMB_DIM, 1), jnp.float32),
        "b_attn": s * jax.random.normal(jax.random.fold_in(key, 77), (1, 1), jnp.float32),
        "w_fc": s * jax.random.normal(ks[8], (EMB_DIM, N_CLS), jnp.float32),
        "b_fc": s * jax.random.normal(ks[9], (1, N_CLS), jnp.float32),
    }


if __name__ == "__main__":
    key = jax.random.PRNGKey(0)
    k_x, k_p = jax.random.split(key)

    B, C_IN, T, H, W = 2, 8, NUM_FRAMES, 16, 16   # C_IN=8 -> fold=1 exercises the shift
    x = jax.random.normal(k_x, (B, C_IN, T, H, W), jnp.float32)
    params = make_params(k_p, C_IN)

    out = jax.block_until_ready(tsm_attn_forward(x, params))
    ref = jax.block_until_ready(reference_forward(x, params))

    assert out.shape == (B, N_CLS), out.shape
    assert jnp.allclose(out, ref, rtol=1e-2, atol=1e-2), (out, ref)
    print("KERNEL_OK")
</pallas_src>

<mosaic_0001>
module attributes {stable_mosaic.version = 11 : i64} {
  func.func @_fused_kernel(%arg0: i32, %arg1: i32, %arg2: memref<1x8x64x8xf32, #tpu.memory_space<vmem>>, %arg3: memref<8x1280xbf16, #tpu.memory_space<vmem>>, %arg4: memref<1x1280xf32, #tpu.memory_space<vmem>>, %arg5: memref<1280x256xbf16, #tpu.memory_space<vmem>>, %arg6: memref<1x256xf32, #tpu.memory_space<vmem>>, %arg7: memref<1x256xf32, #tpu.memory_space<vmem>>, %arg8: memref<1x256xf32, #tpu.memory_space<vmem>>, %arg9: memref<1x1xf32, #tpu.memory_space<smem>>, %arg10: memref<256x128xf32, #tpu.memory_space<vmem>>, %arg11: memref<1x128xf32, #tpu.memory_space<vmem>>, %arg12: memref<1x1x128xf32, #tpu.memory_space<vmem>>, %arg13: memref<8x1280xf32, #tpu.memory_space<vmem>>) attributes {dimension_semantics = [#tpu.dimension_semantics<parallel>, #tpu.dimension_semantics<arbitrary>], iteration_bounds = array<i64: 2, 4>, scalar_prefetch = 0 : i64, scratch_operands = 1 : i64, tpu.core_type = #tpu.core_type<tc>, window_params = [{transform_indices = @transform_0, window_bounds = array<i64: 1, 8, 64, 8>}, {pipeline_mode = #tpu.pipeline_mode<synchronous>, transform_indices = @transform_1, window_bounds = array<i64: 8, 1280>}, {pipeline_mode = #tpu.pipeline_mode<synchronous>, transform_indices = @transform_2, window_bounds = array<i64: 1, 1280>}, {pipeline_mode = #tpu.pipeline_mode<synchronous>, transform_indices = @transform_3, window_bounds = array<i64: 1280, 256>}, {pipeline_mode = #tpu.pipeline_mode<synchronous>, transform_indices = @transform_4, window_bounds = array<i64: 1, 256>}, {pipeline_mode = #tpu.pipeline_mode<synchronous>, transform_indices = @transform_5, window_bounds = array<i64: 1, 256>}, {pipeline_mode = #tpu.pipeline_mode<synchronous>, transform_indices = @transform_6, window_bounds = array<i64: 1, 256>}, {transform_indices = @transform_7, window_bounds = array<i64: 1, 1>}, {pipeline_mode = #tpu.pipeline_mode<synchronous>, transform_indices = @transform_8, window_bounds = array<i64: 256, 128>}, {pipeline_mode = #tpu.pipeline_mode<synchronous>, transform_indices = @transform_9, window_bounds = array<i64: 1, 128>}, {transform_indices = @transform_10, window_bounds = array<i64: 1, 1, 128>}]} {
    %c0_i32 = arith.constant 0 : i32
    %0 = arith.cmpi eq, %arg1, %c0_i32 : i32
    %1 = arith.extui %0 : i1 to i32
    %c0_i32_0 = arith.constant 0 : i32
    %2 = arith.cmpi ne, %1, %c0_i32_0 : i32
    scf.if %2 {
      %cst_17 = arith.constant 0.000000e+00 : f32
      %40 = vector.broadcast %cst_17 : f32 to vector<8x1280xf32>
      %c0_18 = arith.constant 0 : index
      %c0_19 = arith.constant 0 : index
      %41 = vector.load %arg13[%c0_18, %c0_19] : memref<8x1280xf32, #tpu.memory_space<vmem>>, vector<8x1280xf32>
      tpu.vector_store %arg13[%c0_18, %c0_19], %40 {strides = array<i32>} : memref<8x1280xf32, #tpu.memory_space<vmem>>, vector<8x1280xf32>,
    } else {
    }
    %c0 = arith.constant 0 : index
    %c0_1 = arith.constant 0 : index
    %c0_2 = arith.constant 0 : index
    %c0_3 = arith.constant 0 : index
    %3 = vector.load %arg2[%c0, %c0_1, %c0_2, %c0_3] : memref<1x8x64x8xf32, #tpu.memory_space<vmem>>, vector<1x8x64x8xf32>
    %4 = vector.shape_cast %3 : vector<1x8x64x8xf32> to vector<8x64x8xf32>
    %cst = arith.constant 0.000000e+00 : f32
    %5 = vector.broadcast %cst : f32 to vector<1x64x8xf32>
    %6 = vector.extract_strided_slice %4 {offsets = [1, 0, 0], sizes = [7, 64, 8], strides = [1, 1, 1]} : vector<8x64x8xf32> to vector<7x64x8xf32>
    %7 = tpu.concatenate %6, %5 in 0 : vector<7x64x8xf32>, vector<1x64x8xf32> -> vector<8x64x8xf32>
    %8 = vector.extract_strided_slice %4 {offsets = [0, 0, 0], sizes = [7, 64, 8], strides = [1, 1, 1]} : vector<8x64x8xf32> to vector<7x64x8xf32>
    %9 = tpu.concatenate %5, %8 in 0 : vector<1x64x8xf32>, vector<7x64x8xf32> -> vector<8x64x8xf32>
    %10 = tpu.iota {dimensions = array<i32: 2>} : vector<1x1x8xi32>
    %c1_i32 = arith.constant 1 : i32
    %11 = vector.broadcast %c1_i32 : i32 to vector<1x1x8xi32>
    %12 = arith.cmpi slt, %10, %11 : vector<1x1x8xi32>
    %c2_i32 = arith.constant 2 : i32
    %13 = vector.broadcast %c2_i32 : i32 to vector<1x1x8xi32>
    %14 = arith.cmpi slt, %10, %13 : vector<1x1x8xi32>
    %15 = vector.shape_cast %14 : vector<1x1x8xi1> to vector<1x1x8xi1>
    %16 = vector.broadcast %15 : vector<1x1x8xi1> to vector<8x64x8xi1>
    %17 = arith.select %16, %9, %4 : vector<8x64x8xi1>, vector<8x64x8xf32>
    %18 = vector.shape_cast %12 : vector<1x1x8xi1> to vector<1x1x8xi1>
    %19 = vector.broadcast %18 : vector<1x1x8xi1> to vector<8x64x8xi1>
    %20 = arith.select %19, %7, %17 : vector<8x64x8xi1>, vector<8x64x8xf32>
    %21 = vector.shape_cast %20 : vector<8x64x8xf32> to vector<512x8xf32>
    %22 = arith.truncf %21 : vector<512x8xf32> to vector<512x8xbf16>
    %c0_4 = arith.constant 0 : index
    %c0_5 = arith.constant 0 : index
    %23 = vector.load %arg3[%c0_4, %c0_5] : memref<8x1280xbf16, #tpu.memory_space<vmem>>, vector<8x1280xbf16>
    %cst_6 = arith.constant dense<0.000000e+00> : vector<512x1280xf32>
    %24 = tpu.matmul %22, %23, %cst_6 {dimension_numbers = #tpu.dot_dimension_numbers<[1], [0], [0], [1], [0, 0, 1, 1], [], []>} : vector<512x8xbf16>, vector<8x1280xbf16>, vector<512x1280xf32> -> vector<512x1280xf32>
    %c0_7 = arith.constant 0 : index
    %c0_8 = arith.constant 0 : index
    %25 = vector.load %arg4[%c0_7, %c0_8] : memref<1x1280xf32, #tpu.memory_space<vmem>>, vector<1x1280xf32>
    %26 = vector.broadcast %25 : vector<1x1280xf32> to vector<512x1280xf32>
    %27 = arith.addf %24, %26 : vector<512x1280xf32>
    %cst_9 = arith.constant 0.000000e+00 : f32
    %cst_10 = arith.constant 6.000000e+00 : f32
    %28 = vector.broadcast %cst_9 : f32 to vector<512x1280xf32>
    %29 = arith.maximumf %28, %27 : vector<512x1280xf32>
    %30 = vector.broadcast %cst_10 : f32 to vector<512x1280xf32>
    %31 = arith.minimumf %30, %29 : vector<512x1280xf32>
    %c0_11 = arith.constant 0 : index
    %c0_12 = arith.constant 0 : index
    %32 = vector.load %arg13[%c0_11, %c0_12] : memref<8x1280xf32, #tpu.memory_space<vmem>>, vector<8x1280xf32>
    %33 = vector.shape_cast %31 : vector<512x1280xf32> to vector<8x64x1280xf32>
    %cst_13 = arith.constant dense<0.000000e+00> : vector<8x1280xf32>
    %34 = vector.multi_reduction <add>, %33, %cst_13 [1] : vector<8x64x1280xf32> to vector<8x1280xf32>
    %35 = arith.addf %32, %34 : vector<8x1280xf32>
    %c0_14 = arith.constant 0 : index
    %c0_15 = arith.constant 0 : index
    %36 = vector.load %arg13[%c0_14, %c0_15] : memref<8x1280xf32, #tpu.memory_space<vmem>>, vector<8x1280xf32>
    tpu.vector_store %arg13[%c0_14, %c0_15], %35 {strides = array<i32>} : memref<8x1280xf32, #tpu.memory_space<vmem>>, vector<8x1280xf32>,
    %c3_i32 = arith.constant 3 : i32
    %37 = arith.cmpi eq, %arg1, %c3_i32 : i32
    %38 = arith.extui %37 : i1 to i32
    %c0_i32_16 = arith.constant 0 : i32
    %39 = arith.cmpi ne, %38, %c0_i32_16 : i32
    scf.if %39 {
      %c0_17 = arith.constant 0 : index
      %c0_18 = arith.constant 0 : index
      %40 = vector.load %arg13[%c0_17, %c0_18] : memref<8x1280xf32, #tpu.memory_space<vmem>>, vector<8x1280xf32>
      %cst_19 = arith.constant 3.906250e-03 : f32
      %41 = vector.broadcast %cst_19 : f32 to vector<8x1280xf32>
      %42 = arith.mulf %40, %41 : vector<8x1280xf32>
      %43 = arith.truncf %42 : vector<8x1280xf32> to vector<8x1280xbf16>
      %c0_20 = arith.constant 0 : index
      %c0_21 = arith.constant 0 : index
      %44 = vector.load %arg5[%c0_20, %c0_21] : memref<1280x256xbf16, #tpu.memory_space<vmem>>, vector<1280x256xbf16>
      %cst_22 = arith.constant dense<0.000000e+00> : vector<8x256xf32>
      %45 = tpu.matmul %43, %44, %cst_22 {dimension_numbers = #tpu.dot_dimension_numbers<[1], [0], [0], [1], [0, 0, 1, 1], [], []>} : vector<8x1280xbf16>, vector<1280x256xbf16>, vector<8x256xf32> -> vector<8x256xf32>
      %c0_23 = arith.constant 0 : index
      %c0_24 = arith.constant 0 : index
      %46 = vector.load %arg6[%c0_23, %c0_24] : memref<1x256xf32, #tpu.memory_space<vmem>>, vector<1x256xf32>
      %47 = vector.broadcast %46 : vector<1x256xf32> to vector<8x256xf32>
      %48 = arith.mulf %45, %47 : vector<8x256xf32>
      %c0_25 = arith.constant 0 : index
      %c0_26 = arith.constant 0 : index
      %49 = vector.load %arg7[%c0_25, %c0_26] : memref<1x256xf32, #tpu.memory_space<vmem>>, vector<1x256xf32>
      %50 = vector.broadcast %49 : vector<1x256xf32> to vector<8x256xf32>
      %51 = arith.addf %48, %50 : vector<8x256xf32>
      %cst_27 = arith.constant 0.000000e+00 : f32
      %52 = vector.broadcast %cst_27 : f32 to vector<8x256xf32>
      %53 = arith.maximumf %51, %52 : vector<8x256xf32>
      %c0_28 = arith.constant 0 : index
      %c0_29 = arith.constant 0 : index
      %54 = vector.load %arg8[%c0_28, %c0_29] : memref<1x256xf32, #tpu.memory_space<vmem>>, vector<1x256xf32>
      %55 = vector.broadcast %54 : vector<1x256xf32> to vector<8x256xf32>
      %56 = arith.mulf %53, %55 : vector<8x256xf32>
      %cst_30 = arith.constant dense<0.000000e+00> : vector<8xf32>
      %57 = vector.multi_reduction <add>, %56, %cst_30 [1] : vector<8x256xf32> to vector<8xf32>
      %58 = vector.shape_cast %57 : vector<8xf32> to vector<8x1xf32>
      %c0_31 = arith.constant 0 : index
      %c0_32 = arith.constant 0 : index
      %59 = memref.load %arg9[%c0_31, %c0_32] : memref<1x1xf32, #tpu.memory_space<smem>>
      %60 = vector.broadcast %59 : f32 to vector<8x1xf32>
      %61 = arith.addf %58, %60 : vector<8x1xf32>
      %cst_33 = arith.constant dense<0xFF800000> : vector<1xf32>
      %62 = vector.multi_reduction <maximumf>, %61, %cst_33 [0] : vector<8x1xf32> to vector<1xf32>
      %63 = vector.shape_cast %62 : vector<1xf32> to vector<1x1xf32>
      %64 = vector.broadcast %63 : vector<1x1xf32> to vector<8x1xf32>
      %65 = arith.subf %61, %64 : vector<8x1xf32>
      %66 = math.exp %65 : vector<8x1xf32>
      %cst_34 = arith.constant dense<0.000000e+00> : vector<1xf32>
      %67 = vector.multi_reduction <add>, %66, %cst_34 [0] : vector<8x1xf32> to vector<1xf32>
      %68 = vector.shape_cast %67 : vector<1xf32> to vector<1x1xf32>
      %69 = vector.broadcast %68 : vector<1x1xf32> to vector<8x1xf32>
      %70 = arith.divf %66, %69 : vector<8x1xf32>
      %71 = vector.broadcast %70 : vector<8x1xf32> to vector<8x256xf32>
      %72 = arith.mulf %71, %53 : vector<8x256xf32>
      %cst_35 = arith.constant dense<0.000000e+00> : vector<256xf32>
      %73 = vector.multi_reduction <add>, %72, %cst_35 [0] : vector<8x256xf32> to vector<256xf32>
      %74 = vector.shape_cast %73 : vector<256xf32> to vector<1x256xf32>
      %c0_36 = arith.constant 0 : index
      %c0_37 = arith.constant 0 : index
      %75 = vector.load %arg10[%c0_36, %c0_37] : memref<256x128xf32, #tpu.memory_space<vmem>>, vector<256x128xf32>
      %cst_38 = arith.constant dense<0.000000e+00> : vector<1x128xf32>
      %76 = tpu.matmul %74, %75, %cst_38 {dimension_numbers = #tpu.dot_dimension_numbers<[1], [0], [0], [1], [0, 0, 1, 1], [], []>} : vector<1x256xf32>, vector<256x128xf32>, vector<1x128xf32> -> vector<1x128xf32>
      %c0_39 = arith.constant 0 : index
      %c0_40 = arith.constant 0 : index
      %77 = vector.load %arg11[%c0_39, %c0_40] : memref<1x128xf32, #tpu.memory_space<vmem>>, vector<1x128xf32>
      %78 = arith.addf %76, %77 : vector<1x128xf32>
      %c0_41 = arith.constant 0 : index
      %c0_42 = arith.constant 0 : index
      %c0_43 = arith.constant 0 : index
      %79 = vector.load %arg12[%c0_41, %c0_42, %c0_43] : memref<1x1x128xf32, #tpu.memory_space<vmem>>, vector<1x1x128xf32>
      %80 = vector.shape_cast %79 : vector<1x1x128xf32> to vector<1x128xf32>
      %81 = vector.shape_cast %78 : vector<1x128xf32> to vector<1x1x128xf32>
      tpu.vector_store %arg12[%c0_41, %c0_42, %c0_43], %81 {strides = array<i32>} : memref<1x1x128xf32, #tpu.memory_space<vmem>>, vector<1x1x128xf32>,
    } else {
    }
    return
  }
  func.func @transform_0(%arg0: i32, %arg1: i32) -> (i32, i32, i32, i32) {
    %c0_i32 = arith.constant 0 : i32
    %c0_i32_0 = arith.constant 0 : i32
    %c0_i32_1 = arith.constant 0 : i32
    return %arg0, %c0_i32, %arg1, %c0_i32_0 : i32, i32, i32, i32
  }
  func.func @transform_1(%arg0: i32, %arg1: i32) -> (i32, i32) {
    %c0_i32 = arith.constant 0 : i32
    %c0_i32_0 = arith.constant 0 : i32
    %c0_i32_1 = arith.constant 0 : i32
    return %c0_i32, %c0_i32_0 : i32, i32
  }
  func.func @transform_2(%arg0: i32, %arg1: i32) -> (i32, i32) {
    %c0_i32 = arith.constant 0 : i32
    %c0_i32_0 = arith.constant 0 : i32
    %c0_i32_1 = arith.constant 0 : i32
    return %c0_i32, %c0_i32_0 : i32, i32
  }
  func.func @transform_3(%arg0: i32, %arg1: i32) -> (i32, i32) {
    %c0_i32 = arith.constant 0 : i32
    %c0_i32_0 = arith.constant 0 : i32
    %c0_i32_1 = arith.constant 0 : i32
    return %c0_i32, %c0_i32_0 : i32, i32
  }
  func.func @transform_4(%arg0: i32, %arg1: i32) -> (i32, i32) {
    %c0_i32 = arith.constant 0 : i32
    %c0_i32_0 = arith.constant 0 : i32
    %c0_i32_1 = arith.constant 0 : i32
    return %c0_i32, %c0_i32_0 : i32, i32
  }
  func.func @transform_5(%arg0: i32, %arg1: i32) -> (i32, i32) {
    %c0_i32 = arith.constant 0 : i32
    %c0_i32_0 = arith.constant 0 : i32
    %c0_i32_1 = arith.constant 0 : i32
    return %c0_i32, %c0_i32_0 : i32, i32
  }
  func.func @transform_6(%arg0: i32, %arg1: i32) -> (i32, i32) {
    %c0_i32 = arith.constant 0 : i32
    %c0_i32_0 = arith.constant 0 : i32
    %c0_i32_1 = arith.constant 0 : i32
    return %c0_i32, %c0_i32_0 : i32, i32
  }
  func.func @transform_7(%arg0: i32, %arg1: i32) -> (i32, i32) {
    %c0_i32 = arith.constant 0 : i32
    %c0_i32_0 = arith.constant 0 : i32
    %c0_i32_1 = arith.constant 0 : i32
    return %c0_i32, %c0_i32_0 : i32, i32
  }
  func.func @transform_8(%arg0: i32, %arg1: i32) -> (i32, i32) {
    %c0_i32 = arith.constant 0 : i32
    %c0_i32_0 = arith.constant 0 : i32
    %c0_i32_1 = arith.constant 0 : i32
    return %c0_i32, %c0_i32_0 : i32, i32
  }
  func.func @transform_9(%arg0: i32, %arg1: i32) -> (i32, i32) {
    %c0_i32 = arith.constant 0 : i32
    %c0_i32_0 = arith.constant 0 : i32
    %c0_i32_1 = arith.constant 0 : i32
    return %c0_i32, %c0_i32_0 : i32, i32
  }
  func.func @transform_10(%arg0: i32, %arg1: i32) -> (i32, i32, i32) {
    %c0_i32 = arith.constant 0 : i32
    %c0_i32_0 = arith.constant 0 : i32
    %c0_i32_1 = arith.constant 0 : i32
    return %arg0, %c0_i32, %c0_i32_0 : i32, i32, i32
  }
}

</mosaic_0001>

<bundles_post_ra>
// kernel: tpu_custom_call.1
= control target key start
LH: loop header
LB: loop body
LE: loop exit
PB: predicated region body
PF: predicated region fallthrough
CT: control target
= control target key end

     0   :  { %s12602_s0 = inlined_call_operand.vmem [shape: f32[2,8,256,8], index: 0, kind: input, shape index: {}]   ;;  %s12603_s1 = inlined_call_operand.vmem [shape: bf16[8,1280], index: 1, kind: input, shape index: {}]   ;;  %s12604_s2 = inlined_call_operand.vmem [shape: f32[1,1280], index: 2, kind: input, shape index: {}]   ;;  %s12605_s3 = inlined_call_operand.vmem [shape: bf16[1280,256], index: 3, kind: input, shape index: {}]   ;;  %s12606_s4 = inlined_call_operand.vmem [shape: f32[1,256], index: 4, kind: input, shape index: {}]   ;;  %s12607_s5 = inlined_call_operand.vmem [shape: f32[1,256], index: 5, kind: input, shape index: {}]   ;;  %s12608_s6 = inlined_call_operand.vmem [shape: f32[1,256], index: 6, kind: input, shape index: {}]   ;;  %s12609_s7 = inlined_call_operand.<no memory space> [shape: f32[1,1], index: 7, kind: input, shape index: {}]   ;;  %s12610_s8 = inlined_call_operand.vmem [shape: f32[256,128], index: 8, kind: input, shape index: {}]   ;;  %s12611_s9 = inlined_call_operand.vmem [shape: f32[1,128], index: 9, kind: input, shape index: {}]   ;;  %s12612_s10 = inlined_call_operand.hbm [shape: f32[2,1,128], index: 10, kind: output, shape index: {}]  }
   0x1   :  { %12702 = sst [smem:[#allocation92_spill]] %s12602_s0 }
   0x2   :  { %12703 = sst [smem:[#allocation93_spill]] %s12603_s1 }
   0x3   :  { %12704 = sst [smem:[#allocation94_spill]] %s12612_s10 }
   0x4   :  { %15 = sst [smem:[#allocation3]] %s12609_s7 }
   0x5   :  { %16 = vsyncpa [#allocation6], 0 }
   0x6   :  { %18 = vsyncpa [#allocation6 + $0x1], 0  ;;  %s7826_s15 = smov 0   ;;  %s7828_s16 = smov 0  }
   0x7   :  { %s7830_s17 = smov 0   ;;  %s7832_s18 = smov 0  }
   0x8   :  { %s7834_s19 = smov 0   ;;  %s7836_s20 = smov 0  }
   0x9   :  { %s7838_s21 = smov 0   ;;  %s7840_s22 = smov 0  }
   0xa   :  { %s7842_s23 = smov 0   ;;  %s7844_s7 = smov 0  }
   0xb LB: > { %12705 = sst [smem:[#allocation8_spill]] %s7727_s15  ;;  %s6875_s24 = sadd.s32 4294967295, %s7763_s7   ;;  %s7763_s7 = sphi %s7844_s7, %s24_s7   ;;  %s7759_s23 = sphi %s7842_s23, %s13366_s23   ;;  %s7755_s22 = sphi %s7840_s22, %s13365_s22   ;;  %s7751_s21 = sphi %s7838_s21, %s13364_s21   ;;  %s7747_s20 = sphi %s7836_s20, %s13363_s20   ;;  %s7743_s19 = sphi %s7834_s19, %s13362_s19   ;;  %s7739_s18 = sphi %s7832_s18, %s13361_s18   ;;  %s7735_s17 = sphi %s7830_s17, %s13360_s17   ;;  %s7731_s16 = sphi %s7828_s16, %s13359_s16   ;;  %s7727_s15 = sphi %s7826_s15, %s13358_s15  }
   0xc   : > { %s6876_s25 = sadd.s32 4294967294, %s7763_s7   ;;  %s33_s26 = sadd.s32 1, %s7755_s22 }
   0xd   : > { %s36_s27 = sadd.s32 1, %s7759_s23  ;;  %p34_p0 = scmp.ge.s32.totalorder %s33_s26, 4 }
   0xe   : > { %s45_s28 = sadd.s32 1, %s7743_s19  ;;  %p52_p1 = scmp.ne.s32.totalorder %s7743_s19, %s7739_s18 }
   0xf   : > { %p53_p2 = scmp.eq.s32.totalorder %s7763_s7, 0  ;;  %s13368_s26 = smov (%p34_p0, %s33_s26), 0 }
  0x10   : > { %12706 = sst [smem:[#allocation9_spill]] %s13368_s26  ;;  %s13370_s27 = smov (!%p34_p0, %s36_s27), %s7759_s23 }
  0x11   : > { %s41_s29 = ssub.s32 %s7755_s22, %s13368_s26  ;;  %p7889_p3 = por %p53_p2, %p52_p1 }
  0x12   : > { %p38_p4 = scmp.ge.s32.totalorder %s13370_s27, 2  ;;  %s260_s11 = sadd.s32 1, %s7735_s17 }
  0x13   : > { %p270_p5 = scmp.ne.s32.totalorder %s7735_s17, %s7731_s16  ;;  %p271_p6 = scmp.eq.s32.totalorder %s6875_s24, 7 }
  0x14   : > { %s13372_s27 = smov (%p38_p4, %s13370_s27), 0  ;;  %p276_p8 = scmp.ne.s32.totalorder %s7731_s16, %s7727_s15 }
  0x15   : > { %12708 = sst [smem:[#allocation10_spill]] %s13372_s27  ;;  %p7898_p7 = por %p271_p6, %p270_p5 }
  0x16   : > { %s40_s13 = ssub.s32 %s7759_s23, %s13372_s27  ;;  %p277_p9 = scmp.eq.s32.totalorder %s6876_s25, 7 }
  0x17   : > { %s42_s14 = sor.u32 %s41_s29, %s40_s13  ;;  %p258_p10 = scmp.eq.s32.totalorder %s40_s13, 0 }
  0x18   : > { %p43_p11 = scmp.eq.s32.totalorder %s42_s14, 0  ;;  %p7906_p12 = por %p277_p9, %p276_p8 }
  0x19   : > { %s7911_s10 = scalar_select %p258_p10, %s7735_s17, %s260_s11  }
  0x1a   : > { %s12710_s26 = scalar_select %p7906_p12, 1, 0 }
  0x1b   : > { %s7914_s24 = scalar_select %p43_p11, %s7743_s19, %s45_s28  }
  0x1c   : > { %12711 = sst [smem:[#allocation11_spill]] %s12710_s26  ;;  %p6878_p13 = scmp.ge.s32.totalorder %s7763_s7, 8 }
  0x1e   : > { %320 = sbr.rel (%p6878_p13) target bundleno = 79 (0x4f), region = 52 }
  0x25   : > { %323 = sbr.rel (!%p7889_p3) target bundleno = 79 (0x4f), region = 56  ;;  %s325_s25 = sand.u32 (%p7889_p3), 1, %s7743_s19  }
  0x26   : > { %s6880_s29 = sshll.u32 (%p7889_p3), %s7755_s22, 3  ;;  %s6879_s13 = sshll.u32 (%p7889_p3), %s325_s25, 9 }
  0x27   : > { %s6881_s14 = sshll.u32 (%p7889_p3), %s7759_s23, 8  ;;  %s12712_s0 = sld [smem:[#allocation92_spill]] (%p7889_p3) }
  0x28   : > { %s330_s27 = sadd.s32 (%p7889_p3), %s6881_s14, %s6880_s29  ;;  %s7930_s30 = scalar_lea.vmem (%p7889_p3), [#allocation4], %s6879_s13 }
  0x29   : > { %s6882_s15 = sshll.u32 (%p7889_p3), %s330_s27, 3 }
  0x2d   : > { %s7925_s28 = scalar_lea.vmem %s12712_s0, %s6882_s15 }
  0x2e   : > { %v486_v0 = vld [vmem:[%s7925_s28] sm:$0xff]  ;;  %v488_v1 = vld [vmem:[%s7925_s28 + $0x8] sm:$0xff]  ;;  %v490_v2 = vld [vmem:[%s7925_s28 + $0x10] sm:$0xff] }
  0x2f   : > { %487 = vst [vmem:[%s7930_s30] sm:$0xff] %v486_v0  ;;  %489 = vst [vmem:[%s7930_s30 + $0x8] sm:$0xff] %v488_v1  ;;  %v492_v3 = vld [vmem:[%s7925_s28 + $0x18] sm:$0xff]  ;;  %v494_v4 = vld [vmem:[%s7925_s28 + $0x20] sm:$0xff] }
  0x30   : > { %491 = vst [vmem:[%s7930_s30 + $0x10] sm:$0xff] %v490_v2  ;;  %v496_v5 = vld [vmem:[%s7925_s28 + $0x28] sm:$0xff]  ;;  %493 = vst [vmem:[%s7930_s30 + $0x18] sm:$0xff] %v492_v3  ;;  %v498_v6 = vld [vmem:[%s7925_s28 + $0x30] sm:$0xff] }
  0x31   : > { %495 = vst [vmem:[%s7930_s30 + $0x20] sm:$0xff] %v494_v4  ;;  %497 = vst [vmem:[%s7930_s30 + $0x28] sm:$0xff] %v496_v5  ;;  %v500_v7 = vld [vmem:[%s7925_s28 + $0x38] sm:$0xff]  ;;  %v502_v8 = vld [vmem:[%s7925_s28 + $0x100] sm:$0xff] }
  0x32   : > { %499 = vst [vmem:[%s7930_s30 + $0x30] sm:$0xff] %v498_v6  ;;  %501 = vst [vmem:[%s7930_s30 + $0x38] sm:$0xff] %v500_v7  ;;  %v504_v9 = vld [vmem:[%s7925_s28 + $0x108] sm:$0xff]  ;;  %v506_v10 = vld [vmem:[%s7925_s28 + $0x110] sm:$0xff] }
  0x33   : > { %503 = vst [vmem:[%s7930_s30 + $0x40] sm:$0xff] %v502_v8  ;;  %v508_v11 = vld [vmem:[%s7925_s28 + $0x118] sm:$0xff]  ;;  %505 = vst [vmem:[%s7930_s30 + $0x48] sm:$0xff] %v504_v9  ;;  %v510_v12 = vld [vmem:[%s7925_s28 + $0x120] sm:$0xff] }
  0x34   : > { %507 = vst [vmem:[%s7930_s30 + $0x50] sm:$0xff] %v506_v10  ;;  %509 = vst [vmem:[%s7930_s30 + $0x58] sm:$0xff] %v508_v11  ;;  %v512_v13 = vld [vmem:[%s7925_s28 + $0x128] sm:$0xff]  ;;  %v514_v14 = vld [vmem:[%s7925_s28 + $0x130] sm:$0xff] }
  0x35   : > { %511 = vst [vmem:[%s7930_s30 + $0x60] sm:$0xff] %v510_v12  ;;  %513 = vst [vmem:[%s7930_s30 + $0x68] sm:$0xff] %v512_v13  ;;  %v516_v15 = vld [vmem:[%s7925_s28 + $0x138] sm:$0xff]  ;;  %v518_v16 = vld [vmem:[%s7925_s28 + $0x200] sm:$0xff] }
  0x36   : > { %515 = vst [vmem:[%s7930_s30 + $0x70] sm:$0xff] %v514_v14  ;;  %v520_v17 = vld [vmem:[%s7925_s28 + $0x208] sm:$0xff]  ;;  %517 = vst [vmem:[%s7930_s30 + $0x78] sm:$0xff] %v516_v15  ;;  %v522_v18 = vld [vmem:[%s7925_s28 + $0x210] sm:$0xff] }
  0x37   : > { %519 = vst [vmem:[%s7930_s30 + $0x80] sm:$0xff] %v518_v16  ;;  %521 = vst [vmem:[%s7930_s30 + $0x88] sm:$0xff] %v520_v17  ;;  %v524_v19 = vld [vmem:[%s7925_s28 + $0x218] sm:$0xff]  ;;  %v526_v20 = vld [vmem:[%s7925_s28 + $0x220] sm:$0xff] }
  0x38   : > { %523 = vst [vmem:[%s7930_s30 + $0x90] sm:$0xff] %v522_v18  ;;  %525 = vst [vmem:[%s7930_s30 + $0x98] sm:$0xff] %v524_v19  ;;  %v528_v21 = vld [vmem:[%s7925_s28 + $0x228] sm:$0xff]  ;;  %v530_v22 = vld [vmem:[%s7925_s28 + $0x230] sm:$0xff] }
  0x39   : > { %527 = vst [vmem:[%s7930_s30 + $0xa0] sm:$0xff] %v526_v20  ;;  %v532_v23 = vld [vmem:[%s7925_s28 + $0x238] sm:$0xff]  ;;  %529 = vst [vmem:[%s7930_s30 + $0xa8] sm:$0xff] %v528_v21  ;;  %v534_v24 = vld [vmem:[%s7925_s28 + $0x300] sm:$0xff] }
  0x3a   : > { %531 = vst [vmem:[%s7930_s30 + $0xb0] sm:$0xff] %v530_v22  ;;  %533 = vst [vmem:[%s7930_s30 + $0xb8] sm:$0xff] %v532_v23  ;;  %v536_v25 = vld [vmem:[%s7925_s28 + $0x308] sm:$0xff]  ;;  %v538_v26 = vld [vmem:[%s7925_s28 + $0x310] sm:$0xff] }
  0x3b   : > { %535 = vst [vmem:[%s7930_s30 + $0xc0] sm:$0xff] %v534_v24  ;;  %537 = vst [vmem:[%s7930_s30 + $0xc8] sm:$0xff] %v536_v25  ;;  %v540_v27 = vld [vmem:[%s7925_s28 + $0x318] sm:$0xff]  ;;  %v542_v28 = vld [vmem:[%s7925_s28 + $0x320] sm:$0xff] }
  0x3c   : > { %539 = vst [vmem:[%s7930_s30 + $0xd0] sm:$0xff] %v538_v26  ;;  %v544_v29 = vld [vmem:[%s7925_s28 + $0x328] sm:$0xff]  ;;  %541 = vst [vmem:[%s7930_s30 + $0xd8] sm:$0xff] %v540_v27  ;;  %v546_v30 = vld [vmem:[%s7925_s28 + $0x330] sm:$0xff] }
  0x3d   : > { %543 = vst [vmem:[%s7930_s30 + $0xe0] sm:$0xff] %v542_v28  ;;  %545 = vst [vmem:[%s7930_s30 + $0xe8] sm:$0xff] %v544_v29  ;;  %v548_v31 = vld [vmem:[%s7925_s28 + $0x338] sm:$0xff]  ;;  %v550_v32 = vld [vmem:[%s7925_s28 + $0x400] sm:$0xff] }
  0x3e   : > { %547 = vst [vmem:[%s7930_s30 + $0xf0] sm:$0xff] %v546_v30  ;;  %549 = vst [vmem:[%s7930_s30 + $0xf8] sm:$0xff] %v548_v31  ;;  %v552_v33 = vld [vmem:[%s7925_s28 + $0x408] sm:$0xff]  ;;  %v554_v34 = vld [vmem:[%s7925_s28 + $0x410] sm:$0xff] }
  0x3f   : > { %551 = vst [vmem:[%s7930_s30 + $0x100] sm:$0xff] %v550_v32  ;;  %v556_v35 = vld [vmem:[%s7925_s28 + $0x418] sm:$0xff]  ;;  %553 = vst [vmem:[%s7930_s30 + $0x108] sm:$0xff] %v552_v33  ;;  %v558_v36 = vld [vmem:[%s7925_s28 + $0x420] sm:$0xff] }
  0x40   : > { %555 = vst [vmem:[%s7930_s30 + $0x110] sm:$0xff] %v554_v34  ;;  %557 = vst [vmem:[%s7930_s30 + $0x118] sm:$0xff] %v556_v35  ;;  %v560_v37 = vld [vmem:[%s7925_s28 + $0x428] sm:$0xff]  ;;  %v562_v38 = vld [vmem:[%s7925_s28 + $0x430] sm:$0xff] }
  0x41   : > { %559 = vst [vmem:[%s7930_s30 + $0x120] sm:$0xff] %v558_v36  ;;  %561 = vst [vmem:[%s7930_s30 + $0x128] sm:$0xff] %v560_v37  ;;  %v564_v39 = vld [vmem:[%s7925_s28 + $0x438] sm:$0xff]  ;;  %v566_v40 = vld [vmem:[%s7925_s28 + $0x500] sm:$0xff] }
  0x42   : > { %563 = vst [vmem:[%s7930_s30 + $0x130] sm:$0xff] %v562_v38  ;;  %v568_v41 = vld [vmem:[%s7925_s28 + $0x508] sm:$0xff]  ;;  %565 = vst [vmem:[%s7930_s30 + $0x138] sm:$0xff] %v564_v39  ;;  %v570_v42 = vld [vmem:[%s7925_s28 + $0x510] sm:$0xff] }
  0x43   : > { %567 = vst [vmem:[%s7930_s30 + $0x140] sm:$0xff] %v566_v40  ;;  %569 = vst [vmem:[%s7930_s30 + $0x148] sm:$0xff] %v568_v41  ;;  %v572_v43 = vld [vmem:[%s7925_s28 + $0x518] sm:$0xff]  ;;  %v574_v44 = vld [vmem:[%s7925_s28 + $0x520] sm:$0xff] }
  0x44   : > { %571 = vst [vmem:[%s7930_s30 + $0x150] sm:$0xff] %v570_v42  ;;  %573 = vst [vmem:[%s7930_s30 + $0x158] sm:$0xff] %v572_v43  ;;  %v576_v45 = vld [vmem:[%s7925_s28 + $0x528] sm:$0xff]  ;;  %v578_v46 = vld [vmem:[%s7925_s28 + $0x530] sm:$0xff] }
  0x45   : > { %575 = vst [vmem:[%s7930_s30 + $0x160] sm:$0xff] %v574_v44  ;;  %v580_v47 = vld [vmem:[%s7925_s28 + $0x538] sm:$0xff]  ;;  %577 = vst [vmem:[%s7930_s30 + $0x168] sm:$0xff] %v576_v45  ;;  %v582_v48 = vld [vmem:[%s7925_s28 + $0x600] sm:$0xff] }
  0x46   : > { %579 = vst [vmem:[%s7930_s30 + $0x170] sm:$0xff] %v578_v46  ;;  %581 = vst [vmem:[%s7930_s30 + $0x178] sm:$0xff] %v580_v47  ;;  %v584_v49 = vld [vmem:[%s7925_s28 + $0x608] sm:$0xff]  ;;  %v586_v50 = vld [vmem:[%s7925_s28 + $0x610] sm:$0xff] }
  0x47   : > { %583 = vst [vmem:[%s7930_s30 + $0x180] sm:$0xff] %v582_v48  ;;  %585 = vst [vmem:[%s7930_s30 + $0x188] sm:$0xff] %v584_v49  ;;  %v588_v51 = vld [vmem:[%s7925_s28 + $0x618] sm:$0xff]  ;;  %v590_v52 = vld [vmem:[%s7925_s28 + $0x620] sm:$0xff] }
  0x48   : > { %587 = vst [vmem:[%s7930_s30 + $0x190] sm:$0xff] %v586_v50  ;;  %v592_v53 = vld [vmem:[%s7925_s28 + $0x628] sm:$0xff]  ;;  %589 = vst [vmem:[%s7930_s30 + $0x198] sm:$0xff] %v588_v51  ;;  %v594_v54 = vld [vmem:[%s7925_s28 + $0x630] sm:$0xff] }
  0x49   : > { %591 = vst [vmem:[%s7930_s30 + $0x1a0] sm:$0xff] %v590_v52  ;;  %593 = vst [vmem:[%s7930_s30 + $0x1a8] sm:$0xff] %v592_v53  ;;  %v596_v55 = vld [vmem:[%s7925_s28 + $0x638] sm:$0xff]  ;;  %v598_v56 = vld [vmem:[%s7925_s28 + $0x700] sm:$0xff] }
  0x4a   : > { %595 = vst [vmem:[%s7930_s30 + $0x1b0] sm:$0xff] %v594_v54  ;;  %597 = vst [vmem:[%s7930_s30 + $0x1b8] sm:$0xff] %v596_v55  ;;  %v600_v57 = vld [vmem:[%s7925_s28 + $0x708] sm:$0xff]  ;;  %v602_v58 = vld [vmem:[%s7925_s28 + $0x710] sm:$0xff] }
  0x4b   : > { %599 = vst [vmem:[%s7930_s30 + $0x1c0] sm:$0xff] %v598_v56  ;;  %v604_v59 = vld [vmem:[%s7925_s28 + $0x718] sm:$0xff]  ;;  %601 = vst [vmem:[%s7930_s30 + $0x1c8] sm:$0xff] %v600_v57  ;;  %v606_v60 = vld [vmem:[%s7925_s28 + $0x720] sm:$0xff] }
  0x4c   : > { %603 = vst [vmem:[%s7930_s30 + $0x1d0] sm:$0xff] %v602_v58  ;;  %605 = vst [vmem:[%s7930_s30 + $0x1d8] sm:$0xff] %v604_v59  ;;  %v608_v61 = vld [vmem:[%s7925_s28 + $0x728] sm:$0xff]  ;;  %v610_v62 = vld [vmem:[%s7925_s28 + $0x730] sm:$0xff] }
  0x4d   : > { %607 = vst [vmem:[%s7930_s30 + $0x1e0] sm:$0xff] %v606_v60  ;;  %609 = vst [vmem:[%s7930_s30 + $0x1e8] sm:$0xff] %v608_v61  ;;  %v612_v63 = vld [vmem:[%s7925_s28 + $0x738] sm:$0xff] }
  0x4e   : > { %611 = vst [vmem:[%s7930_s30 + $0x1f0] sm:$0xff] %v610_v62  ;;  %613 = vst [vmem:[%s7930_s30 + $0x1f8] sm:$0xff] %v612_v63 }
  0x4f PF: > { %p6883_p0 = scmp.ge.s32.totalorder %s7763_s7, 1  ;;  %p618_p1 = scmp.lt.s32.totalorder %s7763_s7, 9 }
  0x51   : > { %p619_p2 = pnand %p6883_p0, %p618_p1 }
  0x53   : > { %622 = sbr.rel (%p619_p2) target bundleno = 1976 (0x7b8), region = 94 }
  0x5a   : > { %s625_s15 = sand.u32 1, %s7739_s18   ;;  %s12701_s26 = sand.u32 1, %s7731_s16  }
  0x5b   : > { %s6884_s27 = sshll.u32 %s625_s15, 9  ;;  %s8065_s29 = scalar_lea.vmem [#allocation5], %s12701_s26 }
  0x5c   : > { %s8061_s25 = scalar_lea.vmem [#allocation4], %s6884_s27  ;;  %p6885_p3 = scmp.ne.s32.totalorder %s7747_s20, 0 }
  0x5d   : > { %v7765_v0 = vmov (!%p6885_p3), 0.0  }
  0x5e   : > { %666 = sbr.rel (%p6885_p3) target bundleno = 101 (0x65), region = 102  ;;  %667 = vst [vmem:[#allocation2] sm:$0xff] (!%p6885_p3), %v7765_v0  ;;  %668 = vst [vmem:[#allocation2 + $0x8] sm:$0xff] (!%p6885_p3), %v7765_v0 }
  0x5f   : > { %669 = vst [vmem:[#allocation2 + $0x10] sm:$0xff] (!%p6885_p3), %v7765_v0  ;;  %670 = vst [vmem:[#allocation2 + $0x18] sm:$0xff] (!%p6885_p3), %v7765_v0 }
  0x60   : > { %671 = vst [vmem:[#allocation2 + $0x20] sm:$0xff] (!%p6885_p3), %v7765_v0  ;;  %672 = vst [vmem:[#allocation2 + $0x28] sm:$0xff] (!%p6885_p3), %v7765_v0 }
  0x61   : > { %673 = vst [vmem:[#allocation2 + $0x30] sm:$0xff] (!%p6885_p3), %v7765_v0  ;;  %674 = vst [vmem:[#allocation2 + $0x38] sm:$0xff] (!%p6885_p3), %v7765_v0 }
  0x62   : > { %675 = vst [vmem:[#allocation2 + $0x40] sm:$0xff] (!%p6885_p3), %v7765_v0  ;;  %676 = vst [vmem:[#allocation2 + $0x48] sm:$0xff] (!%p6885_p3), %v7765_v0 }
  0x65 PF: > { %s12713_s1 = sld [smem:[#allocation93_spill]]  ;;  %vm1090_vm0 = vcmask 1043456   ;;  %v12618_v4 = vlaneseq  ;;  %v12619_v7 = vmov 0   ;;  %v8080_v9 = vld [vmem:[%s8061_s25] sm:$0xff]  ;;  %v8083_v10 = vld [vmem:[%s8061_s25 + $0x8] sm:$0xff]  ;;  %vm993_vm1 = vcmask 64512  }
  0x66   : > { %1153 = vmatprep.mubr.bf16.mxu0 %v12619_v7  ;;  %1313 = vmatprep.mubr.bf16.mxu1 %v12619_v7  ;;  %v8086_v11 = vld [vmem:[%s8061_s25 + $0x40] sm:$0xff]  ;;  %v8089_v13 = vld [vmem:[%s8061_s25 + $0x48] sm:$0xff]  ;;  %v8120_v26 = vld [vmem:[%s8061_s25 + $0x10] sm:$0xff]  ;;  %vm5296_vm4 = vcmask 1041409   ;;  %vm5298_vm5 = vcmask 1042434   ;;  %vm5300_vm6 = vcmask 1043459  }
  0x67   : > { %v8092_v14 = vand.u32 127, %v12618_v4  ;;  %v8095_v15 = vld [vmem:[%s8061_s25 + $0xc0] sm:$0xff]  ;;  %v8098_v16 = vld [vmem:[%s8061_s25 + $0xc8] sm:$0xff]  ;;  %v8139_v31 = vld [vmem:[%s8061_s25 + $0x18] sm:$0xff]  ;;  %vm5302_vm7 = vcmask 1044484   ;;  %vm5304_vm8 = vcmask 1045509  }
  0x68   : > { %v8104_v20 = vld [vmem:[%s8061_s25 + $0x100] sm:$0xff]  ;;  %v8107_v21 = vld [vmem:[%s8061_s25 + $0x108] sm:$0xff]  ;;  %v8142_v32 = vld [vmem:[%s8061_s25 + $0x50] sm:$0xff]  ;;  %vm5306_vm9 = vcmask 1046534   ;;  %vm5308_vm10 = vcmask 1047559   ;;  %p7061_p4 = scmp.ne.s32.totalorder %s7747_s20, 3 }
  0x69   : > { %v8110_v22 = vld [vmem:[%s8061_s25 + $0x140] sm:$0xff]  ;;  %vm743_vm2 = vcmp.lt.s32.totalorder %v8092_v14, 1  ;;  %vm744_vm3 = vcmp.lt.s32.totalorder %v8092_v14, 2  ;;  %v8115_v23 = vld [vmem:[%s8061_s25 + $0x148] sm:$0xff]  ;;  %v8145_v33 = vld [vmem:[%s8061_s25 + $0x58] sm:$0xff]  ;;  %s6649_s26 = sld [smem:[#allocation3]] (!%p7061_p4) }
  0x6a   : > { %v747_v27 = vsel %vm744_vm3, 0.0, %v8080_v9  ;;  %v748_v28 = vsel %vm744_vm3, 0.0, %v8083_v10  ;;  %v779_v29 = vsel %vm744_vm3, %v8095_v15, %v8104_v20  ;;  %v780_v30 = vsel %vm744_vm3, %v8098_v16, %v8107_v21  ;;  %v8160_v38 = vld [vmem:[%s8061_s25 + $0xd0] sm:$0xff]  ;;  %v8163_v39 = vld [vmem:[%s8061_s25 + $0xd8] sm:$0xff]  ;;  %v8196_v50 = vld [vmem:[%s8061_s25 + $0x20] sm:$0xff] }
  0x6b   : > { %v909_v1 = vld [vmem:[%s12713_s1] sm:$0xff]  ;;  %v910_v2 = vld [vmem:[%s12713_s1 + $0x8] sm:$0xff]  ;;  %v911_v3 = vld [vmem:[%s12713_s1 + $0x10] sm:$0xff]  ;;  %v813_v34 = vsel %vm743_vm2, %v8086_v11, %v747_v27  ;;  %v814_v35 = vsel %vm743_vm2, %v8089_v13, %v748_v28  ;;  %v845_v36 = vsel %vm743_vm2, %v8110_v22, %v779_v29  ;;  %v846_v37 = vsel %vm743_vm2, %v8115_v23, %v780_v30 }
  0x6c   : > { %v6887_v5 = vcombine.high %v909_v1, %v909_v1  ;;  %v6886_v6 = vcombine.low %v909_v1, %v909_v1  ;;  %v6889_v8 = vcombine.high %v910_v2, %v910_v2  ;;  %v6891_v12 = vcombine.high %v911_v3, %v911_v3  ;;  %v8166_v40 = vld [vmem:[%s8061_s25 + $0x110] sm:$0xff]  ;;  %v8179_v45 = vld [vmem:[%s8061_s25 + $0x118] sm:$0xff]  ;;  %v8199_v51 = vld [vmem:[%s8061_s25 + $0x28] sm:$0xff] }
  0x6d   : > { %v6888_v17 = vcombine.low %v910_v2, %v910_v2  ;;  %v6890_v18 = vcombine.low %v911_v3, %v911_v3  ;;  %v8168_v41 = vpack.c.bf16 %v814_v35, %v813_v34  ;;  %v8170_v42 = vpack.c.bf16 %v846_v37, %v845_v36  ;;  %v8182_v46 = vld [vmem:[%s8061_s25 + $0x150] sm:$0xff]  ;;  %v8185_v47 = vld [vmem:[%s8061_s25 + $0x158] sm:$0xff]  ;;  %v8202_v52 = vld [vmem:[%s8061_s25 + $0x60] sm:$0xff] }
  0x6e   : > { %6896 = vmatprep.subr.msk.bf16.mxu0 %vm1090_vm0, %v6887_v5  ;;  %7292 = vmatprep.subr.msk.bf16.mxu1 %vm1090_vm0, %v6887_v5  ;;  %v1092_v19 = vsel %vm1090_vm0, %v6886_v6, 0  ;;  %v749_v43 = vsel %vm744_vm3, 0.0, %v8120_v26  ;;  %v750_v44 = vsel %vm744_vm3, 0.0, %v8139_v31  ;;  %v781_v48 = vsel %vm744_vm3, %v8160_v38, %v8166_v40  ;;  %v8212_v54 = vld [vmem:[%s8061_s25 + $0x68] sm:$0xff]  ;;  %v8218_v56 = vld [vmem:[%s8061_s25 + $0xe0] sm:$0xff]  ;;  %v8283_v27 = vld [vmem:[%s8061_s25 + $0xf8] sm:$0xff] }
  0x6f   : > { %1122 = vmatpush1.bf16.msra.mxu0 %v1092_v19  ;;  %7293 = vmatpush1.bf16.msra.mxu1 %v1092_v19  ;;  %v1098_v24 = vsel %vm1090_vm0, %v6888_v17, 0  ;;  %v1104_v25 = vsel %vm1090_vm0, %v6890_v18, 0  ;;  %12714 = vst [vmem:[#allocation12_spill] sm:$0xff] %v8168_v41  ;;  %12715 = vst [vmem:[#allocation13_spill] sm:$0xff] %v8170_v42  ;;  %v782_v49 = vsel %vm744_vm3, %v8163_v39, %v8179_v45  ;;  %v751_v55 = vsel %vm744_vm3, 0.0, %v8196_v50  ;;  %v8221_v57 = vld [vmem:[%s8061_s25 + $0xe8] sm:$0xff] }
  0x70   : > { %6929 = vmatprep.subr.msk.bf16.mxu1 %vm1090_vm0, %v6889_v8  ;;  %6962 = vmatprep.subr.msk.bf16.mxu0 %vm1090_vm0, %v6891_v12  ;;  %v815_v53 = vsel %vm743_vm2, %v8142_v32, %v749_v43  ;;  %v816_v58 = vsel %vm743_vm2, %v8145_v33, %v750_v44  ;;  %v847_v59 = vsel %vm743_vm2, %v8182_v46, %v781_v48  ;;  %v752_v61 = vsel %vm744_vm3, 0.0, %v8199_v51  ;;  %v8236_v62 = vld [vmem:[%s8061_s25 + $0x120] sm:$0xff]  ;;  %v8239_v63 = vld [vmem:[%s8061_s25 + $0x128] sm:$0xff]  ;;  %v8274_v19 = vld [vmem:[%s8061_s25 + $0x30] sm:$0xff] }
  0x71   : > { %v848_v60 = vsel %vm743_vm2, %v8185_v47, %v782_v49  ;;  %v8242_v0 = vld [vmem:[%s8061_s25 + $0x160] sm:$0xff]  ;;  %v8247_v1 = vld [vmem:[%s8061_s25 + $0x168] sm:$0xff]  ;;  %v783_v2 = vsel %vm744_vm3, %v8218_v56, %v8236_v62  ;;  %v784_v3 = vsel %vm744_vm3, %v8221_v57, %v8239_v63  ;;  %v817_v5 = vsel %vm743_vm2, %v8202_v52, %v751_v55  ;;  %12718 = vst [vmem:[#allocation16_spill] sm:$0xff] %v8274_v19  ;;  %v8286_v28 = vld [vmem:[%s8061_s25 + $0x130] sm:$0xff] }
  0x72   : > { %6897 = vmatmul.mubr.msk.bf16.vlgmr.msra.gmra.mrb[0].mxu0 %vm993_vm1, %v8168_v41  ;;  %6913 = vmatmul.mubr.msk.bf16.vlgmr.msra.gmra.mrb[0].mxu1 %vm993_vm1, %v8170_v42  ;;  %v818_v6 = vsel %vm743_vm2, %v8212_v54, %v752_v61  ;;  %v8263_v8 = vpack.c.bf16 %v816_v58, %v815_v53  ;;  %v8265_v12 = vpack.c.bf16 %v848_v60, %v847_v59  ;;  %v8289_v29 = vld [vmem:[%s8061_s25 + $0x138] sm:$0xff]  ;;  %v8294_v34 = vld [vmem:[%s8061_s25 + $0x70] sm:$0xff]  ;;  %v753_v43 = vsel %vm744_vm3, 0.0, %v8274_v19  ;;  %v8334_v58 = vld [vmem:[%s8061_s25 + $0x80] sm:$0xff] }
  0x73   : > { %1475 = vmatpush1.bf16.msra.mxu1 %v1098_v24  ;;  %1828 = vmatpush1.bf16.msra.mxu0 %v1104_v25  ;;  %v849_v17 = vsel %vm743_vm2, %v8242_v0, %v783_v2  ;;  %v850_v18 = vsel %vm743_vm2, %v8247_v1, %v784_v3  ;;  %v8277_v24 = vld [vmem:[%s8061_s25 + $0x38] sm:$0xff]  ;;  %v8280_v25 = vld [vmem:[%s8061_s25 + $0xf0] sm:$0xff]  ;;  %12720 = vst [vmem:[#allocation18_spill] sm:$0xff] %v8289_v29  ;;  %v8340_v59 = vld [vmem:[%s8061_s25 + $0x180] sm:$0xff] }
  0x74   : > { %1163 = vmatprep.mubr.bf16.mxu0 %v12619_v7  ;;  %1323 = vmatprep.mubr.bf16.mxu1 %v12619_v7  ;;  %12716 = vst [vmem:[#allocation14_spill] sm:$0xff] %v8263_v8  ;;  %12717 = vst [vmem:[#allocation15_spill] sm:$0xff] %v8265_v12  ;;  %v8291_v30 = vpack.c.bf16 %v818_v6, %v817_v5  ;;  %v755_v35 = vsel %vm744_vm3, %v8080_v9, %v8086_v11  ;;  %v8303_v37 = vld [vmem:[%s8061_s25 + $0x78] sm:$0xff]  ;;  %v754_v44 = vsel %vm744_vm3, 0.0, %v8277_v24  ;;  %v8312_v48 = vld [vmem:[%s8061_s25 + $0x170] sm:$0xff] }
  0x75   : > { %12719 = vst [vmem:[#allocation17_spill] sm:$0xff] %v8277_v24  ;;  %v8300_v36 = vpack.c.bf16 %v850_v18, %v849_v17  ;;  %v8315_v49 = vld [vmem:[%s8061_s25 + $0x178] sm:$0xff]  ;;  %v756_v9 = vsel %vm744_vm3, %v8083_v10, %v8089_v13  ;;  %v785_v53 = vsel %vm744_vm3, %v8280_v25, %v8286_v28  ;;  %v786_v55 = vsel %vm744_vm3, %v8283_v27, %v8289_v29  ;;  %v8337_v10 = vld [vmem:[%s8061_s25 + $0x88] sm:$0xff]  ;;  %v8356_v3 = vld [vmem:[%s8061_s25 + $0x90] sm:$0xff] }
  0x76   : > { %12721 = vst [vmem:[#allocation19_spill] sm:$0xff] %v8291_v30  ;;  %v787_v60 = vsel %vm744_vm3, %v8104_v20, %v8110_v22  ;;  %v8349_v61 = vld [vmem:[%s8061_s25 + $0x188] sm:$0xff]  ;;  %v788_v2 = vsel %vm744_vm3, %v8107_v21, %v8115_v23  ;;  %v8359_v5 = vld [vmem:[%s8061_s25 + $0x98] sm:$0xff]  ;;  %v757_v6 = vsel %vm744_vm3, %v8120_v26, %v8142_v32  ;;  %v758_v17 = vsel %vm744_vm3, %v8139_v31, %v8145_v33 }
  0x77   : > { %12722 = vst [vmem:[#allocation20_spill] sm:$0xff] %v8300_v36  ;;  %v819_v18 = vsel %vm743_vm2, %v8294_v34, %v753_v43  ;;  %v820_v4 = vsel %vm743_vm2, %v8303_v37, %v754_v44  ;;  %v789_v26 = vsel %vm744_vm3, %v8166_v40, %v8182_v46  ;;  %v790_v31 = vsel %vm744_vm3, %v8179_v45, %v8185_v47 }
  0x78   : > { %v851_v43 = vsel %vm743_vm2, %v8312_v48, %v785_v53  ;;  %v852_v44 = vsel %vm743_vm2, %v8315_v49, %v786_v55  ;;  %v821_v42 = vsel %vm743_vm2, %v8334_v58, %v755_v35  ;;  %v853_v41 = vsel %vm743_vm2, %v8340_v59, %v787_v60 }
  0x79   : > { %v854_v53 = vsel %vm743_vm2, %v8349_v61, %v788_v2  ;;  %v823_v55 = vsel %vm743_vm2, %v8356_v3, %v757_v6  ;;  %v824_v35 = vsel %vm743_vm2, %v8359_v5, %v758_v17  ;;  %v8419_v24 = vpack.c.bf16 %v820_v4, %v819_v18 }
  0x7a   : > { %6898 = vmatmul.mubr.msk.bf16.gmra.mrb[4].mxu0 %vm993_vm1, %v8263_v8  ;;  %6914 = vmatmul.mubr.msk.bf16.gmra.mrb[4].mxu1 %vm993_vm1, %v8265_v12  ;;  %v8379_v12 = vld [vmem:[%s8061_s25 + $0x198] sm:$0xff]  ;;  %v822_v8 = vsel %vm743_vm2, %v8337_v10, %v756_v9  ;;  %v8421_v2 = vpack.c.bf16 %v852_v44, %v851_v43  ;;  %v8425_v6 = vpack.c.bf16 %v854_v53, %v853_v41  ;;  %v12729_v18 = vmov 0  }
  0x7b   : > { %1173 = vmatprep.mubr.bf16.mxu0 %v12619_v7  ;;  %1333 = vmatprep.mubr.bf16.mxu1 %v12619_v7  ;;  %v8376_v7 = vld [vmem:[%s8061_s25 + $0x190] sm:$0xff]  ;;  %v856_v60 = vsel %vm743_vm2, %v8379_v12, %v790_v31  ;;  %12723 = vst [vmem:[#allocation21_spill] sm:$0xff] %v8419_v24  ;;  %v8423_v19 = vpack.c.bf16 %v822_v8, %v821_v42  ;;  %v8461_v8 = vld [vmem:[%s8061_s25 + $0x1c8] sm:$0xff] }
  0x7c   : > { %v855_v9 = vsel %vm743_vm2, %v8376_v7, %v789_v26  ;;  %12724 = vst [vmem:[#allocation22_spill] sm:$0xff] %v8421_v2  ;;  %12726 = vst [vmem:[#allocation24_spill] sm:$0xff] %v8425_v6  ;;  %v8427_v29 = vpack.c.bf16 %v824_v35, %v823_v55  ;;  %v8433_v17 = vsel %vm744_vm3, %v8196_v50, %v8202_v52  ;;  %v8494_v55 = vld [vmem:[%s8061_s25 + $0x1d0] sm:$0xff] }
  0x7d   : > { %12725 = vst [vmem:[#allocation23_spill] sm:$0xff] %v8423_v19  ;;  %v8439_v4 = vsel %vm744_vm3, %v8199_v51, %v8212_v54  ;;  %v8445_v41 = vpack.c.bf16 %v856_v60, %v855_v9  ;;  %v8451_v42 = vsel %vm744_vm3, %v8236_v62, %v8242_v0  ;;  %v763_v50 = vsel %vm744_vm3, %v8086_v11, %v8334_v58  ;;  %v8458_v51 = vld [vmem:[%s8061_s25 + $0x1c0] sm:$0xff] }
  0x7e   : > { %12727 = vst [vmem:[#allocation25_spill] sm:$0xff] %v8427_v29  ;;  %v8469_v26 = vsel %vm744_vm3, %v8239_v63, %v8247_v1  ;;  %v764_v11 = vsel %vm744_vm3, %v8089_v13, %v8337_v10  ;;  %v829_v31 = vsel %vm743_vm2, %v8095_v15, %v763_v50  ;;  %v795_v44 = vsel %vm744_vm3, %v8110_v22, %v8340_v59  ;;  %v8510_v60 = vld [vmem:[%s8061_s25 + $0xa0] sm:$0xff] }
  0x7f   : > { %12728 = vst [vmem:[#allocation26_spill] sm:$0xff] %v8445_v41  ;;  %v830_v43 = vsel %vm743_vm2, %v8098_v16, %v764_v11  ;;  %v796_v13 = vsel %vm744_vm3, %v8115_v23, %v8349_v61  ;;  %v765_v53 = vsel %vm744_vm3, %v8142_v32, %v8356_v3  ;;  %v861_v9 = vsel %vm743_vm2, %v8458_v51, %v795_v44  ;;  %v736_v32 = vld [vmem:[%s8061_s25 + $0x1d8] sm:$0xff]  ;;  %v8528_v44 = vld [vmem:[%s8061_s25 + $0xa8] sm:$0xff] }
  0x80   : > { %v8496_v35 = vpack.c.bf16 %v830_v43, %v829_v31  ;;  %v862_v22 = vsel %vm743_vm2, %v8461_v8, %v796_v13  ;;  %v766_v23 = vsel %vm744_vm3, %v8145_v33, %v8359_v5  ;;  %v831_v11 = vsel %vm743_vm2, %v8160_v38, %v765_v53  ;;  %v8525_v33 = vld [vmem:[%s8061_s25 + $0x1e0] sm:$0xff] }
  0x81   : > { %v8512_v50 = vpack.c.bf16 %v862_v22, %v861_v9  ;;  %v832_v31 = vsel %vm743_vm2, %v8163_v39, %v766_v23  ;;  %v797_v43 = vsel %vm744_vm3, %v8182_v46, %v8376_v7  ;;  %v8531_v13 = vld [vmem:[%s8061_s25 + $0x1a0] sm:$0xff]  ;;  %v798_v53 = vsel %vm744_vm3, %v8185_v47, %v8379_v12  ;;  %v8547_v23 = vld [vmem:[%s8061_s25 + $0x1e8] sm:$0xff] }
  0x82   : > { %6899 = vmatmul.mubr.msk.bf16.gmra.mrb[8].mxu0 %vm993_vm1, %v8291_v30  ;;  %6915 = vmatmul.mubr.msk.bf16.gmra.mrb[8].mxu1 %vm993_vm1, %v8300_v36  ;;  %12730 = vst [vmem:[#allocation27_spill] sm:$0xff] %v8496_v35  ;;  %v8533_v9 = vpack.c.bf16 %v832_v31, %v831_v11  ;;  %v863_v22 = vsel %vm743_vm2, %v8494_v55, %v797_v43  ;;  %v8550_v36 = vld [vmem:[%s8061_s25 + $0x1a8] sm:$0xff]  ;;  %v8566_v43 = vld [vmem:[%s8061_s25 + $0xb0] sm:$0xff] }
  0x83   : > { %1183 = vmatprep.mubr.bf16.mxu0 %v12729_v18  ;;  %1343 = vmatprep.mubr.bf16.mxu1 %v12729_v18  ;;  %12731 = vst [vmem:[#allocation28_spill] sm:$0xff] %v8512_v50  ;;  %v767_v46 = vsel %vm744_vm3, %v8202_v52, %v8510_v60  ;;  %v864_v11 = vsel %vm743_vm2, %v736_v32, %v798_v53 }
  0x84   : > { %12732 = vst [vmem:[#allocation29_spill] sm:$0xff] %v8533_v9  ;;  %v768_v47 = vsel %vm744_vm3, %v8212_v54, %v8528_v44  ;;  %v833_v31 = vsel %vm743_vm2, %v8218_v56, %v767_v46  ;;  %v799_v52 = vsel %vm744_vm3, %v8242_v0, %v8531_v13  ;;  %v8568_v53 = vpack.c.bf16 %v864_v11, %v863_v22  ;;  %v8585_v0 = vld [vmem:[%s8061_s25 + $0xb8] sm:$0xff] }
  0x85   : > { %v834_v30 = vsel %vm743_vm2, %v8221_v57, %v768_v47  ;;  %v800_v54 = vsel %vm744_vm3, %v8247_v1, %v8550_v36  ;;  %v865_v46 = vsel %vm743_vm2, %v8525_v33, %v799_v52  ;;  %v769_v1 = vsel %vm744_vm3, %v8294_v34, %v8566_v43  ;;  %v739_v47 = vld [vmem:[%s8061_s25 + $0x1f0] sm:$0xff]  ;;  %v740_v52 = vld [vmem:[%s8061_s25 + $0x1f8] sm:$0xff] }
  0x86   : > { %12733 = vst [vmem:[#allocation30_spill] sm:$0xff] %v8568_v53  ;;  %v8587_v22 = vpack.c.bf16 %v834_v30, %v833_v31  ;;  %v866_v11 = vsel %vm743_vm2, %v8547_v23, %v800_v54  ;;  %v770_v31 = vsel %vm744_vm3, %v8303_v37, %v8585_v0  ;;  %v835_v54 = vsel %vm743_vm2, %v8280_v25, %v769_v1 }
  0x87   : > { %v8606_v30 = vpack.c.bf16 %v866_v11, %v865_v46  ;;  %v771_v11 = vsel %vm744_vm3, %v8334_v58, %v8095_v15  ;;  %v772_v9 = vsel %vm744_vm3, %v8337_v10, %v8098_v16  ;;  %v803_v58 = vsel %vm744_vm3, %v8340_v59, %v8458_v51 }
  0x88   : > { %12734 = vst [vmem:[#allocation31_spill] sm:$0xff] %v8587_v22  ;;  %v836_v22 = vsel %vm743_vm2, %v8283_v27, %v770_v31  ;;  %v837_v35 = vsel %vm743_vm2, %v8104_v20, %v771_v11  ;;  %v838_v15 = vsel %vm743_vm2, %v8107_v21, %v772_v9  ;;  %v804_v16 = vsel %vm744_vm3, %v8349_v61, %v8461_v8 }
  0x89   : > { %12735 = vst [vmem:[#allocation32_spill] sm:$0xff] %v8606_v30  ;;  %v8630_v1 = vpack.c.bf16 %v836_v22, %v835_v54  ;;  %v869_v10 = vsel %vm743_vm2, 0.0, %v803_v58  ;;  %v773_v20 = vsel %vm744_vm3, %v8356_v3, %v8160_v38  ;;  %v870_v21 = vsel %vm743_vm2, 0.0, %v804_v16  ;;  %v12744_v54 = vld [vmem:[#allocation18_spill] sm:$0xff] }
  0x8a   : > { %6900 = vmatmul.mubr.msk.bf16.gmra.mrb[12].mxu0 %vm993_vm1, %v8419_v24  ;;  %6916 = vmatmul.mubr.msk.bf16.gmra.mrb[12].mxu1 %vm993_vm1, %v8421_v2  ;;  %v8601_v2 = vld [vmem:[%s8061_s25 + $0x1b0] sm:$0xff]  ;;  %v8604_v24 = vld [vmem:[%s8061_s25 + $0x1b8] sm:$0xff]  ;;  %v774_v59 = vsel %vm744_vm3, %v8359_v5, %v8163_v39  ;;  %v839_v61 = vsel %vm743_vm2, %v8166_v40, %v773_v20  ;;  %v805_v51 = vsel %vm744_vm3, %v8376_v7, %v8494_v55 }
  0x8b   : > { %1193 = vmatprep.mubr.bf16.mxu0 %v12729_v18  ;;  %1353 = vmatprep.mubr.bf16.mxu1 %v12729_v18  ;;  %v801_v53 = vsel %vm744_vm3, %v8312_v48, %v8601_v2  ;;  %v802_v46 = vsel %vm744_vm3, %v8315_v49, %v8604_v24  ;;  %12736 = vst [vmem:[#allocation33_spill] sm:$0xff] %v8630_v1  ;;  %v871_v39 = vsel %vm743_vm2, 0.0, %v805_v51  ;;  %v12755_v14 = vld [vmem:[#allocation29_spill] sm:$0xff] }
  0x8c   : > { %v867_v31 = vsel %vm743_vm2, %v739_v47, %v801_v53  ;;  %v868_v30 = vsel %vm743_vm2, %v740_v52, %v802_v46  ;;  %v8652_v53 = vpack.c.bf16 %v838_v15, %v837_v35  ;;  %v8677_v8 = vpack.c.bf16 %v870_v21, %v869_v10 }
  0x8d   : > { %v8640_v50 = vpack.c.bf16 %v868_v30, %v867_v31  ;;  %v840_v38 = vsel %vm743_vm2, %v8179_v45, %v774_v59  ;;  %v806_v3 = vsel %vm744_vm3, %v8379_v12, %v736_v32  ;;  %v775_v45 = vsel %vm744_vm3, %v8510_v60, %v8218_v56 }
  0x8e   : > { %12738 = vst [vmem:[#allocation35_spill] sm:$0xff] %v8652_v53  ;;  %12739 = vst [vmem:[#allocation36_spill] sm:$0xff] %v8677_v8  ;;  %v8691_v7 = vpack.c.bf16 %v840_v38, %v839_v61  ;;  %v872_v40 = vsel %vm743_vm2, 0.0, %v806_v3  ;;  %v776_v12 = vsel %vm744_vm3, %v8528_v44, %v8221_v57  ;;  %v841_v55 = vsel %vm743_vm2, %v8236_v62, %v775_v45  ;;  %v12759_v45 = vld [vmem:[#allocation12_spill] sm:$0xff] }
  0x8f   : > { %12737 = vst [vmem:[#allocation34_spill] sm:$0xff] %v8640_v50  ;;  %v8705_v5 = vpack.c.bf16 %v872_v40, %v871_v39  ;;  %v842_v35 = vsel %vm743_vm2, %v8239_v63, %v776_v12  ;;  %v807_v57 = vsel %vm744_vm3, %v8531_v13, %v8525_v33  ;;  %v808_v32 = vsel %vm744_vm3, %v8550_v36, %v8547_v23  ;;  %v912_v63 = vld [vmem:[%s12713_s1 + $0x18] sm:$0xff]  ;;  %v12760_v12 = vld [vmem:[#allocation14_spill] sm:$0xff] }
  0x90   : > { %12740 = vst [vmem:[#allocation37_spill] sm:$0xff] %v8691_v7  ;;  %v8713_v56 = vpack.c.bf16 %v842_v35, %v841_v55  ;;  %v777_v62 = vsel %vm744_vm3, %v8566_v43, %v8280_v25  ;;  %v873_v9 = vsel %vm743_vm2, 0.0, %v807_v57  ;;  %v874_v33 = vsel %vm743_vm2, 0.0, %v808_v32  ;;  %v913_v25 = vld [vmem:[%s12713_s1 + $0x20] sm:$0xff]  ;;  %v12749_v39 = vld [vmem:[#allocation16_spill] sm:$0xff]  ;;  %v12761_v55 = vld [vmem:[#allocation19_spill] sm:$0xff] }
  0x91   : > { %12741 = vst [vmem:[#allocation38_spill] sm:$0xff] %v8705_v5  ;;  %v778_v23 = vsel %vm744_vm3, %v8585_v0, %v8283_v27  ;;  %v843_v22 = vsel %vm743_vm2, %v8286_v28, %v777_v62  ;;  %v8744_v30 = vpack.c.bf16 %v874_v33, %v873_v9  ;;  %v809_v11 = vsel %vm744_vm3, %v8601_v2, %v739_v47  ;;  %v12758_v40 = vld [vmem:[#allocation32_spill] sm:$0xff]  ;;  %v12762_v35 = vld [vmem:[#allocation21_spill] sm:$0xff] }
  0x92   : > { %6901 = vmatmul.mubr.msk.bf16.gmra.mrb[16].mxu0 %vm993_vm1, %v8423_v19  ;;  %6917 = vmatmul.mubr.msk.bf16.gmra.mrb[16].mxu1 %vm993_vm1, %v8425_v6  ;;  %12742 = vst [vmem:[#allocation39_spill] sm:$0xff] %v8713_v56  ;;  %v844_v46 = vsel %vm743_vm2, %v12744_v54, %v778_v23  ;;  %v810_v27 = vsel %vm744_vm3, %v8604_v24, %v740_v52  ;;  %v875_v15 = vsel %vm743_vm2, 0.0, %v809_v11  ;;  %v12763_v57 = vlaneseq }
  0x93   : > { %1203 = vmatprep.mubr.bf16.mxu0 %v12729_v18  ;;  %1363 = vmatprep.mubr.bf16.mxu1 %v12729_v18  ;;  %12743 = vst [vmem:[#allocation40_spill] sm:$0xff] %v8744_v30  ;;  %v8755_v31 = vpack.c.bf16 %v844_v46, %v843_v22  ;;  %v876_v58 = vsel %vm743_vm2, 0.0, %v810_v27  ;;  %v6893_v16 = vcombine.high %v912_v63, %v912_v63 }
  0x94   : > { %v8761_v10 = vpack.c.bf16 %v876_v58, %v875_v15  ;;  %v6895_v20 = vcombine.high %v913_v25, %v913_v25  ;;  %v6892_v21 = vcombine.low %v912_v63, %v912_v63  ;;  %v6894_v59 = vcombine.low %v913_v25, %v913_v25  ;;  %v914_v63 = vld [vmem:[%s12604_s2] sm:$0xff] }
  0x95   : > { %12745 = vst [vmem:[#allocation18_spill] sm:$0xff] %v8755_v31  ;;  %6995 = vmatprep.subr.msk.bf16.mxu1 %vm1090_vm0, %v6893_v16  ;;  %v825_v47 = vsel %vm743_vm2, %v8510_v60, %v8433_v17  ;;  %v826_v51 = vsel %vm743_vm2, %v8528_v44, %v8439_v4  ;;  %v857_v38 = vsel %vm743_vm2, %v8531_v13, %v8451_v42  ;;  %v12750_v44 = vld [vmem:[#allocation17_spill] sm:$0xff]  ;;  %v8944_v32 = vshrl.u32 %v12763_v57, 7 }
  0x96   : > { %12746 = vst [vmem:[#allocation41_spill] sm:$0xff] %v8761_v10  ;;  %v1110_v52 = vsel %vm1090_vm0, %v6892_v21, 0  ;;  %v1116_v61 = vsel %vm1090_vm0, %v6894_v59, 0  ;;  %v858_v17 = vsel %vm743_vm2, %v8550_v36, %v8469_v26  ;;  %7028 = vmatprep.subr.msk.bf16.mxu0 %vm1090_vm0, %v6895_v20  ;;  %v8789_v60 = vpack.c.bf16 %v826_v51, %v825_v47 }
  0x97   : > { %v8791_v3 = vpack.c.bf16 %v858_v17, %v857_v38  ;;  %v761_v4 = vsel %vm744_vm3, %v12749_v39, %v8294_v34  ;;  %v762_v42 = vsel %vm744_vm3, %v12750_v44, %v8303_v37  ;;  %v793_v36 = vsel %vm744_vm3, %v8286_v28, %v8312_v48  ;;  %12764 = vst [vmem:[#allocation12_spill] sm:$0xff] %v8944_v32 }
  0x98   : > { %12747 = vst [vmem:[#allocation42_spill] sm:$0xff] %v8789_v60  ;;  %v794_v26 = vsel %vm744_vm3, %v12744_v54, %v8315_v49  ;;  %v827_v34 = vsel %vm743_vm2, %v8566_v43, %v761_v4  ;;  %v828_v28 = vsel %vm743_vm2, %v8585_v0, %v762_v42  ;;  %v859_v37 = vsel %vm743_vm2, %v8601_v2, %v793_v36  ;;  %v12753_v43 = vld [vmem:[#allocation27_spill] sm:$0xff]  ;;  %v12754_v2 = vld [vmem:[#allocation28_spill] sm:$0xff] }
  0x99   : > { %12748 = vst [vmem:[#allocation43_spill] sm:$0xff] %v8791_v3  ;;  %v860_v48 = vsel %vm743_vm2, %v8604_v24, %v794_v26  ;;  %v8827_v49 = vpack.c.bf16 %v828_v28, %v827_v34  ;;  %v12756_v24 = vld [vmem:[#allocation30_spill] sm:$0xff]  ;;  %v12757_v0 = vld [vmem:[#allocation31_spill] sm:$0xff]  ;;  %v8949_v62 = vsub.s32 0, %v8944_v32  ;;  %v8955_v9 = vsub.s32 1, %v8944_v32 }
  0x9a   : > { %6902 = vmatmul.mubr.msk.bf16.gmra.mrb[20].mxu0 %vm993_vm1, %v8427_v29  ;;  %6918 = vmatmul.mubr.msk.bf16.gmra.mrb[20].mxu1 %vm993_vm1, %v8445_v41  ;;  %v8829_v13 = vpack.c.bf16 %v860_v48, %v859_v37 }
  0x9b   : > { %1213 = vmatprep.mubr.bf16.mxu0 %v12729_v18  ;;  %1373 = vmatprep.mubr.bf16.mxu1 %v12729_v18  ;;  %12751 = vst [vmem:[#allocation16_spill] sm:$0xff] %v8827_v49  ;;  %12765 = vst [vmem:[#allocation14_spill] sm:$0xff] %v8949_v62  ;;  %v8962_v33 = vrot.slane %v914_v63, %v8949_v62  ;;  %v8965_v23 = vrot.slane %v914_v63, %v8955_v9 }
  0x9c   : > { %12752 = vst [vmem:[#allocation17_spill] sm:$0xff] %v8829_v13  ;;  %12766 = vst [vmem:[#allocation44_spill] sm:$0xff] %v8955_v9 }
  0xa2   : > { %6903 = vmatmul.mubr.msk.bf16.gmra.mrb[24].mxu0 %vm993_vm1, %v8789_v60  ;;  %6919 = vmatmul.mubr.msk.bf16.gmra.mrb[24].mxu1 %vm993_vm1, %v8791_v3 }
  0xa3   : > { %1223 = vmatprep.mubr.bf16.mxu0 %v12729_v18  ;;  %1383 = vmatprep.mubr.bf16.mxu1 %v12729_v18 }
  0xaa   : > { %6904 = vmatmul.mubr.msk.bf16.gmra.mrb[28].mxu0 %vm993_vm1, %v8827_v49  ;;  %6920 = vmatmul.mubr.msk.bf16.gmra.mrb[28].mxu1 %vm993_vm1, %v8829_v13 }
  0xab   : > { %1233 = vmatprep.mubr.bf16.mxu0 %v12729_v18  ;;  %1393 = vmatprep.mubr.bf16.mxu1 %v12729_v18 }
  0xb2   : > { %6905 = vmatmul.mubr.msk.bf16.gmra.mrb[32].mxu0 %vm993_vm1, %v12753_v43  ;;  %6921 = vmatmul.mubr.msk.bf16.gmra.mrb[32].mxu1 %vm993_vm1, %v12754_v2 }
  0xb3   : > { %1243 = vmatprep.mubr.bf16.mxu0 %v12729_v18  ;;  %1403 = vmatprep.mubr.bf16.mxu1 %v12729_v18 }
  0xba   : > { %6906 = vmatmul.mubr.msk.bf16.gmra.mrb[36].mxu0 %vm993_vm1, %v12755_v14  ;;  %6922 = vmatmul.mubr.msk.bf16.gmra.mrb[36].mxu1 %vm993_vm1, %v12756_v24 }
  0xbb   : > { %1253 = vmatprep.mubr.bf16.mxu0 %v12729_v18  ;;  %1413 = vmatprep.mubr.bf16.mxu1 %v12729_v18 }
  0xc2   : > { %6907 = vmatmul.mubr.msk.bf16.gmra.mrb[40].mxu0 %vm993_vm1, %v12757_v0  ;;  %6923 = vmatmul.mubr.msk.bf16.gmra.mrb[40].mxu1 %vm993_vm1, %v12758_v40 }
  0xc3   : > { %1263 = vmatprep.mubr.bf16.mxu0 %v12729_v18  ;;  %1423 = vmatprep.mubr.bf16.mxu1 %v12729_v18 }
  0xca   : > { %6908 = vmatmul.mubr.msk.bf16.gmra.mrb[44].mxu0 %vm993_vm1, %v8630_v1  ;;  %6924 = vmatmul.mubr.msk.bf16.gmra.mrb[44].mxu1 %vm993_vm1, %v8640_v50 }
  0xcb   : > { %1273 = vmatprep.mubr.bf16.mxu0 %v12729_v18  ;;  %1433 = vmatprep.mubr.bf16.mxu1 %v12729_v18 }
  0xd2   : > { %6909 = vmatmul.mubr.msk.bf16.gmra.mrb[48].mxu0 %vm993_vm1, %v8652_v53  ;;  %6925 = vmatmul.mubr.msk.bf16.gmra.mrb[48].mxu1 %vm993_vm1, %v8677_v8 }
  0xd3   : > { %1283 = vmatprep.mubr.bf16.mxu0 %v12729_v18  ;;  %1443 = vmatprep.mubr.bf16.mxu1 %v12729_v18 }
  0xda   : > { %6910 = vmatmul.mubr.msk.bf16.gmra.mrb[52].mxu0 %vm993_vm1, %v8691_v7  ;;  %6926 = vmatmul.mubr.msk.bf16.gmra.mrb[52].mxu1 %vm993_vm1, %v8705_v5 }
  0xdb   : > { %1293 = vmatprep.mubr.bf16.mxu0 %v12729_v18  ;;  %1453 = vmatprep.mubr.bf16.mxu1 %v12729_v18 }
  0xe2   : > { %6911 = vmatmul.mubr.msk.bf16.gmra.mrb[56].mxu0 %vm993_vm1, %v8713_v56  ;;  %6927 = vmatmul.mubr.msk.bf16.gmra.mrb[56].mxu1 %vm993_vm1, %v8744_v30 }
  0xe3   : > { %1303 = vmatprep.mubr.bf16.mxu0 %v12729_v18  ;;  %1463 = vmatprep.mubr.bf16.mxu1 %v12729_v18 }
  0xea   : > { %6912 = vmatmul.mubr.msk.bf16.gmra.mrb[60].mxu0 %vm993_vm1, %v8755_v31  ;;  %6928 = vmatmul.mubr.msk.bf16.gmra.mrb[60].mxu1 %vm993_vm1, %v8761_v10 }
  0xeb   : > { %1506 = vmatprep.mubr.bf16.mxu1 %v12729_v18  ;;  %1859 = vmatprep.mubr.bf16.mxu0 %v12729_v18 }
  0xf2   : > { %6930 = vmatmul.mubr.msk.bf16.vlgmr.msra.gmra.mrb[64].mxu1 %vm993_vm1, %v12759_v45  ;;  %6963 = vmatmul.mubr.msk.bf16.vlgmr.msra.gmra.mrb[64].mxu0 %vm993_vm1, %v12759_v45 }
  0xf3   : > { %2181 = vmatpush1.bf16.msra.mxu1 %v1110_v52  ;;  %2534 = vmatpush1.bf16.msra.mxu0 %v1116_v61 }
  0xf4   : > { %1516 = vmatprep.mubr.bf16.mxu1 %v12729_v18  ;;  %1869 = vmatprep.mubr.bf16.mxu0 %v12729_v18 }
  0xfa   : > { %6931 = vmatmul.mubr.msk.bf16.gmra.mrb[68].mxu1 %vm993_vm1, %v12760_v12  ;;  %6964 = vmatmul.mubr.msk.bf16.gmra.mrb[68].mxu0 %vm993_vm1, %v12760_v12 }
  0xfb   : > { %1526 = vmatprep.mubr.bf16.mxu1 %v12729_v18  ;;  %1879 = vmatprep.mubr.bf16.mxu0 %v12729_v18 }
 0x102   : > { %6932 = vmatmul.mubr.msk.bf16.gmra.mrb[72].mxu1 %vm993_vm1, %v12761_v55  ;;  %6965 = vmatmul.mubr.msk.bf16.gmra.mrb[72].mxu0 %vm993_vm1, %v12761_v55 }
 0x103   : > { %1536 = vmatprep.mubr.bf16.mxu1 %v12729_v18  ;;  %1889 = vmatprep.mubr.bf16.mxu0 %v12729_v18 }
 0x10a   : > { %6933 = vmatmul.mubr.msk.bf16.gmra.mrb[76].mxu1 %vm993_vm1, %v12762_v35  ;;  %6966 = vmatmul.mubr.msk.bf16.gmra.mrb[76].mxu0 %vm993_vm1, %v12762_v35 }
 0x10b   : > { %1546 = vmatprep.mubr.bf16.mxu1 %v12729_v18  ;;  %1899 = vmatprep.mubr.bf16.mxu0 %v12729_v18 }
 0x112   : > { %6934 = vmatmul.mubr.msk.bf16.gmra.mrb[80].mxu1 %vm993_vm1, %v8423_v19  ;;  %6967 = vmatmul.mubr.msk.bf16.gmra.mrb[80].mxu0 %vm993_vm1, %v8423_v19 }
 0x113   : > { %1556 = vmatprep.mubr.bf16.mxu1 %v12729_v18  ;;  %1909 = vmatprep.mubr.bf16.mxu0 %v12729_v18 }
 0x11a   : > { %6935 = vmatmul.mubr.msk.bf16.gmra.mrb[84].mxu1 %vm993_vm1, %v8427_v29  ;;  %6968 = vmatmul.mubr.msk.bf16.gmra.mrb[84].mxu0 %vm993_vm1, %v8427_v29 }
 0x11b   : > { %1566 = vmatprep.mubr.bf16.mxu1 %v12729_v18  ;;  %1919 = vmatprep.mubr.bf16.mxu0 %v12729_v18 }
 0x122   : > { %6936 = vmatmul.mubr.msk.bf16.gmra.mrb[88].mxu1 %vm993_vm1, %v8789_v60  ;;  %6969 = vmatmul.mubr.msk.bf16.gmra.mrb[88].mxu0 %vm993_vm1, %v8789_v60 }
 0x123   : > { %1576 = vmatprep.mubr.bf16.mxu1 %v12729_v18  ;;  %1929 = vmatprep.mubr.bf16.mxu0 %v12729_v18 }
 0x12a   : > { %6937 = vmatmul.mubr.msk.bf16.gmra.mrb[92].mxu1 %vm993_vm1, %v8827_v49  ;;  %6970 = vmatmul.mubr.msk.bf16.gmra.mrb[92].mxu0 %vm993_vm1, %v8827_v49 }
 0x12b   : > { %1586 = vmatprep.mubr.bf16.mxu1 %v12729_v18  ;;  %1939 = vmatprep.mubr.bf16.mxu0 %v12729_v18 }
 0x132   : > { %6938 = vmatmul.mubr.msk.bf16.gmra.mrb[96].mxu1 %vm993_vm1, %v12753_v43  ;;  %6971 = vmatmul.mubr.msk.bf16.gmra.mrb[96].mxu0 %vm993_vm1, %v12753_v43 }
 0x133   : > { %1596 = vmatprep.mubr.bf16.mxu1 %v12729_v18  ;;  %1949 = vmatprep.mubr.bf16.mxu0 %v12729_v18 }
 0x13a   : > { %6939 = vmatmul.mubr.msk.bf16.gmra.mrb[100].mxu1 %vm993_vm1, %v12755_v14  ;;  %6972 = vmatmul.mubr.msk.bf16.gmra.mrb[100].mxu0 %vm993_vm1, %v12755_v14 }
 0x13b   : > { %1606 = vmatprep.mubr.bf16.mxu1 %v12729_v18  ;;  %1959 = vmatprep.mubr.bf16.mxu0 %v12729_v18 }
 0x142   : > { %6940 = vmatmul.mubr.msk.bf16.gmra.mrb[104].mxu1 %vm993_vm1, %v12757_v0  ;;  %6973 = vmatmul.mubr.msk.bf16.gmra.mrb[104].mxu0 %vm993_vm1, %v12757_v0 }
 0x143   : > { %1616 = vmatprep.mubr.bf16.mxu1 %v12729_v18  ;;  %1969 = vmatprep.mubr.bf16.mxu0 %v12729_v18 }
 0x145   : > { %v1155_v22 = vpop.f32.mrb[0].mxu0  ;;  %v1315_v25 = vpop.f32.mrb[0].mxu1 }
 0x146   : > { %v1156_v54 = vadd.f32 %v1155_v22, %v8962_v33  ;;  %v1316_v46 = vadd.f32 %v1315_v25, %v8962_v33  ;;  %v1157_v11 = vpop.f32.mrb[1].mxu0  ;;  %v1317_v27 = vpop.f32.mrb[1].mxu1 }
 0x147   : > { %v1158_v15 = vadd.f32 %v1157_v11, %v8965_v23  ;;  %v1318_v58 = vadd.f32 %v1317_v27, %v8965_v23  ;;  %v1159_v16 = vpop.f32.mrb[2].mxu0  ;;  %v1319_v20 = vpop.f32.mrb[2].mxu1 }
 0x148   : > { %v2886_v21 = vmax.f32 %v1156_v54, 0.0  ;;  %v3206_v59 = vmax.f32 %v1316_v46, 0.0  ;;  %v1160_v47 = vadd.f32 %v1159_v16, %v8962_v33  ;;  %v1320_v52 = vadd.f32 %v1319_v20, %v8962_v33  ;;  %v1161_v61 = vpop.f32.mrb[3].mxu0  ;;  %v1321_v51 = vpop.f32.mrb[3].mxu1 }
 0x149   : > { %v2887_v38 = vmax.f32 %v1158_v15, 0.0  ;;  %v3207_v17 = vmax.f32 %v1318_v58, 0.0  ;;  %v1162_v39 = vadd.f32 %v1161_v61, %v8965_v23  ;;  %v1322_v4 = vadd.f32 %v1321_v51, %v8965_v23 }
 0x14a   : > { %v2896_v44 = vmax.f32 %v1160_v47, 0.0  ;;  %v3216_v42 = vmax.f32 %v1320_v52, 0.0  ;;  %6941 = vmatmul.mubr.msk.bf16.gmra.mrb[108].mxu1 %vm993_vm1, %v8630_v1  ;;  %6974 = vmatmul.mubr.msk.bf16.gmra.mrb[108].mxu0 %vm993_vm1, %v8630_v1  ;;  %v3526_v34 = vmin.f32 %v2886_v21, 6.0  ;;  %v3846_v28 = vmin.f32 %v3206_v59, 6.0 }
 0x14b   : > { %v2897_v36 = vmax.f32 %v1162_v39, 0.0  ;;  %v3217_v26 = vmax.f32 %v1322_v4, 0.0  ;;  %1626 = vmatprep.mubr.bf16.mxu1 %v12729_v18  ;;  %1979 = vmatprep.mubr.bf16.mxu0 %v12729_v18  ;;  %v3527_v57 = vmin.f32 %v2887_v38, 6.0  ;;  %v3847_v63 = vmin.f32 %v3207_v17, 6.0 }
 0x14c   : > { %v3536_v37 = vmin.f32 %v2896_v44, 6.0  ;;  %v3856_v48 = vmin.f32 %v3216_v42, 6.0 }
 0x14d   : > { %v3537_v22 = vmin.f32 %v2897_v36, 6.0  ;;  %v3857_v25 = vmin.f32 %v3217_v26, 6.0  ;;  %v1165_v54 = vpop.f32.mrb[4].mxu0  ;;  %v1325_v46 = vpop.f32.mrb[4].mxu1 }
 0x14e   : > { %v4176_v11 = vadd.f32 %v3536_v37, %v3526_v34  ;;  %v4696_v27 = vadd.f32 %v3856_v48, %v3846_v28  ;;  %v1166_v15 = vadd.f32 %v1165_v54, %v8962_v33  ;;  %v1326_v58 = vadd.f32 %v1325_v46, %v8962_v33  ;;  %v1167_v16 = vpop.f32.mrb[5].mxu0  ;;  %v1327_v20 = vpop.f32.mrb[5].mxu1 }
 0x14f   : > { %v4189_v47 = vadd.f32 %v3537_v22, %v3527_v57  ;;  %v4709_v52 = vadd.f32 %v3857_v25, %v3847_v63  ;;  %v1168_v21 = vadd.f32 %v1167_v16, %v8965_v23  ;;  %v1328_v59 = vadd.f32 %v1327_v20, %v8965_v23  ;;  %v1169_v61 = vpop.f32.mrb[6].mxu0  ;;  %v1329_v51 = vpop.f32.mrb[6].mxu1 }
 0x150   : > { %v2906_v38 = vmax.f32 %v1166_v15, 0.0  ;;  %v3226_v17 = vmax.f32 %v1326_v58, 0.0  ;;  %v1170_v39 = vadd.f32 %v1169_v61, %v8962_v33  ;;  %v1330_v4 = vadd.f32 %v1329_v51, %v8962_v33  ;;  %v1171_v44 = vpop.f32.mrb[7].mxu0  ;;  %v1331_v42 = vpop.f32.mrb[7].mxu1 }
 0x151   : > { %v2907_v36 = vmax.f32 %v1168_v21, 0.0  ;;  %v3227_v26 = vmax.f32 %v1328_v59, 0.0  ;;  %v1172_v34 = vadd.f32 %v1171_v44, %v8965_v23  ;;  %v1332_v28 = vadd.f32 %v1331_v42, %v8965_v23 }
 0x152   : > { %v3546_v37 = vmin.f32 %v2906_v38, 6.0  ;;  %v3866_v48 = vmin.f32 %v3226_v17, 6.0  ;;  %v2916_v57 = vmax.f32 %v1170_v39, 0.0  ;;  %v3236_v63 = vmax.f32 %v1330_v4, 0.0  ;;  %6942 = vmatmul.mubr.msk.bf16.gmra.mrb[112].mxu1 %vm993_vm1, %v8652_v53  ;;  %6975 = vmatmul.mubr.msk.bf16.gmra.mrb[112].mxu0 %vm993_vm1, %v8652_v53 }
 0x153   : > { %v3547_v22 = vmin.f32 %v2907_v36, 6.0  ;;  %v3867_v25 = vmin.f32 %v3227_v26, 6.0  ;;  %v2917_v54 = vmax.f32 %v1172_v34, 0.0  ;;  %v3237_v46 = vmax.f32 %v1332_v28, 0.0  ;;  %1636 = vmatprep.mubr.bf16.mxu1 %v12729_v18  ;;  %1989 = vmatprep.mubr.bf16.mxu0 %v12729_v18 }
 0x154   : > { %v4177_v15 = vadd.f32 %v4176_v11, %v3546_v37  ;;  %v4697_v58 = vadd.f32 %v4696_v27, %v3866_v48  ;;  %v3556_v16 = vmin.f32 %v2916_v57, 6.0  ;;  %v3876_v20 = vmin.f32 %v3236_v63, 6.0 }
 0x155   : > { %v4190_v21 = vadd.f32 %v4189_v47, %v3547_v22  ;;  %v4710_v59 = vadd.f32 %v4709_v52, %v3867_v25  ;;  %v3557_v61 = vmin.f32 %v2917_v54, 6.0  ;;  %v3877_v51 = vmin.f32 %v3237_v46, 6.0  ;;  %v1175_v38 = vpop.f32.mrb[8].mxu0  ;;  %v1335_v17 = vpop.f32.mrb[8].mxu1 }
 0x156   : > { %v4178_v39 = vadd.f32 %v4177_v15, %v3556_v16  ;;  %v4698_v4 = vadd.f32 %v4697_v58, %v3876_v20  ;;  %v1176_v44 = vadd.f32 %v1175_v38, %v8962_v33  ;;  %v1336_v42 = vadd.f32 %v1335_v17, %v8962_v33  ;;  %v1177_v36 = vpop.f32.mrb[9].mxu0  ;;  %v1337_v26 = vpop.f32.mrb[9].mxu1 }
 0x157   : > { %v4191_v34 = vadd.f32 %v4190_v21, %v3557_v61  ;;  %v4711_v28 = vadd.f32 %v4710_v59, %v3877_v51  ;;  %v1178_v11 = vadd.f32 %v1177_v36, %v8965_v23  ;;  %v1338_v27 = vadd.f32 %v1337_v26, %v8965_v23  ;;  %v1179_v47 = vpop.f32.mrb[10].mxu0  ;;  %v1339_v52 = vpop.f32.mrb[10].mxu1 }
 0x158   : > { %v2926_v37 = vmax.f32 %v1176_v44, 0.0  ;;  %v3246_v48 = vmax.f32 %v1336_v42, 0.0  ;;  %v1180_v57 = vadd.f32 %v1179_v47, %v8962_v33  ;;  %v1340_v63 = vadd.f32 %v1339_v52, %v8962_v33  ;;  %v1181_v22 = vpop.f32.mrb[11].mxu0  ;;  %v1341_v25 = vpop.f32.mrb[11].mxu1 }
 0x159   : > { %v2927_v54 = vmax.f32 %v1178_v11, 0.0  ;;  %v3247_v46 = vmax.f32 %v1338_v27, 0.0  ;;  %v1182_v15 = vadd.f32 %v1181_v22, %v8965_v23  ;;  %v1342_v58 = vadd.f32 %v1341_v25, %v8965_v23 }
 0x15a   : > { %v3566_v16 = vmin.f32 %v2926_v37, 6.0  ;;  %v3886_v20 = vmin.f32 %v3246_v48, 6.0  ;;  %v2936_v21 = vmax.f32 %v1180_v57, 0.0  ;;  %v3256_v59 = vmax.f32 %v1340_v63, 0.0  ;;  %6943 = vmatmul.mubr.msk.bf16.gmra.mrb[116].mxu1 %vm993_vm1, %v8691_v7  ;;  %6976 = vmatmul.mubr.msk.bf16.gmra.mrb[116].mxu0 %vm993_vm1, %v8691_v7 }
 0x15b   : > { %v3567_v61 = vmin.f32 %v2927_v54, 6.0  ;;  %v3887_v51 = vmin.f32 %v3247_v46, 6.0  ;;  %v2937_v38 = vmax.f32 %v1182_v15, 0.0  ;;  %v3257_v17 = vmax.f32 %v1342_v58, 0.0  ;;  %1646 = vmatprep.mubr.bf16.mxu1 %v12729_v18  ;;  %1999 = vmatprep.mubr.bf16.mxu0 %v12729_v18 }
 0x15c   : > { %v4179_v44 = vadd.f32 %v4178_v39, %v3566_v16  ;;  %v4699_v42 = vadd.f32 %v4698_v4, %v3886_v20  ;;  %v3576_v36 = vmin.f32 %v2936_v21, 6.0  ;;  %v3896_v26 = vmin.f32 %v3256_v59, 6.0 }
 0x15d   : > { %v4192_v11 = vadd.f32 %v4191_v34, %v3567_v61  ;;  %v4712_v27 = vadd.f32 %v4711_v28, %v3887_v51  ;;  %v3577_v47 = vmin.f32 %v2937_v38, 6.0  ;;  %v3897_v52 = vmin.f32 %v3257_v17, 6.0  ;;  %v1185_v37 = vpop.f32.mrb[12].mxu0  ;;  %v1345_v48 = vpop.f32.mrb[12].mxu1 }
 0x15e   : > { %v4180_v57 = vadd.f32 %v4179_v44, %v3576_v36  ;;  %v4700_v63 = vadd.f32 %v4699_v42, %v3896_v26  ;;  %v1186_v22 = vadd.f32 %v1185_v37, %v8962_v33  ;;  %v1346_v25 = vadd.f32 %v1345_v48, %v8962_v33  ;;  %v1187_v54 = vpop.f32.mrb[13].mxu0  ;;  %v1347_v46 = vpop.f32.mrb[13].mxu1 }
 0x15f   : > { %v4193_v15 = vadd.f32 %v4192_v11, %v3577_v47  ;;  %v4713_v58 = vadd.f32 %v4712_v27, %v3897_v52  ;;  %v1188_v39 = vadd.f32 %v1187_v54, %v8965_v23  ;;  %v1348_v4 = vadd.f32 %v1347_v46, %v8965_v23  ;;  %v1189_v34 = vpop.f32.mrb[14].mxu0  ;;  %v1349_v28 = vpop.f32.mrb[14].mxu1 }
 0x160   : > { %v2946_v16 = vmax.f32 %v1186_v22, 0.0  ;;  %v3266_v20 = vmax.f32 %v1346_v25, 0.0  ;;  %v1190_v21 = vadd.f32 %v1189_v34, %v8962_v33  ;;  %v1350_v59 = vadd.f32 %v1349_v28, %v8962_v33  ;;  %v1191_v61 = vpop.f32.mrb[15].mxu0  ;;  %v1351_v51 = vpop.f32.mrb[15].mxu1 }
 0x161   : > { %v2947_v38 = vmax.f32 %v1188_v39, 0.0  ;;  %v3267_v17 = vmax.f32 %v1348_v4, 0.0  ;;  %v1192_v44 = vadd.f32 %v1191_v61, %v8965_v23  ;;  %v1352_v42 = vadd.f32 %v1351_v51, %v8965_v23 }
 0x162   : > { %v3586_v36 = vmin.f32 %v2946_v16, 6.0  ;;  %v3906_v26 = vmin.f32 %v3266_v20, 6.0  ;;  %v2956_v11 = vmax.f32 %v1190_v21, 0.0  ;;  %v3276_v27 = vmax.f32 %v1350_v59, 0.0  ;;  %6944 = vmatmul.mubr.msk.bf16.gmra.mrb[120].mxu1 %vm993_vm1, %v8713_v56  ;;  %6977 = vmatmul.mubr.msk.bf16.gmra.mrb[120].mxu0 %vm993_vm1, %v8713_v56 }
 0x163   : > { %v3587_v47 = vmin.f32 %v2947_v38, 6.0  ;;  %v3907_v52 = vmin.f32 %v3267_v17, 6.0  ;;  %v2957_v37 = vmax.f32 %v1192_v44, 0.0  ;;  %v3277_v48 = vmax.f32 %v1352_v42, 0.0  ;;  %1656 = vmatprep.mubr.bf16.mxu1 %v12729_v18  ;;  %2009 = vmatprep.mubr.bf16.mxu0 %v12729_v18 }
 0x164   : > { %v4181_v22 = vadd.f32 %v4180_v57, %v3586_v36  ;;  %v4701_v25 = vadd.f32 %v4700_v63, %v3906_v26  ;;  %v3596_v54 = vmin.f32 %v2956_v11, 6.0  ;;  %v3916_v46 = vmin.f32 %v3276_v27, 6.0 }
 0x165   : > { %v4194_v39 = vadd.f32 %v4193_v15, %v3587_v47  ;;  %v4714_v4 = vadd.f32 %v4713_v58, %v3907_v52  ;;  %v3597_v34 = vmin.f32 %v2957_v37, 6.0  ;;  %v3917_v28 = vmin.f32 %v3277_v48, 6.0  ;;  %v1195_v16 = vpop.f32.mrb[16].mxu0  ;;  %v1355_v20 = vpop.f32.mrb[16].mxu1 }
 0x166   : > { %v4182_v21 = vadd.f32 %v4181_v22, %v3596_v54  ;;  %v4702_v59 = vadd.f32 %v4701_v25, %v3916_v46  ;;  %v1196_v61 = vadd.f32 %v1195_v16, %v8962_v33  ;;  %v1197_v51 = vpop.f32.mrb[17].mxu0  ;;  %v1357_v38 = vpop.f32.mrb[17].mxu1  ;;  %v1356_v42 = vadd.f32 %v1355_v20, %v8962_v33 }
 0x167   : > { %v4195_v17 = vadd.f32 %v4194_v39, %v3597_v34  ;;  %v4715_v44 = vadd.f32 %v4714_v4, %v3917_v28  ;;  %v1198_v57 = vadd.f32 %v1197_v51, %v8965_v23  ;;  %v1199_v63 = vpop.f32.mrb[18].mxu0  ;;  %v1359_v36 = vpop.f32.mrb[18].mxu1  ;;  %v1358_v52 = vadd.f32 %v1357_v38, %v8965_v23 }
 0x168   : > { %v4183_v15 = vrot.slane %v4182_v21, 4  ;;  %v4703_v58 = vrot.slane %v4702_v59, 4  ;;  %v1201_v26 = vpop.f32.mrb[19].mxu0  ;;  %v1361_v11 = vpop.f32.mrb[19].mxu1  ;;  %v2966_v22 = vmax.f32 %v1196_v61, 0.0  ;;  %v3286_v46 = vmax.f32 %v1356_v42, 0.0 }
 0x169   : > { %v4196_v27 = vrot.slane %v4195_v17, 4  ;;  %v4716_v47 = vrot.slane %v4715_v44, 4  ;;  %v2967_v39 = vmax.f32 %v1198_v57, 0.0  ;;  %v1200_v28 = vadd.f32 %v1199_v63, %v8962_v33 }
 0x16a   : > { %v4184_v37 = vadd.f32 %v4183_v15, %v4182_v21  ;;  %v4704_v48 = vadd.f32 %v4703_v58, %v4702_v59  ;;  %6945 = vmatmul.mubr.msk.bf16.gmra.mrb[124].mxu1 %vm993_vm1, %v8755_v31  ;;  %6978 = vmatmul.mubr.msk.bf16.gmra.mrb[124].mxu0 %vm993_vm1, %v8755_v31  ;;  %v1360_v16 = vadd.f32 %v1359_v36, %v8962_v33  ;;  %v3287_v21 = vmax.f32 %v1358_v52, 0.0 }
 0x16b   : > { %v4197_v25 = vadd.f32 %v4196_v27, %v4195_v17  ;;  %v4717_v54 = vadd.f32 %v4716_v47, %v4715_v44  ;;  %1666 = vmatprep.mubr.bf16.mxu1 %v12729_v18  ;;  %2019 = vmatprep.mubr.bf16.mxu0 %v12729_v18  ;;  %v1202_v59 = vadd.f32 %v1201_v26, %v8965_v23  ;;  %v2976_v42 = vmax.f32 %v1200_v28, 0.0 }
 0x16c   : > { %v4185_v4 = vrot.slane %v4184_v37, 2  ;;  %v4705_v34 = vrot.slane %v4704_v48, 2  ;;  %v1362_v61 = vadd.f32 %v1361_v11, %v8965_v23  ;;  %v3296_v57 = vmax.f32 %v1360_v16, 0.0 }
 0x16d   : > { %v4198_v20 = vrot.slane %v4197_v25, 2  ;;  %v1205_v51 = vpop.f32.mrb[20].mxu0  ;;  %v1365_v38 = vpop.f32.mrb[20].mxu1  ;;  %v4718_v44 = vrot.slane %v4717_v54, 2  ;;  %v2977_v36 = vmax.f32 %v1202_v59, 0.0  ;;  %v3606_v26 = vmin.f32 %v2966_v22, 6.0 }
 0x16e   : > { %v9039_v17 = vadd.f32 %v4185_v4, %v4184_v37  ;;  %v1207_v15 = vpop.f32.mrb[21].mxu0  ;;  %v1367_v58 = vpop.f32.mrb[21].mxu1  ;;  %v9041_v27 = vadd.f32 %v4705_v34, %v4704_v48  ;;  %v3297_v47 = vmax.f32 %v1362_v61, 0.0  ;;  %v3926_v62 = vmin.f32 %v3286_v46, 6.0 }
 0x16f   : > { %v9043_v63 = vadd.f32 %v4198_v20, %v4197_v25  ;;  %v1209_v52 = vpop.f32.mrb[22].mxu0  ;;  %v1369_v9 = vpop.f32.mrb[22].mxu1  ;;  %v3616_v11 = vmin.f32 %v2976_v42, 6.0  ;;  %v3936_v31 = vmin.f32 %v3296_v57, 6.0  ;;  %v3607_v4 = vmin.f32 %v2967_v39, 6.0  ;;  %v12767_v20 = vld [vmem:[#allocation13_spill] sm:$0xff] }
 0x170   : > { %v1211_v56 = vpop.f32.mrb[23].mxu0  ;;  %v1371_v37 = vpop.f32.mrb[23].mxu1  ;;  %v3927_v7 = vmin.f32 %v3287_v21, 6.0  ;;  %v3617_v28 = vmin.f32 %v2977_v36, 6.0  ;;  %v3937_v16 = vmin.f32 %v3297_v47, 6.0  ;;  %v9046_v48 = vadd.f32 %v4718_v44, %v4717_v54 }
 0x171   : > { %v4306_v25 = vadd.f32 %v3616_v11, %v3606_v26  ;;  %v4826_v34 = vadd.f32 %v3936_v31, %v3926_v62  ;;  %v1206_v39 = vadd.f32 %v1205_v51, %v8962_v33  ;;  %v1366_v21 = vadd.f32 %v1365_v38, %v8962_v33 }
 0x172   : > { %6946 = vmatmul.mubr.msk.bf16.gmra.mrb[128].mxu1 %vm993_vm1, %v12767_v20  ;;  %v4319_v59 = vadd.f32 %v3617_v28, %v3607_v4  ;;  %v4839_v61 = vadd.f32 %v3937_v16, %v3927_v7  ;;  %6979 = vmatmul.mubr.msk.bf16.gmra.mrb[128].mxu0 %vm993_vm1, %v12767_v20  ;;  %v1208_v54 = vadd.f32 %v1207_v15, %v8965_v23 }
 0x173   : > { %v1368_v31 = vadd.f32 %v1367_v58, %v8965_v23  ;;  %1676 = vmatprep.mubr.bf16.mxu1 %v12729_v18  ;;  %v1210_v62 = vadd.f32 %v1209_v52, %v8962_v33  ;;  %v1370_v44 = vadd.f32 %v1369_v9, %v8962_v33  ;;  %v1212_v42 = vadd.f32 %v1211_v56, %v8965_v23 }
 0x174   : > { %v1372_v7 = vadd.f32 %v1371_v37, %v8965_v23  ;;  %2029 = vmatprep.mubr.bf16.mxu0 %v12729_v18  ;;  %v2986_v51 = vmax.f32 %v1206_v39, 0.0  ;;  %v3306_v38 = vmax.f32 %v1366_v21, 0.0  ;;  %v2987_v47 = vmax.f32 %v1208_v54, 0.0 }
 0x175   : > { %v1215_v57 = vpop.f32.mrb[24].mxu0  ;;  %v1375_v36 = vpop.f32.mrb[24].mxu1  ;;  %v3307_v15 = vmax.f32 %v1368_v31, 0.0  ;;  %v2996_v11 = vmax.f32 %v1210_v62, 0.0  ;;  %v3316_v4 = vmax.f32 %v1370_v44, 0.0  ;;  %v2997_v28 = vmax.f32 %v1212_v42, 0.0 }
 0x176   : > { %v1217_v26 = vpop.f32.mrb[25].mxu0  ;;  %v1377_v58 = vpop.f32.mrb[25].mxu1  ;;  %v3317_v52 = vmax.f32 %v1372_v7, 0.0  ;;  %v3626_v46 = vmin.f32 %v2986_v51, 6.0  ;;  %v3946_v56 = vmin.f32 %v3306_v38, 6.0  ;;  %v3627_v22 = vmin.f32 %v2987_v47, 6.0 }
 0x177   : > { %v1219_v16 = vpop.f32.mrb[26].mxu0  ;;  %v1379_v9 = vpop.f32.mrb[26].mxu1  ;;  %v3947_v37 = vmin.f32 %v3307_v15, 6.0  ;;  %v3636_v1 = vmin.f32 %v2996_v11, 6.0  ;;  %v3956_v0 = vmin.f32 %v3316_v4, 6.0  ;;  %v3637_v39 = vmin.f32 %v2997_v28, 6.0 }
 0x178   : > { %v1221_v53 = vpop.f32.mrb[27].mxu0  ;;  %v1381_v20 = vpop.f32.mrb[27].mxu1  ;;  %v3957_v21 = vmin.f32 %v3317_v52, 6.0  ;;  %v4307_v54 = vadd.f32 %v4306_v25, %v3626_v46  ;;  %v4827_v31 = vadd.f32 %v4826_v34, %v3946_v56  ;;  %v4320_v14 = vadd.f32 %v4319_v59, %v3627_v22  ;;  %v12768_v62 = vld [vmem:[#allocation15_spill] sm:$0xff] }
 0x179   : > { %v4840_v43 = vadd.f32 %v4839_v61, %v3947_v37  ;;  %v1216_v44 = vadd.f32 %v1215_v57, %v8962_v33  ;;  %v1376_v42 = vadd.f32 %v1375_v36, %v8962_v33  ;;  %v1218_v7 = vadd.f32 %v1217_v26, %v8965_v23 }
 0x17a   : > { %6947 = vmatmul.mubr.msk.bf16.gmra.mrb[132].mxu1 %vm993_vm1, %v12768_v62  ;;  %v1378_v51 = vadd.f32 %v1377_v58, %v8965_v23  ;;  %6980 = vmatmul.mubr.msk.bf16.gmra.mrb[132].mxu0 %vm993_vm1, %v12768_v62  ;;  %v4308_v38 = vadd.f32 %v4307_v54, %v3636_v1  ;;  %v4828_v47 = vadd.f32 %v4827_v31, %v3956_v0 }
 0x17b   : > { %v4321_v25 = vadd.f32 %v4320_v14, %v3637_v39  ;;  %v4841_v34 = vadd.f32 %v4840_v43, %v3957_v21  ;;  %1686 = vmatprep.mubr.bf16.mxu1 %v12729_v18  ;;  %v3006_v22 = vmax.f32 %v1216_v44, 0.0  ;;  %v3326_v46 = vmax.f32 %v1376_v42, 0.0  ;;  %2039 = vmatprep.mubr.bf16.mxu0 %v12729_v18 }
 0x17c   : > { %v3007_v59 = vmax.f32 %v1218_v7, 0.0  ;;  %v3327_v61 = vmax.f32 %v1378_v51, 0.0  ;;  %v1220_v36 = vadd.f32 %v1219_v16, %v8962_v33  ;;  %v1380_v26 = vadd.f32 %v1379_v9, %v8962_v33 }
 0x17d   : > { %v1225_v57 = vpop.f32.mrb[28].mxu0  ;;  %v1385_v15 = vpop.f32.mrb[28].mxu1  ;;  %v1222_v58 = vadd.f32 %v1221_v53, %v8965_v23  ;;  %v1382_v1 = vadd.f32 %v1381_v20, %v8965_v23  ;;  %v3646_v0 = vmin.f32 %v3006_v22, 6.0  ;;  %v3966_v11 = vmin.f32 %v3326_v46, 6.0  ;;  %v12769_v22 = vld [vmem:[#allocation20_spill] sm:$0xff] }
 0x17e   : > { %v1227_v14 = vpop.f32.mrb[29].mxu0  ;;  %v1387_v43 = vpop.f32.mrb[29].mxu1  ;;  %v3647_v4 = vmin.f32 %v3007_v59, 6.0  ;;  %v3967_v28 = vmin.f32 %v3327_v61, 6.0  ;;  %v3016_v37 = vmax.f32 %v1220_v36, 0.0  ;;  %v3336_v39 = vmax.f32 %v1380_v26, 0.0 }
 0x17f   : > { %v1229_v52 = vpop.f32.mrb[30].mxu0  ;;  %v1389_v56 = vpop.f32.mrb[30].mxu1  ;;  %v3017_v21 = vmax.f32 %v1222_v58, 0.0  ;;  %v3337_v54 = vmax.f32 %v1382_v1, 0.0  ;;  %v4309_v44 = vadd.f32 %v4308_v38, %v3646_v0  ;;  %v4829_v9 = vadd.f32 %v4828_v47, %v3966_v11 }
 0x180   : > { %v1231_v31 = vpop.f32.mrb[31].mxu0  ;;  %v1391_v16 = vpop.f32.mrb[31].mxu1  ;;  %v4322_v42 = vadd.f32 %v4321_v25, %v3647_v4  ;;  %v4842_v53 = vadd.f32 %v4841_v34, %v3967_v28  ;;  %v3656_v7 = vmin.f32 %v3016_v37, 6.0  ;;  %v3976_v20 = vmin.f32 %v3336_v39, 6.0 }
 0x181   : > { %v3657_v51 = vmin.f32 %v3017_v21, 6.0  ;;  %v3977_v62 = vmin.f32 %v3337_v54, 6.0  ;;  %v1226_v46 = vadd.f32 %v1225_v57, %v8962_v33  ;;  %v1386_v59 = vadd.f32 %v1385_v15, %v8962_v33 }
 0x182   : > { %6948 = vmatmul.mubr.msk.bf16.gmra.mrb[136].mxu1 %vm993_vm1, %v12769_v22  ;;  %v1228_v61 = vadd.f32 %v1227_v14, %v8965_v23  ;;  %v1388_v36 = vadd.f32 %v1387_v43, %v8965_v23  ;;  %6981 = vmatmul.mubr.msk.bf16.gmra.mrb[136].mxu0 %vm993_vm1, %v12769_v22  ;;  %v4310_v38 = vadd.f32 %v4309_v44, %v3656_v7 }
 0x183   : > { %v4830_v47 = vadd.f32 %v4829_v9, %v3976_v20  ;;  %v4323_v25 = vadd.f32 %v4322_v42, %v3657_v51  ;;  %v4843_v34 = vadd.f32 %v4842_v53, %v3977_v62  ;;  %1696 = vmatprep.mubr.bf16.mxu1 %v12729_v18  ;;  %v3026_v26 = vmax.f32 %v1226_v46, 0.0  ;;  %2049 = vmatprep.mubr.bf16.mxu0 %v12729_v18 }
 0x184   : > { %v3346_v58 = vmax.f32 %v1386_v59, 0.0  ;;  %v3027_v1 = vmax.f32 %v1228_v61, 0.0  ;;  %v3347_v0 = vmax.f32 %v1388_v36, 0.0  ;;  %v1230_v15 = vadd.f32 %v1229_v52, %v8962_v33 }
 0x185   : > { %v1235_v57 = vpop.f32.mrb[32].mxu0  ;;  %v1395_v11 = vpop.f32.mrb[32].mxu1  ;;  %v1390_v14 = vadd.f32 %v1389_v56, %v8962_v33  ;;  %v1232_v43 = vadd.f32 %v1231_v31, %v8965_v23  ;;  %v1392_v4 = vadd.f32 %v1391_v16, %v8965_v23  ;;  %v3666_v37 = vmin.f32 %v3026_v26, 6.0  ;;  %v12770_v26 = vld [vmem:[#allocation22_spill] sm:$0xff] }
 0x186   : > { %v1237_v28 = vpop.f32.mrb[33].mxu0  ;;  %v1397_v62 = vpop.f32.mrb[33].mxu1  ;;  %v3986_v39 = vmin.f32 %v3346_v58, 6.0  ;;  %v3667_v21 = vmin.f32 %v3027_v1, 6.0  ;;  %v3987_v54 = vmin.f32 %v3347_v0, 6.0  ;;  %v3036_v42 = vmax.f32 %v1230_v15, 0.0 }
 0x187   : > { %v1239_v44 = vpop.f32.mrb[34].mxu0  ;;  %v1399_v9 = vpop.f32.mrb[34].mxu1  ;;  %v3356_v53 = vmax.f32 %v1390_v14, 0.0  ;;  %v3037_v7 = vmax.f32 %v1232_v43, 0.0  ;;  %v3357_v20 = vmax.f32 %v1392_v4, 0.0  ;;  %v4311_v46 = vadd.f32 %v4310_v38, %v3666_v37 }
 0x188   : > { %v1241_v51 = vpop.f32.mrb[35].mxu0  ;;  %v1401_v52 = vpop.f32.mrb[35].mxu1  ;;  %v4831_v56 = vadd.f32 %v4830_v47, %v3986_v39  ;;  %v4324_v59 = vadd.f32 %v4323_v25, %v3667_v21  ;;  %v4844_v31 = vadd.f32 %v4843_v34, %v3987_v54  ;;  %v3676_v61 = vmin.f32 %v3036_v42, 6.0 }
 0x189   : > { %v3996_v16 = vmin.f32 %v3356_v53, 6.0  ;;  %v3677_v36 = vmin.f32 %v3037_v7, 6.0  ;;  %v3997_v22 = vmin.f32 %v3357_v20, 6.0  ;;  %v1236_v58 = vadd.f32 %v1235_v57, %v8962_v33 }
 0x18a   : > { %6949 = vmatmul.mubr.msk.bf16.gmra.mrb[140].mxu1 %vm993_vm1, %v12770_v26  ;;  %v1396_v1 = vadd.f32 %v1395_v11, %v8962_v33  ;;  %v1238_v0 = vadd.f32 %v1237_v28, %v8965_v23  ;;  %v1398_v15 = vadd.f32 %v1397_v62, %v8965_v23  ;;  %6982 = vmatmul.mubr.msk.bf16.gmra.mrb[140].mxu0 %vm993_vm1, %v12770_v26  ;;  %v4720_v14 = vrot.slane %v9046_v48, 1 }
 0x18b   : > { %v4312_v38 = vadd.f32 %v4311_v46, %v3676_v61  ;;  %v4832_v47 = vadd.f32 %v4831_v56, %v3996_v16  ;;  %v4325_v25 = vadd.f32 %v4324_v59, %v3677_v36  ;;  %v4845_v34 = vadd.f32 %v4844_v31, %v3997_v22  ;;  %1706 = vmatprep.mubr.bf16.mxu1 %v12729_v18 }
 0x18c   : > { %v3046_v43 = vmax.f32 %v1236_v58, 0.0  ;;  %v3366_v4 = vmax.f32 %v1396_v1, 0.0  ;;  %v3047_v57 = vmax.f32 %v1238_v0, 0.0  ;;  %2059 = vmatprep.mubr.bf16.mxu0 %v12729_v18  ;;  %v3367_v21 = vmax.f32 %v1398_v15, 0.0 }
 0x18d   : > { %v9102_v37 = vpop.f32.mrb[36].mxu0  ;;  %v9104_v11 = vpop.f32.mrb[36].mxu1  ;;  %v4313_v28 = vrot.slane %v4312_v38, 4  ;;  %v4833_v62 = vrot.slane %v4832_v47, 4  ;;  %v4326_v39 = vrot.slane %v4325_v25, 4  ;;  %v12771_v22 = vrot.slane %v9039_v17, 1 }
 0x18e   : > { %v1247_v54 = vpop.f32.mrb[37].mxu0  ;;  %v1407_v42 = vpop.f32.mrb[37].mxu1  ;;  %v12772_v7 = vrot.slane %v9041_v27, 1  ;;  %v4846_v46 = vrot.slane %v4845_v34, 4  ;;  %v3686_v56 = vmin.f32 %v3046_v43, 6.0  ;;  %v4006_v58 = vmin.f32 %v3366_v4, 6.0 }
 0x18f   : > { %v4188_v53 = vadd.f32 %v12771_v22, %v9039_v17  ;;  %v1249_v59 = vpop.f32.mrb[38].mxu0  ;;  %v1409_v31 = vpop.f32.mrb[38].mxu1  ;;  %v4314_v61 = vadd.f32 %v4313_v28, %v4312_v38  ;;  %v4834_v16 = vadd.f32 %v4833_v62, %v4832_v47  ;;  %v4327_v36 = vadd.f32 %v4326_v39, %v4325_v25 }
 0x190   : > { %v9113_v20 = vadd.f32 %v12772_v7, %v9041_v27  ;;  %v9115_v1 = vpop.f32.mrb[39].mxu0  ;;  %v9117_v0 = vpop.f32.mrb[39].mxu1  ;;  %v1240_v17 = vadd.f32 %v1239_v44, %v8962_v33  ;;  %v1400_v15 = vadd.f32 %v1399_v9, %v8962_v33  ;;  %v1242_v27 = vadd.f32 %v1241_v51, %v8965_v23 }
 0x191   : > { %v1402_v22 = vadd.f32 %v1401_v52, %v8965_v23  ;;  %v4315_v7 = vrot.slane %v4314_v61, 2  ;;  %v4328_v43 = vrot.slane %v4327_v36, 2  ;;  %v3687_v26 = vmin.f32 %v3047_v57, 6.0 }
 0x192   : > { %v4007_v49 = vmin.f32 %v3367_v21, 6.0  ;;  %6950 = vmatmul.mubr.msk.bf16.gmra.mrb[144].mxu1 %vm993_vm1, %v8425_v6  ;;  %v3056_v38 = vmax.f32 %v1240_v17, 0.0  ;;  %v3376_v47 = vmax.f32 %v1400_v15, 0.0  ;;  %v3057_v25 = vmax.f32 %v1242_v27, 0.0  ;;  %6983 = vmatmul.mubr.msk.bf16.gmra.mrb[144].mxu0 %vm993_vm1, %v8425_v6 }
 0x193   : > { %v3377_v4 = vmax.f32 %v1402_v22, 0.0  ;;  %1716 = vmatprep.mubr.bf16.mxu1 %v12729_v18  ;;  %v4316_v44 = vadd.f32 %v4315_v7, %v4314_v61  ;;  %v4835_v9 = vrot.slane %v4834_v16, 2  ;;  %v4329_v51 = vadd.f32 %v4328_v43, %v4327_v36  ;;  %2069 = vmatprep.mubr.bf16.mxu0 %v12729_v18 }
 0x194   : > { %v9128_v52 = vadd.f32 %v4846_v46, %v4845_v34  ;;  %v3696_v57 = vmin.f32 %v3056_v38, 6.0  ;;  %v4016_v28 = vmin.f32 %v3376_v47, 6.0  ;;  %v3697_v62 = vmin.f32 %v3057_v25, 6.0 }
 0x195   : > { %v4017_v39 = vmin.f32 %v3377_v4, 6.0  ;;  %v1255_v21 = vpop.f32.mrb[40].mxu0  ;;  %v1415_v17 = vpop.f32.mrb[40].mxu1  ;;  %v12773_v15 = vrot.slane %v9043_v63, 1  ;;  %v9135_v22 = vadd.f32 %v4720_v14, %v9046_v48  ;;  %v4317_v61 = vrot.slane %v4316_v44, 1 }
 0x196   : > { %v4330_v7 = vrot.slane %v4329_v51, 1  ;;  %v1257_v36 = vpop.f32.mrb[41].mxu0  ;;  %v1417_v34 = vpop.f32.mrb[41].mxu1  ;;  %v4436_v46 = vadd.f32 %v3696_v57, %v3686_v56  ;;  %v4956_v43 = vadd.f32 %v4016_v28, %v4006_v58  ;;  %v4449_v6 = vadd.f32 %v3697_v62, %v3687_v26 }
 0x197   : > { %v4201_v27 = vadd.f32 %v12773_v15, %v9043_v63  ;;  %v4969_v38 = vadd.f32 %v4017_v39, %v4007_v49  ;;  %v9137_v47 = vpop.f32.mrb[42].mxu0  ;;  %v9139_v25 = vpop.f32.mrb[42].mxu1  ;;  %v4318_v4 = vadd.f32 %v4317_v61, %v4316_v44  ;;  %v9141_v60 = vadd.f32 %v4835_v9, %v4834_v16 }
 0x198   : > { %v4331_v29 = vadd.f32 %v4330_v7, %v4329_v51  ;;  %v9144_v48 = vpop.f32.mrb[43].mxu0  ;;  %v9146_v14 = vpop.f32.mrb[43].mxu1  ;;  %v1246_v56 = vadd.f32 %v9102_v37, %v8962_v33  ;;  %v1406_v49 = vadd.f32 %v9104_v11, %v8962_v33  ;;  %v1248_v26 = vadd.f32 %v1247_v54, %v8965_v23 }
 0x199   : > { %v1408_v58 = vadd.f32 %v1407_v42, %v8965_v23  ;;  %v9155_v16 = vsel %vm5296_vm4, %v4318_v4, %v4188_v53  ;;  %v1250_v9 = vadd.f32 %v1249_v59, %v8962_v33  ;;  %v1410_v51 = vadd.f32 %v1409_v31, %v8962_v33 }
 0x19a   : > { %v9158_v44 = vsel %vm5296_vm4, %v4331_v29, %v4201_v27  ;;  %6951 = vmatmul.mubr.msk.bf16.gmra.mrb[148].mxu1 %vm993_vm1, %v8445_v41  ;;  %v3066_v37 = vmax.f32 %v1246_v56, 0.0  ;;  %v3386_v57 = vmax.f32 %v1406_v49, 0.0  ;;  %v3067_v11 = vmax.f32 %v1248_v26, 0.0  ;;  %6984 = vmatmul.mubr.msk.bf16.gmra.mrb[148].mxu0 %vm993_vm1, %v8445_v41 }
 0x19b   : > { %v3387_v28 = vmax.f32 %v1408_v58, 0.0  ;;  %1726 = vmatprep.mubr.bf16.mxu1 %v12729_v18  ;;  %v3076_v54 = vmax.f32 %v1250_v9, 0.0  ;;  %v3396_v42 = vmax.f32 %v1410_v51, 0.0  ;;  %v1252_v29 = vadd.f32 %v9115_v1, %v8965_v23  ;;  %2079 = vmatprep.mubr.bf16.mxu0 %v12729_v18 }
 0x19c   : > { %v1412_v53 = vadd.f32 %v9117_v0, %v8965_v23  ;;  %v3706_v59 = vmin.f32 %v3066_v37, 6.0  ;;  %v4026_v31 = vmin.f32 %v3386_v57, 6.0  ;;  %v3707_v62 = vmin.f32 %v3067_v11, 6.0 }
 0x19d   : > { %v4027_v39 = vmin.f32 %v3387_v28, 6.0  ;;  %v1265_v15 = vpop.f32.mrb[44].mxu0  ;;  %v1425_v27 = vpop.f32.mrb[44].mxu1  ;;  %v3716_v61 = vmin.f32 %v3076_v54, 6.0  ;;  %v4036_v7 = vmin.f32 %v3396_v42, 6.0  ;;  %v3077_v4 = vmax.f32 %v1252_v29, 0.0 }
 0x19e   : > { %v3397_v56 = vmax.f32 %v1412_v53, 0.0  ;;  %v1267_v49 = vpop.f32.mrb[45].mxu0  ;;  %v1427_v26 = vpop.f32.mrb[45].mxu1  ;;  %v4437_v58 = vadd.f32 %v4436_v46, %v3706_v59  ;;  %v4957_v9 = vadd.f32 %v4956_v43, %v4026_v31  ;;  %v4450_v1 = vadd.f32 %v4449_v6, %v3707_v62 }
 0x19f   : > { %v4970_v51 = vadd.f32 %v4969_v38, %v4027_v39  ;;  %v9172_v63 = vpop.f32.mrb[46].mxu0  ;;  %v9174_v0 = vpop.f32.mrb[46].mxu1  ;;  %v3717_v37 = vmin.f32 %v3077_v4, 6.0  ;;  %v1256_v11 = vadd.f32 %v1255_v21, %v8962_v33  ;;  %v1416_v28 = vadd.f32 %v1415_v17, %v8962_v33 }
 0x1a0   : > { %v4037_v57 = vmin.f32 %v3397_v56, 6.0  ;;  %v9178_v54 = vpop.f32.mrb[47].mxu0  ;;  %v9180_v42 = vpop.f32.mrb[47].mxu1  ;;  %v4438_v29 = vadd.f32 %v4437_v58, %v3716_v61  ;;  %v4958_v53 = vadd.f32 %v4957_v9, %v4036_v7  ;;  %v1258_v46 = vadd.f32 %v1257_v36, %v8965_v23 }
 0x1a1   : > { %v1418_v6 = vadd.f32 %v1417_v34, %v8965_v23  ;;  %v4451_v43 = vadd.f32 %v4450_v1, %v3717_v37  ;;  %v3086_v59 = vmax.f32 %v1256_v11, 0.0  ;;  %v3406_v31 = vmax.f32 %v1416_v28, 0.0 }
 0x1a2   : > { %v4971_v38 = vadd.f32 %v4970_v51, %v4037_v57  ;;  %6952 = vmatmul.mubr.msk.bf16.gmra.mrb[152].mxu1 %vm993_vm1, %v8791_v3  ;;  %v3087_v21 = vmax.f32 %v1258_v46, 0.0  ;;  %v1260_v17 = vadd.f32 %v9137_v47, %v8962_v33  ;;  %v1420_v39 = vadd.f32 %v9139_v25, %v8962_v33  ;;  %6985 = vmatmul.mubr.msk.bf16.gmra.mrb[152].mxu0 %vm993_vm1, %v8791_v3 }
 0x1a3   : > { %v3407_v62 = vmax.f32 %v1418_v6, 0.0  ;;  %1736 = vmatprep.mubr.bf16.mxu1 %v12729_v18  ;;  %v3726_v36 = vmin.f32 %v3086_v59, 6.0  ;;  %v4046_v34 = vmin.f32 %v3406_v31, 6.0  ;;  %v1262_v61 = vadd.f32 %v9144_v48, %v8965_v23  ;;  %2089 = vmatprep.mubr.bf16.mxu0 %v12729_v18 }
 0x1a4   : > { %v1422_v7 = vadd.f32 %v9146_v14, %v8965_v23  ;;  %v3727_v4 = vmin.f32 %v3087_v21, 6.0  ;;  %v3096_v56 = vmax.f32 %v1260_v17, 0.0  ;;  %v3416_v58 = vmax.f32 %v1420_v39, 0.0 }
 0x1a5   : > { %v4047_v47 = vmin.f32 %v3407_v62, 6.0  ;;  %v1275_v25 = vpop.f32.mrb[48].mxu0  ;;  %v1435_v9 = vpop.f32.mrb[48].mxu1  ;;  %v4439_v1 = vadd.f32 %v4438_v29, %v3726_v36  ;;  %v4959_v51 = vadd.f32 %v4958_v53, %v4046_v34  ;;  %v3097_v37 = vmax.f32 %v1262_v61, 0.0 }
 0x1a6   : > { %v3417_v57 = vmax.f32 %v1422_v7, 0.0  ;;  %v1277_v11 = vpop.f32.mrb[49].mxu0  ;;  %v1437_v28 = vpop.f32.mrb[49].mxu1  ;;  %v4452_v46 = vadd.f32 %v4451_v43, %v3727_v4  ;;  %v3736_v48 = vmin.f32 %v3096_v56, 6.0  ;;  %v4056_v59 = vmin.f32 %v3416_v58, 6.0 }
 0x1a7   : > { %v4972_v6 = vadd.f32 %v4971_v38, %v4047_v47  ;;  %v9198_v31 = vpop.f32.mrb[50].mxu0  ;;  %v9200_v14 = vpop.f32.mrb[50].mxu1  ;;  %v3737_v21 = vmin.f32 %v3097_v37, 6.0  ;;  %v1266_v17 = vadd.f32 %v1265_v15, %v8962_v33  ;;  %v1426_v39 = vadd.f32 %v1425_v27, %v8962_v33 }
 0x1a8   : > { %v4057_v62 = vmin.f32 %v3417_v57, 6.0  ;;  %v9204_v29 = vpop.f32.mrb[51].mxu0  ;;  %v9206_v53 = vpop.f32.mrb[51].mxu1  ;;  %v4440_v36 = vadd.f32 %v4439_v1, %v3736_v48  ;;  %v4960_v34 = vadd.f32 %v4959_v51, %v4056_v59  ;;  %v1268_v43 = vadd.f32 %v1267_v49, %v8965_v23 }
 0x1a9   : > { %v1428_v38 = vadd.f32 %v1427_v26, %v8965_v23  ;;  %v4453_v61 = vadd.f32 %v4452_v46, %v3737_v21  ;;  %v3106_v4 = vmax.f32 %v1266_v17, 0.0  ;;  %v3426_v47 = vmax.f32 %v1426_v39, 0.0 }
 0x1aa   : > { %v4973_v7 = vadd.f32 %v4972_v6, %v4057_v62  ;;  %6953 = vmatmul.mubr.msk.bf16.gmra.mrb[156].mxu1 %vm993_vm1, %v8829_v13  ;;  %v3107_v15 = vmax.f32 %v1268_v43, 0.0  ;;  %v1270_v27 = vadd.f32 %v9172_v63, %v8962_v33  ;;  %v1430_v58 = vadd.f32 %v9174_v0, %v8962_v33  ;;  %6986 = vmatmul.mubr.msk.bf16.gmra.mrb[156].mxu0 %vm993_vm1, %v8829_v13 }
 0x1ab   : > { %v3427_v56 = vmax.f32 %v1428_v38, 0.0  ;;  %1746 = vmatprep.mubr.bf16.mxu1 %v12729_v18  ;;  %v3746_v49 = vmin.f32 %v3106_v4, 6.0  ;;  %v4066_v26 = vmin.f32 %v3426_v47, 6.0  ;;  %v1272_v1 = vadd.f32 %v9178_v54, %v8965_v23  ;;  %2099 = vmatprep.mubr.bf16.mxu0 %v12729_v18 }
 0x1ac   : > { %v1432_v51 = vadd.f32 %v9180_v42, %v8965_v23  ;;  %v3747_v37 = vmin.f32 %v3107_v15, 6.0  ;;  %v3116_v57 = vmax.f32 %v1270_v27, 0.0  ;;  %v3436_v46 = vmax.f32 %v1430_v58, 0.0 }
 0x1ad   : > { %v4067_v63 = vmin.f32 %v3427_v56, 6.0  ;;  %v9224_v0 = vpop.f32.mrb[52].mxu0  ;;  %v9226_v6 = vpop.f32.mrb[52].mxu1  ;;  %v4441_v48 = vadd.f32 %v4440_v36, %v3746_v49  ;;  %v4961_v59 = vadd.f32 %v4960_v34, %v4066_v26  ;;  %v3117_v21 = vmax.f32 %v1272_v1, 0.0 }
 0x1ae   : > { %v3437_v62 = vmax.f32 %v1432_v51, 0.0  ;;  %v9228_v17 = vpop.f32.mrb[53].mxu0  ;;  %v9230_v54 = vpop.f32.mrb[53].mxu1  ;;  %v4454_v39 = vadd.f32 %v4453_v61, %v3747_v37  ;;  %v3756_v43 = vmin.f32 %v3116_v57, 6.0  ;;  %v4076_v38 = vmin.f32 %v3436_v46, 6.0 }
 0x1af   : > { %v4974_v42 = vadd.f32 %v4973_v7, %v4067_v63  ;;  %v9232_v4 = vpop.f32.mrb[54].mxu0  ;;  %v9234_v47 = vpop.f32.mrb[54].mxu1  ;;  %v3757_v15 = vmin.f32 %v3117_v21, 6.0  ;;  %v1276_v27 = vadd.f32 %v1275_v25, %v8962_v33  ;;  %v1436_v36 = vadd.f32 %v1435_v9, %v8962_v33 }
 0x1b0   : > { %v4077_v56 = vmin.f32 %v3437_v62, 6.0  ;;  %v9238_v34 = vpop.f32.mrb[55].mxu0  ;;  %v9240_v58 = vpop.f32.mrb[55].mxu1  ;;  %v4442_v49 = vadd.f32 %v4441_v48, %v3756_v43  ;;  %v4962_v26 = vadd.f32 %v4961_v59, %v4076_v38  ;;  %v1278_v61 = vadd.f32 %v1277_v11, %v8965_v23 }
 0x1b1   : > { %v1438_v7 = vadd.f32 %v1437_v28, %v8965_v23  ;;  %v4455_v1 = vadd.f32 %v4454_v39, %v3757_v15  ;;  %v3126_v37 = vmax.f32 %v1276_v27, 0.0  ;;  %v3446_v63 = vmax.f32 %v1436_v36, 0.0 }
 0x1b2   : > { %v4975_v51 = vadd.f32 %v4974_v42, %v4077_v56  ;;  %6954 = vmatmul.mubr.msk.bf16.gmra.mrb[160].mxu1 %vm993_vm1, %v12754_v2  ;;  %v12774_v9 = vrot.slane %v9128_v52, 2  ;;  %v4443_v46 = vrot.slane %v4442_v49, 4  ;;  %v4963_v48 = vrot.slane %v4962_v26, 4  ;;  %6987 = vmatmul.mubr.msk.bf16.gmra.mrb[160].mxu0 %vm993_vm1, %v12754_v2 }
 0x1b3   : > { %1756 = vmatprep.mubr.bf16.mxu1 %v12729_v18  ;;  %v4456_v11 = vrot.slane %v4455_v1, 4  ;;  %v3127_v59 = vmax.f32 %v1278_v61, 0.0  ;;  %v3447_v21 = vmax.f32 %v1438_v7, 0.0  ;;  %2109 = vmatprep.mubr.bf16.mxu0 %v12729_v18  ;;  %v3766_v42 = vmin.f32 %v3126_v37, 6.0 }
 0x1b4   : > { %v9250_v57 = vadd.f32 %v12774_v9, %v9128_v52  ;;  %v4976_v28 = vrot.slane %v4975_v51, 4  ;;  %v4444_v62 = vadd.f32 %v4443_v46, %v4442_v49  ;;  %v4964_v39 = vadd.f32 %v4963_v48, %v4962_v26 }
 0x1b5   : > { %v4086_v43 = vmin.f32 %v3446_v63, 6.0  ;;  %v9256_v52 = vpop.f32.mrb[56].mxu0  ;;  %v9258_v38 = vpop.f32.mrb[56].mxu1  ;;  %v4457_v15 = vadd.f32 %v4456_v11, %v4455_v1  ;;  %v1280_v27 = vadd.f32 %v9198_v31, %v8962_v33  ;;  %v1440_v36 = vadd.f32 %v9200_v14, %v8962_v33 }
 0x1b6   : > { %v4977_v56 = vadd.f32 %v4976_v28, %v4975_v51  ;;  %v9264_v61 = vpop.f32.mrb[57].mxu0  ;;  %v9266_v7 = vpop.f32.mrb[57].mxu1  ;;  %v4445_v49 = vrot.slane %v4444_v62, 2  ;;  %v4965_v26 = vrot.slane %v4964_v39, 2  ;;  %v1282_v37 = vadd.f32 %v9204_v29, %v8965_v23 }
 0x1b7   : > { %v1442_v63 = vadd.f32 %v9206_v53, %v8965_v23  ;;  %v9272_v1 = vpop.f32.mrb[58].mxu0  ;;  %v9274_v51 = vpop.f32.mrb[58].mxu1  ;;  %v4458_v31 = vrot.slane %v4457_v15, 2  ;;  %v3767_v9 = vmin.f32 %v3127_v59, 6.0  ;;  %v3136_v46 = vmax.f32 %v1280_v27, 0.0 }
 0x1b8   : > { %v3456_v14 = vmax.f32 %v1440_v36, 0.0  ;;  %v9276_v48 = vpop.f32.mrb[59].mxu0  ;;  %v9278_v11 = vpop.f32.mrb[59].mxu1  ;;  %v4446_v28 = vadd.f32 %v4445_v49, %v4444_v62  ;;  %v4978_v25 = vrot.slane %v4977_v56, 2  ;;  %v3137_v2 = vmax.f32 %v1282_v37, 0.0 }
 0x1b9   : > { %v3457_v13 = vmax.f32 %v1442_v63, 0.0  ;;  %v9280_v29 = vadd.f32 %v4965_v26, %v4964_v39  ;;  %v4459_v3 = vadd.f32 %v4458_v31, %v4457_v15  ;;  %v3776_v53 = vmin.f32 %v3136_v46, 6.0 }
 0x1ba   : > { %v4096_v41 = vmin.f32 %v3456_v14, 6.0  ;;  %6955 = vmatmul.mubr.msk.bf16.gmra.mrb[164].mxu1 %vm993_vm1, %v12756_v24  ;;  %v4447_v19 = vrot.slane %v4446_v28, 1  ;;  %v4087_v59 = vmin.f32 %v3447_v21, 6.0  ;;  %v3777_v27 = vmin.f32 %v3137_v2, 6.0  ;;  %6988 = vmatmul.mubr.msk.bf16.gmra.mrb[164].mxu0 %vm993_vm1, %v12756_v24 }
 0x1bb   : > { %v4097_v36 = vmin.f32 %v3457_v13, 6.0  ;;  %1766 = vmatprep.mubr.bf16.mxu1 %v12729_v18  ;;  %v4460_v49 = vrot.slane %v4459_v3, 1  ;;  %v4566_v39 = vadd.f32 %v3776_v53, %v3766_v42  ;;  %2119 = vmatprep.mubr.bf16.mxu0 %v12729_v18  ;;  %v9289_v37 = vadd.f32 %v4978_v25, %v4977_v56 }
 0x1bc   : > { %v5086_v26 = vadd.f32 %v4096_v41, %v4086_v43  ;;  %v4448_v15 = vadd.f32 %v4447_v19, %v4446_v28  ;;  %v4579_v63 = vadd.f32 %v3777_v27, %v3767_v9  ;;  %v1286_v14 = vadd.f32 %v9224_v0, %v8962_v33 }
 0x1bd   : > { %v5099_v31 = vadd.f32 %v4097_v36, %v4087_v59  ;;  %v9291_v21 = vpop.f32.mrb[60].mxu0  ;;  %v9293_v13 = vpop.f32.mrb[60].mxu1  ;;  %v4461_v46 = vadd.f32 %v4460_v49, %v4459_v3  ;;  %v1446_v41 = vadd.f32 %v9226_v6, %v8962_v33  ;;  %v1288_v43 = vadd.f32 %v9228_v17, %v8965_v23 }
 0x1be   : > { %v9300_v42 = vpop.f32.mrb[61].mxu0  ;;  %v9302_v19 = vpop.f32.mrb[61].mxu1  ;;  %v9306_v25 = vsel %vm5298_vm5, %v4448_v15, %v9155_v16  ;;  %v1448_v3 = vadd.f32 %v9230_v54, %v8965_v23  ;;  %v1290_v0 = vadd.f32 %v9232_v4, %v8962_v33  ;;  %v3146_v28 = vmax.f32 %v1286_v14, 0.0 }
 0x1bf   : > { %v9314_v56 = vpop.f32.mrb[62].mxu0  ;;  %v9316_v6 = vpop.f32.mrb[62].mxu1  ;;  %v9320_v9 = vsel %vm5298_vm5, %v4461_v46, %v9158_v44  ;;  %v3466_v16 = vmax.f32 %v1446_v41, 0.0  ;;  %v1450_v53 = vadd.f32 %v9234_v47, %v8962_v33  ;;  %v3147_v54 = vmax.f32 %v1288_v43, 0.0 }
 0x1c0   : > { %v9324_v17 = vpop.f32.mrb[63].mxu0  ;;  %v9326_v59 = vpop.f32.mrb[63].mxu1  ;;  %v3467_v27 = vmax.f32 %v1448_v3, 0.0  ;;  %v3156_v4 = vmax.f32 %v1290_v0, 0.0  ;;  %v1292_v36 = vadd.f32 %v9238_v34, %v8965_v23  ;;  %v3786_v49 = vmin.f32 %v3146_v28, 6.0 }
 0x1c1   : > { %v4106_v15 = vmin.f32 %v3466_v16, 6.0  ;;  %v3476_v2 = vmax.f32 %v1450_v53, 0.0  ;;  %v1452_v44 = vadd.f32 %v9240_v58, %v8965_v23  ;;  %v3787_v47 = vmin.f32 %v3147_v54, 6.0 }
 0x1c2   : > { %6956 = vmatmul.mubr.msk.bf16.gmra.mrb[168].mxu1 %vm993_vm1, %v12758_v40  ;;  %v4107_v46 = vmin.f32 %v3467_v27, 6.0  ;;  %v3796_v14 = vmin.f32 %v3156_v4, 6.0  ;;  %v3157_v41 = vmax.f32 %v1292_v36, 0.0  ;;  %6989 = vmatmul.mubr.msk.bf16.gmra.mrb[168].mxu0 %vm993_vm1, %v12758_v40  ;;  %v4567_v43 = vadd.f32 %v4566_v39, %v3786_v49 }
 0x1c3   : > { %1776 = vmatprep.mubr.bf16.mxu1 %v12729_v18  ;;  %v5087_v34 = vadd.f32 %v5086_v26, %v4106_v15  ;;  %v4116_v3 = vmin.f32 %v3476_v2, 6.0  ;;  %v3477_v0 = vmax.f32 %v1452_v44, 0.0  ;;  %2129 = vmatprep.mubr.bf16.mxu0 %v12729_v18  ;;  %v4580_v28 = vadd.f32 %v4579_v63, %v3787_v47 }
 0x1c4   : > { %v5100_v58 = vadd.f32 %v5099_v31, %v4107_v46  ;;  %v3797_v16 = vmin.f32 %v3157_v41, 6.0  ;;  %v1296_v53 = vadd.f32 %v9256_v52, %v8962_v33  ;;  %v4568_v4 = vadd.f32 %v4567_v43, %v3796_v14 }
 0x1c5   : > { %v9340_v54 = vpop.f32.mrb[64].mxu1  ;;  %v9342_v27 = vpop.f32.mrb[64].mxu0  ;;  %v5088_v36 = vadd.f32 %v5087_v34, %v4116_v3  ;;  %v4117_v62 = vmin.f32 %v3477_v0, 6.0  ;;  %v1456_v39 = vadd.f32 %v9258_v38, %v8962_v33  ;;  %v1298_v49 = vadd.f32 %v9264_v61, %v8965_v23 }
 0x1c6   : > { %v9346_v26 = vpop.f32.mrb[65].mxu1  ;;  %v9348_v2 = vpop.f32.mrb[65].mxu0  ;;  %v4581_v63 = vadd.f32 %v4580_v28, %v3797_v16  ;;  %v3166_v31 = vmax.f32 %v1296_v53, 0.0  ;;  %v1458_v52 = vadd.f32 %v9266_v7, %v8965_v23  ;;  %v1300_v38 = vadd.f32 %v9272_v1, %v8962_v33 }
 0x1c7   : > { %v9354_v15 = vpop.f32.mrb[66].mxu1  ;;  %v9356_v44 = vpop.f32.mrb[66].mxu0  ;;  %v5101_v47 = vadd.f32 %v5100_v58, %v4117_v62  ;;  %v3486_v46 = vmax.f32 %v1456_v39, 0.0  ;;  %v1460_v14 = vadd.f32 %v9274_v51, %v8962_v33  ;;  %v3167_v34 = vmax.f32 %v1298_v49, 0.0 }
 0x1c8   : > { %v9362_v41 = vpop.f32.mrb[67].mxu1  ;;  %v9364_v43 = vpop.f32.mrb[67].mxu0  ;;  %v3806_v61 = vmin.f32 %v3166_v31, 6.0  ;;  %v3487_v3 = vmax.f32 %v1458_v52, 0.0  ;;  %v1302_v7 = vadd.f32 %v9276_v48, %v8965_v23  ;;  %v3176_v28 = vmax.f32 %v1300_v38, 0.0 }
 0x1c9   : > { %v4126_v0 = vmin.f32 %v3486_v46, 6.0  ;;  %v3496_v62 = vmax.f32 %v1460_v14, 0.0  ;;  %v1462_v58 = vadd.f32 %v9278_v11, %v8965_v23  ;;  %v3807_v51 = vmin.f32 %v3167_v34, 6.0 }
 0x1ca   : > { %6957 = vmatmul.mubr.msk.bf16.gmra.mrb[172].mxu1 %vm993_vm1, %v8640_v50  ;;  %v4569_v1 = vadd.f32 %v4568_v4, %v3806_v61  ;;  %v4127_v16 = vmin.f32 %v3487_v3, 6.0  ;;  %v3177_v53 = vmax.f32 %v1302_v7, 0.0  ;;  %6990 = vmatmul.mubr.msk.bf16.gmra.mrb[172].mxu0 %vm993_vm1, %v8640_v50  ;;  %v3816_v48 = vmin.f32 %v3176_v28, 6.0 }
 0x1cb   : > { %1786 = vmatprep.mubr.bf16.mxu1 %v12729_v18  ;;  %v5089_v39 = vadd.f32 %v5088_v36, %v4126_v0  ;;  %v4136_v31 = vmin.f32 %v3496_v62, 6.0  ;;  %v3497_v49 = vmax.f32 %v1462_v58, 0.0  ;;  %2139 = vmatprep.mubr.bf16.mxu0 %v12729_v18  ;;  %v4582_v52 = vadd.f32 %v4581_v63, %v3807_v51 }
 0x1cc   : > { %v5102_v11 = vadd.f32 %v5101_v47, %v4127_v16  ;;  %v3817_v46 = vmin.f32 %v3177_v53, 6.0  ;;  %v1306_v4 = vadd.f32 %v9291_v21, %v8962_v33  ;;  %v4570_v61 = vadd.f32 %v4569_v1, %v3816_v48 }
 0x1cd   : > { %v9378_v38 = vpop.f32.mrb[68].mxu1  ;;  %v9380_v14 = vpop.f32.mrb[68].mxu0  ;;  %v5090_v34 = vadd.f32 %v5089_v39, %v4136_v31  ;;  %v4137_v3 = vmin.f32 %v3497_v49, 6.0  ;;  %v1466_v36 = vadd.f32 %v9293_v13, %v8962_v33  ;;  %v1308_v28 = vadd.f32 %v9300_v42, %v8965_v23 }
 0x1ce   : > { %v9384_v7 = vpop.f32.mrb[69].mxu1  ;;  %v9386_v0 = vpop.f32.mrb[69].mxu0  ;;  %v4583_v63 = vadd.f32 %v4582_v52, %v3817_v46  ;;  %v3186_v47 = vmax.f32 %v1306_v4, 0.0  ;;  %v1468_v21 = vadd.f32 %v9302_v19, %v8965_v23  ;;  %v4980_v1 = vrot.slane %v9289_v37, 1 }
 0x1cf   : > { %v9392_v62 = vpop.f32.mrb[70].mxu1  ;;  %v9394_v58 = vpop.f32.mrb[70].mxu0  ;;  %v5103_v51 = vadd.f32 %v5102_v11, %v4137_v3  ;;  %v3506_v13 = vmax.f32 %v1466_v36, 0.0  ;;  %v1310_v16 = vadd.f32 %v9314_v56, %v8962_v33  ;;  %v12775_v42 = vrot.slane %v9141_v60, 1 }
 0x1d0   : > { %v9399_v53 = vpop.f32.mrb[71].mxu1  ;;  %v9401_v39 = vpop.f32.mrb[71].mxu0  ;;  %v3826_v19 = vmin.f32 %v3186_v47, 6.0  ;;  %v3187_v31 = vmax.f32 %v1308_v28, 0.0  ;;  %v3507_v49 = vmax.f32 %v1468_v21, 0.0  ;;  %v12776_v52 = vrot.slane %v9250_v57, 1 }
 0x1d1   : > { %v9406_v48 = vadd.f32 %v12775_v42, %v9141_v60  ;;  %v4146_v46 = vmin.f32 %v3506_v13, 6.0  ;;  %v3196_v4 = vmax.f32 %v1310_v16, 0.0  ;;  %v1470_v56 = vadd.f32 %v9316_v6, %v8962_v33 }
 0x1d2   : > { %v9411_v11 = vadd.f32 %v12776_v52, %v9250_v57  ;;  %6958 = vmatmul.mubr.msk.bf16.gmra.mrb[176].mxu1 %vm993_vm1, %v8677_v8  ;;  %v12777_v60 = vrot.slane %v9280_v29, 1  ;;  %v4571_v36 = vadd.f32 %v4570_v61, %v3826_v19  ;;  %v3827_v47 = vmin.f32 %v3187_v31, 6.0  ;;  %6991 = vmatmul.mubr.msk.bf16.gmra.mrb[176].mxu0 %vm993_vm1, %v8677_v8 }
 0x1d3   : > { %v4147_v28 = vmin.f32 %v3507_v49, 6.0  ;;  %1796 = vmatprep.mubr.bf16.mxu1 %v12729_v18  ;;  %v9426_v57 = vadd.f32 %v4980_v1, %v9289_v37  ;;  %v5091_v33 = vadd.f32 %v5090_v34, %v4146_v46  ;;  %v3836_v6 = vmin.f32 %v3196_v4, 6.0  ;;  %2149 = vmatprep.mubr.bf16.mxu0 %v12729_v18 }
 0x1d4   : > { %v9420_v3 = vadd.f32 %v12777_v60, %v9280_v29  ;;  %v3516_v21 = vmax.f32 %v1470_v56, 0.0  ;;  %v4584_v13 = vadd.f32 %v4583_v63, %v3827_v47  ;;  %v1312_v29 = vadd.f32 %v9324_v17, %v8965_v23  ;;  %v7407_v60 = vld [vmem:[%s12604_s2] sm:$0xff] }
 0x1d5   : > { %v5104_v16 = vadd.f32 %v5103_v51, %v4147_v28  ;;  %v1472_v61 = vadd.f32 %v9326_v59, %v8965_v23  ;;  %v9433_v42 = vpop.f32.mrb[72].mxu1  ;;  %v9435_v19 = vpop.f32.mrb[72].mxu0  ;;  %v4572_v31 = vadd.f32 %v4571_v36, %v3836_v6  ;;  %v928_v34 = vsub.s32 2, %v8944_v32 }
 0x1d6   : > { %v4156_v37 = vmin.f32 %v3516_v21, 6.0  ;;  %v936_v1 = vsub.s32 4, %v8944_v32  ;;  %v9439_v49 = vpop.f32.mrb[73].mxu1  ;;  %v9441_v63 = vpop.f32.mrb[73].mxu0  ;;  %v3197_v51 = vmax.f32 %v1312_v29, 0.0  ;;  %v932_v17 = vsub.s32 3, %v8944_v32 }
 0x1d7   : > { %v3517_v52 = vmax.f32 %v1472_v61, 0.0  ;;  %v940_v23 = vsub.s32 5, %v8944_v32  ;;  %v9445_v59 = vpop.f32.mrb[74].mxu1  ;;  %v9447_v46 = vpop.f32.mrb[74].mxu0  ;;  %v4573_v4 = vrot.slane %v4572_v31, 4  ;;  %v9452_v36 = vrot.slane %v7407_v60, %v928_v34 }
 0x1d8   : > { %v5092_v56 = vadd.f32 %v5091_v33, %v4156_v37  ;;  %v9454_v47 = vrot.slane %v7407_v60, %v936_v1  ;;  %v9456_v28 = vpop.f32.mrb[75].mxu1  ;;  %v9458_v6 = vpop.f32.mrb[75].mxu0  ;;  %v3837_v21 = vmin.f32 %v3197_v51, 6.0  ;;  %v9460_v61 = vrot.slane %v7407_v60, %v932_v17 }
 0x1d9   : > { %v4157_v29 = vmin.f32 %v3517_v52, 6.0  ;;  %v9462_v32 = vrot.slane %v7407_v60, %v940_v23  ;;  %v4574_v33 = vadd.f32 %v4573_v4, %v4572_v31  ;;  %v1509_v34 = vadd.f32 %v9340_v54, %v9452_v36 }
 0x1da   : > { %v5093_v37 = vrot.slane %v5092_v56, 4  ;;  %v1862_v1 = vadd.f32 %v9342_v27, %v9454_v47  ;;  %6959 = vmatmul.mubr.msk.bf16.gmra.mrb[180].mxu1 %vm993_vm1, %v8705_v5  ;;  %v4585_v8 = vadd.f32 %v4584_v13, %v3837_v21  ;;  %v1511_v52 = vadd.f32 %v9346_v26, %v9460_v61  ;;  %6992 = vmatmul.mubr.msk.bf16.gmra.mrb[180].mxu0 %vm993_vm1, %v8705_v5 }
 0x1db   : > { %v5105_v51 = vadd.f32 %v5104_v16, %v4157_v29  ;;  %v1864_v31 = vadd.f32 %v9348_v2, %v9462_v32  ;;  %v4575_v17 = vrot.slane %v4574_v33, 2  ;;  %v2888_v23 = vmax.f32 %v1509_v34, 0.0  ;;  %1806 = vmatprep.mubr.bf16.mxu1 %v12729_v18  ;;  %2159 = vmatprep.mubr.bf16.mxu0 %v12729_v18 }
 0x1dc   : > { %v5094_v54 = vadd.f32 %v5093_v37, %v5092_v56  ;;  %v2890_v27 = vmax.f32 %v1862_v1, 0.0  ;;  %v4586_v13 = vrot.slane %v4585_v8, 4  ;;  %v2889_v4 = vmax.f32 %v1511_v52, 0.0 }
 0x1dd   : > { %v5106_v16 = vrot.slane %v5105_v51, 4  ;;  %v2891_v26 = vmax.f32 %v1864_v31, 0.0  ;;  %v9478_v60 = vpop.f32.mrb[76].mxu1  ;;  %v9480_v2 = vpop.f32.mrb[76].mxu0  ;;  %v4576_v21 = vadd.f32 %v4575_v17, %v4574_v33  ;;  %v3528_v5 = vmin.f32 %v2888_v23, 6.0 }
 0x1de   : > { %v5095_v29 = vrot.slane %v5094_v54, 2  ;;  %v3530_v56 = vmin.f32 %v2890_v27, 6.0  ;;  %v9482_v37 = vpop.f32.mrb[77].mxu1  ;;  %v9484_v34 = vpop.f32.mrb[77].mxu0  ;;  %v4587_v1 = vadd.f32 %v4586_v13, %v4585_v8  ;;  %v3529_v40 = vmin.f32 %v2889_v4, 6.0 }
 0x1df   : > { %v5107_v50 = vadd.f32 %v5106_v16, %v5105_v51  ;;  %v3531_v24 = vmin.f32 %v2891_v26, 6.0  ;;  %v9486_v35 = vpop.f32.mrb[78].mxu1  ;;  %v9488_v52 = vpop.f32.mrb[78].mxu0  ;;  %v4577_v31 = vrot.slane %v4576_v21, 1  ;;  %v1513_v33 = vadd.f32 %v9354_v15, %v9452_v36 }
 0x1e0   : > { %12778 = vst [vmem:[#allocation45_spill] sm:$0xff] %v9488_v52  ;;  %v5096_v55 = vadd.f32 %v5095_v29, %v5094_v54  ;;  %v1866_v17 = vadd.f32 %v9356_v44, %v9454_v47  ;;  %v9494_v23 = vpop.f32.mrb[79].mxu1  ;;  %v9496_v27 = vpop.f32.mrb[79].mxu0  ;;  %v4588_v8 = vrot.slane %v4587_v1, 2  ;;  %v1515_v13 = vadd.f32 %v9362_v41, %v9460_v61 }
 0x1e1   : > { %12779 = vst [vmem:[#allocation46_spill] sm:$0xff] %v9494_v23  ;;  %v5108_v51 = vrot.slane %v5107_v50, 2  ;;  %v1868_v16 = vadd.f32 %v9364_v43, %v9462_v32  ;;  %v4578_v4 = vadd.f32 %v4577_v31, %v4576_v21  ;;  %v2898_v26 = vmax.f32 %v1513_v33, 0.0 }
 0x1e2   : > { %v5097_v54 = vrot.slane %v5096_v55, 1  ;;  %v2900_v29 = vmax.f32 %v1866_v17, 0.0  ;;  %6960 = vmatmul.mubr.msk.bf16.gmra.mrb[184].mxu1 %vm993_vm1, %v8744_v30  ;;  %v4589_v15 = vadd.f32 %v4588_v8, %v4587_v1  ;;  %v2899_v23 = vmax.f32 %v1515_v13, 0.0  ;;  %6993 = vmatmul.mubr.msk.bf16.gmra.mrb[184].mxu0 %vm993_vm1, %v8744_v30  ;;  %v4166_v13 = vld [vmem:[#allocation2] sm:$0xff] }
 0x1e3   : > { %v5109_v44 = vadd.f32 %v5108_v51, %v5107_v50  ;;  %v2901_v52 = vmax.f32 %v1868_v16, 0.0  ;;  %1816 = vmatprep.mubr.bf16.mxu1 %v12729_v18  ;;  %v5301_v41 = vsel %vm5300_vm6, %v4578_v4, %v9306_v25  ;;  %v3538_v21 = vmin.f32 %v2898_v26, 6.0  ;;  %2169 = vmatprep.mubr.bf16.mxu0 %v12729_v18 }
 0x1e4   : > { %v5098_v43 = vadd.f32 %v5097_v54, %v5096_v55  ;;  %v3540_v31 = vmin.f32 %v2900_v29, 6.0  ;;  %v5303_v33 = vsel %vm5302_vm7, %v9113_v20, %v5301_v41  ;;  %v4590_v1 = vrot.slane %v4589_v15, 1 }
 0x1e5   : > { %v5110_v50 = vrot.slane %v5109_v44, 1  ;;  %v3539_v17 = vmin.f32 %v2899_v23, 6.0  ;;  %v9512_v8 = vpop.f32.mrb[80].mxu1  ;;  %v9514_v51 = vpop.f32.mrb[80].mxu0  ;;  %v5305_v16 = vsel %vm5304_vm8, %v9406_v48, %v5303_v33  ;;  %v4202_v25 = vadd.f32 %v3538_v21, %v3528_v5 }
 0x1e6   : > { %12780 = vst [vmem:[#allocation47_spill] sm:$0xff] %v9512_v8  ;;  %12781 = vst [vmem:[#allocation48_spill] sm:$0xff] %v9514_v51  ;;  %v4228_v55 = vadd.f32 %v3540_v31, %v3530_v56  ;;  %v3541_v4 = vmin.f32 %v2901_v52, 6.0  ;;  %v9518_v54 = vpop.f32.mrb[81].mxu1  ;;  %v9520_v26 = vpop.f32.mrb[81].mxu0  ;;  %v5307_v20 = vsel %vm5306_vm9, %v9420_v3, %v5305_v16  ;;  %v4591_v29 = vadd.f32 %v4590_v1, %v4589_v15  ;;  %v4167_v31 = vld [vmem:[#allocation2 + $0x8] sm:$0xff] }
 0x1e7   : > { %v5111_v23 = vadd.f32 %v5110_v50, %v5109_v44  ;;  %v4215_v41 = vadd.f32 %v3539_v17, %v3529_v40  ;;  %v9524_v30 = vpop.f32.mrb[82].mxu1  ;;  %v9526_v51 = vpop.f32.mrb[82].mxu0  ;;  %v5309_v8 = vsel %vm5308_vm10, %v5098_v43, %v5307_v20  ;;  %v1519_v5 = vadd.f32 %v9378_v38, %v9452_v36 }
 0x1e8   : > { %v4241_v48 = vadd.f32 %v3541_v4, %v3531_v24  ;;  %v1872_v56 = vadd.f32 %v9380_v14, %v9454_v47  ;;  %v9533_v52 = vpop.f32.mrb[83].mxu1  ;;  %v9535_v21 = vpop.f32.mrb[83].mxu0  ;;  %v5383_v3 = vadd.f32 %v5309_v8, %v4166_v13  ;;  %v5312_v40 = vsel %vm5300_vm6, %v4591_v29, %v9320_v9 }
 0x1e9   : > { %v1521_v15 = vadd.f32 %v9384_v7, %v9460_v61  ;;  %v1874_v24 = vadd.f32 %v9386_v0, %v9462_v32  ;;  %v5313_v38 = vsel %vm5302_vm7, %v9135_v22, %v5312_v40  ;;  %v2908_v44 = vmax.f32 %v1519_v5, 0.0 }
 0x1ea   : > { %v2910_v43 = vmax.f32 %v1872_v56, 0.0  ;;  %v1523_v14 = vadd.f32 %v9392_v62, %v9452_v36  ;;  %6961 = vmatmul.mubr.msk.bf16.gmra.mrb[188].mxu1 %vm993_vm1, %v8761_v10  ;;  %5393 = vst [vmem:[#allocation2] sm:$0xff] %v5383_v3  ;;  %v5314_v9 = vsel %vm5304_vm8, %v9411_v11, %v5313_v38  ;;  %v1876_v0 = vadd.f32 %v9394_v58, %v9454_v47 }
 0x1eb   : > { %v2909_v7 = vmax.f32 %v1521_v15, 0.0  ;;  %v2911_v33 = vmax.f32 %v1874_v24, 0.0  ;;  %6994 = vmatmul.mubr.msk.bf16.gmra.mrb[188].mxu0 %vm993_vm1, %v8761_v10  ;;  %2212 = vmatprep.mubr.bf16.mxu1 %v12729_v18  ;;  %v5315_v22 = vsel %vm5306_vm9, %v9426_v57, %v5314_v9  ;;  %v3548_v62 = vmin.f32 %v2908_v44, 6.0 }
 0x1ec   : > { %v3550_v1 = vmin.f32 %v2910_v43, 6.0  ;;  %v2918_v50 = vmax.f32 %v1523_v14, 0.0  ;;  %2565 = vmatprep.mubr.bf16.mxu0 %v12729_v18  ;;  %v5316_v11 = vsel %vm5308_vm10, %v5111_v23, %v5315_v22  ;;  %v2920_v13 = vmax.f32 %v1876_v0, 0.0 }
 0x1ed   : > { %v3549_v17 = vmin.f32 %v2909_v7, 6.0  ;;  %v3551_v8 = vmin.f32 %v2911_v33, 6.0  ;;  %v9560_v16 = vpop.f32.mrb[84].mxu1  ;;  %v9562_v58 = vpop.f32.mrb[84].mxu0  ;;  %v5384_v4 = vadd.f32 %v5316_v11, %v4167_v31  ;;  %v4203_v20 = vadd.f32 %v4202_v25, %v3548_v62 }
 0x1ee   : > { %v4229_v29 = vadd.f32 %v4228_v55, %v3550_v1  ;;  %v3558_v5 = vmin.f32 %v2918_v50, 6.0  ;;  %v9564_v56 = vpop.f32.mrb[85].mxu1  ;;  %v9566_v57 = vpop.f32.mrb[85].mxu0  ;;  %v3560_v15 = vmin.f32 %v2920_v13, 6.0  ;;  %v1525_v23 = vadd.f32 %v9399_v53, %v9460_v61 }
 0x1ef   : > { %v4216_v3 = vadd.f32 %v4215_v41, %v3549_v17  ;;  %v4242_v40 = vadd.f32 %v4241_v48, %v3551_v8  ;;  %v9570_v24 = vpop.f32.mrb[86].mxu1  ;;  %v9572_v38 = vpop.f32.mrb[86].mxu0  ;;  %5394 = vst [vmem:[#allocation2 + $0x8] sm:$0xff] %v5384_v4  ;;  %v1878_v25 = vadd.f32 %v9401_v39, %v9462_v32  ;;  %v1529_v55 = vadd.f32 %v9433_v42, %v9452_v36 }
 0x1f0   : > { %v4204_v44 = vadd.f32 %v4203_v20, %v3558_v5  ;;  %v1882_v41 = vadd.f32 %v9435_v19, %v9454_v47  ;;  %v9580_v48 = vpop.f32.mrb[87].mxu1  ;;  %v9582_v43 = vpop.f32.mrb[87].mxu0  ;;  %v4230_v53 = vadd.f32 %v4229_v29, %v3560_v15  ;;  %v2919_v14 = vmax.f32 %v1525_v23, 0.0 }
 0x1f1   : > { %v1531_v31 = vadd.f32 %v9439_v49, %v9460_v61  ;;  %v1884_v9 = vadd.f32 %v9441_v63, %v9462_v32  ;;  %v2921_v7 = vmax.f32 %v1878_v25, 0.0  ;;  %v2928_v39 = vmax.f32 %v1529_v55, 0.0 }
 0x1f2   : > { %v2930_v33 = vmax.f32 %v1882_v41, 0.0  ;;  %v1533_v42 = vadd.f32 %v9445_v59, %v9452_v36  ;;  %6996 = vmatmul.mubr.msk.bf16.vlgmr.msra.gmra.mrb[192].mxu1 %vm993_vm1, %v12759_v45  ;;  %v3559_v19 = vmin.f32 %v2919_v14, 6.0  ;;  %v1886_v62 = vadd.f32 %v9447_v46, %v9454_v47 }
 0x1f3   : > { %v2929_v0 = vmax.f32 %v1531_v31, 0.0  ;;  %v2931_v22 = vmax.f32 %v1884_v9, 0.0  ;;  %7029 = vmatmul.mubr.msk.bf16.vlgmr.msra.gmra.mrb[192].mxu0 %vm993_vm1, %v12759_v45  ;;  %2222 = vmatprep.mubr.bf16.mxu1 %v12729_v18  ;;  %v3561_v49 = vmin.f32 %v2921_v7, 6.0  ;;  %v3568_v63 = vmin.f32 %v2928_v39, 6.0 }
 0x1f4   : > { %v3570_v1 = vmin.f32 %v2930_v33, 6.0  ;;  %v2938_v50 = vmax.f32 %v1533_v42, 0.0  ;;  %2575 = vmatprep.mubr.bf16.mxu0 %v12729_v18  ;;  %v4217_v59 = vadd.f32 %v4216_v3, %v3559_v19  ;;  %v2940_v8 = vmax.f32 %v1886_v62, 0.0 }
 0x1f5   : > { %v3569_v11 = vmin.f32 %v2929_v0, 6.0  ;;  %v3571_v17 = vmin.f32 %v2931_v22, 6.0  ;;  %v9598_v13 = vpop.f32.mrb[88].mxu1  ;;  %v9600_v4 = vpop.f32.mrb[88].mxu0  ;;  %v4243_v46 = vadd.f32 %v4242_v40, %v3561_v49  ;;  %v4205_v20 = vadd.f32 %v4204_v44, %v3568_v63  ;;  %v12782_v49 = vld [vmem:[#allocation45_spill] sm:$0xff] }
 0x1f6   : > { %v4231_v29 = vadd.f32 %v4230_v53, %v3570_v1  ;;  %v3578_v45 = vmin.f32 %v2938_v50, 6.0  ;;  %v9602_v5 = vpop.f32.mrb[89].mxu1  ;;  %v9604_v15 = vpop.f32.mrb[89].mxu0  ;;  %v3580_v25 = vmin.f32 %v2940_v8, 6.0  ;;  %v1535_v3 = vadd.f32 %v9456_v28, %v9460_v61 }
 0x1f7   : > { %v4218_v23 = vadd.f32 %v4217_v59, %v3569_v11  ;;  %v1888_v55 = vadd.f32 %v9458_v6, %v9462_v32  ;;  %v9610_v41 = vpop.f32.mrb[90].mxu1  ;;  %v9612_v14 = vpop.f32.mrb[90].mxu0  ;;  %v4244_v40 = vadd.f32 %v4243_v46, %v3571_v17  ;;  %v1539_v53 = vadd.f32 %v9478_v60, %v9452_v36 }
 0x1f8   : > { %v4206_v44 = vadd.f32 %v4205_v20, %v3578_v45  ;;  %v1892_v31 = vadd.f32 %v9480_v2, %v9454_v47  ;;  %v9618_v9 = vpop.f32.mrb[91].mxu1  ;;  %v9620_v7 = vpop.f32.mrb[91].mxu0  ;;  %v4232_v28 = vadd.f32 %v4231_v29, %v3580_v25  ;;  %v2939_v39 = vmax.f32 %v1535_v3, 0.0 }
 0x1f9   : > { %v2941_v33 = vmax.f32 %v1888_v55, 0.0  ;;  %v1541_v6 = vadd.f32 %v9482_v37, %v9460_v61  ;;  %v2948_v42 = vmax.f32 %v1539_v53, 0.0  ;;  %v1894_v0 = vadd.f32 %v9484_v34, %v9462_v32 }
 0x1fa   : > { %v2950_v19 = vmax.f32 %v1892_v31, 0.0  ;;  %v1543_v60 = vadd.f32 %v9486_v35, %v9452_v36  ;;  %6997 = vmatmul.mubr.msk.bf16.gmra.mrb[196].mxu1 %vm993_vm1, %v12760_v12  ;;  %v3579_v2 = vmin.f32 %v2939_v39, 6.0  ;;  %v1896_v63 = vadd.f32 %v12782_v49, %v9454_v47  ;;  %v12783_v31 = vld [vmem:[#allocation46_spill] sm:$0xff] }
 0x1fb   : > { %v3581_v22 = vmin.f32 %v2941_v33, 6.0  ;;  %v2949_v62 = vmax.f32 %v1541_v6, 0.0  ;;  %7030 = vmatmul.mubr.msk.bf16.gmra.mrb[196].mxu0 %vm993_vm1, %v12760_v12  ;;  %2232 = vmatprep.mubr.bf16.mxu1 %v12729_v18  ;;  %v3588_v37 = vmin.f32 %v2948_v42, 6.0  ;;  %v2951_v34 = vmax.f32 %v1894_v0, 0.0  ;;  %v12784_v6 = vld [vmem:[#allocation47_spill] sm:$0xff] }
 0x1fc   : > { %v3590_v1 = vmin.f32 %v2950_v19, 6.0  ;;  %v2958_v50 = vmax.f32 %v1543_v60, 0.0  ;;  %2585 = vmatprep.mubr.bf16.mxu0 %v12729_v18  ;;  %v4219_v35 = vadd.f32 %v4218_v23, %v3579_v2  ;;  %v2960_v17 = vmax.f32 %v1896_v63, 0.0  ;;  %v12785_v19 = vld [vmem:[#allocation48_spill] sm:$0xff] }
 0x1fd   : > { %v4245_v59 = vadd.f32 %v4244_v40, %v3581_v22  ;;  %v3589_v11 = vmin.f32 %v2949_v62, 6.0  ;;  %v9636_v8 = vpop.f32.mrb[92].mxu1  ;;  %v9638_v46 = vpop.f32.mrb[92].mxu0  ;;  %v4207_v20 = vadd.f32 %v4206_v44, %v3588_v37  ;;  %v3591_v45 = vmin.f32 %v2951_v34, 6.0 }
 0x1fe   : > { %v4233_v29 = vadd.f32 %v4232_v28, %v3590_v1  ;;  %v3598_v12 = vmin.f32 %v2958_v50, 6.0  ;;  %v9640_v25 = vpop.f32.mrb[93].mxu1  ;;  %v9642_v3 = vpop.f32.mrb[93].mxu0  ;;  %v3600_v53 = vmin.f32 %v2960_v17, 6.0  ;;  %v1545_v23 = vadd.f32 %v12783_v31, %v9460_v61  ;;  %v12786_v50 = vld [vmem:[#allocation19_spill] sm:$0xff] }
 0x1ff   : > { %v4220_v55 = vadd.f32 %v4219_v35, %v3589_v11  ;;  %v1898_v40 = vadd.f32 %v9496_v27, %v9462_v32  ;;  %v9648_v39 = vpop.f32.mrb[94].mxu1  ;;  %v9650_v33 = vpop.f32.mrb[94].mxu0  ;;  %v4246_v44 = vadd.f32 %v4245_v59, %v3591_v45  ;;  %v1549_v42 = vadd.f32 %v12784_v6, %v9452_v36 }
 0x200   : > { %v4208_v28 = vadd.f32 %v4207_v20, %v3598_v12  ;;  %v1902_v0 = vadd.f32 %v12785_v19, %v9454_v47  ;;  %v9656_v60 = vpop.f32.mrb[95].mxu1  ;;  %v9658_v2 = vpop.f32.mrb[95].mxu0  ;;  %v4234_v22 = vadd.f32 %v4233_v29, %v3600_v53  ;;  %v2959_v62 = vmax.f32 %v1545_v23, 0.0 }
 0x201   : > { %v2961_v49 = vmax.f32 %v1898_v40, 0.0  ;;  %v1551_v27 = vadd.f32 %v9518_v54, %v9460_v61  ;;  %v2968_v37 = vmax.f32 %v1549_v42, 0.0  ;;  %v1904_v34 = vadd.f32 %v9520_v26, %v9462_v32 }
 0x202   : > { %v4209_v63 = vrot.slane %v4208_v28, 4  ;;  %v2970_v1 = vmax.f32 %v1902_v0, 0.0  ;;  %6998 = vmatmul.mubr.msk.bf16.gmra.mrb[200].mxu1 %vm993_vm1, %v12786_v50  ;;  %v4235_v35 = vrot.slane %v4234_v22, 4  ;;  %v3599_v59 = vmin.f32 %v2959_v62, 6.0 }
 0x203   : > { %v3601_v11 = vmin.f32 %v2961_v49, 6.0  ;;  %v2969_v17 = vmax.f32 %v1551_v27, 0.0  ;;  %7031 = vmatmul.mubr.msk.bf16.gmra.mrb[200].mxu0 %vm993_vm1, %v12786_v50  ;;  %2242 = vmatprep.mubr.bf16.mxu1 %v12729_v18  ;;  %v3608_v54 = vmin.f32 %v2968_v37, 6.0  ;;  %v2971_v45 = vmax.f32 %v1904_v34, 0.0 }
 0x204   : > { %v4210_v20 = vadd.f32 %v4209_v63, %v4208_v28  ;;  %v3610_v29 = vmin.f32 %v2970_v1, 6.0  ;;  %2595 = vmatprep.mubr.bf16.mxu0 %v12729_v18  ;;  %v4236_v12 = vadd.f32 %v4235_v35, %v4234_v22  ;;  %v4221_v26 = vadd.f32 %v4220_v55, %v3599_v59 }
 0x205   : > { %v4247_v53 = vadd.f32 %v4246_v44, %v3601_v11  ;;  %v3609_v31 = vmin.f32 %v2969_v17, 6.0  ;;  %v9670_v23 = vpop.f32.mrb[96].mxu1  ;;  %v9672_v40 = vpop.f32.mrb[96].mxu0  ;;  %v3611_v42 = vmin.f32 %v2971_v45, 6.0  ;;  %v1553_v19 = vadd.f32 %v9524_v30, %v9452_v36 }
 0x206   : > { %v4211_v6 = vrot.slane %v4210_v20, 2  ;;  %v1906_v28 = vadd.f32 %v9526_v51, %v9454_v47  ;;  %v9678_v0 = vpop.f32.mrb[97].mxu1  ;;  %v9680_v62 = vpop.f32.mrb[97].mxu0  ;;  %v4237_v22 = vrot.slane %v4236_v12, 2  ;;  %v4222_v55 = vrot.slane %v4221_v26, 4 }
 0x207   : > { %12787 = vst [vmem:[#allocation45_spill] sm:$0xff] %v9680_v62  ;;  %v4248_v44 = vrot.slane %v4247_v53, 4  ;;  %v1555_v49 = vadd.f32 %v9533_v52, %v9460_v61  ;;  %v9684_v27 = vpop.f32.mrb[98].mxu1  ;;  %v9686_v63 = vpop.f32.mrb[98].mxu0  ;;  %v2978_v1 = vmax.f32 %v1553_v19, 0.0  ;;  %v1908_v51 = vadd.f32 %v9535_v21, %v9462_v32  ;;  %v12789_v62 = vld [vmem:[#allocation21_spill] sm:$0xff] }
 0x208   : > { %12788 = vst [vmem:[#allocation46_spill] sm:$0xff] %v9684_v27  ;;  %v4212_v37 = vadd.f32 %v4211_v6, %v4210_v20  ;;  %v2980_v30 = vmax.f32 %v1906_v28, 0.0  ;;  %v9690_v34 = vpop.f32.mrb[99].mxu1  ;;  %v9692_v50 = vpop.f32.mrb[99].mxu0  ;;  %v4238_v35 = vadd.f32 %v4237_v22, %v4236_v12  ;;  %v4223_v59 = vadd.f32 %v4222_v55, %v4221_v26 }
 0x209   : > { %v4249_v11 = vadd.f32 %v4248_v44, %v4247_v53  ;;  %v2979_v17 = vmax.f32 %v1555_v49, 0.0  ;;  %v3618_v52 = vmin.f32 %v2978_v1, 6.0  ;;  %v2981_v27 = vmax.f32 %v1908_v51, 0.0 }
 0x20a   : > { %v4213_v45 = vrot.slane %v4212_v37, 1  ;;  %v3620_v10 = vmin.f32 %v2980_v30, 6.0  ;;  %6999 = vmatmul.mubr.msk.bf16.gmra.mrb[204].mxu1 %vm993_vm1, %v12789_v62  ;;  %v4239_v20 = vrot.slane %v4238_v35, 1  ;;  %v4224_v6 = vrot.slane %v4223_v59, 2 }
 0x20b   : > { %v4250_v19 = vrot.slane %v4249_v11, 2  ;;  %v3619_v28 = vmin.f32 %v2979_v17, 6.0  ;;  %7032 = vmatmul.mubr.msk.bf16.gmra.mrb[204].mxu0 %vm993_vm1, %v12789_v62  ;;  %2252 = vmatprep.mubr.bf16.mxu1 %v12729_v18  ;;  %v4332_v12 = vadd.f32 %v3618_v52, %v3608_v54  ;;  %v3621_v53 = vmin.f32 %v2981_v27, 6.0 }
 0x20c   : > { %v9699_v21 = vadd.f32 %v4213_v45, %v4212_v37  ;;  %v4358_v26 = vadd.f32 %v3620_v10, %v3610_v29  ;;  %2605 = vmatprep.mubr.bf16.mxu0 %v12729_v18  ;;  %v9702_v22 = vadd.f32 %v4239_v20, %v4238_v35  ;;  %v4225_v55 = vadd.f32 %v4224_v6, %v4223_v59 }
 0x20d   : > { %v4251_v44 = vadd.f32 %v4250_v19, %v4249_v11  ;;  %v4345_v49 = vadd.f32 %v3619_v28, %v3609_v31  ;;  %v9704_v1 = vpop.f32.mrb[100].mxu1  ;;  %v9706_v30 = vpop.f32.mrb[100].mxu0  ;;  %v4371_v51 = vadd.f32 %v3621_v53, %v3611_v42  ;;  %v1559_v62 = vadd.f32 %v9560_v16, %v9452_v36 }
 0x20e   : > { %v1912_v54 = vadd.f32 %v9562_v58, %v9454_v47  ;;  %v1561_v10 = vadd.f32 %v9564_v56, %v9460_v61  ;;  %v9714_v29 = vpop.f32.mrb[101].mxu1  ;;  %v9716_v27 = vpop.f32.mrb[101].mxu0  ;;  %v4226_v37 = vrot.slane %v4225_v55, 1  ;;  %v1914_v35 = vadd.f32 %v9566_v57, %v9462_v32 }
 0x20f   : > { %v4252_v31 = vrot.slane %v4251_v44, 1  ;;  %v1563_v42 = vadd.f32 %v9570_v24, %v9452_v36  ;;  %v9722_v59 = vpop.f32.mrb[102].mxu1  ;;  %v9724_v16 = vpop.f32.mrb[102].mxu0  ;;  %v2988_v58 = vmax.f32 %v1559_v62, 0.0  ;;  %v1916_v56 = vadd.f32 %v9572_v38, %v9454_v47  ;;  %v12791_v62 = vld [vmem:[#allocation23_spill] sm:$0xff] }
 0x210   : > { %12790 = vst [vmem:[#allocation47_spill] sm:$0xff] %v9724_v16  ;;  %v2990_v11 = vmax.f32 %v1912_v54, 0.0  ;;  %v2989_v17 = vmax.f32 %v1561_v10, 0.0  ;;  %v9728_v45 = vpop.f32.mrb[103].mxu1  ;;  %v9730_v52 = vpop.f32.mrb[103].mxu0  ;;  %v9732_v20 = vadd.f32 %v4226_v37, %v4225_v55  ;;  %v2991_v6 = vmax.f32 %v1914_v35, 0.0 }
 0x211   : > { %v9734_v57 = vadd.f32 %v4252_v31, %v4251_v44  ;;  %v2998_v24 = vmax.f32 %v1563_v42, 0.0  ;;  %v3628_v19 = vmin.f32 %v2988_v58, 6.0  ;;  %v3000_v16 = vmax.f32 %v1916_v56, 0.0 }
 0x212   : > { %v3630_v28 = vmin.f32 %v2990_v11, 6.0  ;;  %v3629_v53 = vmin.f32 %v2989_v17, 6.0  ;;  %7000 = vmatmul.mubr.msk.bf16.gmra.mrb[208].mxu1 %vm993_vm1, %v12791_v62  ;;  %v3631_v54 = vmin.f32 %v2991_v6, 6.0  ;;  %v1565_v38 = vadd.f32 %v9580_v48, %v9460_v61 }
 0x213   : > { %v3638_v10 = vmin.f32 %v2998_v24, 6.0  ;;  %v1918_v55 = vadd.f32 %v9582_v43, %v9462_v32  ;;  %7033 = vmatmul.mubr.msk.bf16.gmra.mrb[208].mxu0 %vm993_vm1, %v12791_v62  ;;  %2262 = vmatprep.mubr.bf16.mxu1 %v12729_v18  ;;  %v4333_v44 = vadd.f32 %v4332_v12, %v3628_v19  ;;  %v3640_v35 = vmin.f32 %v3000_v16, 6.0 }
 0x214   : > { %v4359_v37 = vadd.f32 %v4358_v26, %v3630_v28  ;;  %v4346_v31 = vadd.f32 %v4345_v49, %v3629_v53  ;;  %2615 = vmatprep.mubr.bf16.mxu0 %v12729_v18  ;;  %v4372_v42 = vadd.f32 %v4371_v51, %v3631_v54  ;;  %v2999_v58 = vmax.f32 %v1565_v38, 0.0 }
 0x215   : > { %v3001_v11 = vmax.f32 %v1918_v55, 0.0  ;;  %v1569_v48 = vadd.f32 %v9598_v13, %v9452_v36  ;;  %v9748_v17 = vpop.f32.mrb[104].mxu1  ;;  %v9750_v43 = vpop.f32.mrb[104].mxu0  ;;  %v4334_v56 = vadd.f32 %v4333_v44, %v3638_v10  ;;  %v1922_v12 = vadd.f32 %v9600_v4, %v9454_v47 }
 0x216   : > { %v4360_v6 = vadd.f32 %v4359_v37, %v3640_v35  ;;  %v1571_v26 = vadd.f32 %v9602_v5, %v9460_v61  ;;  %v9756_v49 = vpop.f32.mrb[105].mxu1  ;;  %v9758_v51 = vpop.f32.mrb[105].mxu0  ;;  %v3639_v16 = vmin.f32 %v2999_v58, 6.0  ;;  %v1924_v13 = vadd.f32 %v9604_v15, %v9462_v32 }
 0x217   : > { %v3641_v24 = vmin.f32 %v3001_v11, 6.0  ;;  %v3008_v19 = vmax.f32 %v1569_v48, 0.0  ;;  %v9762_v28 = vpop.f32.mrb[106].mxu1  ;;  %v9764_v53 = vpop.f32.mrb[106].mxu0  ;;  %v3010_v62 = vmax.f32 %v1922_v12, 0.0  ;;  %v1573_v4 = vadd.f32 %v9610_v41, %v9452_v36  ;;  %v12793_v12 = vld [vmem:[#allocation25_spill] sm:$0xff] }
 0x218   : > { %v3009_v54 = vmax.f32 %v1571_v26, 0.0  ;;  %v1926_v5 = vadd.f32 %v9612_v14, %v9454_v47  ;;  %v9770_v10 = vpop.f32.mrb[107].mxu1  ;;  %v9772_v38 = vpop.f32.mrb[107].mxu0  ;;  %v4347_v55 = vadd.f32 %v4346_v31, %v3639_v16  ;;  %v3011_v15 = vmax.f32 %v1924_v13, 0.0 }
 0x219   : > { %12792 = vst [vmem:[#allocation48_spill] sm:$0xff] %v9770_v10  ;;  %v4373_v44 = vadd.f32 %v4372_v42, %v3641_v24  ;;  %v3648_v37 = vmin.f32 %v3008_v19, 6.0  ;;  %v3650_v35 = vmin.f32 %v3010_v62, 6.0  ;;  %v3018_v11 = vmax.f32 %v1573_v4, 0.0 }
 0x21a   : > { %v3649_v58 = vmin.f32 %v3009_v54, 6.0  ;;  %v3020_v48 = vmax.f32 %v1926_v5, 0.0  ;;  %7001 = vmatmul.mubr.msk.bf16.gmra.mrb[212].mxu1 %vm993_vm1, %v12793_v12  ;;  %v3651_v41 = vmin.f32 %v3011_v15, 6.0  ;;  %v1575_v14 = vadd.f32 %v9618_v9, %v9460_v61 }
 0x21b   : > { %v4335_v26 = vadd.f32 %v4334_v56, %v3648_v37  ;;  %v1928_v10 = vadd.f32 %v9620_v7, %v9462_v32  ;;  %7034 = vmatmul.mubr.msk.bf16.gmra.mrb[212].mxu0 %vm993_vm1, %v12793_v12  ;;  %2272 = vmatprep.mubr.bf16.mxu1 %v12729_v18  ;;  %v4361_v31 = vadd.f32 %v4360_v6, %v3650_v35  ;;  %v3658_v16 = vmin.f32 %v3018_v11, 6.0 }
 0x21c   : > { %v4348_v42 = vadd.f32 %v4347_v55, %v3649_v58  ;;  %v3660_v24 = vmin.f32 %v3020_v48, 6.0  ;;  %2625 = vmatprep.mubr.bf16.mxu0 %v12729_v18  ;;  %v4374_v19 = vadd.f32 %v4373_v44, %v3651_v41  ;;  %v3019_v56 = vmax.f32 %v1575_v14, 0.0 }
 0x21d   : > { %v3021_v13 = vmax.f32 %v1928_v10, 0.0  ;;  %v1579_v9 = vadd.f32 %v9636_v8, %v9452_v36  ;;  %v9786_v62 = vpop.f32.mrb[108].mxu1  ;;  %v9788_v7 = vpop.f32.mrb[108].mxu0  ;;  %v4336_v54 = vadd.f32 %v4335_v26, %v3658_v16  ;;  %v1932_v6 = vadd.f32 %v9638_v46, %v9454_v47 }
 0x21e   : > { %v4362_v4 = vadd.f32 %v4361_v31, %v3660_v24  ;;  %v1581_v5 = vadd.f32 %v9640_v25, %v9460_v61  ;;  %v9794_v55 = vpop.f32.mrb[109].mxu1  ;;  %v9796_v44 = vpop.f32.mrb[109].mxu0  ;;  %v3659_v10 = vmin.f32 %v3019_v56, 6.0  ;;  %v1934_v8 = vadd.f32 %v9642_v3, %v9462_v32 }
 0x21f   : > { %v3661_v37 = vmin.f32 %v3021_v13, 6.0  ;;  %v3028_v15 = vmax.f32 %v1579_v9, 0.0  ;;  %v9800_v35 = vpop.f32.mrb[110].mxu1  ;;  %v9802_v58 = vpop.f32.mrb[110].mxu0  ;;  %v3030_v11 = vmax.f32 %v1932_v6, 0.0  ;;  %v1583_v46 = vadd.f32 %v9648_v39, %v9452_v36  ;;  %v12794_v9 = vld [vmem:[#allocation42_spill] sm:$0xff] }
 0x220   : > { %v3029_v48 = vmax.f32 %v1581_v5, 0.0  ;;  %v1936_v25 = vadd.f32 %v9650_v33, %v9454_v47  ;;  %v9808_v12 = vpop.f32.mrb[111].mxu1  ;;  %v9810_v26 = vpop.f32.mrb[111].mxu0  ;;  %v4349_v41 = vadd.f32 %v4348_v42, %v3659_v10  ;;  %v3031_v3 = vmax.f32 %v1934_v8, 0.0 }
 0x221   : > { %v4375_v14 = vadd.f32 %v4374_v19, %v3661_v37  ;;  %v3668_v31 = vmin.f32 %v3028_v15, 6.0  ;;  %v3670_v16 = vmin.f32 %v3030_v11, 6.0  ;;  %v3038_v56 = vmax.f32 %v1583_v46, 0.0 }
 0x222   : > { %v3669_v24 = vmin.f32 %v3029_v48, 6.0  ;;  %v3040_v13 = vmax.f32 %v1936_v25, 0.0  ;;  %7002 = vmatmul.mubr.msk.bf16.gmra.mrb[216].mxu1 %vm993_vm1, %v12794_v9  ;;  %v3671_v39 = vmin.f32 %v3031_v3, 6.0  ;;  %v1585_v33 = vadd.f32 %v9656_v60, %v9460_v61 }
 0x223   : > { %v4337_v6 = vadd.f32 %v4336_v54, %v3668_v31  ;;  %v1938_v5 = vadd.f32 %v9658_v2, %v9462_v32  ;;  %7035 = vmatmul.mubr.msk.bf16.gmra.mrb[216].mxu0 %vm993_vm1, %v12794_v9  ;;  %2282 = vmatprep.mubr.bf16.mxu1 %v12729_v18  ;;  %v4363_v42 = vadd.f32 %v4362_v4, %v3670_v16  ;;  %v3678_v10 = vmin.f32 %v3038_v56, 6.0 }
 0x224   : > { %v4350_v19 = vadd.f32 %v4349_v41, %v3669_v24  ;;  %v3680_v37 = vmin.f32 %v3040_v13, 6.0  ;;  %2635 = vmatprep.mubr.bf16.mxu0 %v12729_v18  ;;  %v4376_v15 = vadd.f32 %v4375_v14, %v3671_v39  ;;  %v3039_v54 = vmax.f32 %v1585_v33, 0.0 }
 0x225   : > { %v3041_v8 = vmax.f32 %v1938_v5, 0.0  ;;  %v1589_v60 = vadd.f32 %v9670_v23, %v9452_v36  ;;  %v9824_v11 = vpop.f32.mrb[112].mxu1  ;;  %v9826_v2 = vpop.f32.mrb[112].mxu0  ;;  %v4338_v48 = vadd.f32 %v4337_v6, %v3678_v10  ;;  %v1942_v4 = vadd.f32 %v9672_v40, %v9454_v47  ;;  %v12798_v23 = vld [vmem:[#allocation45_spill] sm:$0xff] }
 0x226   : > { %12795 = vst [vmem:[#allocation19_spill] sm:$0xff] %v9826_v2  ;;  %v4364_v46 = vadd.f32 %v4363_v42, %v3680_v37  ;;  %v1591_v25 = vadd.f32 %v9678_v0, %v9460_v61  ;;  %v9832_v41 = vpop.f32.mrb[113].mxu1  ;;  %v9834_v14 = vpop.f32.mrb[113].mxu0  ;;  %v3679_v31 = vmin.f32 %v3039_v54, 6.0  ;;  %v1944_v24 = vadd.f32 %v12798_v23, %v9462_v32 }
 0x227   : > { %12796 = vst [vmem:[#allocation21_spill] sm:$0xff] %v9832_v41  ;;  %12797 = vst [vmem:[#allocation23_spill] sm:$0xff] %v9834_v14  ;;  %v3681_v3 = vmin.f32 %v3041_v8, 6.0  ;;  %v3048_v16 = vmax.f32 %v1589_v60, 0.0  ;;  %v9838_v56 = vpop.f32.mrb[114].mxu1  ;;  %v9840_v13 = vpop.f32.mrb[114].mxu0 }
 0x228   : > { %12799 = vst [vmem:[#allocation25_spill] sm:$0xff] %v9838_v56  ;;  %12800 = vst [vmem:[#allocation42_spill] sm:$0xff] %v9840_v13  ;;  %v4339_v9 = vrot.slane %v4338_v48, 4  ;;  %v4365_v6 = vrot.slane %v4364_v46, 4  ;;  %v3050_v40 = vmax.f32 %v1942_v4, 0.0  ;;  %v3049_v39 = vmax.f32 %v1591_v25, 0.0 }
 0x229   : > { %v9842_v33 = vpop.f32.mrb[115].mxu1  ;;  %v9844_v0 = vpop.f32.mrb[115].mxu0  ;;  %v4351_v5 = vadd.f32 %v4350_v19, %v3679_v31  ;;  %v4377_v42 = vadd.f32 %v4376_v15, %v3681_v3  ;;  %v3688_v10 = vmin.f32 %v3048_v16, 6.0  ;;  %v3051_v37 = vmax.f32 %v1944_v24, 0.0  ;;  %v12803_v14 = vld [vmem:[#allocation16_spill] sm:$0xff]  ;;  %v12804_v4 = vld [vmem:[#allocation46_spill] sm:$0xff] }
 0x22a   : > { %12801 = vst [vmem:[#allocation45_spill] sm:$0xff] %v9842_v33  ;;  %12802 = vst [vmem:[#allocation49_spill] sm:$0xff] %v9844_v0  ;;  %v4340_v54 = vadd.f32 %v4339_v9, %v4338_v48  ;;  %v4366_v8 = vadd.f32 %v4365_v6, %v4364_v46  ;;  %v3690_v60 = vmin.f32 %v3050_v40, 6.0  ;;  %v3689_v23 = vmin.f32 %v3049_v39, 6.0  ;;  %7003 = vmatmul.mubr.msk.bf16.gmra.mrb[220].mxu1 %vm993_vm1, %v12803_v14  ;;  %v12811_v33 = vld [vmem:[#allocation27_spill] sm:$0xff] }
 0x22b   : > { %v4352_v13 = vrot.slane %v4351_v5, 4  ;;  %v4378_v56 = vrot.slane %v4377_v42, 4  ;;  %v3691_v41 = vmin.f32 %v3051_v37, 6.0  ;;  %v1593_v25 = vadd.f32 %v12804_v4, %v9452_v36  ;;  %7036 = vmatmul.mubr.msk.bf16.gmra.mrb[220].mxu0 %vm993_vm1, %v12803_v14  ;;  %2292 = vmatprep.mubr.bf16.mxu1 %v12729_v18 }
 0x22c   : > { %v4341_v19 = vrot.slane %v4340_v54, 2  ;;  %v4367_v15 = vrot.slane %v4366_v8, 2  ;;  %v1946_v48 = vadd.f32 %v9686_v63, %v9454_v47  ;;  %v1595_v46 = vadd.f32 %v9690_v34, %v9460_v61  ;;  %2645 = vmatprep.mubr.bf16.mxu0 %v12729_v18 }
 0x22d   : > { %v4353_v31 = vadd.f32 %v4352_v13, %v4351_v5  ;;  %v4379_v3 = vadd.f32 %v4378_v56, %v4377_v42  ;;  %v3058_v16 = vmax.f32 %v1593_v25, 0.0  ;;  %v1948_v24 = vadd.f32 %v9692_v50, %v9462_v32  ;;  %v9860_v9 = vpop.f32.mrb[116].mxu1  ;;  %v9862_v14 = vpop.f32.mrb[116].mxu0 }
 0x22e   : > { %12805 = vst [vmem:[#allocation16_spill] sm:$0xff] %v9860_v9  ;;  %12806 = vst [vmem:[#allocation46_spill] sm:$0xff] %v9862_v14  ;;  %v4342_v6 = vadd.f32 %v4341_v19, %v4340_v54  ;;  %v4368_v40 = vadd.f32 %v4367_v15, %v4366_v8  ;;  %v3060_v39 = vmax.f32 %v1946_v48, 0.0  ;;  %v3059_v37 = vmax.f32 %v1595_v46, 0.0  ;;  %v9864_v63 = vpop.f32.mrb[117].mxu1  ;;  %v9866_v4 = vpop.f32.mrb[117].mxu0 }
 0x22f   : > { %12807 = vst [vmem:[#allocation50_spill] sm:$0xff] %v9864_v63  ;;  %12808 = vst [vmem:[#allocation51_spill] sm:$0xff] %v9866_v4  ;;  %v4354_v34 = vrot.slane %v4353_v31, 2  ;;  %v4380_v0 = vrot.slane %v4379_v3, 2  ;;  %v3698_v13 = vmin.f32 %v3058_v16, 6.0  ;;  %v3061_v56 = vmax.f32 %v1948_v24, 0.0 }
 0x230   : > { %v9868_v5 = vpop.f32.mrb[118].mxu1  ;;  %v9870_v42 = vpop.f32.mrb[118].mxu0  ;;  %v4343_v50 = vrot.slane %v4342_v6, 1  ;;  %v4369_v25 = vrot.slane %v4368_v40, 1  ;;  %v3700_v9 = vmin.f32 %v3060_v39, 6.0  ;;  %v3699_v14 = vmin.f32 %v3059_v37, 6.0 }
 0x231   : > { %12809 = vst [vmem:[#allocation52_spill] sm:$0xff] %v9868_v5  ;;  %12810 = vst [vmem:[#allocation53_spill] sm:$0xff] %v9870_v42  ;;  %v9872_v54 = vpop.f32.mrb[119].mxu1  ;;  %v9874_v8 = vpop.f32.mrb[119].mxu0  ;;  %v4355_v19 = vadd.f32 %v4354_v34, %v4353_v31  ;;  %v4381_v15 = vadd.f32 %v4380_v0, %v4379_v3  ;;  %v4462_v48 = vadd.f32 %v3698_v13, %v3688_v10  ;;  %v3701_v46 = vmin.f32 %v3061_v56, 6.0 }
 0x232   : > { %v4344_v4 = vadd.f32 %v4343_v50, %v4342_v6  ;;  %v4370_v63 = vadd.f32 %v4369_v25, %v4368_v40  ;;  %v4488_v16 = vadd.f32 %v3700_v9, %v3690_v60  ;;  %v4475_v24 = vadd.f32 %v3699_v14, %v3689_v23  ;;  %7004 = vmatmul.mubr.msk.bf16.gmra.mrb[224].mxu1 %vm993_vm1, %v12811_v33  ;;  %v12812_v14 = vld [vmem:[#allocation47_spill] sm:$0xff] }
 0x233   : > { %v4356_v42 = vrot.slane %v4355_v19, 1  ;;  %v4382_v5 = vrot.slane %v4381_v15, 1  ;;  %v4501_v2 = vadd.f32 %v3701_v46, %v3691_v41  ;;  %v1599_v39 = vadd.f32 %v9704_v1, %v9452_v36  ;;  %7037 = vmatmul.mubr.msk.bf16.gmra.mrb[224].mxu0 %vm993_vm1, %v12811_v33  ;;  %2302 = vmatprep.mubr.bf16.mxu1 %v12729_v18 }
 0x234   : > { %v9885_v0 = vsel %vm5296_vm4, %v4344_v4, %v9699_v21  ;;  %v9889_v10 = vsel %vm5296_vm4, %v4370_v63, %v9702_v22  ;;  %v1952_v60 = vadd.f32 %v9706_v30, %v9454_v47  ;;  %v1601_v41 = vadd.f32 %v9714_v29, %v9460_v61  ;;  %2655 = vmatprep.mubr.bf16.mxu0 %v12729_v18 }
 0x235   : > { %v4357_v1 = vadd.f32 %v4356_v42, %v4355_v19  ;;  %v4383_v33 = vadd.f32 %v4382_v5, %v4381_v15  ;;  %v3068_v23 = vmax.f32 %v1599_v39, 0.0  ;;  %v1954_v31 = vadd.f32 %v9716_v27, %v9462_v32  ;;  %v9898_v21 = vpop.f32.mrb[120].mxu1  ;;  %v9900_v3 = vpop.f32.mrb[120].mxu0 }
 0x236   : > { %v3070_v22 = vmax.f32 %v1952_v60, 0.0  ;;  %v3069_v9 = vmax.f32 %v1601_v41, 0.0  ;;  %v1603_v30 = vadd.f32 %v9722_v59, %v9452_v36  ;;  %v1956_v29 = vadd.f32 %v12812_v14, %v9454_v47  ;;  %v9906_v6 = vpop.f32.mrb[121].mxu1  ;;  %v9908_v40 = vpop.f32.mrb[121].mxu0 }
 0x237   : > { %v9912_v37 = vsel %vm5296_vm4, %v4357_v1, %v9732_v20  ;;  %v9916_v27 = vsel %vm5296_vm4, %v4383_v33, %v9734_v57  ;;  %v3708_v63 = vmin.f32 %v3068_v23, 6.0  ;;  %v3071_v4 = vmax.f32 %v1954_v31, 0.0  ;;  %v9918_v34 = vpop.f32.mrb[122].mxu1  ;;  %v9920_v59 = vpop.f32.mrb[122].mxu0  ;;  %v12813_v1 = vld [vmem:[#allocation29_spill] sm:$0xff] }
 0x238   : > { %v3710_v13 = vmin.f32 %v3070_v22, 6.0  ;;  %v3709_v56 = vmin.f32 %v3069_v9, 6.0  ;;  %v3078_v5 = vmax.f32 %v1603_v30, 0.0  ;;  %v3080_v42 = vmax.f32 %v1956_v29, 0.0  ;;  %v9922_v50 = vpop.f32.mrb[123].mxu1  ;;  %v9924_v25 = vpop.f32.mrb[123].mxu0 }
 0x239   : > { %v4463_v20 = vadd.f32 %v4462_v48, %v3708_v63  ;;  %v3711_v19 = vmin.f32 %v3071_v4, 6.0  ;;  %v1605_v57 = vadd.f32 %v9728_v45, %v9460_v61  ;;  %v1958_v15 = vadd.f32 %v9730_v52, %v9462_v32 }
 0x23a   : > { %v4489_v46 = vadd.f32 %v4488_v16, %v3710_v13  ;;  %v4476_v39 = vadd.f32 %v4475_v24, %v3709_v56  ;;  %v3718_v60 = vmin.f32 %v3078_v5, 6.0  ;;  %v3720_v41 = vmin.f32 %v3080_v42, 6.0  ;;  %7005 = vmatmul.mubr.msk.bf16.gmra.mrb[228].mxu1 %vm993_vm1, %v12813_v1 }
 0x23b   : > { %v4502_v33 = vadd.f32 %v4501_v2, %v3711_v19  ;;  %v3079_v23 = vmax.f32 %v1605_v57, 0.0  ;;  %v3081_v31 = vmax.f32 %v1958_v15, 0.0  ;;  %v1609_v48 = vadd.f32 %v9748_v17, %v9452_v36  ;;  %7038 = vmatmul.mubr.msk.bf16.gmra.mrb[228].mxu0 %vm993_vm1, %v12813_v1  ;;  %2312 = vmatprep.mubr.bf16.mxu1 %v12729_v18 }
 0x23c   : > { %v4464_v45 = vadd.f32 %v4463_v20, %v3718_v60  ;;  %v4490_v52 = vadd.f32 %v4489_v46, %v3720_v41  ;;  %v1962_v16 = vadd.f32 %v9750_v43, %v9454_v47  ;;  %v1611_v24 = vadd.f32 %v9756_v49, %v9460_v61  ;;  %2665 = vmatprep.mubr.bf16.mxu0 %v12729_v18 }
 0x23d   : > { %v3719_v2 = vmin.f32 %v3079_v23, 6.0  ;;  %v3721_v22 = vmin.f32 %v3081_v31, 6.0  ;;  %v3088_v9 = vmax.f32 %v1609_v48, 0.0  ;;  %v1964_v17 = vadd.f32 %v9758_v51, %v9462_v32  ;;  %v9944_v30 = vpop.f32.mrb[124].mxu1  ;;  %v9946_v14 = vpop.f32.mrb[124].mxu0  ;;  %v12814_v23 = vld [vmem:[#allocation48_spill] sm:$0xff] }
 0x23e   : > { %v3090_v29 = vmax.f32 %v1962_v16, 0.0  ;;  %v3089_v63 = vmax.f32 %v1611_v24, 0.0  ;;  %v1613_v43 = vadd.f32 %v9762_v28, %v9452_v36  ;;  %v1966_v49 = vadd.f32 %v9764_v53, %v9454_v47  ;;  %v9952_v4 = vpop.f32.mrb[125].mxu1  ;;  %v9954_v13 = vpop.f32.mrb[125].mxu0 }
 0x23f   : > { %v4477_v56 = vadd.f32 %v4476_v39, %v3719_v2  ;;  %v4503_v5 = vadd.f32 %v4502_v33, %v3721_v22  ;;  %v3728_v42 = vmin.f32 %v3088_v9, 6.0  ;;  %v3091_v51 = vmax.f32 %v1964_v17, 0.0  ;;  %v9956_v20 = vpop.f32.mrb[126].mxu1  ;;  %v9958_v19 = vpop.f32.mrb[126].mxu0  ;;  %v12815_v2 = vld [vmem:[#allocation31_spill] sm:$0xff] }
 0x240   : > { %v3730_v57 = vmin.f32 %v3090_v29, 6.0  ;;  %v3729_v15 = vmin.f32 %v3089_v63, 6.0  ;;  %v3098_v46 = vmax.f32 %v1613_v43, 0.0  ;;  %v3100_v60 = vmax.f32 %v1966_v49, 0.0  ;;  %v9960_v28 = vpop.f32.mrb[127].mxu1  ;;  %v9962_v41 = vpop.f32.mrb[127].mxu0 }
 0x241   : > { %v4465_v53 = vadd.f32 %v4464_v45, %v3728_v42  ;;  %v3731_v1 = vmin.f32 %v3091_v51, 6.0  ;;  %v1615_v39 = vadd.f32 %v12814_v23, %v9460_v61  ;;  %v1968_v33 = vadd.f32 %v9772_v38, %v9462_v32 }
 0x242   : > { %v4491_v31 = vadd.f32 %v4490_v52, %v3730_v57  ;;  %v4478_v48 = vadd.f32 %v4477_v56, %v3729_v15  ;;  %v3738_v16 = vmin.f32 %v3098_v46, 6.0  ;;  %v3740_v24 = vmin.f32 %v3100_v60, 6.0  ;;  %7006 = vmatmul.mubr.msk.bf16.gmra.mrb[232].mxu1 %vm993_vm1, %v12815_v2 }
 0x243   : > { %v4504_v22 = vadd.f32 %v4503_v5, %v3731_v1  ;;  %v3099_v9 = vmax.f32 %v1615_v39, 0.0  ;;  %v3101_v17 = vmax.f32 %v1968_v33, 0.0  ;;  %v1619_v45 = vadd.f32 %v9786_v62, %v9452_v36  ;;  %7039 = vmatmul.mubr.msk.bf16.gmra.mrb[232].mxu0 %vm993_vm1, %v12815_v2  ;;  %2322 = vmatprep.mubr.bf16.mxu1 %v12729_v18 }
 0x244   : > { %v4466_v29 = vadd.f32 %v4465_v53, %v3738_v16  ;;  %v4492_v38 = vadd.f32 %v4491_v31, %v3740_v24  ;;  %v1972_v52 = vadd.f32 %v9788_v7, %v9454_v47  ;;  %v1621_v63 = vadd.f32 %v9794_v55, %v9460_v61  ;;  %2675 = vmatprep.mubr.bf16.mxu0 %v12729_v18 }
 0x245   : > { %v3739_v43 = vmin.f32 %v3099_v9, 6.0  ;;  %v3741_v49 = vmin.f32 %v3101_v17, 6.0  ;;  %v3108_v56 = vmax.f32 %v1619_v45, 0.0  ;;  %v1974_v62 = vadd.f32 %v9796_v44, %v9462_v32  ;;  %v9982_v5 = vpop.f32.mrb[128].mxu1  ;;  %v9988_v15 = vpop.f32.mrb[128].mxu0 }
 0x246   : > { %v3110_v42 = vmax.f32 %v1972_v52, 0.0  ;;  %v3109_v51 = vmax.f32 %v1621_v63, 0.0  ;;  %v1623_v57 = vadd.f32 %v9800_v35, %v9452_v36  ;;  %v1976_v7 = vadd.f32 %v9802_v58, %v9454_v47  ;;  %v9990_v55 = vpop.f32.mrb[129].mxu1  ;;  %v9992_v23 = vpop.f32.mrb[129].mxu0 }
 0x247   : > { %v4479_v46 = vadd.f32 %v4478_v48, %v3739_v43  ;;  %v4505_v60 = vadd.f32 %v4504_v22, %v3741_v49  ;;  %v3748_v53 = vmin.f32 %v3108_v56, 6.0  ;;  %v3111_v1 = vmax.f32 %v1974_v62, 0.0  ;;  %v9994_v44 = vpop.f32.mrb[130].mxu1  ;;  %v9996_v35 = vpop.f32.mrb[130].mxu0  ;;  %v12819_v43 = vld [vmem:[#allocation33_spill] sm:$0xff] }
 0x248   : > { %v3750_v39 = vmin.f32 %v3110_v42, 6.0  ;;  %v3749_v33 = vmin.f32 %v3109_v51, 6.0  ;;  %v3118_v31 = vmax.f32 %v1623_v57, 0.0  ;;  %v3120_v16 = vmax.f32 %v1976_v7, 0.0  ;;  %12816 = vst [vmem:[#allocation27_spill] sm:$0xff] %v9996_v35  ;;  %v9998_v24 = vpop.f32.mrb[131].mxu1 }
 0x249   : > { %12817 = vst [vmem:[#allocation47_spill] sm:$0xff] %v9998_v24  ;;  %v4467_v58 = vadd.f32 %v4466_v29, %v3748_v53  ;;  %v3751_v2 = vmin.f32 %v3111_v1, 6.0  ;;  %v1625_v48 = vadd.f32 %v9808_v12, %v9460_v61  ;;  %v1978_v22 = vadd.f32 %v9810_v26, %v9462_v32  ;;  %v10004_v9 = vpop.f32.mrb[131].mxu0  ;;  %v12821_v51 = vld [vmem:[#allocation21_spill] sm:$0xff] }
 0x24a   : > { %12818 = vst [vmem:[#allocation29_spill] sm:$0xff] %v10004_v9  ;;  %v4493_v17 = vadd.f32 %v4492_v38, %v3750_v39  ;;  %v4480_v45 = vadd.f32 %v4479_v46, %v3749_v33  ;;  %v3758_v52 = vmin.f32 %v3118_v31, 6.0  ;;  %v3760_v63 = vmin.f32 %v3120_v16, 6.0  ;;  %7007 = vmatmul.mubr.msk.bf16.gmra.mrb[236].mxu1 %vm993_vm1, %v12819_v43  ;;  %v12820_v38 = vld [vmem:[#allocation19_spill] sm:$0xff] }
 0x24b   : > { %v4506_v49 = vadd.f32 %v4505_v60, %v3751_v2  ;;  %v3119_v56 = vmax.f32 %v1625_v48, 0.0  ;;  %v3121_v62 = vmax.f32 %v1978_v22, 0.0  ;;  %v1629_v29 = vadd.f32 %v9824_v11, %v9452_v36  ;;  %7040 = vmatmul.mubr.msk.bf16.gmra.mrb[236].mxu0 %vm993_vm1, %v12819_v43  ;;  %2332 = vmatprep.mubr.bf16.mxu1 %v12729_v18  ;;  %v12822_v11 = vld [vmem:[#allocation23_spill] sm:$0xff] }
 0x24c   : > { %v4468_v12 = vadd.f32 %v4467_v58, %v3758_v52  ;;  %v4494_v26 = vadd.f32 %v4493_v17, %v3760_v63  ;;  %v1982_v42 = vadd.f32 %v12820_v38, %v9454_v47  ;;  %v1631_v57 = vadd.f32 %v12821_v51, %v9460_v61  ;;  %2685 = vmatprep.mubr.bf16.mxu0 %v12729_v18 }
 0x24d   : > { %v3759_v7 = vmin.f32 %v3119_v56, 6.0  ;;  %v3761_v46 = vmin.f32 %v3121_v62, 6.0  ;;  %v3128_v60 = vmax.f32 %v1629_v29, 0.0  ;;  %v1984_v53 = vadd.f32 %v12822_v11, %v9462_v32  ;;  %v10020_v1 = vpop.f32.mrb[132].mxu1  ;;  %v10022_v58 = vpop.f32.mrb[132].mxu0 }
 0x24e   : > { %12823 = vst [vmem:[#allocation48_spill] sm:$0xff] %v10020_v1  ;;  %v4469_v39 = vrot.slane %v4468_v12, 4  ;;  %v4495_v33 = vrot.slane %v4494_v26, 4  ;;  %v3130_v31 = vmax.f32 %v1982_v42, 0.0  ;;  %v3129_v16 = vmax.f32 %v1631_v57, 0.0  ;;  %12824 = vst [vmem:[#allocation31_spill] sm:$0xff] %v10022_v58 }
 0x24f   : > { %v10024_v2 = vpop.f32.mrb[133].mxu1  ;;  %v4481_v48 = vadd.f32 %v4480_v45, %v3759_v7  ;;  %v4507_v22 = vadd.f32 %v4506_v49, %v3761_v46  ;;  %v3768_v17 = vmin.f32 %v3128_v60, 6.0  ;;  %v3131_v52 = vmax.f32 %v1984_v53, 0.0  ;;  %v10026_v63 = vpop.f32.mrb[133].mxu0  ;;  %v12830_v45 = vld [vmem:[#allocation25_spill] sm:$0xff]  ;;  %v12832_v53 = vld [vmem:[#allocation42_spill] sm:$0xff] }
 0x250   : > { %12825 = vst [vmem:[#allocation33_spill] sm:$0xff] %v10024_v2  ;;  %12826 = vst [vmem:[#allocation19_spill] sm:$0xff] %v10026_v63  ;;  %v10028_v43 = vpop.f32.mrb[134].mxu1  ;;  %v4470_v56 = vadd.f32 %v4469_v39, %v4468_v12  ;;  %v4496_v62 = vadd.f32 %v4495_v33, %v4494_v26  ;;  %v3770_v29 = vmin.f32 %v3130_v31, 6.0  ;;  %v3769_v38 = vmin.f32 %v3129_v16, 6.0  ;;  %v10030_v51 = vpop.f32.mrb[134].mxu0 }
 0x251   : > { %12827 = vst [vmem:[#allocation21_spill] sm:$0xff] %v10028_v43  ;;  %12828 = vst [vmem:[#allocation23_spill] sm:$0xff] %v10030_v51  ;;  %v10032_v42 = vpop.f32.mrb[135].mxu1  ;;  %v4482_v57 = vrot.slane %v4481_v48, 4  ;;  %v4508_v11 = vrot.slane %v4507_v22, 4  ;;  %v3771_v58 = vmin.f32 %v3131_v52, 6.0  ;;  %v1633_v49 = vadd.f32 %v12830_v45, %v9452_v36 }
 0x252   : > { %12829 = vst [vmem:[#allocation54_spill] sm:$0xff] %v10032_v42  ;;  %v10036_v7 = vpop.f32.mrb[135].mxu0  ;;  %v4471_v46 = vrot.slane %v4470_v56, 2  ;;  %v4497_v60 = vrot.slane %v4496_v62, 2  ;;  %v1986_v12 = vadd.f32 %v12832_v53, %v9454_v47  ;;  %v12833_v26 = vld [vmem:[#allocation45_spill] sm:$0xff]  ;;  %v12834_v33 = vld [vmem:[#allocation35_spill] sm:$0xff] }
 0x253   : > { %12831 = vst [vmem:[#allocation25_spill] sm:$0xff] %v10036_v7  ;;  %v1635_v39 = vadd.f32 %v12833_v26, %v9460_v61  ;;  %7008 = vmatmul.mubr.msk.bf16.gmra.mrb[240].mxu1 %vm993_vm1, %v12834_v33  ;;  %v4483_v31 = vadd.f32 %v4482_v57, %v4481_v48  ;;  %v4509_v16 = vadd.f32 %v4508_v11, %v4507_v22  ;;  %v3138_v42 = vmax.f32 %v1633_v49, 0.0  ;;  %v12835_v52 = vld [vmem:[#allocation49_spill] sm:$0xff] }
 0x254   : > { %v1988_v51 = vadd.f32 %v12835_v52, %v9462_v32  ;;  %7041 = vmatmul.mubr.msk.bf16.gmra.mrb[240].mxu0 %vm993_vm1, %v12834_v33  ;;  %2342 = vmatprep.mubr.bf16.mxu1 %v12729_v18  ;;  %v4472_v45 = vadd.f32 %v4471_v46, %v4470_v56  ;;  %v4498_v7 = vadd.f32 %v4497_v60, %v4496_v62  ;;  %v3140_v53 = vmax.f32 %v1986_v12, 0.0 }
 0x255   : > { %v3139_v43 = vmax.f32 %v1635_v39, 0.0  ;;  %2695 = vmatprep.mubr.bf16.mxu0 %v12729_v18  ;;  %v4484_v26 = vrot.slane %v4483_v31, 2  ;;  %v4510_v63 = vrot.slane %v4509_v16, 2  ;;  %v3778_v2 = vmin.f32 %v3138_v42, 6.0  ;;  %v10050_v22 = vpop.f32.mrb[136].mxu1  ;;  %v10052_v1 = vpop.f32.mrb[136].mxu0 }
 0x256   : > { %v3141_v48 = vmax.f32 %v1988_v51, 0.0  ;;  %12836 = vst [vmem:[#allocation42_spill] sm:$0xff] %v10050_v22  ;;  %v4473_v57 = vrot.slane %v4472_v45, 1  ;;  %v4499_v11 = vrot.slane %v4498_v7, 1  ;;  %v3780_v49 = vmin.f32 %v3140_v53, 6.0  ;;  %12837 = vst [vmem:[#allocation45_spill] sm:$0xff] %v10052_v1 }
 0x257   : > { %v3779_v52 = vmin.f32 %v3139_v43, 6.0  ;;  %v10054_v33 = vpop.f32.mrb[137].mxu1  ;;  %v4485_v56 = vadd.f32 %v4484_v26, %v4483_v31  ;;  %v4511_v62 = vadd.f32 %v4510_v63, %v4509_v16  ;;  %v4592_v46 = vadd.f32 %v3778_v2, %v3768_v17  ;;  %v10056_v12 = vpop.f32.mrb[137].mxu0  ;;  %v12838_v31 = vld [vmem:[#allocation16_spill] sm:$0xff]  ;;  %v12840_v16 = vld [vmem:[#allocation50_spill] sm:$0xff] }
 0x258   : > { %v3781_v60 = vmin.f32 %v3141_v48, 6.0  ;;  %v10058_v39 = vpop.f32.mrb[138].mxu1  ;;  %v4474_v42 = vadd.f32 %v4473_v57, %v4472_v45  ;;  %v4500_v51 = vadd.f32 %v4499_v11, %v4498_v7  ;;  %v4618_v9 = vadd.f32 %v3780_v49, %v3770_v29  ;;  %v10060_v24 = vpop.f32.mrb[138].mxu0  ;;  %v12842_v11 = vld [vmem:[#allocation51_spill] sm:$0xff] }
 0x259   : > { %v4605_v22 = vadd.f32 %v3779_v52, %v3769_v38  ;;  %v10062_v53 = vpop.f32.mrb[139].mxu1  ;;  %v4486_v43 = vrot.slane %v4485_v56, 1  ;;  %v4512_v1 = vrot.slane %v4511_v62, 1  ;;  %v1639_v63 = vadd.f32 %v12838_v31, %v9452_v36  ;;  %v10066_v2 = vpop.f32.mrb[139].mxu0  ;;  %v12839_v38 = vld [vmem:[#allocation46_spill] sm:$0xff]  ;;  %v12843_v52 = vld [vmem:[#allocation52_spill] sm:$0xff] }
 0x25a   : > { %v4631_v35 = vadd.f32 %v3781_v60, %v3771_v58  ;;  %v10070_v17 = vsel %vm5298_vm5, %v4474_v42, %v9885_v0  ;;  %v10074_v29 = vsel %vm5298_vm5, %v4500_v51, %v9889_v10  ;;  %v1992_v7 = vadd.f32 %v12839_v38, %v9454_v47  ;;  %v12841_v58 = vld [vmem:[#allocation37_spill] sm:$0xff] }
 0x25b   : > { %v1641_v45 = vadd.f32 %v12840_v16, %v9460_v61  ;;  %7009 = vmatmul.mubr.msk.bf16.gmra.mrb[244].mxu1 %vm993_vm1, %v12841_v58  ;;  %v4487_v26 = vadd.f32 %v4486_v43, %v4485_v56  ;;  %v4513_v48 = vadd.f32 %v4512_v1, %v4511_v62  ;;  %v3148_v57 = vmax.f32 %v1639_v63, 0.0  ;;  %v12844_v42 = vld [vmem:[#allocation53_spill] sm:$0xff] }
 0x25c   : > { %v1994_v0 = vadd.f32 %v12842_v11, %v9462_v32  ;;  %7042 = vmatmul.mubr.msk.bf16.gmra.mrb[244].mxu0 %vm993_vm1, %v12841_v58  ;;  %2352 = vmatprep.mubr.bf16.mxu1 %v12729_v18  ;;  %v3150_v10 = vmax.f32 %v1992_v7, 0.0  ;;  %v1643_v60 = vadd.f32 %v12843_v52, %v9452_v36  ;;  %v1996_v51 = vadd.f32 %v12844_v42, %v9454_v47 }
 0x25d   : > { %v3149_v49 = vmax.f32 %v1641_v45, 0.0  ;;  %2705 = vmatprep.mubr.bf16.mxu0 %v12729_v18  ;;  %v10094_v1 = vsel %vm5298_vm5, %v4487_v26, %v9912_v37  ;;  %v10098_v56 = vsel %vm5298_vm5, %v4513_v48, %v9916_v27  ;;  %v3788_v62 = vmin.f32 %v3148_v57, 6.0  ;;  %v10100_v31 = vpop.f32.mrb[140].mxu1  ;;  %v10102_v45 = vpop.f32.mrb[140].mxu0 }
 0x25e   : > { %v3151_v43 = vmax.f32 %v1994_v0, 0.0  ;;  %v3790_v63 = vmin.f32 %v3150_v10, 6.0  ;;  %v3158_v7 = vmax.f32 %v1643_v60, 0.0  ;;  %v3160_v16 = vmax.f32 %v1996_v51, 0.0  ;;  %v10104_v58 = vpop.f32.mrb[141].mxu1  ;;  %v10110_v26 = vpop.f32.mrb[141].mxu0 }
 0x25f   : > { %v3789_v38 = vmin.f32 %v3149_v49, 6.0  ;;  %v4593_v11 = vadd.f32 %v4592_v46, %v3788_v62  ;;  %v1645_v37 = vadd.f32 %v9872_v54, %v9460_v61  ;;  %v1998_v27 = vadd.f32 %v9874_v8, %v9462_v32  ;;  %12845 = vst [vmem:[#allocation35_spill] sm:$0xff] %v10110_v26  ;;  %v10112_v48 = vpop.f32.mrb[142].mxu1  ;;  %v10114_v60 = vpop.f32.mrb[142].mxu0 }
 0x260   : > { %v3791_v52 = vmin.f32 %v3151_v43, 6.0  ;;  %v4619_v57 = vadd.f32 %v4618_v9, %v3790_v63  ;;  %v3798_v10 = vmin.f32 %v3158_v7, 6.0  ;;  %v3800_v49 = vmin.f32 %v3160_v16, 6.0  ;;  %v10116_v42 = vpop.f32.mrb[143].mxu1  ;;  %v10120_v43 = vpop.f32.mrb[143].mxu0  ;;  %v12846_v63 = vld [vmem:[#allocation39_spill] sm:$0xff] }
 0x261   : > { %v4606_v0 = vadd.f32 %v4605_v22, %v3789_v38  ;;  %v3159_v51 = vmax.f32 %v1645_v37, 0.0  ;;  %v3161_v62 = vmax.f32 %v1998_v27, 0.0  ;;  %v1649_v54 = vadd.f32 %v9898_v21, %v9452_v36 }
 0x262   : > { %v4632_v46 = vadd.f32 %v4631_v35, %v3791_v52  ;;  %v4594_v8 = vadd.f32 %v4593_v11, %v3798_v10  ;;  %v4620_v26 = vadd.f32 %v4619_v57, %v3800_v49  ;;  %v2002_v9 = vadd.f32 %v9900_v3, %v9454_v47 }
 0x263   : > { %v1651_v22 = vadd.f32 %v9906_v6, %v9460_v61  ;;  %7010 = vmatmul.mubr.msk.bf16.gmra.mrb[248].mxu1 %vm993_vm1, %v12846_v63  ;;  %v3799_v38 = vmin.f32 %v3159_v51, 6.0  ;;  %v3801_v35 = vmin.f32 %v3161_v62, 6.0  ;;  %v3168_v7 = vmax.f32 %v1649_v54, 0.0 }
 0x264   : > { %v2004_v16 = vadd.f32 %v9908_v40, %v9462_v32  ;;  %7043 = vmatmul.mubr.msk.bf16.gmra.mrb[248].mxu0 %vm993_vm1, %v12846_v63  ;;  %2362 = vmatprep.mubr.bf16.mxu1 %v12729_v18  ;;  %v3170_v21 = vmax.f32 %v2002_v9, 0.0  ;;  %v1653_v3 = vadd.f32 %v9918_v34, %v9452_v36  ;;  %v2006_v6 = vadd.f32 %v9920_v59, %v9454_v47 }
 0x265   : > { %v3169_v11 = vmax.f32 %v1651_v22, 0.0  ;;  %2715 = vmatprep.mubr.bf16.mxu0 %v12729_v18  ;;  %v4607_v52 = vadd.f32 %v4606_v0, %v3799_v38  ;;  %v4633_v37 = vadd.f32 %v4632_v46, %v3801_v35  ;;  %v3808_v27 = vmin.f32 %v3168_v7, 6.0  ;;  %v10138_v40 = vpop.f32.mrb[144].mxu1  ;;  %v10140_v54 = vpop.f32.mrb[144].mxu0 }
 0x266   : > { %v3171_v57 = vmax.f32 %v2004_v16, 0.0  ;;  %v3810_v10 = vmin.f32 %v3170_v21, 6.0  ;;  %v3178_v51 = vmax.f32 %v1653_v3, 0.0  ;;  %v3180_v62 = vmax.f32 %v2006_v6, 0.0  ;;  %v10142_v9 = vpop.f32.mrb[145].mxu1  ;;  %v10148_v46 = vpop.f32.mrb[145].mxu0 }
 0x267   : > { %v3809_v49 = vmin.f32 %v3169_v11, 6.0  ;;  %v4595_v34 = vadd.f32 %v4594_v8, %v3808_v27  ;;  %v1655_v59 = vadd.f32 %v9922_v50, %v9460_v61  ;;  %v2008_v0 = vadd.f32 %v9924_v25, %v9462_v32  ;;  %v10150_v63 = vpop.f32.mrb[146].mxu1  ;;  %v10152_v21 = vpop.f32.mrb[146].mxu0 }
 0x268   : > { %v3811_v22 = vmin.f32 %v3171_v57, 6.0  ;;  %v4621_v38 = vadd.f32 %v4620_v26, %v3810_v10  ;;  %v3818_v7 = vmin.f32 %v3178_v51, 6.0  ;;  %v3820_v16 = vmin.f32 %v3180_v62, 6.0  ;;  %v10154_v11 = vpop.f32.mrb[147].mxu1  ;;  %v10158_v27 = vpop.f32.mrb[147].mxu0  ;;  %v12847_v10 = vld [vmem:[#allocation18_spill] sm:$0xff] }
 0x269   : > { %v4608_v35 = vadd.f32 %v4607_v52, %v3809_v49  ;;  %v3179_v3 = vmax.f32 %v1655_v59, 0.0  ;;  %v3181_v6 = vmax.f32 %v2008_v0, 0.0  ;;  %v1659_v50 = vadd.f32 %v9944_v30, %v9452_v36 }
 0x26a   : > { %v4634_v8 = vadd.f32 %v4633_v37, %v3811_v22  ;;  %v4596_v25 = vadd.f32 %v4595_v34, %v3818_v7  ;;  %v4622_v57 = vadd.f32 %v4621_v38, %v3820_v16  ;;  %v2012_v26 = vadd.f32 %v9946_v14, %v9454_v47 }
 0x26b   : > { %v1661_v52 = vadd.f32 %v9952_v4, %v9460_v61  ;;  %7011 = vmatmul.mubr.msk.bf16.gmra.mrb[252].mxu1 %vm993_vm1, %v12847_v10  ;;  %v3819_v49 = vmin.f32 %v3179_v3, 6.0  ;;  %v3821_v37 = vmin.f32 %v3181_v6, 6.0  ;;  %v3188_v51 = vmax.f32 %v1659_v50, 0.0 }
 0x26c   : > { %v2014_v62 = vadd.f32 %v9954_v13, %v9462_v32  ;;  %7044 = vmatmul.mubr.msk.bf16.gmra.mrb[252].mxu0 %vm993_vm1, %v12847_v10  ;;  %2372 = vmatprep.mubr.bf16.mxu1 %v12729_v18  ;;  %v3190_v30 = vmax.f32 %v2012_v26, 0.0  ;;  %v1663_v14 = vadd.f32 %v9956_v20, %v9452_v36  ;;  %v2016_v4 = vadd.f32 %v9958_v19, %v9454_v47 }
 0x26d   : > { %v3189_v34 = vmax.f32 %v1661_v52, 0.0  ;;  %2725 = vmatprep.mubr.bf16.mxu0 %v12729_v18  ;;  %v4609_v22 = vadd.f32 %v4608_v35, %v3819_v49  ;;  %v4635_v59 = vadd.f32 %v4634_v8, %v3821_v37  ;;  %v3828_v0 = vmin.f32 %v3188_v51, 6.0  ;;  %v10176_v13 = vpop.f32.mrb[148].mxu1  ;;  %v10178_v50 = vpop.f32.mrb[148].mxu0 }
 0x26e   : > { %v3191_v38 = vmax.f32 %v2014_v62, 0.0  ;;  %v3830_v7 = vmin.f32 %v3190_v30, 6.0  ;;  %v3198_v3 = vmax.f32 %v1663_v14, 0.0  ;;  %v3200_v6 = vmax.f32 %v2016_v4, 0.0  ;;  %v10180_v26 = vpop.f32.mrb[149].mxu1  ;;  %v10186_v8 = vpop.f32.mrb[149].mxu0 }
 0x26f   : > { %v3829_v16 = vmin.f32 %v3189_v34, 6.0  ;;  %12848 = vst [vmem:[#allocation49_spill] sm:$0xff] %v10180_v26  ;;  %v4597_v20 = vadd.f32 %v4596_v25, %v3828_v0  ;;  %v1665_v19 = vadd.f32 %v9960_v28, %v9460_v61  ;;  %v2018_v35 = vadd.f32 %v9962_v41, %v9462_v32  ;;  %12849 = vst [vmem:[#allocation16_spill] sm:$0xff] %v10186_v8  ;;  %v10188_v10 = vpop.f32.mrb[150].mxu1  ;;  %v10190_v30 = vpop.f32.mrb[150].mxu0 }
 0x270   : > { %v3831_v52 = vmin.f32 %v3191_v38, 6.0  ;;  %12850 = vst [vmem:[#allocation46_spill] sm:$0xff] %v10188_v10  ;;  %v4623_v49 = vadd.f32 %v4622_v57, %v3830_v7  ;;  %v3838_v51 = vmin.f32 %v3198_v3, 6.0  ;;  %v3840_v62 = vmin.f32 %v3200_v6, 6.0  ;;  %12851 = vst [vmem:[#allocation50_spill] sm:$0xff] %v10190_v30  ;;  %v10192_v34 = vpop.f32.mrb[151].mxu1 }
 0x271   : > { %v4610_v37 = vadd.f32 %v4609_v22, %v3829_v16  ;;  %12852 = vst [vmem:[#allocation37_spill] sm:$0xff] %v10192_v34  ;;  %v3199_v14 = vmax.f32 %v1665_v19, 0.0  ;;  %v3201_v4 = vmax.f32 %v2018_v35, 0.0  ;;  %v1669_v28 = vadd.f32 %v9982_v5, %v9452_v36  ;;  %v10196_v0 = vpop.f32.mrb[151].mxu0  ;;  %v12854_v7 = vld [vmem:[#allocation13_spill] sm:$0xff] }
 0x272   : > { %v4636_v25 = vadd.f32 %v4635_v59, %v3831_v52  ;;  %12853 = vst [vmem:[#allocation51_spill] sm:$0xff] %v10196_v0  ;;  %v4598_v41 = vadd.f32 %v4597_v20, %v3838_v51  ;;  %v4624_v38 = vadd.f32 %v4623_v49, %v3840_v62  ;;  %v2022_v57 = vadd.f32 %v9988_v15, %v9454_v47 }
 0x273   : > { %v1671_v22 = vadd.f32 %v9990_v55, %v9460_v61  ;;  %7012 = vmatmul.mubr.msk.bf16.gmra.mrb[0].mxu1 %vm993_vm1, %v12854_v7  ;;  %v3839_v16 = vmin.f32 %v3199_v14, 6.0  ;;  %v3841_v59 = vmin.f32 %v3201_v4, 6.0  ;;  %v3208_v3 = vmax.f32 %v1669_v28, 0.0 }
 0x274   : > { %v2024_v6 = vadd.f32 %v9992_v23, %v9462_v32  ;;  %7045 = vmatmul.mubr.msk.bf16.gmra.mrb[0].mxu0 %vm993_vm1, %v12854_v7  ;;  %2382 = vmatprep.mubr.bf16.mxu1 %v12729_v18  ;;  %v4599_v5 = vrot.slane %v4598_v41, 4  ;;  %v4625_v20 = vrot.slane %v4624_v38, 4  ;;  %v3210_v15 = vmax.f32 %v2022_v57, 0.0 }
 0x275   : > { %v3209_v52 = vmax.f32 %v1671_v22, 0.0  ;;  %2735 = vmatprep.mubr.bf16.mxu0 %v12729_v18  ;;  %v4611_v55 = vadd.f32 %v4610_v37, %v3839_v16  ;;  %v4637_v19 = vadd.f32 %v4636_v25, %v3841_v59  ;;  %v3848_v35 = vmin.f32 %v3208_v3, 6.0  ;;  %v10210_v51 = vpop.f32.mrb[152].mxu1  ;;  %v10212_v28 = vpop.f32.mrb[152].mxu0  ;;  %v12861_v3 = vld [vmem:[#allocation47_spill] sm:$0xff] }
 0x276   : > { %v3211_v49 = vmax.f32 %v2024_v6, 0.0  ;;  %12855 = vst [vmem:[#allocation52_spill] sm:$0xff] %v10210_v51  ;;  %v4600_v62 = vadd.f32 %v4599_v5, %v4598_v41  ;;  %v4626_v14 = vadd.f32 %v4625_v20, %v4624_v38  ;;  %v3850_v23 = vmin.f32 %v3210_v15, 6.0  ;;  %12856 = vst [vmem:[#allocation53_spill] sm:$0xff] %v10212_v28  ;;  %v10214_v7 = vpop.f32.mrb[153].mxu1  ;;  %v10218_v37 = vpop.f32.mrb[153].mxu0 }
 0x277   : > { %v3849_v4 = vmin.f32 %v3209_v52, 6.0  ;;  %12857 = vst [vmem:[#allocation39_spill] sm:$0xff] %v10214_v7  ;;  %v4612_v0 = vrot.slane %v4611_v55, 4  ;;  %v4638_v34 = vrot.slane %v4637_v19, 4  ;;  %v1673_v22 = vadd.f32 %v9994_v44, %v9452_v36  ;;  %12858 = vst [vmem:[#allocation18_spill] sm:$0xff] %v10218_v37  ;;  %v10220_v25 = vpop.f32.mrb[154].mxu1 }
 0x278   : > { %v3851_v57 = vmin.f32 %v3211_v49, 6.0  ;;  %12859 = vst [vmem:[#allocation13_spill] sm:$0xff] %v10220_v25  ;;  %v4601_v16 = vrot.slane %v4600_v62, 2  ;;  %v4627_v59 = vrot.slane %v4626_v14, 2  ;;  %v12860_v41 = vld [vmem:[#allocation27_spill] sm:$0xff]  ;;  %v1675_v6 = vadd.f32 %v12861_v3, %v9460_v61  ;;  %v10226_v5 = vpop.f32.mrb[154].mxu0 }
 0x279   : > { %v2026_v38 = vadd.f32 %v12860_v41, %v9454_v47  ;;  %12862 = vst [vmem:[#allocation27_spill] sm:$0xff] %v10226_v5  ;;  %v10228_v20 = vpop.f32.mrb[155].mxu1  ;;  %v4613_v15 = vadd.f32 %v4612_v0, %v4611_v55  ;;  %v4639_v52 = vadd.f32 %v4638_v34, %v4637_v19  ;;  %v3218_v49 = vmax.f32 %v1673_v22, 0.0  ;;  %v12864_v44 = vld [vmem:[#allocation29_spill] sm:$0xff]  ;;  %v10232_v7 = vpop.f32.mrb[155].mxu0  ;;  %v12866_v41 = vld [vmem:[#allocation15_spill] sm:$0xff] }
 0x27a   : > { %12863 = vst [vmem:[#allocation47_spill] sm:$0xff] %v10228_v20  ;;  %v2028_v37 = vadd.f32 %v12864_v44, %v9462_v32  ;;  %12865 = vst [vmem:[#allocation29_spill] sm:$0xff] %v10232_v7  ;;  %v4602_v25 = vadd.f32 %v4601_v16, %v4600_v62  ;;  %v4628_v28 = vadd.f32 %v4627_v59, %v4626_v14  ;;  %v3219_v30 = vmax.f32 %v1675_v6, 0.0 }
 0x27b   : > { %v3220_v51 = vmax.f32 %v2026_v38, 0.0  ;;  %7013 = vmatmul.mubr.msk.bf16.gmra.mrb[4].mxu1 %vm993_vm1, %v12866_v41  ;;  %v4614_v3 = vrot.slane %v4613_v15, 2  ;;  %v4640_v10 = vrot.slane %v4639_v52, 2  ;;  %v3858_v5 = vmin.f32 %v3218_v49, 6.0 }
 0x27c   : > { %v3221_v8 = vmax.f32 %v2028_v37, 0.0  ;;  %7046 = vmatmul.mubr.msk.bf16.gmra.mrb[4].mxu0 %vm993_vm1, %v12866_v41  ;;  %2392 = vmatprep.mubr.bf16.mxu1 %v12729_v18  ;;  %v4603_v34 = vrot.slane %v4602_v25, 1  ;;  %v4629_v0 = vrot.slane %v4628_v28, 1  ;;  %v3859_v19 = vmin.f32 %v3219_v30, 6.0  ;;  %v12867_v30 = vld [vmem:[#allocation48_spill] sm:$0xff] }
 0x27d   : > { %v3860_v55 = vmin.f32 %v3220_v51, 6.0  ;;  %2745 = vmatprep.mubr.bf16.mxu0 %v12729_v18  ;;  %v4615_v62 = vadd.f32 %v4614_v3, %v4613_v15  ;;  %v4641_v14 = vadd.f32 %v4640_v10, %v4639_v52  ;;  %v4722_v22 = vadd.f32 %v3858_v5, %v3848_v35  ;;  %v10240_v59 = vpop.f32.mrb[156].mxu1  ;;  %v10242_v44 = vpop.f32.mrb[156].mxu0 }
 0x27e   : > { %v3861_v16 = vmin.f32 %v3221_v8, 6.0  ;;  %v4604_v38 = vadd.f32 %v4603_v34, %v4602_v25  ;;  %v4630_v6 = vadd.f32 %v4629_v0, %v4628_v28  ;;  %v4735_v49 = vadd.f32 %v3859_v19, %v3849_v4  ;;  %v10244_v41 = vpop.f32.mrb[157].mxu1  ;;  %v10248_v15 = vpop.f32.mrb[157].mxu0  ;;  %v12869_v28 = vld [vmem:[#allocation33_spill] sm:$0xff] }
 0x27f   : > { %v4748_v37 = vadd.f32 %v3860_v55, %v3850_v23  ;;  %v4616_v7 = vrot.slane %v4615_v62, 1  ;;  %v4642_v20 = vrot.slane %v4641_v14, 1  ;;  %v1679_v26 = vadd.f32 %v12867_v30, %v9452_v36  ;;  %v10250_v10 = vpop.f32.mrb[158].mxu1  ;;  %v12868_v23 = vld [vmem:[#allocation31_spill] sm:$0xff]  ;;  %v10264_v25 = vpop.f32.mrb[158].mxu0 }
 0x280   : > { %v4761_v51 = vadd.f32 %v3861_v16, %v3851_v57  ;;  %v10254_v8 = vsel %vm5300_vm6, %v4604_v38, %v10070_v17  ;;  %v10258_v35 = vsel %vm5300_vm6, %v4630_v6, %v10074_v29  ;;  %v2032_v4 = vadd.f32 %v12868_v23, %v9454_v47  ;;  %v10266_v5 = vpop.f32.mrb[159].mxu1  ;;  %v12871_v17 = vld [vmem:[#allocation19_spill] sm:$0xff]  ;;  %v10270_v55 = vpop.f32.mrb[159].mxu0  ;;  %v12873_v16 = vld [vmem:[#allocation21_spill] sm:$0xff]  ;;  %v12875_v23 = vld [vmem:[#allocation20_spill] sm:$0xff] }
 0x281   : > { %v1681_v57 = vadd.f32 %v12869_v28, %v9460_v61  ;;  %12870 = vst [vmem:[#allocation15_spill] sm:$0xff] %v10266_v5  ;;  %v4617_v52 = vadd.f32 %v4616_v7, %v4615_v62  ;;  %v4643_v3 = vadd.f32 %v4642_v20, %v4641_v14  ;;  %v3228_v34 = vmax.f32 %v1679_v26, 0.0  ;;  %12872 = vst [vmem:[#allocation48_spill] sm:$0xff] %v10270_v55  ;;  %v12874_v6 = vld [vmem:[#allocation23_spill] sm:$0xff] }
 0x282   : > { %v2034_v0 = vadd.f32 %v12871_v17, %v9462_v32  ;;  %v3230_v29 = vmax.f32 %v2032_v4, 0.0  ;;  %v1683_v38 = vadd.f32 %v12873_v16, %v9452_v36  ;;  %v2036_v30 = vadd.f32 %v12874_v6, %v9454_v47 }
 0x283   : > { %v3229_v19 = vmax.f32 %v1681_v57, 0.0  ;;  %7014 = vmatmul.mubr.msk.bf16.gmra.mrb[8].mxu1 %vm993_vm1, %v12875_v23  ;;  %v10280_v7 = vsel %vm5300_vm6, %v4617_v52, %v10094_v1  ;;  %v10284_v26 = vsel %vm5300_vm6, %v4643_v3, %v10098_v56  ;;  %v3868_v20 = vmin.f32 %v3228_v34, 6.0  ;;  %v12876_v52 = vld [vmem:[#allocation54_spill] sm:$0xff]  ;;  %v12877_v56 = vld [vmem:[#allocation25_spill] sm:$0xff] }
 0x284   : > { %v3231_v62 = vmax.f32 %v2034_v0, 0.0  ;;  %7047 = vmatmul.mubr.msk.bf16.gmra.mrb[8].mxu0 %vm993_vm1, %v12875_v23  ;;  %2402 = vmatprep.mubr.bf16.mxu1 %v12729_v18  ;;  %v3870_v14 = vmin.f32 %v3230_v29, 6.0  ;;  %v3238_v28 = vmax.f32 %v1683_v38, 0.0  ;;  %v3240_v57 = vmax.f32 %v2036_v30, 0.0 }
 0x285   : > { %v3869_v4 = vmin.f32 %v3229_v19, 6.0  ;;  %2755 = vmatprep.mubr.bf16.mxu0 %v12729_v18  ;;  %v4723_v17 = vadd.f32 %v4722_v22, %v3868_v20  ;;  %v1685_v16 = vadd.f32 %v12876_v52, %v9460_v61  ;;  %v2038_v3 = vadd.f32 %v12877_v56, %v9462_v32  ;;  %v10294_v34 = vpop.f32.mrb[160].mxu1  ;;  %v10296_v29 = vpop.f32.mrb[160].mxu0  ;;  %v12879_v20 = vld [vmem:[#allocation42_spill] sm:$0xff] }
 0x286   : > { %v3871_v1 = vmin.f32 %v3231_v62, 6.0  ;;  %12878 = vst [vmem:[#allocation31_spill] sm:$0xff] %v10294_v34  ;;  %v4749_v0 = vadd.f32 %v4748_v37, %v3870_v14  ;;  %v3878_v23 = vmin.f32 %v3238_v28, 6.0  ;;  %v3880_v55 = vmin.f32 %v3240_v57, 6.0  ;;  %v10298_v19 = vpop.f32.mrb[161].mxu1  ;;  %v10302_v52 = vpop.f32.mrb[161].mxu0 }
 0x287   : > { %v4736_v6 = vadd.f32 %v4735_v49, %v3869_v4  ;;  %v3239_v30 = vmax.f32 %v1685_v16, 0.0  ;;  %v3241_v22 = vmax.f32 %v2038_v3, 0.0  ;;  %v1689_v62 = vadd.f32 %v12879_v20, %v9452_v36  ;;  %v10304_v5 = vpop.f32.mrb[162].mxu1  ;;  %v12880_v37 = vld [vmem:[#allocation45_spill] sm:$0xff]  ;;  %v10310_v4 = vpop.f32.mrb[162].mxu0 }
 0x288   : > { %v4762_v38 = vadd.f32 %v4761_v51, %v3871_v1  ;;  %v4724_v56 = vadd.f32 %v4723_v17, %v3878_v23  ;;  %v4750_v34 = vadd.f32 %v4749_v0, %v3880_v55  ;;  %v2042_v49 = vadd.f32 %v12880_v37, %v9454_v47  ;;  %v10312_v51 = vpop.f32.mrb[163].mxu1  ;;  %v10316_v3 = vpop.f32.mrb[163].mxu0  ;;  %v12882_v23 = vld [vmem:[#allocation22_spill] sm:$0xff] }
 0x289   : > { %v1691_v14 = vadd.f32 %v10054_v33, %v9460_v61  ;;  %v3879_v28 = vmin.f32 %v3239_v30, 6.0  ;;  %v3881_v57 = vmin.f32 %v3241_v22, 6.0  ;;  %v3248_v1 = vmax.f32 %v1689_v62, 0.0  ;;  %12881 = vst [vmem:[#allocation33_spill] sm:$0xff] %v10316_v3 }
 0x28a   : > { %v2044_v16 = vadd.f32 %v10056_v12, %v9462_v32  ;;  %v3250_v17 = vmax.f32 %v2042_v49, 0.0  ;;  %v1693_v0 = vadd.f32 %v10058_v39, %v9452_v36  ;;  %v2046_v33 = vadd.f32 %v10060_v24, %v9454_v47 }
 0x28b   : > { %v3249_v55 = vmax.f32 %v1691_v14, 0.0  ;;  %7015 = vmatmul.mubr.msk.bf16.gmra.mrb[12].mxu1 %vm993_vm1, %v12882_v23  ;;  %v4737_v20 = vadd.f32 %v4736_v6, %v3879_v28  ;;  %v4763_v30 = vadd.f32 %v4762_v38, %v3881_v57  ;;  %v3888_v22 = vmin.f32 %v3248_v1, 6.0 }
 0x28c   : > { %v3251_v62 = vmax.f32 %v2044_v16, 0.0  ;;  %7048 = vmatmul.mubr.msk.bf16.gmra.mrb[12].mxu0 %vm993_vm1, %v12882_v23  ;;  %2412 = vmatprep.mubr.bf16.mxu1 %v12729_v18  ;;  %v3890_v12 = vmin.f32 %v3250_v17, 6.0  ;;  %v3258_v49 = vmax.f32 %v1693_v0, 0.0  ;;  %v3260_v14 = vmax.f32 %v2046_v33, 0.0 }
 0x28d   : > { %v3889_v37 = vmin.f32 %v3249_v55, 6.0  ;;  %2765 = vmatprep.mubr.bf16.mxu0 %v12729_v18  ;;  %v4725_v39 = vadd.f32 %v4724_v56, %v3888_v22  ;;  %v1695_v3 = vadd.f32 %v10062_v53, %v9460_v61  ;;  %v2048_v6 = vadd.f32 %v10066_v2, %v9462_v32  ;;  %v10332_v38 = vpop.f32.mrb[164].mxu1  ;;  %v10334_v17 = vpop.f32.mrb[164].mxu0 }
 0x28e   : > { %v3891_v24 = vmin.f32 %v3251_v62, 6.0  ;;  %v4751_v28 = vadd.f32 %v4750_v34, %v3890_v12  ;;  %v3898_v1 = vmin.f32 %v3258_v49, 6.0  ;;  %v3900_v16 = vmin.f32 %v3260_v14, 6.0  ;;  %v10336_v55 = vpop.f32.mrb[165].mxu1  ;;  %v10340_v53 = vpop.f32.mrb[165].mxu0 }
 0x28f   : > { %v4738_v57 = vadd.f32 %v4737_v20, %v3889_v37  ;;  %v3259_v33 = vmax.f32 %v1695_v3, 0.0  ;;  %v3261_v56 = vmax.f32 %v2048_v6, 0.0  ;;  %v1699_v23 = vadd.f32 %v10100_v31, %v9452_v36  ;;  %v10342_v22 = vpop.f32.mrb[166].mxu1  ;;  %v10348_v12 = vpop.f32.mrb[166].mxu0  ;;  %v12883_v31 = vld [vmem:[#allocation35_spill] sm:$0xff] }
 0x290   : > { %v4764_v0 = vadd.f32 %v4763_v30, %v3891_v24  ;;  %v4726_v2 = vadd.f32 %v4725_v39, %v3898_v1  ;;  %v4752_v62 = vadd.f32 %v4751_v28, %v3900_v16  ;;  %v2052_v34 = vadd.f32 %v10102_v45, %v9454_v47  ;;  %v10350_v30 = vpop.f32.mrb[167].mxu1  ;;  %v10354_v24 = vpop.f32.mrb[167].mxu0  ;;  %v12885_v28 = vld [vmem:[#allocation24_spill] sm:$0xff] }
 0x291   : > { %v1701_v20 = vadd.f32 %v10104_v58, %v9460_v61  ;;  %v3899_v3 = vmin.f32 %v3259_v33, 6.0  ;;  %v3901_v37 = vmin.f32 %v3261_v56, 6.0  ;;  %v3268_v49 = vmax.f32 %v1699_v23, 0.0  ;;  %12884 = vst [vmem:[#allocation19_spill] sm:$0xff] %v10354_v24 }
 0x292   : > { %v2054_v14 = vadd.f32 %v12883_v31, %v9462_v32  ;;  %v3270_v39 = vmax.f32 %v2052_v34, 0.0  ;;  %v1703_v45 = vadd.f32 %v10112_v48, %v9452_v36  ;;  %v2056_v58 = vadd.f32 %v10114_v60, %v9454_v47 }
 0x293   : > { %v3269_v6 = vmax.f32 %v1701_v20, 0.0  ;;  %7016 = vmatmul.mubr.msk.bf16.gmra.mrb[16].mxu1 %vm993_vm1, %v12885_v28  ;;  %v4739_v1 = vadd.f32 %v4738_v57, %v3899_v3  ;;  %v4765_v16 = vadd.f32 %v4764_v0, %v3901_v37  ;;  %v3908_v33 = vmin.f32 %v3268_v49, 6.0 }
 0x294   : > { %v3271_v56 = vmax.f32 %v2054_v14, 0.0  ;;  %7049 = vmatmul.mubr.msk.bf16.gmra.mrb[16].mxu0 %vm993_vm1, %v12885_v28  ;;  %2422 = vmatprep.mubr.bf16.mxu1 %v12729_v18  ;;  %v3910_v23 = vmin.f32 %v3270_v39, 6.0  ;;  %v3278_v20 = vmax.f32 %v1703_v45, 0.0  ;;  %v3280_v31 = vmax.f32 %v2056_v58, 0.0 }
 0x295   : > { %v3909_v34 = vmin.f32 %v3269_v6, 6.0  ;;  %2775 = vmatprep.mubr.bf16.mxu0 %v12729_v18  ;;  %v4727_v48 = vadd.f32 %v4726_v2, %v3908_v33  ;;  %v1705_v24 = vadd.f32 %v10116_v42, %v9460_v61  ;;  %v2058_v57 = vadd.f32 %v10120_v43, %v9462_v32  ;;  %v10370_v0 = vpop.f32.mrb[168].mxu1  ;;  %v10372_v39 = vpop.f32.mrb[168].mxu0 }
 0x296   : > { %v3911_v60 = vmin.f32 %v3271_v56, 6.0  ;;  %v4753_v3 = vadd.f32 %v4752_v62, %v3910_v23  ;;  %v3918_v49 = vmin.f32 %v3278_v20, 6.0  ;;  %v3920_v14 = vmin.f32 %v3280_v31, 6.0  ;;  %v10374_v6 = vpop.f32.mrb[169].mxu1  ;;  %v10378_v42 = vpop.f32.mrb[169].mxu0 }
 0x297   : > { %v4740_v37 = vadd.f32 %v4739_v1, %v3909_v34  ;;  %v3279_v58 = vmax.f32 %v1705_v24, 0.0  ;;  %v3281_v2 = vmax.f32 %v2058_v57, 0.0  ;;  %v1709_v28 = vadd.f32 %v10138_v40, %v9452_v36  ;;  %12886 = vst [vmem:[#allocation21_spill] sm:$0xff] %v10378_v42  ;;  %v10380_v33 = vpop.f32.mrb[170].mxu1  ;;  %v10386_v23 = vpop.f32.mrb[170].mxu0  ;;  %v12897_v42 = vld [vmem:[#allocation43_spill] sm:$0xff] }
 0x298   : > { %v4766_v45 = vadd.f32 %v4765_v16, %v3911_v60  ;;  %12887 = vst [vmem:[#allocation23_spill] sm:$0xff] %v10380_v33  ;;  %v4728_v43 = vadd.f32 %v4727_v48, %v3918_v49  ;;  %v4754_v56 = vadd.f32 %v4753_v3, %v3920_v14  ;;  %v2062_v62 = vadd.f32 %v10140_v54, %v9454_v47  ;;  %v10388_v16 = vpop.f32.mrb[171].mxu1  ;;  %v10392_v31 = vpop.f32.mrb[171].mxu0  ;;  %v12891_v54 = vld [vmem:[#allocation26_spill] sm:$0xff] }
 0x299   : > { %v1711_v1 = vadd.f32 %v10142_v9, %v9460_v61  ;;  %12888 = vst [vmem:[#allocation20_spill] sm:$0xff] %v10386_v23  ;;  %12889 = vst [vmem:[#allocation54_spill] sm:$0xff] %v10388_v16  ;;  %v3919_v24 = vmin.f32 %v3279_v58, 6.0  ;;  %v3921_v34 = vmin.f32 %v3281_v2, 6.0  ;;  %v3288_v20 = vmax.f32 %v1709_v28, 0.0 }
 0x29a   : > { %v2064_v40 = vadd.f32 %v10148_v46, %v9462_v32  ;;  %12890 = vst [vmem:[#allocation25_spill] sm:$0xff] %v10392_v31  ;;  %v4729_v48 = vrot.slane %v4728_v43, 4  ;;  %v4755_v60 = vrot.slane %v4754_v56, 4  ;;  %v3290_v57 = vmax.f32 %v2062_v62, 0.0 }
 0x29b   : > { %v3289_v3 = vmax.f32 %v1711_v1, 0.0  ;;  %7017 = vmatmul.mubr.msk.bf16.gmra.mrb[20].mxu1 %vm993_vm1, %v12891_v54  ;;  %v4741_v9 = vadd.f32 %v4740_v37, %v3919_v24  ;;  %v4767_v49 = vadd.f32 %v4766_v45, %v3921_v34  ;;  %v3928_v14 = vmin.f32 %v3288_v20, 6.0 }
 0x29c   : > { %v3291_v23 = vmax.f32 %v2064_v40, 0.0  ;;  %7050 = vmatmul.mubr.msk.bf16.gmra.mrb[20].mxu0 %vm993_vm1, %v12891_v54  ;;  %2432 = vmatprep.mubr.bf16.mxu1 %v12729_v18  ;;  %v4730_v58 = vadd.f32 %v4729_v48, %v4728_v43  ;;  %v4756_v46 = vadd.f32 %v4755_v60, %v4754_v56  ;;  %v3930_v2 = vmin.f32 %v3290_v57, 6.0 }
 0x29d   : > { %v3929_v28 = vmin.f32 %v3289_v3, 6.0  ;;  %2785 = vmatprep.mubr.bf16.mxu0 %v12729_v18  ;;  %v4742_v62 = vrot.slane %v4741_v9, 4  ;;  %v4768_v1 = vrot.slane %v4767_v49, 4  ;;  %v1713_v37 = vadd.f32 %v10150_v63, %v9452_v36  ;;  %v10402_v45 = vpop.f32.mrb[172].mxu1  ;;  %v10408_v56 = vpop.f32.mrb[172].mxu0 }
 0x29e   : > { %v3931_v31 = vmin.f32 %v3291_v23, 6.0  ;;  %12892 = vst [vmem:[#allocation42_spill] sm:$0xff] %v10402_v45  ;;  %v4731_v24 = vrot.slane %v4730_v58, 2  ;;  %v4757_v34 = vrot.slane %v4756_v46, 2  ;;  %v2066_v20 = vadd.f32 %v10152_v21, %v9454_v47  ;;  %12893 = vst [vmem:[#allocation45_spill] sm:$0xff] %v10408_v56  ;;  %v10410_v40 = vpop.f32.mrb[173].mxu1 }
 0x29f   : > { %v1715_v43 = vadd.f32 %v10154_v11, %v9460_v61  ;;  %12894 = vst [vmem:[#allocation22_spill] sm:$0xff] %v10410_v40  ;;  %v4743_v48 = vadd.f32 %v4742_v62, %v4741_v9  ;;  %v4769_v60 = vadd.f32 %v4768_v1, %v4767_v49  ;;  %v3298_v23 = vmax.f32 %v1713_v37, 0.0  ;;  %v10414_v57 = vpop.f32.mrb[173].mxu0  ;;  %v10416_v3 = vpop.f32.mrb[174].mxu1 }
 0x2a0   : > { %v2068_v63 = vadd.f32 %v10158_v27, %v9462_v32  ;;  %12895 = vst [vmem:[#allocation35_spill] sm:$0xff] %v10414_v57  ;;  %v4732_v54 = vadd.f32 %v4731_v24, %v4730_v58  ;;  %v4758_v45 = vadd.f32 %v4757_v34, %v4756_v46  ;;  %v3300_v21 = vmax.f32 %v2066_v20, 0.0  ;;  %v10418_v33 = vpop.f32.mrb[174].mxu0  ;;  %v10420_v11 = vpop.f32.mrb[175].mxu1 }
 0x2a1   : > { %v3299_v16 = vmax.f32 %v1715_v43, 0.0  ;;  %v4744_v56 = vrot.slane %v4743_v48, 2  ;;  %v4770_v40 = vrot.slane %v4769_v60, 2  ;;  %v3938_v9 = vmin.f32 %v3298_v23, 6.0  ;;  %v10422_v62 = vpop.f32.mrb[175].mxu0 }
 0x2a2   : > { %v3301_v49 = vmax.f32 %v2068_v63, 0.0  ;;  %12896 = vst [vmem:[#allocation24_spill] sm:$0xff] %v10422_v62  ;;  %v4733_v1 = vrot.slane %v4732_v54, 1  ;;  %v4759_v27 = vrot.slane %v4758_v45, 1  ;;  %v3940_v37 = vmin.f32 %v3300_v21, 6.0 }
 0x2a3   : > { %v3939_v57 = vmin.f32 %v3299_v16, 6.0  ;;  %7018 = vmatmul.mubr.msk.bf16.gmra.mrb[24].mxu1 %vm993_vm1, %v12897_v42  ;;  %v4745_v58 = vadd.f32 %v4744_v56, %v4743_v48  ;;  %v4771_v46 = vadd.f32 %v4770_v40, %v4769_v60  ;;  %v4852_v24 = vadd.f32 %v3938_v9, %v3928_v14 }
 0x2a4   : > { %v3941_v34 = vmin.f32 %v3301_v49, 6.0  ;;  %7051 = vmatmul.mubr.msk.bf16.gmra.mrb[24].mxu0 %vm993_vm1, %v12897_v42  ;;  %2442 = vmatprep.mubr.bf16.mxu1 %v12729_v18  ;;  %v4734_v20 = vadd.f32 %v4733_v1, %v4732_v54  ;;  %v4760_v43 = vadd.f32 %v4759_v27, %v4758_v45  ;;  %v4878_v23 = vadd.f32 %v3940_v37, %v3930_v2  ;;  %v12903_v37 = vld [vmem:[#allocation50_spill] sm:$0xff] }
 0x2a5   : > { %v4865_v63 = vadd.f32 %v3939_v57, %v3929_v28  ;;  %2795 = vmatprep.mubr.bf16.mxu0 %v12729_v18  ;;  %v4746_v21 = vrot.slane %v4745_v58, 1  ;;  %v4772_v16 = vrot.slane %v4771_v46, 1  ;;  %v1719_v56 = vadd.f32 %v10176_v13, %v9452_v36  ;;  %v10432_v40 = vpop.f32.mrb[176].mxu1  ;;  %v12898_v28 = vld [vmem:[#allocation49_spill] sm:$0xff] }
 0x2a6   : > { %v4891_v62 = vadd.f32 %v3941_v34, %v3931_v31  ;;  %v10436_v14 = vsel %vm5302_vm7, %v4734_v20, %v10254_v8  ;;  %v10440_v42 = vsel %vm5302_vm7, %v4760_v43, %v10258_v35  ;;  %v2072_v2 = vadd.f32 %v10178_v50, %v9454_v47  ;;  %v10446_v31 = vpop.f32.mrb[176].mxu0  ;;  %v10448_v48 = vpop.f32.mrb[177].mxu1  ;;  %v12899_v8 = vld [vmem:[#allocation16_spill] sm:$0xff]  ;;  %v12902_v50 = vld [vmem:[#allocation46_spill] sm:$0xff] }
 0x2a7   : > { %v1721_v45 = vadd.f32 %v12898_v28, %v9460_v61  ;;  %v4747_v13 = vadd.f32 %v4746_v21, %v4745_v58  ;;  %v4773_v60 = vadd.f32 %v4772_v16, %v4771_v46  ;;  %v3308_v57 = vmax.f32 %v1719_v56, 0.0  ;;  %v10452_v9 = vpop.f32.mrb[177].mxu0  ;;  %v10454_v35 = vpop.f32.mrb[178].mxu1 }
 0x2a8   : > { %v2074_v54 = vadd.f32 %v12899_v8, %v9462_v32  ;;  %12900 = vst [vmem:[#allocation26_spill] sm:$0xff] %v10452_v9  ;;  %12901 = vst [vmem:[#allocation43_spill] sm:$0xff] %v10454_v35  ;;  %v3310_v49 = vmax.f32 %v2072_v2, 0.0  ;;  %v1723_v27 = vadd.f32 %v12902_v50, %v9452_v36  ;;  %v2076_v34 = vadd.f32 %v12903_v37, %v9454_v47  ;;  %v10460_v20 = vpop.f32.mrb[178].mxu0  ;;  %v10462_v58 = vpop.f32.mrb[179].mxu1  ;;  %v12907_v50 = vld [vmem:[#allocation17_spill] sm:$0xff] }
 0x2a9   : > { %v3309_v1 = vmax.f32 %v1721_v45, 0.0  ;;  %12904 = vst [vmem:[#allocation49_spill] sm:$0xff] %v10460_v20  ;;  %12905 = vst [vmem:[#allocation16_spill] sm:$0xff] %v10462_v58  ;;  %v10466_v46 = vsel %vm5302_vm7, %v4747_v13, %v10280_v7  ;;  %v10470_v43 = vsel %vm5302_vm7, %v4773_v60, %v10284_v26  ;;  %v3948_v21 = vmin.f32 %v3308_v57, 6.0  ;;  %v10472_v56 = vpop.f32.mrb[179].mxu0  ;;  %v12908_v7 = vld [vmem:[#allocation37_spill] sm:$0xff] }
 0x2aa   : > { %v3311_v16 = vmax.f32 %v2074_v54, 0.0  ;;  %12906 = vst [vmem:[#allocation46_spill] sm:$0xff] %v10472_v56  ;;  %v3950_v2 = vmin.f32 %v3310_v49, 6.0  ;;  %v3318_v45 = vmax.f32 %v1723_v27, 0.0  ;;  %v3320_v8 = vmax.f32 %v2076_v34, 0.0  ;;  %v12909_v20 = vld [vmem:[#allocation51_spill] sm:$0xff] }
 0x2ab   : > { %v3949_v28 = vmin.f32 %v3309_v1, 6.0  ;;  %7019 = vmatmul.mubr.msk.bf16.gmra.mrb[28].mxu1 %vm993_vm1, %v12907_v50  ;;  %v4853_v37 = vadd.f32 %v4852_v24, %v3948_v21  ;;  %v1725_v13 = vadd.f32 %v12908_v7, %v9460_v61  ;;  %v2078_v26 = vadd.f32 %v12909_v20, %v9462_v32  ;;  %v12910_v34 = vld [vmem:[#allocation52_spill] sm:$0xff] }
 0x2ac   : > { %v3951_v58 = vmin.f32 %v3311_v16, 6.0  ;;  %7052 = vmatmul.mubr.msk.bf16.gmra.mrb[28].mxu0 %vm993_vm1, %v12907_v50  ;;  %2452 = vmatprep.mubr.bf16.mxu1 %v12729_v18  ;;  %v4879_v60 = vadd.f32 %v4878_v23, %v3950_v2  ;;  %v3958_v54 = vmin.f32 %v3318_v45, 6.0  ;;  %v3960_v49 = vmin.f32 %v3320_v8, 6.0  ;;  %v12912_v50 = vld [vmem:[#allocation53_spill] sm:$0xff]  ;;  %v12913_v23 = vld [vmem:[#allocation39_spill] sm:$0xff]  ;;  %v12916_v8 = vld [vmem:[#allocation18_spill] sm:$0xff] }
 0x2ad   : > { %v4866_v57 = vadd.f32 %v4865_v63, %v3949_v28  ;;  %2805 = vmatprep.mubr.bf16.mxu0 %v12729_v18  ;;  %v3319_v24 = vmax.f32 %v1725_v13, 0.0  ;;  %v3321_v27 = vmax.f32 %v2078_v26, 0.0  ;;  %v1729_v21 = vadd.f32 %v12910_v34, %v9452_v36  ;;  %v10486_v16 = vpop.f32.mrb[180].mxu1  ;;  %v10492_v2 = vpop.f32.mrb[180].mxu0  ;;  %v12923_v35 = vld [vmem:[#allocation28_spill] sm:$0xff] }
 0x2ae   : > { %v4892_v1 = vadd.f32 %v4891_v62, %v3951_v58  ;;  %12911 = vst [vmem:[#allocation50_spill] sm:$0xff] %v10486_v16  ;;  %v4854_v20 = vadd.f32 %v4853_v37, %v3958_v54  ;;  %v4880_v7 = vadd.f32 %v4879_v60, %v3960_v49  ;;  %v2082_v56 = vadd.f32 %v12912_v50, %v9454_v47  ;;  %v10494_v28 = vpop.f32.mrb[181].mxu1  ;;  %v10498_v26 = vpop.f32.mrb[181].mxu0  ;;  %v12919_v49 = vld [vmem:[#allocation13_spill] sm:$0xff]  ;;  %v12920_v50 = vld [vmem:[#allocation27_spill] sm:$0xff] }
 0x2af   : > { %v1731_v63 = vadd.f32 %v12913_v23, %v9460_v61  ;;  %12914 = vst [vmem:[#allocation17_spill] sm:$0xff] %v10492_v2  ;;  %12915 = vst [vmem:[#allocation37_spill] sm:$0xff] %v10494_v28  ;;  %v3959_v62 = vmin.f32 %v3319_v24, 6.0  ;;  %v3961_v58 = vmin.f32 %v3321_v27, 6.0  ;;  %v3328_v45 = vmax.f32 %v1729_v21, 0.0  ;;  %v10500_v37 = vpop.f32.mrb[182].mxu1 }
 0x2b0   : > { %v2084_v13 = vadd.f32 %v12916_v8, %v9462_v32  ;;  %12917 = vst [vmem:[#allocation51_spill] sm:$0xff] %v10498_v26  ;;  %12918 = vst [vmem:[#allocation52_spill] sm:$0xff] %v10500_v37  ;;  %v3330_v60 = vmax.f32 %v2082_v56, 0.0  ;;  %v1733_v34 = vadd.f32 %v12919_v49, %v9452_v36  ;;  %v2086_v23 = vadd.f32 %v12920_v50, %v9454_v47  ;;  %v10506_v2 = vpop.f32.mrb[182].mxu0  ;;  %v10508_v24 = vpop.f32.mrb[183].mxu1  ;;  %v12924_v50 = vld [vmem:[#allocation47_spill] sm:$0xff] }
 0x2b1   : > { %v3329_v54 = vmax.f32 %v1731_v63, 0.0  ;;  %12921 = vst [vmem:[#allocation53_spill] sm:$0xff] %v10506_v2  ;;  %12922 = vst [vmem:[#allocation39_spill] sm:$0xff] %v10508_v24  ;;  %v4867_v27 = vadd.f32 %v4866_v57, %v3959_v62  ;;  %v4893_v21 = vadd.f32 %v4892_v1, %v3961_v58  ;;  %v3968_v28 = vmin.f32 %v3328_v45, 6.0  ;;  %v10510_v16 = vpop.f32.mrb[183].mxu0  ;;  %v12925_v24 = vld [vmem:[#allocation29_spill] sm:$0xff] }
 0x2b2   : > { %v3331_v8 = vmax.f32 %v2084_v13, 0.0  ;;  %v3970_v26 = vmin.f32 %v3330_v60, 6.0  ;;  %v3338_v56 = vmax.f32 %v1733_v34, 0.0  ;;  %v3340_v63 = vmax.f32 %v2086_v23, 0.0 }
 0x2b3   : > { %v3969_v37 = vmin.f32 %v3329_v54, 6.0  ;;  %7020 = vmatmul.mubr.msk.bf16.gmra.mrb[32].mxu1 %vm993_vm1, %v12923_v35  ;;  %v4855_v49 = vadd.f32 %v4854_v20, %v3968_v28  ;;  %v1735_v2 = vadd.f32 %v12924_v50, %v9460_v61  ;;  %v2088_v57 = vadd.f32 %v12925_v24, %v9462_v32 }
 0x2b4   : > { %v3971_v9 = vmin.f32 %v3331_v8, 6.0  ;;  %7053 = vmatmul.mubr.msk.bf16.gmra.mrb[32].mxu0 %vm993_vm1, %v12923_v35  ;;  %2462 = vmatprep.mubr.bf16.mxu1 %v12729_v18  ;;  %v4881_v1 = vadd.f32 %v4880_v7, %v3970_v26  ;;  %v3978_v58 = vmin.f32 %v3338_v56, 6.0  ;;  %v3980_v45 = vmin.f32 %v3340_v63, 6.0 }
 0x2b5   : > { %v4868_v62 = vadd.f32 %v4867_v27, %v3969_v37  ;;  %2815 = vmatprep.mubr.bf16.mxu0 %v12729_v18  ;;  %v3339_v20 = vmax.f32 %v1735_v2, 0.0  ;;  %v3341_v28 = vmax.f32 %v2088_v57, 0.0  ;;  %v1739_v60 = vadd.f32 %v10240_v59, %v9452_v36  ;;  %v10524_v54 = vpop.f32.mrb[184].mxu1  ;;  %v10530_v26 = vpop.f32.mrb[184].mxu0 }
 0x2b6   : > { %v4894_v13 = vadd.f32 %v4893_v21, %v3971_v9  ;;  %v4856_v34 = vadd.f32 %v4855_v49, %v3978_v58  ;;  %v4882_v23 = vadd.f32 %v4881_v1, %v3980_v45  ;;  %v2092_v35 = vadd.f32 %v10242_v44, %v9454_v47  ;;  %v10532_v37 = vpop.f32.mrb[185].mxu1  ;;  %v10536_v27 = vpop.f32.mrb[185].mxu0 }
 0x2b7   : > { %v1741_v7 = vadd.f32 %v10244_v41, %v9460_v61  ;;  %v3979_v9 = vmin.f32 %v3339_v20, 6.0  ;;  %v3981_v2 = vmin.f32 %v3341_v28, 6.0  ;;  %v3348_v24 = vmax.f32 %v1739_v60, 0.0  ;;  %v10538_v21 = vpop.f32.mrb[186].mxu1  ;;  %v10544_v63 = vpop.f32.mrb[186].mxu0 }
 0x2b8   : > { %v2094_v59 = vadd.f32 %v10248_v15, %v9462_v32  ;;  %v3350_v8 = vmax.f32 %v2092_v35, 0.0  ;;  %v1743_v44 = vadd.f32 %v10250_v10, %v9452_v36  ;;  %v2096_v41 = vadd.f32 %v10264_v25, %v9454_v47  ;;  %12926 = vst [vmem:[#allocation18_spill] sm:$0xff] %v10544_v63  ;;  %v10546_v49 = vpop.f32.mrb[187].mxu1  ;;  %v10548_v58 = vpop.f32.mrb[187].mxu0  ;;  %v12928_v35 = vld [vmem:[#allocation30_spill] sm:$0xff]  ;;  %v12929_v25 = vld [vmem:[#allocation15_spill] sm:$0xff] }
 0x2b9   : > { %v3349_v56 = vmax.f32 %v1741_v7, 0.0  ;;  %12927 = vst [vmem:[#allocation13_spill] sm:$0xff] %v10546_v49  ;;  %v4869_v50 = vadd.f32 %v4868_v62, %v3979_v9  ;;  %v4895_v57 = vadd.f32 %v4894_v13, %v3981_v2  ;;  %v3988_v1 = vmin.f32 %v3348_v24, 6.0  ;;  %v12930_v49 = vld [vmem:[#allocation48_spill] sm:$0xff] }
 0x2ba   : > { %v3351_v15 = vmax.f32 %v2094_v59, 0.0  ;;  %v3990_v45 = vmin.f32 %v3350_v8, 6.0  ;;  %v3358_v28 = vmax.f32 %v1743_v44, 0.0  ;;  %v3360_v60 = vmax.f32 %v2096_v41, 0.0 }
 0x2bb   : > { %v3989_v20 = vmin.f32 %v3349_v56, 6.0  ;;  %7021 = vmatmul.mubr.msk.bf16.gmra.mrb[36].mxu1 %vm993_vm1, %v12928_v35  ;;  %v4857_v10 = vadd.f32 %v4856_v34, %v3988_v1  ;;  %v1745_v63 = vadd.f32 %v12929_v25, %v9460_v61  ;;  %v2098_v62 = vadd.f32 %v12930_v49, %v9462_v32  ;;  %v12931_v56 = vld [vmem:[#allocation31_spill] sm:$0xff] }
 0x2bc   : > { %v3991_v7 = vmin.f32 %v3351_v15, 6.0  ;;  %7054 = vmatmul.mubr.msk.bf16.gmra.mrb[36].mxu0 %vm993_vm1, %v12928_v35  ;;  %2472 = vmatprep.mubr.bf16.mxu1 %v12729_v18  ;;  %v4883_v13 = vadd.f32 %v4882_v23, %v3990_v45  ;;  %v3998_v2 = vmin.f32 %v3358_v28, 6.0  ;;  %v4000_v24 = vmin.f32 %v3360_v60, 6.0 }
 0x2bd   : > { %v4870_v9 = vadd.f32 %v4869_v50, %v3989_v20  ;;  %2825 = vmatprep.mubr.bf16.mxu0 %v12729_v18  ;;  %v3359_v34 = vmax.f32 %v1745_v63, 0.0  ;;  %v3361_v8 = vmax.f32 %v2098_v62, 0.0  ;;  %v1749_v44 = vadd.f32 %v12931_v56, %v9452_v36  ;;  %v10562_v41 = vpop.f32.mrb[188].mxu1 }
 0x2be   : > { %v4896_v59 = vadd.f32 %v4895_v57, %v3991_v7  ;;  %v4858_v49 = vadd.f32 %v4857_v10, %v3998_v2  ;;  %v4884_v1 = vadd.f32 %v4883_v13, %v4000_v24  ;;  %v2102_v15 = vadd.f32 %v10296_v29, %v9454_v47  ;;  %v10568_v50 = vpop.f32.mrb[188].mxu0  ;;  %v10570_v45 = vpop.f32.mrb[189].mxu1 }
 0x2bf   : > { %v1751_v23 = vadd.f32 %v10298_v19, %v9460_v61  ;;  %12932 = vst [vmem:[#allocation27_spill] sm:$0xff] %v10568_v50  ;;  %12933 = vst [vmem:[#allocation28_spill] sm:$0xff] %v10570_v45  ;;  %v3999_v57 = vmin.f32 %v3359_v34, 6.0  ;;  %v4001_v63 = vmin.f32 %v3361_v8, 6.0  ;;  %v3368_v20 = vmax.f32 %v1749_v44, 0.0  ;;  %v10574_v60 = vpop.f32.mrb[189].mxu0 }
 0x2c0   : > { %v2104_v28 = vadd.f32 %v10302_v52, %v9462_v32  ;;  %12934 = vst [vmem:[#allocation47_spill] sm:$0xff] %v10574_v60  ;;  %v10576_v35 = vpop.f32.mrb[190].mxu1  ;;  %v4859_v10 = vrot.slane %v4858_v49, 4  ;;  %v4885_v7 = vrot.slane %v4884_v1, 4  ;;  %v3370_v29 = vmax.f32 %v2102_v15, 0.0  ;;  %v10578_v62 = vpop.f32.mrb[190].mxu0 }
 0x2c1   : > { %12935 = vst [vmem:[#allocation29_spill] sm:$0xff] %v10576_v35  ;;  %v3369_v25 = vmax.f32 %v1751_v23, 0.0  ;;  %12936 = vst [vmem:[#allocation30_spill] sm:$0xff] %v10578_v62  ;;  %v10580_v19 = vpop.f32.mrb[191].mxu1  ;;  %v4871_v13 = vadd.f32 %v4870_v9, %v3999_v57  ;;  %v4897_v2 = vadd.f32 %v4896_v59, %v4001_v63  ;;  %v4008_v24 = vmin.f32 %v3368_v20, 6.0  ;;  %v10582_v8 = vpop.f32.mrb[191].mxu0 }
 0x2c2   : > { %12937 = vst [vmem:[#allocation15_spill] sm:$0xff] %v10580_v19  ;;  %v3371_v34 = vmax.f32 %v2104_v28, 0.0  ;;  %12938 = vst [vmem:[#allocation48_spill] sm:$0xff] %v10582_v8  ;;  %v4860_v56 = vadd.f32 %v4859_v10, %v4858_v49  ;;  %v4886_v52 = vadd.f32 %v4885_v7, %v4884_v1  ;;  %v4010_v44 = vmin.f32 %v3370_v29, 6.0  ;;  %v12939_v45 = vld [vmem:[#allocation32_spill] sm:$0xff] }
 0x2c3   : > { %v4009_v60 = vmin.f32 %v3369_v25, 6.0  ;;  %7022 = vmatmul.mubr.msk.bf16.gmra.mrb[40].mxu1 %vm993_vm1, %v12939_v45  ;;  %v4872_v35 = vrot.slane %v4871_v13, 4  ;;  %v4898_v15 = vrot.slane %v4897_v2, 4  ;;  %v1753_v62 = vadd.f32 %v10304_v5, %v9452_v36  ;;  %v12940_v5 = vld [vmem:[#allocation33_spill] sm:$0xff] }
 0x2c4   : > { %v4011_v23 = vmin.f32 %v3371_v34, 6.0  ;;  %7055 = vmatmul.mubr.msk.bf16.gmra.mrb[40].mxu0 %vm993_vm1, %v12939_v45  ;;  %2482 = vmatprep.mubr.bf16.mxu1 %v12729_v18  ;;  %v4861_v9 = vrot.slane %v4860_v56, 2  ;;  %v4887_v59 = vrot.slane %v4886_v52, 2  ;;  %v2106_v49 = vadd.f32 %v10310_v4, %v9454_v47 }
 0x2c5   : > { %v1755_v1 = vadd.f32 %v10312_v51, %v9460_v61  ;;  %2835 = vmatprep.mubr.bf16.mxu0 %v12729_v18  ;;  %v4873_v57 = vadd.f32 %v4872_v35, %v4871_v13  ;;  %v4899_v63 = vadd.f32 %v4898_v15, %v4897_v2  ;;  %v3378_v20 = vmax.f32 %v1753_v62, 0.0  ;;  %v10598_v10 = vpop.f32.mrb[192].mxu1 }
 0x2c6   : > { %v2108_v28 = vadd.f32 %v12940_v5, %v9462_v32  ;;  %12941 = vst [vmem:[#allocation31_spill] sm:$0xff] %v10598_v10  ;;  %v4862_v45 = vadd.f32 %v4861_v9, %v4860_v56  ;;  %v4888_v7 = vadd.f32 %v4887_v59, %v4886_v52  ;;  %v3380_v29 = vmax.f32 %v2106_v49, 0.0  ;;  %v10600_v34 = vpop.f32.mrb[192].mxu0  ;;  %v10602_v4 = vpop.f32.mrb[193].mxu1 }
 0x2c7   : > { %v3379_v25 = vmax.f32 %v1755_v1, 0.0  ;;  %12942 = vst [vmem:[#allocation32_spill] sm:$0xff] %v10600_v34  ;;  %12943 = vst [vmem:[#allocation33_spill] sm:$0xff] %v10602_v4  ;;  %v4874_v8 = vrot.slane %v4873_v57, 2  ;;  %v4900_v51 = vrot.slane %v4899_v63, 2  ;;  %v4018_v19 = vmin.f32 %v3378_v20, 6.0 }
 0x2c8   : > { %v3381_v50 = vmax.f32 %v2108_v28, 0.0  ;;  %v10604_v35 = vpop.f32.mrb[193].mxu0  ;;  %v10606_v62 = vpop.f32.mrb[194].mxu1  ;;  %v4863_v13 = vrot.slane %v4862_v45, 1  ;;  %v4889_v2 = vrot.slane %v4888_v7, 1  ;;  %v4020_v15 = vmin.f32 %v3380_v29, 6.0 }
 0x2c9   : > { %12944 = vst [vmem:[#allocation55_spill] sm:$0xff] %v10604_v35  ;;  %12945 = vst [vmem:[#allocation56_spill] sm:$0xff] %v10606_v62  ;;  %v4019_v5 = vmin.f32 %v3379_v25, 6.0  ;;  %v10608_v56 = vpop.f32.mrb[194].mxu0  ;;  %v10610_v52 = vpop.f32.mrb[195].mxu1  ;;  %v4875_v9 = vadd.f32 %v4874_v8, %v4873_v57  ;;  %v4901_v59 = vadd.f32 %v4900_v51, %v4899_v63  ;;  %v4982_v49 = vadd.f32 %v4018_v19, %v4008_v24  ;;  %v12947_v34 = vld [vmem:[#allocation34_spill] sm:$0xff] }
 0x2ca   : > { %12946 = vst [vmem:[#allocation57_spill] sm:$0xff] %v10608_v56  ;;  %v4021_v1 = vmin.f32 %v3381_v50, 6.0  ;;  %v10612_v4 = vpop.f32.mrb[195].mxu0  ;;  %v4864_v20 = vadd.f32 %v4863_v13, %v4862_v45  ;;  %v4890_v28 = vadd.f32 %v4889_v2, %v4888_v7  ;;  %v5008_v10 = vadd.f32 %v4020_v15, %v4010_v44 }
 0x2cb   : > { %v4995_v35 = vadd.f32 %v4019_v5, %v4009_v60  ;;  %7023 = vmatmul.mubr.msk.bf16.gmra.mrb[44].mxu1 %vm993_vm1, %v12947_v34  ;;  %v4876_v62 = vrot.slane %v4875_v9, 1  ;;  %v4902_v29 = vrot.slane %v4901_v59, 1  ;;  %v1759_v56 = vadd.f32 %v10332_v38, %v9452_v36 }
 0x2cc   : > { %v5021_v25 = vadd.f32 %v4021_v1, %v4011_v23  ;;  %7056 = vmatmul.mubr.msk.bf16.gmra.mrb[44].mxu0 %vm993_vm1, %v12947_v34  ;;  %2492 = vmatprep.mubr.bf16.mxu1 %v12729_v18  ;;  %v10623_v50 = vsel %vm5304_vm8, %v4864_v20, %v10436_v14  ;;  %v10627_v60 = vsel %vm5304_vm8, %v4890_v28, %v10440_v42 }
 0x2cd   : > { %v2112_v19 = vadd.f32 %v10334_v17, %v9454_v47  ;;  %v1761_v24 = vadd.f32 %v10336_v55, %v9460_v61  ;;  %2845 = vmatprep.mubr.bf16.mxu0 %v12729_v18  ;;  %v4877_v38 = vadd.f32 %v4876_v62, %v4875_v9  ;;  %v4903_v8 = vadd.f32 %v4902_v29, %v4901_v59  ;;  %v10636_v14 = vpop.f32.mrb[196].mxu1  ;;  %v12948_v59 = vld [vmem:[#allocation19_spill] sm:$0xff] }
 0x2ce   : > { %v3388_v44 = vmax.f32 %v1759_v56, 0.0  ;;  %v2114_v23 = vadd.f32 %v10340_v53, %v9462_v32  ;;  %v1763_v42 = vadd.f32 %v10342_v22, %v9452_v36  ;;  %v2116_v17 = vadd.f32 %v10348_v12, %v9454_v47  ;;  %v10642_v45 = vpop.f32.mrb[196].mxu0  ;;  %v10644_v55 = vpop.f32.mrb[197].mxu1 }
 0x2cf   : > { %v3390_v57 = vmax.f32 %v2112_v19, 0.0  ;;  %v3389_v63 = vmax.f32 %v1761_v24, 0.0  ;;  %v10648_v7 = vsel %vm5304_vm8, %v4877_v38, %v10466_v46  ;;  %v10652_v53 = vsel %vm5304_vm8, %v4903_v8, %v10470_v43  ;;  %v10654_v62 = vpop.f32.mrb[197].mxu0  ;;  %v10656_v22 = vpop.f32.mrb[198].mxu1  ;;  %v12949_v38 = vld [vmem:[#allocation36_spill] sm:$0xff] }
 0x2d0   : > { %v4028_v34 = vmin.f32 %v3388_v44, 6.0  ;;  %v3391_v51 = vmax.f32 %v2114_v23, 0.0  ;;  %v3398_v2 = vmax.f32 %v1763_v42, 0.0  ;;  %v3400_v15 = vmax.f32 %v2116_v17, 0.0  ;;  %v10658_v5 = vpop.f32.mrb[198].mxu0  ;;  %v10660_v56 = vpop.f32.mrb[199].mxu1 }
 0x2d1   : > { %v4030_v13 = vmin.f32 %v3390_v57, 6.0  ;;  %v4029_v12 = vmin.f32 %v3389_v63, 6.0  ;;  %v1765_v43 = vadd.f32 %v10350_v30, %v9460_v61  ;;  %v2118_v1 = vadd.f32 %v12948_v59, %v9462_v32  ;;  %v10666_v20 = vpop.f32.mrb[199].mxu0 }
 0x2d2   : > { %v4983_v46 = vadd.f32 %v4982_v49, %v4028_v34  ;;  %v4031_v9 = vmin.f32 %v3391_v51, 6.0  ;;  %v4038_v19 = vmin.f32 %v3398_v2, 6.0  ;;  %v4040_v24 = vmin.f32 %v3400_v15, 6.0 }
 0x2d3   : > { %v5009_v28 = vadd.f32 %v5008_v10, %v4030_v13  ;;  %v4996_v29 = vadd.f32 %v4995_v35, %v4029_v12  ;;  %7024 = vmatmul.mubr.msk.bf16.gmra.mrb[48].mxu1 %vm993_vm1, %v12949_v38  ;;  %v3399_v44 = vmax.f32 %v1765_v43, 0.0  ;;  %v3401_v23 = vmax.f32 %v2118_v1, 0.0  ;;  %v12951_v12 = vld [vmem:[#allocation23_spill] sm:$0xff] }
 0x2d4   : > { %v5022_v8 = vadd.f32 %v5021_v25, %v4031_v9  ;;  %v1769_v49 = vadd.f32 %v10370_v0, %v9452_v36  ;;  %7057 = vmatmul.mubr.msk.bf16.gmra.mrb[48].mxu0 %vm993_vm1, %v12949_v38  ;;  %2502 = vmatprep.mubr.bf16.mxu1 %v12729_v18  ;;  %v4984_v30 = vadd.f32 %v4983_v46, %v4038_v19  ;;  %v12950_v0 = vld [vmem:[#allocation21_spill] sm:$0xff] }
 0x2d5   : > { %v5010_v57 = vadd.f32 %v5009_v28, %v4040_v24  ;;  %v2122_v10 = vadd.f32 %v10372_v39, %v9454_v47  ;;  %v1771_v35 = vadd.f32 %v10374_v6, %v9460_v61  ;;  %2855 = vmatprep.mubr.bf16.mxu0 %v12729_v18  ;;  %v4039_v25 = vmin.f32 %v3399_v44, 6.0  ;;  %v10682_v34 = vpop.f32.mrb[200].mxu1  ;;  %v12952_v39 = vld [vmem:[#allocation20_spill] sm:$0xff] }
 0x2d6   : > { %v4041_v63 = vmin.f32 %v3401_v23, 6.0  ;;  %v3408_v42 = vmax.f32 %v1769_v49, 0.0  ;;  %v2124_v17 = vadd.f32 %v12950_v0, %v9462_v32  ;;  %v1773_v2 = vadd.f32 %v12951_v12, %v9452_v36  ;;  %v10688_v46 = vpop.f32.mrb[200].mxu0  ;;  %v10690_v6 = vpop.f32.mrb[201].mxu1  ;;  %v12954_v12 = vld [vmem:[#allocation54_spill] sm:$0xff] }
 0x2d7   : > { %v3410_v51 = vmax.f32 %v2122_v10, 0.0  ;;  %v3409_v13 = vmax.f32 %v1771_v35, 0.0  ;;  %v2126_v15 = vadd.f32 %v12952_v39, %v9454_v47  ;;  %v4997_v9 = vadd.f32 %v4996_v29, %v4039_v25  ;;  %v10692_v28 = vpop.f32.mrb[201].mxu0  ;;  %v10694_v19 = vpop.f32.mrb[202].mxu1 }
 0x2d8   : > { %v5023_v43 = vadd.f32 %v5022_v8, %v4041_v63  ;;  %v4048_v59 = vmin.f32 %v3408_v42, 6.0  ;;  %v3411_v1 = vmax.f32 %v2124_v17, 0.0  ;;  %v3418_v44 = vmax.f32 %v1773_v2, 0.0  ;;  %v10696_v49 = vpop.f32.mrb[202].mxu0  ;;  %v10698_v10 = vpop.f32.mrb[203].mxu1  ;;  %v12955_v8 = vld [vmem:[#allocation25_spill] sm:$0xff] }
 0x2d9   : > { %v4050_v24 = vmin.f32 %v3410_v51, 6.0  ;;  %v4049_v38 = vmin.f32 %v3409_v13, 6.0  ;;  %v3420_v23 = vmax.f32 %v2126_v15, 0.0  ;;  %12953 = vst [vmem:[#allocation34_spill] sm:$0xff] %v10698_v10  ;;  %v1775_v29 = vadd.f32 %v12954_v12, %v9460_v61  ;;  %v10704_v63 = vpop.f32.mrb[203].mxu0  ;;  %v12957_v2 = vld [vmem:[#allocation38_spill] sm:$0xff] }
 0x2da   : > { %v4985_v35 = vadd.f32 %v4984_v30, %v4048_v59  ;;  %v4051_v0 = vmin.f32 %v3411_v1, 6.0  ;;  %v2128_v25 = vadd.f32 %v12955_v8, %v9462_v32  ;;  %12956 = vst [vmem:[#allocation19_spill] sm:$0xff] %v10704_v63  ;;  %v4058_v51 = vmin.f32 %v3418_v44, 6.0  ;;  %v12958_v30 = vld [vmem:[#allocation42_spill] sm:$0xff] }
 0x2db   : > { %v5011_v42 = vadd.f32 %v5010_v57, %v4050_v24  ;;  %v4998_v17 = vadd.f32 %v4997_v9, %v4049_v38  ;;  %v4060_v13 = vmin.f32 %v3420_v23, 6.0  ;;  %7025 = vmatmul.mubr.msk.bf16.gmra.mrb[52].mxu1 %vm993_vm1, %v12957_v2  ;;  %v3419_v15 = vmax.f32 %v1775_v29, 0.0  ;;  %v12959_v57 = vld [vmem:[#allocation45_spill] sm:$0xff]  ;;  %v12960_v24 = vld [vmem:[#allocation22_spill] sm:$0xff] }
 0x2dc   : > { %v5024_v39 = vadd.f32 %v5023_v43, %v4051_v0  ;;  %v3421_v10 = vmax.f32 %v2128_v25, 0.0  ;;  %v1779_v59 = vadd.f32 %v12958_v30, %v9452_v36  ;;  %7058 = vmatmul.mubr.msk.bf16.gmra.mrb[52].mxu0 %vm993_vm1, %v12957_v2  ;;  %2512 = vmatprep.mubr.bf16.mxu1 %v12729_v18  ;;  %v4986_v1 = vadd.f32 %v4985_v35, %v4058_v51  ;;  %v12961_v0 = vld [vmem:[#allocation35_spill] sm:$0xff] }
 0x2dd   : > { %v5012_v12 = vadd.f32 %v5011_v42, %v4060_v13  ;;  %v2132_v9 = vadd.f32 %v12959_v57, %v9454_v47  ;;  %v1781_v38 = vadd.f32 %v12960_v24, %v9460_v61  ;;  %2865 = vmatprep.mubr.bf16.mxu0 %v12729_v18  ;;  %v4059_v43 = vmin.f32 %v3419_v15, 6.0  ;;  %v10720_v8 = vpop.f32.mrb[204].mxu1 }
 0x2de   : > { %v4061_v44 = vmin.f32 %v3421_v10, 6.0  ;;  %v3428_v23 = vmax.f32 %v1779_v59, 0.0  ;;  %v2134_v29 = vadd.f32 %v12961_v0, %v9462_v32  ;;  %12962 = vst [vmem:[#allocation36_spill] sm:$0xff] %v10720_v8  ;;  %v1783_v35 = vadd.f32 %v10416_v3, %v9452_v36  ;;  %v10726_v51 = vpop.f32.mrb[204].mxu0  ;;  %v10728_v13 = vpop.f32.mrb[205].mxu1 }
 0x2df   : > { %v3430_v25 = vmax.f32 %v2132_v9, 0.0  ;;  %v3429_v2 = vmax.f32 %v1781_v38, 0.0  ;;  %v2136_v42 = vadd.f32 %v10418_v33, %v9454_v47  ;;  %12963 = vst [vmem:[#allocation21_spill] sm:$0xff] %v10726_v51  ;;  %12964 = vst [vmem:[#allocation23_spill] sm:$0xff] %v10728_v13  ;;  %v4999_v15 = vadd.f32 %v4998_v17, %v4059_v43  ;;  %v10730_v57 = vpop.f32.mrb[205].mxu0  ;;  %v10732_v24 = vpop.f32.mrb[206].mxu1 }
 0x2e0   : > { %v5025_v10 = vadd.f32 %v5024_v39, %v4061_v44  ;;  %v4068_v30 = vmin.f32 %v3428_v23, 6.0  ;;  %v3431_v59 = vmax.f32 %v2134_v29, 0.0  ;;  %12965 = vst [vmem:[#allocation20_spill] sm:$0xff] %v10730_v57  ;;  %12966 = vst [vmem:[#allocation54_spill] sm:$0xff] %v10732_v24  ;;  %v3438_v0 = vmax.f32 %v1783_v35, 0.0  ;;  %v10734_v3 = vpop.f32.mrb[206].mxu0 }
 0x2e1   : > { %v4070_v9 = vmin.f32 %v3430_v25, 6.0  ;;  %v4069_v38 = vmin.f32 %v3429_v2, 6.0  ;;  %v3440_v8 = vmax.f32 %v2136_v42, 0.0  ;;  %12967 = vst [vmem:[#allocation25_spill] sm:$0xff] %v10734_v3  ;;  %v10736_v63 = vpop.f32.mrb[207].mxu1  ;;  %v1785_v17 = vadd.f32 %v10420_v11, %v9460_v61  ;;  %v12969_v39 = vld [vmem:[#allocation24_spill] sm:$0xff] }
 0x2e2   : > { %12968 = vst [vmem:[#allocation38_spill] sm:$0xff] %v10736_v63  ;;  %v4987_v33 = vadd.f32 %v4986_v1, %v4068_v30  ;;  %v4071_v51 = vmin.f32 %v3431_v59, 6.0  ;;  %v2138_v43 = vadd.f32 %v12969_v39, %v9462_v32  ;;  %v10742_v44 = vpop.f32.mrb[207].mxu0  ;;  %v4078_v25 = vmin.f32 %v3438_v0, 6.0  ;;  %v12971_v35 = vld [vmem:[#allocation40_spill] sm:$0xff] }
 0x2e3   : > { %12970 = vst [vmem:[#allocation42_spill] sm:$0xff] %v10742_v44  ;;  %v5013_v23 = vadd.f32 %v5012_v12, %v4070_v9  ;;  %v5000_v29 = vadd.f32 %v4999_v15, %v4069_v38  ;;  %v4080_v2 = vmin.f32 %v3440_v8, 6.0  ;;  %7026 = vmatmul.mubr.msk.bf16.gmra.mrb[56].mxu1 %vm993_vm1, %v12971_v35  ;;  %v3439_v3 = vmax.f32 %v1785_v17, 0.0 }
 0x2e4   : > { %v5026_v42 = vadd.f32 %v5025_v10, %v4071_v51  ;;  %v3441_v63 = vmax.f32 %v2138_v43, 0.0  ;;  %v1789_v1 = vadd.f32 %v10432_v40, %v9452_v36  ;;  %7059 = vmatmul.mubr.msk.bf16.gmra.mrb[56].mxu0 %vm993_vm1, %v12971_v35  ;;  %2522 = vmatprep.mubr.bf16.mxu1 %v12729_v18  ;;  %v4988_v11 = vadd.f32 %v4987_v33, %v4078_v25  ;;  %v12972_v40 = vld [vmem:[#allocation26_spill] sm:$0xff] }
 0x2e5   : > { %v5014_v30 = vadd.f32 %v5013_v23, %v4080_v2  ;;  %v2142_v12 = vadd.f32 %v10446_v31, %v9454_v47  ;;  %v1791_v8 = vadd.f32 %v10448_v48, %v9460_v61  ;;  %2875 = vmatprep.mubr.bf16.mxu0 %v12729_v18  ;;  %v4079_v51 = vmin.f32 %v3439_v3, 6.0  ;;  %v10758_v9 = vpop.f32.mrb[208].mxu1 }
 0x2e6   : > { %v4081_v15 = vmin.f32 %v3441_v63, 6.0  ;;  %v3448_v10 = vmax.f32 %v1789_v1, 0.0  ;;  %v2144_v59 = vadd.f32 %v12972_v40, %v9462_v32  ;;  %12973 = vst [vmem:[#allocation45_spill] sm:$0xff] %v10758_v9  ;;  %v4989_v38 = vrot.slane %v4988_v11, 4  ;;  %v10760_v39 = vpop.f32.mrb[208].mxu0  ;;  %v10762_v31 = vpop.f32.mrb[209].mxu1 }
 0x2e7   : > { %v5015_v0 = vrot.slane %v5014_v30, 4  ;;  %v3450_v33 = vmax.f32 %v2142_v12, 0.0  ;;  %v3449_v17 = vmax.f32 %v1791_v8, 0.0  ;;  %12974 = vst [vmem:[#allocation22_spill] sm:$0xff] %v10760_v39  ;;  %12975 = vst [vmem:[#allocation35_spill] sm:$0xff] %v10762_v31  ;;  %v5001_v43 = vadd.f32 %v5000_v29, %v4079_v51  ;;  %v10764_v3 = vpop.f32.mrb[209].mxu0 }
 0x2e8   : > { %v5027_v48 = vadd.f32 %v5026_v42, %v4081_v15  ;;  %v4088_v23 = vmin.f32 %v3448_v10, 6.0  ;;  %v3451_v18 = vmax.f32 %v2144_v59, 0.0  ;;  %12976 = vst [vmem:[#allocation24_spill] sm:$0xff] %v10764_v3  ;;  %v10766_v63 = vpop.f32.mrb[210].mxu1  ;;  %v4990_v25 = vadd.f32 %v4989_v38, %v4988_v11  ;;  %v10768_v40 = vpop.f32.mrb[210].mxu0  ;;  %v12980_v29 = vld [vmem:[#allocation43_spill] sm:$0xff] }
 0x2e9   : > { %12977 = vst [vmem:[#allocation40_spill] sm:$0xff] %v10766_v63  ;;  %v5016_v2 = vadd.f32 %v5015_v0, %v5014_v30  ;;  %v4090_v35 = vmin.f32 %v3450_v33, 6.0  ;;  %v4089_v1 = vmin.f32 %v3449_v17, 6.0  ;;  %12978 = vst [vmem:[#allocation26_spill] sm:$0xff] %v10768_v40  ;;  %v10770_v12 = vpop.f32.mrb[211].mxu1  ;;  %v5002_v8 = vrot.slane %v5001_v43, 4 }
 0x2ea   : > { %12979 = vst [vmem:[#allocation58_spill] sm:$0xff] %v10770_v12  ;;  %v5028_v39 = vrot.slane %v5027_v48, 4  ;;  %v4091_v9 = vmin.f32 %v3451_v18, 6.0  ;;  %v1793_v42 = vadd.f32 %v12980_v29, %v9452_v36  ;;  %v10774_v51 = vpop.f32.mrb[211].mxu0  ;;  %v4991_v15 = vrot.slane %v4990_v25, 2  ;;  %v12982_v59 = vld [vmem:[#allocation49_spill] sm:$0xff] }
 0x2eb   : > { %12981 = vst [vmem:[#allocation43_spill] sm:$0xff] %v10774_v51  ;;  %v5017_v10 = vrot.slane %v5016_v2, 2  ;;  %v2146_v11 = vadd.f32 %v12982_v59, %v9454_v47  ;;  %v12983_v30 = vld [vmem:[#allocation16_spill] sm:$0xff]  ;;  %v12984_v0 = vld [vmem:[#allocation41_spill] sm:$0xff]  ;;  %v5003_v33 = vadd.f32 %v5002_v8, %v5001_v43  ;;  %v12985_v18 = vld [vmem:[#allocation46_spill] sm:$0xff] }
 0x2ec   : > { %v1795_v38 = vadd.f32 %v12983_v30, %v9460_v61  ;;  %7027 = vmatmul.mubr.msk.bf16.gmra.mrb[60].mxu1 %vm993_vm1, %v12984_v0  ;;  %v5029_v17 = vadd.f32 %v5028_v39, %v5027_v48  ;;  %v3458_v12 = vmax.f32 %v1793_v42, 0.0  ;;  %v2148_v40 = vadd.f32 %v12985_v18, %v9462_v32  ;;  %7060 = vmatmul.mubr.msk.bf16.gmra.mrb[60].mxu0 %vm993_vm1, %v12984_v0 }
 0x2ed   : > { %v4992_v29 = vadd.f32 %v4991_v15, %v4990_v25  ;;  %v5018_v51 = vadd.f32 %v5017_v10, %v5016_v2  ;;  %v3460_v63 = vmax.f32 %v2146_v11, 0.0  ;;  %v5004_v59 = vrot.slane %v5003_v33, 2  ;;  %v10786_v24 = vpop.f32.mrb[212].mxu1 }
 0x2ee   : > { %v3459_v3 = vmax.f32 %v1795_v38, 0.0  ;;  %v5030_v31 = vrot.slane %v5029_v17, 2  ;;  %v4098_v44 = vmin.f32 %v3458_v12, 6.0  ;;  %v3461_v30 = vmax.f32 %v2148_v40, 0.0  ;;  %12986 = vst [vmem:[#allocation49_spill] sm:$0xff] %v10786_v24  ;;  %v10788_v8 = vpop.f32.mrb[212].mxu0 }
 0x2ef   : > { %v4993_v57 = vrot.slane %v4992_v29, 1  ;;  %v5019_v43 = vrot.slane %v5018_v51, 1  ;;  %v4100_v39 = vmin.f32 %v3460_v63, 6.0  ;;  %12987 = vst [vmem:[#allocation16_spill] sm:$0xff] %v10788_v8  ;;  %v10790_v42 = vpop.f32.mrb[213].mxu1  ;;  %v5005_v18 = vadd.f32 %v5004_v59, %v5003_v33  ;;  %v10792_v15 = vpop.f32.mrb[213].mxu0 }
 0x2f0   : > { %v4099_v48 = vmin.f32 %v3459_v3, 6.0  ;;  %v5031_v0 = vadd.f32 %v5030_v31, %v5029_v17  ;;  %v5112_v25 = vadd.f32 %v4098_v44, %v4088_v23  ;;  %v4101_v2 = vmin.f32 %v3461_v30, 6.0  ;;  %v10794_v10 = vpop.f32.mrb[214].mxu1  ;;  %v10796_v24 = vpop.f32.mrb[214].mxu0  ;;  %v12988_v33 = vld [vmem:[#allocation50_spill] sm:$0xff]  ;;  %v12991_v30 = vld [vmem:[#allocation51_spill] sm:$0xff] }
 0x2f1   : > { %v4994_v12 = vadd.f32 %v4993_v57, %v4992_v29  ;;  %v5020_v40 = vadd.f32 %v5019_v43, %v5018_v51  ;;  %v5138_v11 = vadd.f32 %v4100_v39, %v4090_v35  ;;  %v10798_v63 = vpop.f32.mrb[215].mxu1  ;;  %v5006_v3 = vrot.slane %v5005_v18, 1  ;;  %v10802_v44 = vpop.f32.mrb[215].mxu0  ;;  %v12989_v35 = vld [vmem:[#allocation17_spill] sm:$0xff] }
 0x2f2   : > { %v5125_v38 = vadd.f32 %v4099_v48, %v4089_v1  ;;  %v5032_v8 = vrot.slane %v5031_v0, 1  ;;  %v5151_v13 = vadd.f32 %v4101_v2, %v4091_v9  ;;  %v1799_v31 = vadd.f32 %v12988_v33, %v9452_v36  ;;  %v12990_v51 = vld [vmem:[#allocation37_spill] sm:$0xff] }
 0x2f3   : > { %v10806_v23 = vsel %vm5306_vm9, %v4994_v12, %v10623_v50  ;;  %v10810_v57 = vsel %vm5306_vm9, %v5020_v40, %v10627_v60  ;;  %v2152_v1 = vadd.f32 %v12989_v35, %v9454_v47  ;;  %v1801_v17 = vadd.f32 %v12990_v51, %v9460_v61  ;;  %v12992_v50 = vld [vmem:[#allocation52_spill] sm:$0xff]  ;;  %v12993_v60 = vld [vmem:[#allocation53_spill] sm:$0xff] }
 0x2f4   : > { %v5007_v9 = vadd.f32 %v5006_v3, %v5005_v18  ;;  %v5033_v29 = vadd.f32 %v5032_v8, %v5031_v0  ;;  %v3468_v59 = vmax.f32 %v1799_v31, 0.0  ;;  %v2154_v43 = vadd.f32 %v12991_v30, %v9462_v32 }
 0x2f5   : > { %v3470_v39 = vmax.f32 %v2152_v1, 0.0  ;;  %v3469_v48 = vmax.f32 %v1801_v17, 0.0  ;;  %v1803_v2 = vadd.f32 %v12992_v50, %v9452_v36  ;;  %v2156_v12 = vadd.f32 %v12993_v60, %v9454_v47  ;;  %v10830_v3 = vpop.f32.mrb[216].mxu1 }
 0x2f6   : > { %v10824_v40 = vsel %vm5306_vm9, %v5007_v9, %v10648_v7  ;;  %v10828_v18 = vsel %vm5306_vm9, %v5033_v29, %v10652_v53  ;;  %v4108_v8 = vmin.f32 %v3468_v59, 6.0  ;;  %v3471_v0 = vmax.f32 %v2154_v43, 0.0  ;;  %v10832_v51 = vpop.f32.mrb[216].mxu0  ;;  %v10834_v17 = vpop.f32.mrb[217].mxu1  ;;  %v12995_v7 = vld [vmem:[#allocation39_spill] sm:$0xff] }
 0x2f7   : > { %v4110_v33 = vmin.f32 %v3470_v39, 6.0  ;;  %v4109_v31 = vmin.f32 %v3469_v48, 6.0  ;;  %v3478_v35 = vmax.f32 %v1803_v2, 0.0  ;;  %v3480_v1 = vmax.f32 %v2156_v12, 0.0  ;;  %12994 = vst [vmem:[#allocation41_spill] sm:$0xff] %v10834_v17  ;;  %v10840_v29 = vpop.f32.mrb[217].mxu0 }
 0x2f8   : > { %v5113_v30 = vadd.f32 %v5112_v25, %v4108_v8  ;;  %v4111_v50 = vmin.f32 %v3471_v0, 6.0  ;;  %v1805_v9 = vadd.f32 %v12995_v7, %v9460_v61  ;;  %v2158_v53 = vadd.f32 %v10510_v16, %v9462_v32  ;;  %12996 = vst [vmem:[#allocation46_spill] sm:$0xff] %v10840_v29  ;;  %v10842_v59 = vpop.f32.mrb[218].mxu1  ;;  %v10844_v60 = vpop.f32.mrb[218].mxu0 }
 0x2f9   : > { %v5139_v43 = vadd.f32 %v5138_v11, %v4110_v33  ;;  %v5126_v39 = vadd.f32 %v5125_v38, %v4109_v31  ;;  %v4118_v48 = vmin.f32 %v3478_v35, 6.0  ;;  %v4120_v2 = vmin.f32 %v3480_v1, 6.0  ;;  %12997 = vst [vmem:[#allocation50_spill] sm:$0xff] %v10844_v60  ;;  %v10846_v12 = vpop.f32.mrb[219].mxu1  ;;  %v10850_v17 = vpop.f32.mrb[219].mxu0 }
 0x2fa   : > { %12998 = vst [vmem:[#allocation17_spill] sm:$0xff] %v10846_v12  ;;  %v5152_v25 = vadd.f32 %v5151_v13, %v4111_v50  ;;  %v3479_v8 = vmax.f32 %v1805_v9, 0.0  ;;  %v3481_v0 = vmax.f32 %v2158_v53, 0.0  ;;  %v1809_v7 = vadd.f32 %v10524_v54, %v9452_v36  ;;  %12999 = vst [vmem:[#allocation37_spill] sm:$0xff] %v10850_v17 }
 0x2fb   : > { %v5114_v16 = vadd.f32 %v5113_v30, %v4118_v48  ;;  %v5140_v29 = vadd.f32 %v5139_v43, %v4120_v2  ;;  %v2162_v11 = vadd.f32 %v10530_v26, %v9454_v47  ;;  %v1811_v38 = vadd.f32 %v10532_v37, %v9460_v61  ;;  %v13000_v30 = vld [vmem:[#allocation18_spill] sm:$0xff] }
 0x2fc   : > { %v4119_v33 = vmin.f32 %v3479_v8, 6.0  ;;  %v4121_v31 = vmin.f32 %v3481_v0, 6.0  ;;  %v3488_v35 = vmax.f32 %v1809_v7, 0.0  ;;  %v2164_v13 = vadd.f32 %v10536_v27, %v9462_v32 }
 0x2fd   : > { %v3490_v1 = vmax.f32 %v2162_v11, 0.0  ;;  %v3489_v50 = vmax.f32 %v1811_v38, 0.0  ;;  %v1813_v54 = vadd.f32 %v10538_v21, %v9452_v36  ;;  %v2166_v9 = vadd.f32 %v13000_v30, %v9454_v47  ;;  %v10862_v2 = vpop.f32.mrb[220].mxu1  ;;  %v13004_v21 = vld [vmem:[#allocation13_spill] sm:$0xff] }
 0x2fe   : > { %v5127_v53 = vadd.f32 %v5126_v39, %v4119_v33  ;;  %v5153_v43 = vadd.f32 %v5152_v25, %v4121_v31  ;;  %v4128_v26 = vmin.f32 %v3488_v35, 6.0  ;;  %v3491_v48 = vmax.f32 %v2164_v13, 0.0  ;;  %13001 = vst [vmem:[#allocation51_spill] sm:$0xff] %v10862_v2  ;;  %v10864_v17 = vpop.f32.mrb[220].mxu0  ;;  %v10866_v27 = vpop.f32.mrb[221].mxu1 }
 0x2ff   : > { %v4130_v37 = vmin.f32 %v3490_v1, 6.0  ;;  %v4129_v8 = vmin.f32 %v3489_v50, 6.0  ;;  %v3498_v0 = vmax.f32 %v1813_v54, 0.0  ;;  %v3500_v7 = vmax.f32 %v2166_v9, 0.0  ;;  %13002 = vst [vmem:[#allocation52_spill] sm:$0xff] %v10864_v17  ;;  %13003 = vst [vmem:[#allocation53_spill] sm:$0xff] %v10866_v27 }
 0x300   : > { %v5115_v11 = vadd.f32 %v5114_v16, %v4128_v26  ;;  %v4131_v38 = vmin.f32 %v3491_v48, 6.0  ;;  %v1815_v12 = vadd.f32 %v13004_v21, %v9460_v61  ;;  %v2168_v39 = vadd.f32 %v10548_v58, %v9462_v32  ;;  %v10872_v25 = vpop.f32.mrb[221].mxu0  ;;  %v10874_v33 = vpop.f32.mrb[222].mxu1 }
 0x301   : > { %13005 = vst [vmem:[#allocation39_spill] sm:$0xff] %v10872_v25  ;;  %13006 = vst [vmem:[#allocation18_spill] sm:$0xff] %v10874_v33  ;;  %v5141_v31 = vadd.f32 %v5140_v29, %v4130_v37  ;;  %v5128_v35 = vadd.f32 %v5127_v53, %v4129_v8  ;;  %v4138_v13 = vmin.f32 %v3498_v0, 6.0  ;;  %v4140_v1 = vmin.f32 %v3500_v7, 6.0  ;;  %v10876_v50 = vpop.f32.mrb[222].mxu0  ;;  %v10878_v54 = vpop.f32.mrb[223].mxu1 }
 0x302   : > { %13007 = vst [vmem:[#allocation13_spill] sm:$0xff] %v10876_v50  ;;  %13008 = vst [vmem:[#allocation59_spill] sm:$0xff] %v10878_v54  ;;  %v5154_v16 = vadd.f32 %v5153_v43, %v4131_v38  ;;  %v3499_v30 = vmax.f32 %v1815_v12, 0.0  ;;  %v3501_v9 = vmax.f32 %v2168_v39, 0.0  ;;  %v1819_v26 = vadd.f32 %v10562_v41, %v9452_v36  ;;  %v10882_v48 = vpop.f32.mrb[223].mxu0  ;;  %v13010_v33 = vld [vmem:[#allocation27_spill] sm:$0xff] }
 0x303   : > { %13009 = vst [vmem:[#allocation60_spill] sm:$0xff] %v10882_v48  ;;  %v5116_v58 = vadd.f32 %v5115_v11, %v4138_v13  ;;  %v5142_v21 = vadd.f32 %v5141_v31, %v4140_v1  ;;  %v2172_v29 = vadd.f32 %v13010_v33, %v9454_v47  ;;  %v13011_v53 = vld [vmem:[#allocation28_spill] sm:$0xff]  ;;  %v13012_v43 = vld [vmem:[#allocation47_spill] sm:$0xff]  ;;  %v13013_v41 = vld [vmem:[#allocation29_spill] sm:$0xff] }
 0x304   : > { %v1821_v37 = vadd.f32 %v13011_v53, %v9460_v61  ;;  %v4139_v8 = vmin.f32 %v3499_v30, 6.0  ;;  %v4141_v0 = vmin.f32 %v3501_v9, 6.0  ;;  %v3508_v7 = vmax.f32 %v1819_v26, 0.0  ;;  %v13014_v11 = vld [vmem:[#allocation30_spill] sm:$0xff] }
 0x305   : > { %v2174_v12 = vadd.f32 %v13012_v43, %v9462_v32  ;;  %v3510_v38 = vmax.f32 %v2172_v29, 0.0  ;;  %v1823_v54 = vadd.f32 %v13013_v41, %v9452_v36  ;;  %v2176_v31 = vadd.f32 %v13014_v11, %v9454_v47  ;;  %v10894_v50 = vpop.f32.mrb[224].mxu1  ;;  %v13018_v36 = vld [vmem:[#allocation15_spill] sm:$0xff]  ;;  %v13019_v47 = vld [vmem:[#allocation48_spill] sm:$0xff] }
 0x306   : > { %v3509_v39 = vmax.f32 %v1821_v37, 0.0  ;;  %v5129_v13 = vadd.f32 %v5128_v35, %v4139_v8  ;;  %v5155_v1 = vadd.f32 %v5154_v16, %v4141_v0  ;;  %v4148_v33 = vmin.f32 %v3508_v7, 6.0  ;;  %13015 = vst [vmem:[#allocation27_spill] sm:$0xff] %v10894_v50  ;;  %v10896_v25 = vpop.f32.mrb[224].mxu0  ;;  %v10898_v29 = vpop.f32.mrb[225].mxu1 }
 0x307   : > { %v3511_v48 = vmax.f32 %v2174_v12, 0.0  ;;  %v4150_v30 = vmin.f32 %v3510_v38, 6.0  ;;  %v3518_v26 = vmax.f32 %v1823_v54, 0.0  ;;  %v3520_v53 = vmax.f32 %v2176_v31, 0.0  ;;  %13016 = vst [vmem:[#allocation28_spill] sm:$0xff] %v10896_v25  ;;  %13017 = vst [vmem:[#allocation47_spill] sm:$0xff] %v10898_v29 }
 0x308   : > { %v4149_v9 = vmin.f32 %v3509_v39, 6.0  ;;  %v5117_v37 = vadd.f32 %v5116_v58, %v4148_v33  ;;  %v1825_v41 = vadd.f32 %v13018_v36, %v9460_v61  ;;  %v2178_v35 = vadd.f32 %v13019_v47, %v9462_v32  ;;  %v915_v16 = vld [vmem:[%s12604_s2 + $0x8] sm:$0x3]  ;;  %v10907_v8 = vpop.f32.mrb[225].mxu0  ;;  %v10909_v54 = vpop.f32.mrb[226].mxu1  ;;  %v13024_v32 = vld [vmem:[#allocation12_spill] sm:$0xff] }
 0x309   : > { %v4151_v43 = vmin.f32 %v3511_v48, 6.0  ;;  %13020 = vst [vmem:[#allocation29_spill] sm:$0xff] %v10907_v8  ;;  %13021 = vst [vmem:[#allocation30_spill] sm:$0xff] %v10909_v54  ;;  %v5143_v0 = vadd.f32 %v5142_v21, %v4150_v30  ;;  %v4158_v12 = vmin.f32 %v3518_v26, 6.0  ;;  %v4160_v38 = vmin.f32 %v3520_v53, 6.0  ;;  %v10911_v58 = vpop.f32.mrb[226].mxu0 }
 0x30a   : > { %v5130_v7 = vadd.f32 %v5129_v13, %v4149_v9  ;;  %13022 = vst [vmem:[#allocation15_spill] sm:$0xff] %v10911_v58  ;;  %v10913_v48 = vpop.f32.mrb[227].mxu1  ;;  %v3519_v39 = vmax.f32 %v1825_v41, 0.0  ;;  %v3521_v11 = vmax.f32 %v2178_v35, 0.0  ;;  %v944_v31 = vsub.s32 6, %v13024_v32  ;;  %v10916_v33 = vpop.f32.mrb[227].mxu0 }
 0x30b   : > { %13023 = vst [vmem:[#allocation48_spill] sm:$0xff] %v10913_v48  ;;  %v5156_v61 = vadd.f32 %v5155_v1, %v4151_v43  ;;  %13025 = vst [vmem:[#allocation12_spill] sm:$0xff] %v10916_v33  ;;  %v5118_v36 = vadd.f32 %v5117_v37, %v4158_v12  ;;  %v5144_v47 = vadd.f32 %v5143_v0, %v4160_v38  ;;  %v13026_v8 = vld [vmem:[#allocation14_spill] sm:$0xff]  ;;  %v948_v21 = vsub.s32 7, %v13024_v32  ;;  %v13027_v26 = vld [vmem:[#allocation44_spill] sm:$0xff] }
 0x30c   : > { %v10919_v29 = vrot.slane %v915_v16, %v13026_v8  ;;  %v4159_v13 = vmin.f32 %v3519_v39, 6.0  ;;  %v4161_v30 = vmin.f32 %v3521_v11, 6.0  ;;  %v7408_v9 = vld [vmem:[%s12604_s2] sm:$0xff]  ;;  %v10928_v53 = vrot.slane %v915_v16, %v13027_v26  ;;  %v13028_v37 = vld [vmem:[#allocation32_spill] sm:$0xff]  ;;  %v13029_v38 = vld [vmem:[#allocation31_spill] sm:$0xff] }
 0x30d   : > { %v10925_v1 = vrot.slane %v7408_v9, %v944_v31  ;;  %v5119_v43 = vrot.slane %v5118_v36, 4  ;;  %v5145_v41 = vrot.slane %v5144_v47, 4  ;;  %v10932_v8 = vrot.slane %v7408_v9, %v948_v21  ;;  %v13030_v11 = vld [vmem:[#allocation55_spill] sm:$0xff]  ;;  %v10938_v31 = vpop.f32.mrb[228].mxu1  ;;  %v13032_v48 = vld [vmem:[#allocation33_spill] sm:$0xff] }
 0x30e   : > { %v2568_v35 = vadd.f32 %v13028_v37, %v10919_v29  ;;  %v5131_v0 = vadd.f32 %v5130_v7, %v4159_v13  ;;  %v5157_v12 = vadd.f32 %v5156_v61, %v4161_v30  ;;  %v2570_v32 = vadd.f32 %v13030_v11, %v10928_v53  ;;  %13031 = vst [vmem:[#allocation32_spill] sm:$0xff] %v10938_v31  ;;  %v10942_v54 = vpop.f32.mrb[228].mxu0  ;;  %v10944_v21 = vpop.f32.mrb[229].mxu1 }
 0x30f   : > { %v2215_v39 = vadd.f32 %v13029_v38, %v10925_v1  ;;  %v5120_v33 = vadd.f32 %v5119_v43, %v5118_v36  ;;  %v5146_v16 = vadd.f32 %v5145_v41, %v5144_v47  ;;  %v2217_v58 = vadd.f32 %v13032_v48, %v10932_v8  ;;  %13033 = vst [vmem:[#allocation31_spill] sm:$0xff] %v10942_v54  ;;  %v10946_v9 = vpop.f32.mrb[229].mxu0  ;;  %v10948_v37 = vpop.f32.mrb[230].mxu1 }
 0x310   : > { %v2894_v26 = vmax.f32 %v2568_v35, 0.0  ;;  %13034 = vst [vmem:[#allocation55_spill] sm:$0xff] %v10944_v21  ;;  %v5132_v7 = vrot.slane %v5131_v0, 4  ;;  %v5158_v61 = vrot.slane %v5157_v12, 4  ;;  %v2895_v30 = vmax.f32 %v2570_v32, 0.0  ;;  %13035 = vst [vmem:[#allocation33_spill] sm:$0xff] %v10946_v9 }
 0x311   : > { %v2892_v13 = vmax.f32 %v2215_v39, 0.0  ;;  %13036 = vst [vmem:[#allocation61_spill] sm:$0xff] %v10948_v37  ;;  %v5121_v38 = vrot.slane %v5120_v33, 2  ;;  %v5147_v11 = vrot.slane %v5146_v16, 2  ;;  %v2893_v47 = vmax.f32 %v2217_v58, 0.0  ;;  %v10950_v43 = vpop.f32.mrb[230].mxu0 }
 0x312   : > { %v3534_v36 = vmin.f32 %v2894_v26, 6.0  ;;  %13037 = vst [vmem:[#allocation62_spill] sm:$0xff] %v10950_v43  ;;  %v10952_v41 = vpop.f32.mrb[231].mxu1  ;;  %v5133_v48 = vadd.f32 %v5132_v7, %v5131_v0  ;;  %v5159_v35 = vadd.f32 %v5158_v61, %v5157_v12  ;;  %v3535_v21 = vmin.f32 %v2895_v30, 6.0  ;;  %v10954_v31 = vpop.f32.mrb[231].mxu0  ;;  %v13040_v9 = vld [vmem:[#allocation56_spill] sm:$0xff] }
 0x313   : > { %13038 = vst [vmem:[#allocation63_spill] sm:$0xff] %v10952_v41  ;;  %v3532_v54 = vmin.f32 %v2892_v13, 6.0  ;;  %13039 = vst [vmem:[#allocation64_spill] sm:$0xff] %v10954_v31  ;;  %v5122_v39 = vadd.f32 %v5121_v38, %v5120_v33  ;;  %v5148_v32 = vadd.f32 %v5147_v11, %v5146_v16  ;;  %v3533_v25 = vmin.f32 %v2893_v47, 6.0  ;;  %v13041_v58 = vld [vmem:[#allocation57_spill] sm:$0xff] }
 0x314   : > { %v2219_v37 = vadd.f32 %v13040_v9, %v10925_v1  ;;  %v5134_v50 = vrot.slane %v5133_v48, 2  ;;  %v5160_v27 = vrot.slane %v5159_v35, 2  ;;  %v2572_v26 = vadd.f32 %v13041_v58, %v10919_v29  ;;  %v4168_v9 = vld [vmem:[#allocation2 + $0x10] sm:$0xff]  ;;  %v4170_v47 = vld [vmem:[#allocation2 + $0x20] sm:$0xff] }
 0x315   : > { %v2221_v41 = vadd.f32 %v10610_v52, %v10932_v8  ;;  %v5123_v0 = vrot.slane %v5122_v39, 1  ;;  %v5149_v12 = vrot.slane %v5148_v32, 1  ;;  %v2574_v61 = vadd.f32 %v10612_v4, %v10928_v53  ;;  %v10964_v38 = vpop.f32.mrb[232].mxu1 }
 0x316   : > { %v2902_v7 = vmax.f32 %v2219_v37, 0.0  ;;  %v5135_v33 = vadd.f32 %v5134_v50, %v5133_v48  ;;  %v5161_v16 = vadd.f32 %v5160_v27, %v5159_v35  ;;  %v2904_v13 = vmax.f32 %v2572_v26, 0.0  ;;  %v10966_v17 = vpop.f32.mrb[232].mxu0  ;;  %v10968_v52 = vpop.f32.mrb[233].mxu1 }
 0x317   : > { %v2903_v30 = vmax.f32 %v2221_v41, 0.0  ;;  %v5124_v11 = vadd.f32 %v5123_v0, %v5122_v39  ;;  %v5150_v31 = vadd.f32 %v5149_v12, %v5148_v32  ;;  %v2905_v43 = vmax.f32 %v2574_v61, 0.0  ;;  %13042 = vst [vmem:[#allocation56_spill] sm:$0xff] %v10968_v52  ;;  %v10970_v50 = vpop.f32.mrb[233].mxu0  ;;  %v10972_v27 = vpop.f32.mrb[234].mxu1 }
 0x318   : > { %v3542_v58 = vmin.f32 %v2902_v7, 6.0  ;;  %v5136_v37 = vrot.slane %v5135_v33, 1  ;;  %v5162_v2 = vrot.slane %v5161_v16, 1  ;;  %v3544_v60 = vmin.f32 %v2904_v13, 6.0  ;;  %13043 = vst [vmem:[#allocation57_spill] sm:$0xff] %v10970_v50  ;;  %13044 = vst [vmem:[#allocation65_spill] sm:$0xff] %v10972_v27 }
 0x319   : > { %v3543_v4 = vmin.f32 %v2903_v30, 6.0  ;;  %v5323_v41 = vsel %vm5308_vm10, %v5124_v11, %v10806_v23  ;;  %v5337_v48 = vsel %vm5308_vm10, %v5150_v31, %v10810_v57  ;;  %v3545_v39 = vmin.f32 %v2905_v43, 6.0  ;;  %v10978_v32 = vpop.f32.mrb[234].mxu0  ;;  %v10980_v26 = vpop.f32.mrb[235].mxu1  ;;  %v4169_v7 = vld [vmem:[#allocation2 + $0x18] sm:$0xff]  ;;  %v4171_v13 = vld [vmem:[#allocation2 + $0x28] sm:$0xff] }
 0x31a   : > { %v4254_v35 = vadd.f32 %v3542_v58, %v3532_v54  ;;  %v5385_v0 = vadd.f32 %v5323_v41, %v4168_v9  ;;  %v5387_v12 = vadd.f32 %v5337_v48, %v4170_v47  ;;  %v5137_v61 = vadd.f32 %v5136_v37, %v5135_v33  ;;  %v10982_v50 = vpop.f32.mrb[235].mxu0 }
 0x31b   : > { %v5163_v30 = vadd.f32 %v5162_v2, %v5161_v16  ;;  %v4280_v27 = vadd.f32 %v3544_v60, %v3534_v36  ;;  %v4267_v52 = vadd.f32 %v3543_v4, %v3533_v25  ;;  %v4293_v23 = vadd.f32 %v3545_v39, %v3535_v21 }
 0x31c   : > { %v2225_v57 = vadd.f32 %v10636_v14, %v10925_v1  ;;  %5395 = vst [vmem:[#allocation2 + $0x10] sm:$0xff] %v5385_v0  ;;  %5397 = vst [vmem:[#allocation2 + $0x20] sm:$0xff] %v5387_v12  ;;  %v5330_v54 = vsel %vm5308_vm10, %v5137_v61, %v10824_v40  ;;  %v2578_v43 = vadd.f32 %v10642_v45, %v10919_v29 }
 0x31d   : > { %v5344_v31 = vsel %vm5308_vm10, %v5163_v30, %v10828_v18  ;;  %v2227_v2 = vadd.f32 %v10644_v55, %v10932_v8  ;;  %v5386_v60 = vadd.f32 %v5330_v54, %v4169_v7  ;;  %v2580_v14 = vadd.f32 %v10654_v62, %v10928_v53  ;;  %v11000_v16 = vpop.f32.mrb[236].mxu1 }
 0x31e   : > { %v5388_v25 = vadd.f32 %v5344_v31, %v4171_v13  ;;  %v2912_v21 = vmax.f32 %v2225_v57, 0.0  ;;  %v2914_v36 = vmax.f32 %v2578_v43, 0.0  ;;  %v2229_v40 = vadd.f32 %v10656_v22, %v10925_v1  ;;  %v11006_v11 = vpop.f32.mrb[236].mxu0  ;;  %v11008_v47 = vpop.f32.mrb[237].mxu1 }
 0x31f   : > { %v2913_v33 = vmax.f32 %v2227_v2, 0.0  ;;  %v2582_v18 = vadd.f32 %v10658_v5, %v10919_v29  ;;  %5396 = vst [vmem:[#allocation2 + $0x18] sm:$0xff] %v5386_v60  ;;  %v2915_v55 = vmax.f32 %v2580_v14, 0.0  ;;  %v2231_v9 = vadd.f32 %v10660_v56, %v10932_v8  ;;  %v11010_v4 = vpop.f32.mrb[237].mxu0  ;;  %v11012_v41 = vpop.f32.mrb[238].mxu1 }
 0x320   : > { %5398 = vst [vmem:[#allocation2 + $0x28] sm:$0xff] %v5388_v25  ;;  %v3552_v45 = vmin.f32 %v2912_v21, 6.0  ;;  %v2584_v62 = vadd.f32 %v10666_v20, %v10928_v53  ;;  %v3554_v22 = vmin.f32 %v2914_v36, 6.0  ;;  %v2922_v37 = vmax.f32 %v2229_v40, 0.0  ;;  %v11014_v56 = vpop.f32.mrb[238].mxu0  ;;  %v11016_v7 = vpop.f32.mrb[239].mxu1 }
 0x321   : > { %v3553_v58 = vmin.f32 %v2913_v33, 6.0  ;;  %v2924_v5 = vmax.f32 %v2582_v18, 0.0  ;;  %v3555_v39 = vmin.f32 %v2915_v55, 6.0  ;;  %v2923_v0 = vmax.f32 %v2231_v9, 0.0  ;;  %v11018_v57 = vpop.f32.mrb[239].mxu0  ;;  %v13046_v9 = vld [vmem:[#allocation19_spill] sm:$0xff] }
 0x322   : > { %v4255_v48 = vadd.f32 %v4254_v35, %v3552_v45  ;;  %v2925_v12 = vmax.f32 %v2584_v62, 0.0  ;;  %v4281_v20 = vadd.f32 %v4280_v27, %v3554_v22  ;;  %v3562_v13 = vmin.f32 %v2922_v37, 6.0 }
 0x323   : > { %v4268_v61 = vadd.f32 %v4267_v52, %v3553_v58  ;;  %v3564_v30 = vmin.f32 %v2924_v5, 6.0  ;;  %v4294_v54 = vadd.f32 %v4293_v23, %v3555_v39  ;;  %v3563_v31 = vmin.f32 %v2923_v0, 6.0 }
 0x324   : > { %v3565_v43 = vmin.f32 %v2925_v12, 6.0  ;;  %v2235_v2 = vadd.f32 %v10682_v34, %v10925_v1  ;;  %v4256_v35 = vadd.f32 %v4255_v48, %v3562_v13  ;;  %v2588_v25 = vadd.f32 %v10688_v46, %v10919_v29 }
 0x325   : > { %v4282_v60 = vadd.f32 %v4281_v20, %v3564_v30  ;;  %v2237_v21 = vadd.f32 %v10690_v6, %v10932_v8  ;;  %v4269_v27 = vadd.f32 %v4268_v61, %v3563_v31  ;;  %v2590_v36 = vadd.f32 %v10692_v28, %v10928_v53  ;;  %v13045_v6 = vld [vmem:[#allocation34_spill] sm:$0xff] }
 0x326   : > { %v4295_v52 = vadd.f32 %v4294_v54, %v3565_v43  ;;  %v2932_v14 = vmax.f32 %v2235_v2, 0.0  ;;  %v2934_v23 = vmax.f32 %v2588_v25, 0.0  ;;  %v2239_v40 = vadd.f32 %v10694_v19, %v10925_v1  ;;  %v11032_v18 = vpop.f32.mrb[240].mxu1 }
 0x327   : > { %v2933_v33 = vmax.f32 %v2237_v21, 0.0  ;;  %v2592_v34 = vadd.f32 %v10696_v49, %v10919_v29  ;;  %v2935_v45 = vmax.f32 %v2590_v36, 0.0  ;;  %v2241_v55 = vadd.f32 %v13045_v6, %v10932_v8  ;;  %v11038_v22 = vpop.f32.mrb[240].mxu0  ;;  %v11040_v28 = vpop.f32.mrb[241].mxu1  ;;  %v13052_v36 = vld [vmem:[#allocation36_spill] sm:$0xff] }
 0x328   : > { %v3572_v46 = vmin.f32 %v2932_v14, 6.0  ;;  %v2594_v62 = vadd.f32 %v13046_v9, %v10928_v53  ;;  %v3574_v58 = vmin.f32 %v2934_v23, 6.0  ;;  %v2942_v19 = vmax.f32 %v2239_v40, 0.0  ;;  %v11042_v48 = vpop.f32.mrb[241].mxu0  ;;  %v11044_v49 = vpop.f32.mrb[242].mxu1  ;;  %v13053_v40 = vld [vmem:[#allocation21_spill] sm:$0xff] }
 0x329   : > { %v3573_v37 = vmin.f32 %v2933_v33, 6.0  ;;  %v2944_v5 = vmax.f32 %v2592_v34, 0.0  ;;  %13047 = vst [vmem:[#allocation34_spill] sm:$0xff] %v11042_v48  ;;  %13048 = vst [vmem:[#allocation19_spill] sm:$0xff] %v11044_v49  ;;  %v3575_v0 = vmin.f32 %v2935_v45, 6.0  ;;  %v2943_v12 = vmax.f32 %v2241_v55, 0.0 }
 0x32a   : > { %v4257_v39 = vadd.f32 %v4256_v35, %v3572_v46  ;;  %v2945_v20 = vmax.f32 %v2594_v62, 0.0  ;;  %v11046_v61 = vpop.f32.mrb[242].mxu0  ;;  %v11048_v13 = vpop.f32.mrb[243].mxu1  ;;  %v4283_v30 = vadd.f32 %v4282_v60, %v3574_v58  ;;  %v3582_v31 = vmin.f32 %v2942_v19, 6.0  ;;  %v13054_v46 = vld [vmem:[#allocation23_spill] sm:$0xff]  ;;  %v13055_v55 = vld [vmem:[#allocation20_spill] sm:$0xff] }
 0x32b   : > { %13049 = vst [vmem:[#allocation66_spill] sm:$0xff] %v11046_v61  ;;  %13050 = vst [vmem:[#allocation67_spill] sm:$0xff] %v11048_v13  ;;  %v4270_v54 = vadd.f32 %v4269_v27, %v3573_v37  ;;  %v3584_v43 = vmin.f32 %v2944_v5, 6.0  ;;  %v11050_v2 = vpop.f32.mrb[243].mxu0  ;;  %v4296_v25 = vadd.f32 %v4295_v52, %v3575_v0  ;;  %v3583_v21 = vmin.f32 %v2943_v12, 6.0  ;;  %v13056_v58 = vld [vmem:[#allocation54_spill] sm:$0xff] }
 0x32c   : > { %13051 = vst [vmem:[#allocation68_spill] sm:$0xff] %v11050_v2  ;;  %v3585_v14 = vmin.f32 %v2945_v20, 6.0  ;;  %v2245_v23 = vadd.f32 %v13052_v36, %v10925_v1  ;;  %v4258_v35 = vadd.f32 %v4257_v39, %v3582_v31  ;;  %v2598_v34 = vadd.f32 %v13053_v40, %v10919_v29  ;;  %v13057_v19 = vld [vmem:[#allocation25_spill] sm:$0xff]  ;;  %v13059_v20 = vld [vmem:[#allocation38_spill] sm:$0xff] }
 0x32d   : > { %v4284_v33 = vadd.f32 %v4283_v30, %v3584_v43  ;;  %v2247_v45 = vadd.f32 %v13054_v46, %v10932_v8  ;;  %v4271_v60 = vadd.f32 %v4270_v54, %v3583_v21  ;;  %v2600_v9 = vadd.f32 %v13055_v55, %v10928_v53  ;;  %v13060_v54 = vld [vmem:[#allocation42_spill] sm:$0xff] }
 0x32e   : > { %v4297_v27 = vadd.f32 %v4296_v25, %v3585_v14  ;;  %v2952_v6 = vmax.f32 %v2245_v23, 0.0  ;;  %v2954_v52 = vmax.f32 %v2598_v34, 0.0  ;;  %v2249_v37 = vadd.f32 %v13056_v58, %v10925_v1  ;;  %v11064_v39 = vpop.f32.mrb[244].mxu1 }
 0x32f   : > { %v2953_v62 = vmax.f32 %v2247_v45, 0.0  ;;  %v2602_v5 = vadd.f32 %v13057_v19, %v10919_v29  ;;  %13058 = vst [vmem:[#allocation36_spill] sm:$0xff] %v11064_v39  ;;  %v2955_v12 = vmax.f32 %v2600_v9, 0.0  ;;  %v2251_v30 = vadd.f32 %v13059_v20, %v10932_v8  ;;  %v11070_v43 = vpop.f32.mrb[244].mxu0  ;;  %v11072_v25 = vpop.f32.mrb[245].mxu1 }
 0x330   : > { %v3592_v0 = vmin.f32 %v2952_v6, 6.0  ;;  %v2604_v31 = vadd.f32 %v13060_v54, %v10928_v53  ;;  %13061 = vst [vmem:[#allocation21_spill] sm:$0xff] %v11070_v43  ;;  %13062 = vst [vmem:[#allocation23_spill] sm:$0xff] %v11072_v25  ;;  %v3594_v21 = vmin.f32 %v2954_v52, 6.0  ;;  %v2962_v36 = vmax.f32 %v2249_v37, 0.0  ;;  %v11074_v40 = vpop.f32.mrb[245].mxu0 }
 0x331   : > { %v3593_v14 = vmin.f32 %v2953_v62, 6.0  ;;  %v2964_v23 = vmax.f32 %v2602_v5, 0.0  ;;  %13063 = vst [vmem:[#allocation20_spill] sm:$0xff] %v11074_v40  ;;  %v11076_v34 = vpop.f32.mrb[246].mxu1  ;;  %v3595_v45 = vmin.f32 %v2955_v12, 6.0  ;;  %v2963_v6 = vmax.f32 %v2251_v30, 0.0 }
 0x332   : > { %13064 = vst [vmem:[#allocation54_spill] sm:$0xff] %v11076_v34  ;;  %v4259_v46 = vadd.f32 %v4258_v35, %v3592_v0  ;;  %v2965_v55 = vmax.f32 %v2604_v31, 0.0  ;;  %v11078_v9 = vpop.f32.mrb[246].mxu0  ;;  %v11080_v58 = vpop.f32.mrb[247].mxu1  ;;  %v4285_v19 = vadd.f32 %v4284_v33, %v3594_v21  ;;  %v3602_v54 = vmin.f32 %v2962_v36, 6.0  ;;  %v13068_v40 = vld [vmem:[#allocation45_spill] sm:$0xff] }
 0x333   : > { %13065 = vst [vmem:[#allocation25_spill] sm:$0xff] %v11078_v9  ;;  %13066 = vst [vmem:[#allocation38_spill] sm:$0xff] %v11080_v58  ;;  %v4272_v20 = vadd.f32 %v4271_v60, %v3593_v14  ;;  %v3604_v25 = vmin.f32 %v2964_v23, 6.0  ;;  %v11082_v52 = vpop.f32.mrb[247].mxu0  ;;  %v4298_v62 = vadd.f32 %v4297_v27, %v3595_v45  ;;  %v3603_v37 = vmin.f32 %v2963_v6, 6.0  ;;  %v13069_v12 = vld [vmem:[#allocation22_spill] sm:$0xff] }
 0x334   : > { %13067 = vst [vmem:[#allocation42_spill] sm:$0xff] %v11082_v52  ;;  %v3605_v5 = vmin.f32 %v2965_v55, 6.0  ;;  %v2255_v34 = vadd.f32 %v13068_v40, %v10925_v1  ;;  %v4260_v35 = vadd.f32 %v4259_v46, %v3602_v54  ;;  %v2608_v30 = vadd.f32 %v13069_v12, %v10919_v29  ;;  %v13070_v31 = vld [vmem:[#allocation35_spill] sm:$0xff]  ;;  %v13071_v14 = vld [vmem:[#allocation24_spill] sm:$0xff] }
 0x335   : > { %v4286_v0 = vadd.f32 %v4285_v19, %v3604_v25  ;;  %v2257_v58 = vadd.f32 %v13070_v31, %v10932_v8  ;;  %v4273_v33 = vadd.f32 %v4272_v20, %v3603_v37  ;;  %v2610_v36 = vadd.f32 %v13071_v14, %v10928_v53 }
 0x336   : > { %v4299_v60 = vadd.f32 %v4298_v62, %v3605_v5  ;;  %v2972_v21 = vmax.f32 %v2255_v34, 0.0  ;;  %v4261_v27 = vrot.slane %v4260_v35, 4  ;;  %v2974_v45 = vmax.f32 %v2608_v30, 0.0  ;;  %v11092_v55 = vpop.f32.mrb[248].mxu1 }
 0x337   : > { %v4287_v23 = vrot.slane %v4286_v0, 4  ;;  %v2973_v6 = vmax.f32 %v2257_v58, 0.0  ;;  %13072 = vst [vmem:[#allocation45_spill] sm:$0xff] %v11092_v55  ;;  %v4274_v40 = vrot.slane %v4273_v33, 4  ;;  %v2975_v19 = vmax.f32 %v2610_v36, 0.0  ;;  %v11094_v54 = vpop.f32.mrb[248].mxu0 }
 0x338   : > { %v4300_v25 = vrot.slane %v4299_v60, 4  ;;  %v3612_v46 = vmin.f32 %v2972_v21, 6.0  ;;  %13073 = vst [vmem:[#allocation22_spill] sm:$0xff] %v11094_v54  ;;  %v11096_v12 = vpop.f32.mrb[249].mxu1  ;;  %v4262_v20 = vadd.f32 %v4261_v27, %v4260_v35  ;;  %v3614_v34 = vmin.f32 %v2974_v45, 6.0  ;;  %v11098_v5 = vpop.f32.mrb[249].mxu0 }
 0x339   : > { %13074 = vst [vmem:[#allocation35_spill] sm:$0xff] %v11096_v12  ;;  %v4288_v62 = vadd.f32 %v4287_v23, %v4286_v0  ;;  %v3613_v37 = vmin.f32 %v2973_v6, 6.0  ;;  %13075 = vst [vmem:[#allocation24_spill] sm:$0xff] %v11098_v5  ;;  %v11100_v31 = vpop.f32.mrb[250].mxu1  ;;  %v4275_v30 = vadd.f32 %v4274_v40, %v4273_v33  ;;  %v3615_v14 = vmin.f32 %v2975_v19, 6.0  ;;  %v13077_v55 = vld [vmem:[#allocation40_spill] sm:$0xff] }
 0x33a   : > { %13076 = vst [vmem:[#allocation69_spill] sm:$0xff] %v11100_v31  ;;  %v4301_v58 = vadd.f32 %v4300_v25, %v4299_v60  ;;  %v2259_v52 = vadd.f32 %v13077_v55, %v10925_v1  ;;  %v11104_v21 = vpop.f32.mrb[250].mxu0  ;;  %v11106_v36 = vpop.f32.mrb[251].mxu1  ;;  %v4263_v54 = vrot.slane %v4262_v20, 2  ;;  %v13080_v35 = vld [vmem:[#allocation26_spill] sm:$0xff]  ;;  %v13083_v40 = vld [vmem:[#allocation43_spill] sm:$0xff] }
 0x33b   : > { %13078 = vst [vmem:[#allocation40_spill] sm:$0xff] %v11104_v21  ;;  %13079 = vst [vmem:[#allocation70_spill] sm:$0xff] %v11106_v36  ;;  %v4289_v12 = vrot.slane %v4288_v62, 2  ;;  %v2612_v0 = vadd.f32 %v13080_v35, %v10919_v29  ;;  %v13081_v27 = vld [vmem:[#allocation58_spill] sm:$0xff]  ;;  %v11112_v45 = vpop.f32.mrb[251].mxu0  ;;  %v4276_v33 = vrot.slane %v4275_v30, 2  ;;  %v2614_v55 = vadd.f32 %v13083_v40, %v10928_v53 }
 0x33c   : > { %v2261_v23 = vadd.f32 %v13081_v27, %v10932_v8  ;;  %13082 = vst [vmem:[#allocation26_spill] sm:$0xff] %v11112_v45  ;;  %v4302_v60 = vrot.slane %v4301_v58, 2  ;;  %v2982_v6 = vmax.f32 %v2259_v52, 0.0  ;;  %v4264_v25 = vadd.f32 %v4263_v54, %v4262_v20 }
 0x33d   : > { %v4290_v19 = vadd.f32 %v4289_v12, %v4288_v62  ;;  %v2984_v21 = vmax.f32 %v2612_v0, 0.0  ;;  %v4277_v31 = vadd.f32 %v4276_v33, %v4275_v30  ;;  %v2985_v43 = vmax.f32 %v2614_v55, 0.0 }
 0x33e   : > { %v2983_v36 = vmax.f32 %v2261_v23, 0.0  ;;  %v4303_v5 = vadd.f32 %v4302_v60, %v4301_v58  ;;  %v3622_v9 = vmin.f32 %v2982_v6, 6.0  ;;  %v4265_v35 = vrot.slane %v4264_v25, 1  ;;  %v11116_v13 = vpop.f32.mrb[252].mxu1 }
 0x33f   : > { %v4291_v39 = vrot.slane %v4290_v19, 1  ;;  %v3624_v2 = vmin.f32 %v2984_v21, 6.0  ;;  %v4278_v45 = vrot.slane %v4277_v31, 1  ;;  %v3625_v49 = vmin.f32 %v2985_v43, 6.0  ;;  %v11118_v48 = vpop.f32.mrb[252].mxu0  ;;  %v11120_v54 = vpop.f32.mrb[253].mxu1 }
 0x340   : > { %v3623_v27 = vmin.f32 %v2983_v36, 6.0  ;;  %v4304_v61 = vrot.slane %v4303_v5, 1  ;;  %v4384_v52 = vadd.f32 %v3622_v9, %v3612_v46  ;;  %v11122_v12 = vadd.f32 %v4265_v35, %v4264_v25  ;;  %v11126_v58 = vpop.f32.mrb[253].mxu0  ;;  %v11128_v21 = vpop.f32.mrb[254].mxu1  ;;  %v13084_v43 = vld [vmem:[#allocation49_spill] sm:$0xff] }
 0x341   : > { %v11124_v20 = vadd.f32 %v4291_v39, %v4290_v19  ;;  %v4410_v62 = vadd.f32 %v3624_v2, %v3614_v34  ;;  %v11130_v36 = vadd.f32 %v4278_v45, %v4277_v31  ;;  %v4423_v9 = vadd.f32 %v3625_v49, %v3615_v14  ;;  %v11136_v23 = vpop.f32.mrb[254].mxu0  ;;  %v11138_v33 = vpop.f32.mrb[255].mxu1  ;;  %v13086_v39 = vld [vmem:[#allocation16_spill] sm:$0xff] }
 0x342   : > { %v4397_v30 = vadd.f32 %v3623_v27, %v3613_v37  ;;  %v11132_v0 = vadd.f32 %v4304_v61, %v4303_v5  ;;  %v2265_v46 = vadd.f32 %v13084_v43, %v10925_v1  ;;  %13085 = vst [vmem:[#allocation58_spill] sm:$0xff] %v11138_v33  ;;  %v2618_v2 = vadd.f32 %v13086_v39, %v10919_v29  ;;  %v11148_v49 = vpop.f32.mrb[255].mxu0 }
 0x343   : > { %v2267_v34 = vadd.f32 %v10790_v42, %v10932_v8  ;;  %v2620_v37 = vadd.f32 %v10792_v15, %v10928_v53  ;;  %v2269_v61 = vadd.f32 %v10794_v10, %v10925_v1  ;;  %13087 = vst [vmem:[#allocation43_spill] sm:$0xff] %v11148_v49  ;;  %v2622_v31 = vadd.f32 %v10796_v24, %v10919_v29 }
 0x344   : > { %v2992_v5 = vmax.f32 %v2265_v46, 0.0  ;;  %v2271_v14 = vadd.f32 %v10798_v63, %v10932_v8  ;;  %v2624_v45 = vadd.f32 %v10802_v44, %v10928_v53  ;;  %v2994_v60 = vmax.f32 %v2618_v2, 0.0 }
 0x345   : > { %v2993_v42 = vmax.f32 %v2267_v34, 0.0  ;;  %v2995_v6 = vmax.f32 %v2620_v37, 0.0  ;;  %v3002_v40 = vmax.f32 %v2269_v61, 0.0  ;;  %v3004_v55 = vmax.f32 %v2622_v31, 0.0 }
 0x346   : > { %v3632_v15 = vmin.f32 %v2992_v5, 6.0  ;;  %v3003_v25 = vmax.f32 %v2271_v14, 0.0  ;;  %v3005_v10 = vmax.f32 %v2624_v45, 0.0  ;;  %v3634_v19 = vmin.f32 %v2994_v60, 6.0  ;;  %v11156_v46 = vpop.f32.mrb[0].mxu1  ;;  %v13093_v45 = vld [vmem:[#allocation41_spill] sm:$0xff] }
 0x347   : > { %v3633_v35 = vmin.f32 %v2993_v42, 6.0  ;;  %v3635_v27 = vmin.f32 %v2995_v6, 6.0  ;;  %v3642_v43 = vmin.f32 %v3002_v40, 6.0  ;;  %13088 = vst [vmem:[#allocation49_spill] sm:$0xff] %v11156_v46  ;;  %v3644_v39 = vmin.f32 %v3004_v55, 6.0  ;;  %v11158_v33 = vpop.f32.mrb[0].mxu0 }
 0x348   : > { %v4385_v24 = vadd.f32 %v4384_v52, %v3632_v15  ;;  %v3643_v63 = vmin.f32 %v3003_v25, 6.0  ;;  %v3645_v49 = vmin.f32 %v3005_v10, 6.0  ;;  %13089 = vst [vmem:[#allocation16_spill] sm:$0xff] %v11158_v33  ;;  %v11160_v44 = vpop.f32.mrb[1].mxu1  ;;  %v4411_v2 = vadd.f32 %v4410_v62, %v3634_v19  ;;  %v11164_v5 = vpop.f32.mrb[1].mxu0  ;;  %v13094_v42 = vld [vmem:[#allocation46_spill] sm:$0xff] }
 0x349   : > { %13090 = vst [vmem:[#allocation71_spill] sm:$0xff] %v11160_v44  ;;  %v4398_v34 = vadd.f32 %v4397_v30, %v3633_v35  ;;  %v4424_v37 = vadd.f32 %v4423_v9, %v3635_v27  ;;  %v2275_v61 = vadd.f32 %v10830_v3, %v10925_v1  ;;  %13091 = vst [vmem:[#allocation72_spill] sm:$0xff] %v11164_v5  ;;  %v11166_v31 = vpop.f32.mrb[2].mxu1  ;;  %v11174_v62 = vpop.f32.mrb[2].mxu0  ;;  %v13098_v27 = vld [vmem:[#allocation50_spill] sm:$0xff] }
 0x34a   : > { %13092 = vst [vmem:[#allocation73_spill] sm:$0xff] %v11166_v31  ;;  %v4386_v14 = vadd.f32 %v4385_v24, %v3642_v43  ;;  %v2628_v52 = vadd.f32 %v10832_v51, %v10919_v29  ;;  %v2277_v60 = vadd.f32 %v13093_v45, %v10932_v8  ;;  %v2630_v6 = vadd.f32 %v13094_v42, %v10928_v53  ;;  %v11176_v30 = vpop.f32.mrb[3].mxu1  ;;  %v11178_v55 = vpop.f32.mrb[3].mxu0  ;;  %v13099_v24 = vld [vmem:[#allocation17_spill] sm:$0xff] }
 0x34b   : > { %13095 = vst [vmem:[#allocation41_spill] sm:$0xff] %v11174_v62  ;;  %13096 = vst [vmem:[#allocation46_spill] sm:$0xff] %v11176_v30  ;;  %v4412_v9 = vadd.f32 %v4411_v2, %v3644_v39  ;;  %v4399_v3 = vadd.f32 %v4398_v34, %v3643_v63  ;;  %v4425_v40 = vadd.f32 %v4424_v37, %v3645_v49  ;;  %v3012_v15 = vmax.f32 %v2275_v61, 0.0  ;;  %v13100_v39 = vld [vmem:[#allocation37_spill] sm:$0xff] }
 0x34c   : > { %13097 = vst [vmem:[#allocation74_spill] sm:$0xff] %v11178_v55  ;;  %v3014_v25 = vmax.f32 %v2628_v52, 0.0  ;;  %v3013_v10 = vmax.f32 %v2277_v60, 0.0  ;;  %v3015_v19 = vmax.f32 %v2630_v6, 0.0  ;;  %v2279_v51 = vadd.f32 %v10842_v59, %v10925_v1 }
 0x34d   : > { %v3652_v35 = vmin.f32 %v3012_v15, 6.0  ;;  %v2632_v43 = vadd.f32 %v13098_v27, %v10919_v29  ;;  %v2281_v45 = vadd.f32 %v13099_v24, %v10932_v8  ;;  %v2634_v63 = vadd.f32 %v13100_v39, %v10928_v53 }
 0x34e   : > { %v3654_v49 = vmin.f32 %v3014_v25, 6.0  ;;  %v3653_v2 = vmin.f32 %v3013_v10, 6.0  ;;  %v3655_v34 = vmin.f32 %v3015_v19, 6.0  ;;  %v3022_v37 = vmax.f32 %v2279_v51, 0.0  ;;  %v11188_v6 = vpop.f32.mrb[4].mxu1  ;;  %v13104_v10 = vld [vmem:[#allocation51_spill] sm:$0xff] }
 0x34f   : > { %v4387_v61 = vadd.f32 %v4386_v14, %v3652_v35  ;;  %v3024_v52 = vmax.f32 %v2632_v43, 0.0  ;;  %v3023_v60 = vmax.f32 %v2281_v45, 0.0  ;;  %v3025_v42 = vmax.f32 %v2634_v63, 0.0  ;;  %13101 = vst [vmem:[#allocation50_spill] sm:$0xff] %v11188_v6  ;;  %v11190_v30 = vpop.f32.mrb[4].mxu0  ;;  %v11192_v24 = vpop.f32.mrb[5].mxu1 }
 0x350   : > { %v4413_v59 = vadd.f32 %v4412_v9, %v3654_v49  ;;  %v4400_v15 = vadd.f32 %v4399_v3, %v3653_v2  ;;  %v4426_v55 = vadd.f32 %v4425_v40, %v3655_v34  ;;  %v3662_v27 = vmin.f32 %v3022_v37, 6.0  ;;  %13102 = vst [vmem:[#allocation17_spill] sm:$0xff] %v11190_v30  ;;  %13103 = vst [vmem:[#allocation37_spill] sm:$0xff] %v11192_v24  ;;  %v11196_v14 = vpop.f32.mrb[5].mxu0  ;;  %v11198_v51 = vpop.f32.mrb[6].mxu1  ;;  %v13107_v9 = vld [vmem:[#allocation52_spill] sm:$0xff] }
 0x351   : > { %v3664_v62 = vmin.f32 %v3024_v52, 6.0  ;;  %v3663_v39 = vmin.f32 %v3023_v60, 6.0  ;;  %v3665_v25 = vmin.f32 %v3025_v42, 6.0  ;;  %v2285_v19 = vadd.f32 %v13104_v10, %v10925_v1  ;;  %13105 = vst [vmem:[#allocation51_spill] sm:$0xff] %v11196_v14  ;;  %13106 = vst [vmem:[#allocation75_spill] sm:$0xff] %v11198_v51  ;;  %v13108_v40 = vld [vmem:[#allocation53_spill] sm:$0xff] }
 0x352   : > { %v4388_v35 = vadd.f32 %v4387_v61, %v3662_v27  ;;  %v2638_v3 = vadd.f32 %v13107_v9, %v10919_v29  ;;  %v2287_v43 = vadd.f32 %v13108_v40, %v10932_v8  ;;  %v13109_v45 = vld [vmem:[#allocation39_spill] sm:$0xff]  ;;  %v11206_v49 = vpop.f32.mrb[6].mxu0  ;;  %v11208_v2 = vpop.f32.mrb[7].mxu1  ;;  %v13113_v9 = vld [vmem:[#allocation18_spill] sm:$0xff]  ;;  %v13114_v14 = vld [vmem:[#allocation13_spill] sm:$0xff] }
 0x353   : > { %v2640_v63 = vadd.f32 %v13109_v45, %v10928_v53  ;;  %13110 = vst [vmem:[#allocation52_spill] sm:$0xff] %v11206_v49  ;;  %13111 = vst [vmem:[#allocation53_spill] sm:$0xff] %v11208_v2  ;;  %v4414_v34 = vadd.f32 %v4413_v59, %v3664_v62  ;;  %v4401_v37 = vadd.f32 %v4400_v15, %v3663_v39  ;;  %v3032_v60 = vmax.f32 %v2285_v19, 0.0  ;;  %v11210_v42 = vpop.f32.mrb[7].mxu0  ;;  %v13115_v49 = vld [vmem:[#allocation59_spill] sm:$0xff]  ;;  %v13116_v62 = vld [vmem:[#allocation60_spill] sm:$0xff] }
 0x354   : > { %v4427_v52 = vadd.f32 %v4426_v55, %v3665_v25  ;;  %13112 = vst [vmem:[#allocation39_spill] sm:$0xff] %v11210_v42  ;;  %v3034_v61 = vmax.f32 %v2638_v3, 0.0  ;;  %v3033_v27 = vmax.f32 %v2287_v43, 0.0  ;;  %v2289_v51 = vadd.f32 %v13113_v9, %v10925_v1 }
 0x355   : > { %v3035_v10 = vmax.f32 %v2640_v63, 0.0  ;;  %v3672_v40 = vmin.f32 %v3032_v60, 6.0  ;;  %v2642_v45 = vadd.f32 %v13114_v14, %v10919_v29  ;;  %v2291_v24 = vadd.f32 %v13115_v49, %v10932_v8 }
 0x356   : > { %v2644_v59 = vadd.f32 %v13116_v62, %v10928_v53  ;;  %v3674_v55 = vmin.f32 %v3034_v61, 6.0  ;;  %v3673_v15 = vmin.f32 %v3033_v27, 6.0  ;;  %v3042_v25 = vmax.f32 %v2289_v51, 0.0  ;;  %v11220_v42 = vpop.f32.mrb[8].mxu1  ;;  %v13120_v27 = vld [vmem:[#allocation27_spill] sm:$0xff] }
 0x357   : > { %v3675_v39 = vmin.f32 %v3035_v10, 6.0  ;;  %v4389_v19 = vadd.f32 %v4388_v35, %v3672_v40  ;;  %v3044_v3 = vmax.f32 %v2642_v45, 0.0  ;;  %v3043_v43 = vmax.f32 %v2291_v24, 0.0  ;;  %13117 = vst [vmem:[#allocation18_spill] sm:$0xff] %v11220_v42  ;;  %v11222_v30 = vpop.f32.mrb[8].mxu0  ;;  %v11224_v49 = vpop.f32.mrb[9].mxu1 }
 0x358   : > { %v3045_v63 = vmax.f32 %v2644_v59, 0.0  ;;  %v4415_v60 = vadd.f32 %v4414_v34, %v3674_v55  ;;  %v4402_v9 = vadd.f32 %v4401_v37, %v3673_v15  ;;  %v3682_v14 = vmin.f32 %v3042_v25, 6.0  ;;  %13118 = vst [vmem:[#allocation13_spill] sm:$0xff] %v11222_v30  ;;  %13119 = vst [vmem:[#allocation59_spill] sm:$0xff] %v11224_v49  ;;  %v11228_v35 = vpop.f32.mrb[9].mxu0  ;;  %v11230_v24 = vpop.f32.mrb[10].mxu1 }
 0x359   : > { %v4428_v2 = vadd.f32 %v4427_v52, %v3675_v39  ;;  %v3684_v6 = vmin.f32 %v3044_v3, 6.0  ;;  %v3683_v62 = vmin.f32 %v3043_v43, 6.0  ;;  %v2295_v51 = vadd.f32 %v13120_v27, %v10925_v1  ;;  %13121 = vst [vmem:[#allocation60_spill] sm:$0xff] %v11228_v35  ;;  %13122 = vst [vmem:[#allocation27_spill] sm:$0xff] %v11230_v24  ;;  %v13123_v34 = vld [vmem:[#allocation28_spill] sm:$0xff]  ;;  %v13124_v52 = vld [vmem:[#allocation47_spill] sm:$0xff] }
 0x35a   : > { %v3685_v61 = vmin.f32 %v3045_v63, 6.0  ;;  %v4390_v10 = vadd.f32 %v4389_v19, %v3682_v14  ;;  %v2648_v37 = vadd.f32 %v13123_v34, %v10919_v29  ;;  %v2297_v40 = vadd.f32 %v13124_v52, %v10932_v8  ;;  %v13125_v45 = vld [vmem:[#allocation29_spill] sm:$0xff]  ;;  %v11238_v55 = vpop.f32.mrb[10].mxu0  ;;  %v11240_v15 = vpop.f32.mrb[11].mxu1 }
 0x35b   : > { %v2650_v59 = vadd.f32 %v13125_v45, %v10928_v53  ;;  %13126 = vst [vmem:[#allocation28_spill] sm:$0xff] %v11238_v55  ;;  %13127 = vst [vmem:[#allocation47_spill] sm:$0xff] %v11240_v15  ;;  %v4416_v39 = vadd.f32 %v4415_v60, %v3684_v6  ;;  %v4403_v25 = vadd.f32 %v4402_v9, %v3683_v62  ;;  %v3052_v43 = vmax.f32 %v2295_v51, 0.0  ;;  %v11242_v63 = vpop.f32.mrb[11].mxu0 }
 0x35c   : > { %v4429_v3 = vadd.f32 %v4428_v2, %v3685_v61  ;;  %13128 = vst [vmem:[#allocation29_spill] sm:$0xff] %v11242_v63  ;;  %v4391_v19 = vrot.slane %v4390_v10, 4  ;;  %v3054_v14 = vmax.f32 %v2648_v37, 0.0  ;;  %v3053_v27 = vmax.f32 %v2297_v40, 0.0  ;;  %v13129_v2 = vld [vmem:[#allocation30_spill] sm:$0xff]  ;;  %v13131_v61 = vld [vmem:[#allocation15_spill] sm:$0xff] }
 0x35d   : > { %v3055_v34 = vmax.f32 %v2650_v59, 0.0  ;;  %v4417_v24 = vrot.slane %v4416_v39, 4  ;;  %v4404_v35 = vrot.slane %v4403_v25, 4  ;;  %v3692_v49 = vmin.f32 %v3052_v43, 6.0  ;;  %v13132_v37 = vld [vmem:[#allocation48_spill] sm:$0xff] }
 0x35e   : > { %v4430_v52 = vrot.slane %v4429_v3, 4  ;;  %v4392_v30 = vadd.f32 %v4391_v19, %v4390_v10  ;;  %v3694_v45 = vmin.f32 %v3054_v14, 6.0  ;;  %v3693_v42 = vmin.f32 %v3053_v27, 6.0  ;;  %v11246_v9 = vpop.f32.mrb[12].mxu1  ;;  %v13133_v10 = vld [vmem:[#allocation12_spill] sm:$0xff] }
 0x35f   : > { %v3695_v55 = vmin.f32 %v3055_v34, 6.0  ;;  %v4418_v31 = vadd.f32 %v4417_v24, %v4416_v39  ;;  %v4405_v15 = vadd.f32 %v4404_v35, %v4403_v25  ;;  %v2299_v60 = vadd.f32 %v13129_v2, %v10925_v1  ;;  %13130 = vst [vmem:[#allocation30_spill] sm:$0xff] %v11246_v9  ;;  %v11254_v43 = vpop.f32.mrb[12].mxu0  ;;  %v11256_v24 = vpop.f32.mrb[13].mxu1 }
 0x360   : > { %v4431_v6 = vadd.f32 %v4430_v52, %v4429_v3  ;;  %v4393_v62 = vrot.slane %v4392_v30, 2  ;;  %v2652_v51 = vadd.f32 %v13131_v61, %v10919_v29  ;;  %v2301_v40 = vadd.f32 %v13132_v37, %v10932_v8  ;;  %13134 = vst [vmem:[#allocation15_spill] sm:$0xff] %v11254_v43  ;;  %13135 = vst [vmem:[#allocation48_spill] sm:$0xff] %v11256_v24  ;;  %v11258_v19 = vpop.f32.mrb[13].mxu0  ;;  %v11260_v14 = vpop.f32.mrb[14].mxu1 }
 0x361   : > { %v2654_v59 = vadd.f32 %v13133_v10, %v10928_v53  ;;  %v4419_v35 = vrot.slane %v4418_v31, 2  ;;  %v4406_v39 = vrot.slane %v4405_v15, 2  ;;  %v3062_v3 = vmax.f32 %v2299_v60, 0.0  ;;  %13136 = vst [vmem:[#allocation12_spill] sm:$0xff] %v11258_v19  ;;  %13137 = vst [vmem:[#allocation76_spill] sm:$0xff] %v11260_v14  ;;  %v11262_v61 = vpop.f32.mrb[14].mxu0 }
 0x362   : > { %v4432_v25 = vrot.slane %v4431_v6, 2  ;;  %v4394_v27 = vadd.f32 %v4393_v62, %v4392_v30  ;;  %v3064_v34 = vmax.f32 %v2652_v51, 0.0  ;;  %v3063_v52 = vmax.f32 %v2301_v40, 0.0  ;;  %13138 = vst [vmem:[#allocation77_spill] sm:$0xff] %v11262_v61  ;;  %v11264_v37 = vpop.f32.mrb[15].mxu1  ;;  %v11266_v63 = vpop.f32.mrb[15].mxu0 }
 0x363   : > { %v3065_v2 = vmax.f32 %v2654_v59, 0.0  ;;  %13139 = vst [vmem:[#allocation78_spill] sm:$0xff] %v11264_v37  ;;  %v4420_v10 = vadd.f32 %v4419_v35, %v4418_v31  ;;  %v4407_v43 = vadd.f32 %v4406_v39, %v4405_v15  ;;  %v3702_v24 = vmin.f32 %v3062_v3, 6.0  ;;  %v13140_v15 = vld [vmem:[#allocation32_spill] sm:$0xff] }
 0x364   : > { %v4433_v9 = vadd.f32 %v4432_v25, %v4431_v6  ;;  %v4395_v5 = vrot.slane %v4394_v27, 1  ;;  %v3704_v60 = vmin.f32 %v3064_v34, 6.0  ;;  %v3703_v44 = vmin.f32 %v3063_v52, 6.0  ;;  %v13141_v25 = vld [vmem:[#allocation31_spill] sm:$0xff]  ;;  %v13146_v52 = vld [vmem:[#allocation61_spill] sm:$0xff] }
 0x365   : > { %v3705_v19 = vmin.f32 %v3065_v2, 6.0  ;;  %v4421_v33 = vrot.slane %v4420_v10, 1  ;;  %v4408_v14 = vrot.slane %v4407_v43, 1  ;;  %v4514_v62 = vadd.f32 %v3702_v24, %v3692_v49 }
 0x366   : > { %v4434_v30 = vrot.slane %v4433_v9, 1  ;;  %v4396_v51 = vadd.f32 %v4395_v5, %v4394_v27  ;;  %v4540_v40 = vadd.f32 %v3704_v60, %v3694_v45  ;;  %v4527_v59 = vadd.f32 %v3703_v44, %v3693_v42  ;;  %v11270_v35 = vpop.f32.mrb[16].mxu1  ;;  %v13142_v5 = vld [vmem:[#allocation55_spill] sm:$0xff]  ;;  %v13143_v44 = vld [vmem:[#allocation33_spill] sm:$0xff] }
 0x367   : > { %v4553_v61 = vadd.f32 %v3705_v19, %v3695_v55  ;;  %v4422_v46 = vadd.f32 %v4421_v33, %v4420_v10  ;;  %v4409_v37 = vadd.f32 %v4408_v14, %v4407_v43  ;;  %v2305_v6 = vadd.f32 %v13140_v15, %v10925_v1  ;;  %v11282_v42 = vpop.f32.mrb[16].mxu0  ;;  %v11284_v55 = vpop.f32.mrb[17].mxu1  ;;  %v13150_v10 = vld [vmem:[#allocation63_spill] sm:$0xff] }
 0x368   : > { %v4435_v31 = vadd.f32 %v4434_v30, %v4433_v9  ;;  %v11274_v39 = vsel %vm5296_vm4, %v4396_v51, %v11122_v12  ;;  %v2658_v3 = vadd.f32 %v13141_v25, %v10919_v29  ;;  %v2307_v49 = vadd.f32 %v13142_v5, %v10932_v8  ;;  %v11298_v24 = vpop.f32.mrb[17].mxu0  ;;  %v11300_v19 = vpop.f32.mrb[18].mxu1  ;;  %v13151_v30 = vld [vmem:[#allocation64_spill] sm:$0xff] }
 0x369   : > { %v2660_v33 = vadd.f32 %v13143_v44, %v10928_v53  ;;  %v11288_v45 = vsel %vm5296_vm4, %v4422_v46, %v11124_v20  ;;  %v11292_v12 = vsel %vm5296_vm4, %v4409_v37, %v11130_v36  ;;  %v3072_v43 = vmax.f32 %v2305_v6, 0.0  ;;  %13144 = vst [vmem:[#allocation32_spill] sm:$0xff] %v11298_v24  ;;  %13145 = vst [vmem:[#allocation31_spill] sm:$0xff] %v11300_v19  ;;  %v11304_v46 = vpop.f32.mrb[18].mxu0  ;;  %v11306_v2 = vpop.f32.mrb[19].mxu1  ;;  %v13149_v37 = vld [vmem:[#allocation62_spill] sm:$0xff] }
 0x36a   : > { %v11296_v9 = vsel %vm5296_vm4, %v4435_v31, %v11132_v0  ;;  %v3074_v14 = vmax.f32 %v2658_v3, 0.0  ;;  %v3073_v27 = vmax.f32 %v2307_v49, 0.0  ;;  %v2309_v20 = vadd.f32 %v13146_v52, %v10925_v1  ;;  %13147 = vst [vmem:[#allocation55_spill] sm:$0xff] %v11304_v46  ;;  %13148 = vst [vmem:[#allocation33_spill] sm:$0xff] %v11306_v2  ;;  %v11314_v31 = vpop.f32.mrb[19].mxu0 }
 0x36b   : > { %v3075_v34 = vmax.f32 %v2660_v33, 0.0  ;;  %v3712_v36 = vmin.f32 %v3072_v43, 6.0  ;;  %v2662_v0 = vadd.f32 %v13149_v37, %v10919_v29  ;;  %v2311_v60 = vadd.f32 %v13150_v10, %v10932_v8 }
 0x36c   : > { %v2664_v51 = vadd.f32 %v13151_v30, %v10928_v53  ;;  %v3714_v15 = vmin.f32 %v3074_v14, 6.0  ;;  %v3713_v6 = vmin.f32 %v3073_v27, 6.0  ;;  %v3082_v3 = vmax.f32 %v2309_v20, 0.0 }
 0x36d   : > { %v3715_v25 = vmin.f32 %v3075_v34, 6.0  ;;  %v4515_v5 = vadd.f32 %v4514_v62, %v3712_v36  ;;  %v3084_v49 = vmax.f32 %v2662_v0, 0.0  ;;  %v3083_v44 = vmax.f32 %v2311_v60, 0.0  ;;  %v13152_v62 = vld [vmem:[#allocation56_spill] sm:$0xff] }
 0x36e   : > { %v3085_v33 = vmax.f32 %v2664_v51, 0.0  ;;  %v4541_v43 = vadd.f32 %v4540_v40, %v3714_v15  ;;  %v4528_v52 = vadd.f32 %v4527_v59, %v3713_v6  ;;  %v3722_v37 = vmin.f32 %v3082_v3, 6.0  ;;  %v11318_v24 = vpop.f32.mrb[20].mxu1  ;;  %v13153_v40 = vld [vmem:[#allocation57_spill] sm:$0xff] }
 0x36f   : > { %v4554_v2 = vadd.f32 %v4553_v61, %v3715_v25  ;;  %v3724_v46 = vmin.f32 %v3084_v49, 6.0  ;;  %v3723_v19 = vmin.f32 %v3083_v44, 6.0  ;;  %v2315_v30 = vadd.f32 %v10964_v38, %v10925_v1  ;;  %v11326_v61 = vpop.f32.mrb[20].mxu0  ;;  %v11328_v20 = vpop.f32.mrb[21].mxu1  ;;  %v13155_v3 = vld [vmem:[#allocation65_spill] sm:$0xff] }
 0x370   : > { %v3725_v10 = vmin.f32 %v3085_v33, 6.0  ;;  %v4516_v14 = vadd.f32 %v4515_v5, %v3722_v37  ;;  %v2668_v27 = vadd.f32 %v10966_v17, %v10919_v29  ;;  %v2317_v34 = vadd.f32 %v13152_v62, %v10932_v8  ;;  %v11330_v51 = vpop.f32.mrb[21].mxu0  ;;  %v11332_v15 = vpop.f32.mrb[22].mxu1 }
 0x371   : > { %v2670_v59 = vadd.f32 %v13153_v40, %v10928_v53  ;;  %v4542_v36 = vadd.f32 %v4541_v43, %v3724_v46  ;;  %v4529_v0 = vadd.f32 %v4528_v52, %v3723_v19  ;;  %v3092_v38 = vmax.f32 %v2315_v30, 0.0  ;;  %13154 = vst [vmem:[#allocation61_spill] sm:$0xff] %v11332_v15  ;;  %v11336_v49 = vpop.f32.mrb[22].mxu0  ;;  %v11338_v44 = vpop.f32.mrb[23].mxu1 }
 0x372   : > { %v4555_v60 = vadd.f32 %v4554_v2, %v3725_v10  ;;  %v3094_v6 = vmax.f32 %v2668_v27, 0.0  ;;  %v3093_v17 = vmax.f32 %v2317_v34, 0.0  ;;  %v2319_v5 = vadd.f32 %v13155_v3, %v10925_v1  ;;  %13156 = vst [vmem:[#allocation62_spill] sm:$0xff] %v11336_v49  ;;  %13157 = vst [vmem:[#allocation63_spill] sm:$0xff] %v11338_v44  ;;  %v11346_v43 = vpop.f32.mrb[23].mxu0 }
 0x373   : > { %v3095_v25 = vmax.f32 %v2670_v59, 0.0  ;;  %v3732_v33 = vmin.f32 %v3092_v38, 6.0  ;;  %v2672_v19 = vadd.f32 %v10978_v32, %v10919_v29  ;;  %v2321_v46 = vadd.f32 %v10980_v26, %v10932_v8 }
 0x374   : > { %v2674_v2 = vadd.f32 %v10982_v50, %v10928_v53  ;;  %v3734_v52 = vmin.f32 %v3094_v6, 6.0  ;;  %v3733_v37 = vmin.f32 %v3093_v17, 6.0  ;;  %v3102_v30 = vmax.f32 %v2319_v5, 0.0 }
 0x375   : > { %v3735_v10 = vmin.f32 %v3095_v25, 6.0  ;;  %v4517_v27 = vadd.f32 %v4516_v14, %v3732_v33  ;;  %v3104_v62 = vmax.f32 %v2672_v19, 0.0  ;;  %v3103_v34 = vmax.f32 %v2321_v46, 0.0 }
 0x376   : > { %v3105_v40 = vmax.f32 %v2674_v2, 0.0  ;;  %v4543_v59 = vadd.f32 %v4542_v36, %v3734_v52  ;;  %v4530_v38 = vadd.f32 %v4529_v0, %v3733_v37  ;;  %v3742_v32 = vmin.f32 %v3102_v30, 6.0  ;;  %v11350_v15 = vpop.f32.mrb[24].mxu1 }
 0x377   : > { %v4556_v3 = vadd.f32 %v4555_v60, %v3735_v10  ;;  %v3744_v44 = vmin.f32 %v3104_v62, 6.0  ;;  %v3743_v49 = vmin.f32 %v3103_v34, 6.0  ;;  %v2325_v50 = vadd.f32 %v11000_v16, %v10925_v1  ;;  %v11358_v0 = vpop.f32.mrb[24].mxu0  ;;  %v11360_v60 = vpop.f32.mrb[25].mxu1 }
 0x378   : > { %v3745_v26 = vmin.f32 %v3105_v40, 6.0  ;;  %v4518_v6 = vadd.f32 %v4517_v27, %v3742_v32  ;;  %v2678_v17 = vadd.f32 %v11006_v11, %v10919_v29  ;;  %v2327_v14 = vadd.f32 %v11008_v47, %v10932_v8  ;;  %v11362_v19 = vpop.f32.mrb[25].mxu0  ;;  %v11364_v46 = vpop.f32.mrb[26].mxu1 }
 0x379   : > { %v2680_v36 = vadd.f32 %v11010_v4, %v10928_v53  ;;  %v4544_v25 = vadd.f32 %v4543_v59, %v3744_v44  ;;  %v4531_v5 = vadd.f32 %v4530_v38, %v3743_v49  ;;  %v3112_v16 = vmax.f32 %v2325_v50, 0.0  ;;  %v11368_v37 = vpop.f32.mrb[26].mxu0  ;;  %v11370_v4 = vpop.f32.mrb[27].mxu1 }
 0x37a   : > { %v4557_v33 = vadd.f32 %v4556_v3, %v3745_v26  ;;  %v3114_v2 = vmax.f32 %v2678_v17, 0.0  ;;  %v3113_v11 = vmax.f32 %v2327_v14, 0.0  ;;  %v2329_v47 = vadd.f32 %v11012_v41, %v10925_v1  ;;  %v11378_v27 = vpop.f32.mrb[27].mxu0 }
 0x37b   : > { %v3115_v52 = vmax.f32 %v2680_v36, 0.0  ;;  %v3752_v10 = vmin.f32 %v3112_v16, 6.0  ;;  %v2682_v49 = vadd.f32 %v11014_v56, %v10919_v29  ;;  %v2331_v44 = vadd.f32 %v11016_v7, %v10932_v8 }
 0x37c   : > { %v2684_v30 = vadd.f32 %v11018_v57, %v10928_v53  ;;  %v3754_v62 = vmin.f32 %v3114_v2, 6.0  ;;  %v3753_v34 = vmin.f32 %v3113_v11, 6.0  ;;  %v3122_v41 = vmax.f32 %v2329_v47, 0.0 }
 0x37d   : > { %v3755_v40 = vmin.f32 %v3115_v52, 6.0  ;;  %v4519_v59 = vadd.f32 %v4518_v6, %v3752_v10  ;;  %v3124_v38 = vmax.f32 %v2682_v49, 0.0  ;;  %v3123_v3 = vmax.f32 %v2331_v44, 0.0 }
 0x37e   : > { %v3125_v32 = vmax.f32 %v2684_v30, 0.0  ;;  %v4545_v26 = vadd.f32 %v4544_v25, %v3754_v62  ;;  %v4532_v50 = vadd.f32 %v4531_v5, %v3753_v34  ;;  %v3762_v56 = vmin.f32 %v3122_v41, 6.0  ;;  %v11382_v16 = vpop.f32.mrb[28].mxu1  ;;  %v13159_v25 = vld [vmem:[#allocation34_spill] sm:$0xff] }
 0x37f   : > { %v4558_v17 = vadd.f32 %v4557_v33, %v3755_v40  ;;  %v3764_v14 = vmin.f32 %v3124_v38, 6.0  ;;  %v3763_v36 = vmin.f32 %v3123_v3, 6.0  ;;  %v2335_v57 = vadd.f32 %v11032_v18, %v10925_v1  ;;  %13158 = vst [vmem:[#allocation64_spill] sm:$0xff] %v11382_v16  ;;  %v11390_v33 = vpop.f32.mrb[28].mxu0  ;;  %v11392_v52 = vpop.f32.mrb[29].mxu1 }
 0x380   : > { %v3765_v7 = vmin.f32 %v3125_v32, 6.0  ;;  %v4520_v2 = vadd.f32 %v4519_v59, %v3762_v56  ;;  %v2688_v11 = vadd.f32 %v11038_v22, %v10919_v29  ;;  %v2337_v6 = vadd.f32 %v11040_v28, %v10932_v8  ;;  %13160 = vst [vmem:[#allocation56_spill] sm:$0xff] %v11390_v33  ;;  %13161 = vst [vmem:[#allocation57_spill] sm:$0xff] %v11392_v52  ;;  %v11394_v44 = vpop.f32.mrb[29].mxu0  ;;  %v11396_v30 = vpop.f32.mrb[30].mxu1 }
 0x381   : > { %v2690_v5 = vadd.f32 %v13159_v25, %v10928_v53  ;;  %v4546_v47 = vadd.f32 %v4545_v26, %v3764_v14  ;;  %v4533_v10 = vadd.f32 %v4532_v50, %v3763_v36  ;;  %v3132_v18 = vmax.f32 %v2335_v57, 0.0  ;;  %13162 = vst [vmem:[#allocation65_spill] sm:$0xff] %v11394_v44  ;;  %13163 = vst [vmem:[#allocation34_spill] sm:$0xff] %v11396_v30  ;;  %v11398_v28 = vpop.f32.mrb[30].mxu0  ;;  %v11400_v41 = vpop.f32.mrb[31].mxu1 }
 0x382   : > { %v4559_v49 = vadd.f32 %v4558_v17, %v3765_v7  ;;  %v4521_v62 = vrot.slane %v4520_v2, 4  ;;  %v3134_v22 = vmax.f32 %v2688_v11, 0.0  ;;  %v3133_v34 = vmax.f32 %v2337_v6, 0.0  ;;  %13164 = vst [vmem:[#allocation79_spill] sm:$0xff] %v11398_v28  ;;  %13165 = vst [vmem:[#allocation80_spill] sm:$0xff] %v11400_v41  ;;  %v11402_v26 = vpop.f32.mrb[31].mxu0 }
 0x383   : > { %v3135_v40 = vmax.f32 %v2690_v5, 0.0  ;;  %v4547_v59 = vrot.slane %v4546_v47, 4  ;;  %v4534_v38 = vrot.slane %v4533_v10, 4  ;;  %v3772_v32 = vmin.f32 %v3132_v18, 6.0  ;;  %13166 = vst [vmem:[#allocation81_spill] sm:$0xff] %v11402_v26  ;;  %v13167_v11 = vld [vmem:[#allocation19_spill] sm:$0xff] }
 0x384   : > { %v4560_v3 = vrot.slane %v4559_v49, 4  ;;  %v4522_v50 = vadd.f32 %v4521_v62, %v4520_v2  ;;  %v3774_v17 = vmin.f32 %v3134_v22, 6.0  ;;  %v3773_v56 = vmin.f32 %v3133_v34, 6.0  ;;  %v13168_v5 = vld [vmem:[#allocation66_spill] sm:$0xff]  ;;  %v13169_v28 = vld [vmem:[#allocation67_spill] sm:$0xff]  ;;  %v13170_v18 = vld [vmem:[#allocation68_spill] sm:$0xff] }
 0x385   : > { %v3775_v14 = vmin.f32 %v3135_v40, 6.0  ;;  %v4548_v36 = vadd.f32 %v4547_v59, %v4546_v47  ;;  %v4535_v7 = vadd.f32 %v4534_v38, %v4533_v10  ;;  %v2339_v6 = vadd.f32 %v13167_v11, %v10925_v1 }
 0x386   : > { %v4561_v57 = vadd.f32 %v4560_v3, %v4559_v49  ;;  %v4523_v25 = vrot.slane %v4522_v50, 2  ;;  %v2692_v41 = vadd.f32 %v13168_v5, %v10919_v29  ;;  %v2341_v30 = vadd.f32 %v13169_v28, %v10932_v8  ;;  %v11412_v47 = vpop.f32.mrb[32].mxu1 }
 0x387   : > { %v2694_v26 = vadd.f32 %v13170_v18, %v10928_v53  ;;  %v4549_v2 = vrot.slane %v4548_v36, 2  ;;  %v4536_v62 = vrot.slane %v4535_v7, 2  ;;  %v3142_v34 = vmax.f32 %v2339_v6, 0.0  ;;  %13171 = vst [vmem:[#allocation19_spill] sm:$0xff] %v11412_v47  ;;  %v11414_v38 = vpop.f32.mrb[32].mxu0  ;;  %v11416_v3 = vpop.f32.mrb[33].mxu1 }
 0x388   : > { %v4562_v22 = vrot.slane %v4561_v57, 2  ;;  %v4524_v10 = vadd.f32 %v4523_v25, %v4522_v50  ;;  %v3144_v49 = vmax.f32 %v2692_v41, 0.0  ;;  %v3143_v40 = vmax.f32 %v2341_v30, 0.0  ;;  %13172 = vst [vmem:[#allocation66_spill] sm:$0xff] %v11416_v3  ;;  %v11418_v52 = vpop.f32.mrb[33].mxu0  ;;  %v11420_v18 = vpop.f32.mrb[34].mxu1 }
 0x389   : > { %v3145_v59 = vmax.f32 %v2694_v26, 0.0  ;;  %v4550_v11 = vadd.f32 %v4549_v2, %v4548_v36  ;;  %v4537_v5 = vadd.f32 %v4536_v62, %v4535_v7  ;;  %v3782_v44 = vmin.f32 %v3142_v34, 6.0  ;;  %13173 = vst [vmem:[#allocation67_spill] sm:$0xff] %v11420_v18  ;;  %v11422_v50 = vpop.f32.mrb[34].mxu0  ;;  %v11424_v30 = vpop.f32.mrb[35].mxu1 }
 0x38a   : > { %v4563_v28 = vadd.f32 %v4562_v22, %v4561_v57  ;;  %v4525_v33 = vrot.slane %v4524_v10, 1  ;;  %v3784_v6 = vmin.f32 %v3144_v49, 6.0  ;;  %v3783_v16 = vmin.f32 %v3143_v40, 6.0  ;;  %13174 = vst [vmem:[#allocation68_spill] sm:$0xff] %v11422_v50  ;;  %13175 = vst [vmem:[#allocation82_spill] sm:$0xff] %v11424_v30  ;;  %v11426_v36 = vpop.f32.mrb[35].mxu0 }
 0x38b   : > { %v3785_v47 = vmin.f32 %v3145_v59, 6.0  ;;  %v4551_v41 = vrot.slane %v4550_v11, 1  ;;  %v4538_v26 = vrot.slane %v4537_v5, 1  ;;  %v4644_v3 = vadd.f32 %v3782_v44, %v3772_v32  ;;  %v13176_v49 = vld [vmem:[#allocation36_spill] sm:$0xff]  ;;  %v13177_v30 = vld [vmem:[#allocation21_spill] sm:$0xff]  ;;  %v13178_v44 = vld [vmem:[#allocation23_spill] sm:$0xff] }
 0x38c   : > { %v4564_v25 = vrot.slane %v4563_v28, 1  ;;  %v4526_v7 = vadd.f32 %v4525_v33, %v4524_v10  ;;  %v4670_v57 = vadd.f32 %v3784_v6, %v3774_v17  ;;  %v4657_v2 = vadd.f32 %v3783_v16, %v3773_v56  ;;  %v13179_v33 = vld [vmem:[#allocation20_spill] sm:$0xff] }
 0x38d   : > { %v4683_v62 = vadd.f32 %v3785_v47, %v3775_v14  ;;  %v4552_v22 = vadd.f32 %v4551_v41, %v4550_v11  ;;  %v4539_v34 = vadd.f32 %v4538_v26, %v4537_v5  ;;  %v2345_v40 = vadd.f32 %v13176_v49, %v10925_v1 }
 0x38e   : > { %v4565_v18 = vadd.f32 %v4564_v25, %v4563_v28  ;;  %v11432_v59 = vsel %vm5298_vm5, %v4526_v7, %v11274_v39  ;;  %v2698_v50 = vadd.f32 %v13177_v30, %v10919_v29  ;;  %v2347_v32 = vadd.f32 %v13178_v44, %v10932_v8  ;;  %v11452_v47 = vpop.f32.mrb[36].mxu1  ;;  %v13181_v28 = vld [vmem:[#allocation54_spill] sm:$0xff] }
 0x38f   : > { %v2700_v16 = vadd.f32 %v13179_v33, %v10928_v53  ;;  %v11442_v17 = vsel %vm5298_vm5, %v4552_v22, %v11288_v45  ;;  %v11446_v56 = vsel %vm5298_vm5, %v4539_v34, %v11292_v12  ;;  %v3152_v14 = vmax.f32 %v2345_v40, 0.0  ;;  %13180 = vst [vmem:[#allocation36_spill] sm:$0xff] %v11452_v47  ;;  %v11456_v30 = vpop.f32.mrb[36].mxu0  ;;  %v11458_v45 = vpop.f32.mrb[37].mxu1  ;;  %v13184_v12 = vld [vmem:[#allocation25_spill] sm:$0xff]  ;;  %v13186_v25 = vld [vmem:[#allocation42_spill] sm:$0xff] }
 0x390   : > { %v11450_v39 = vsel %vm5298_vm5, %v4565_v18, %v11296_v9  ;;  %v3154_v10 = vmax.f32 %v2698_v50, 0.0  ;;  %v3153_v11 = vmax.f32 %v2347_v32, 0.0  ;;  %v2349_v6 = vadd.f32 %v13181_v28, %v10925_v1  ;;  %13182 = vst [vmem:[#allocation21_spill] sm:$0xff] %v11456_v30  ;;  %13183 = vst [vmem:[#allocation23_spill] sm:$0xff] %v11458_v45  ;;  %v13185_v9 = vld [vmem:[#allocation38_spill] sm:$0xff]  ;;  %v11466_v50 = vpop.f32.mrb[37].mxu0 }
 0x391   : > { %v3155_v5 = vmax.f32 %v2700_v16, 0.0  ;;  %v3792_v41 = vmin.f32 %v3152_v14, 6.0  ;;  %v2702_v26 = vadd.f32 %v13184_v12, %v10919_v29  ;;  %v2351_v18 = vadd.f32 %v13185_v9, %v10932_v8  ;;  %13187 = vst [vmem:[#allocation20_spill] sm:$0xff] %v11466_v50  ;;  %v11468_v22 = vpop.f32.mrb[38].mxu1  ;;  %v11470_v32 = vpop.f32.mrb[38].mxu0 }
 0x392   : > { %v2704_v7 = vadd.f32 %v13186_v25, %v10928_v53  ;;  %13188 = vst [vmem:[#allocation54_spill] sm:$0xff] %v11468_v22  ;;  %v3794_v34 = vmin.f32 %v3154_v10, 6.0  ;;  %v3793_v49 = vmin.f32 %v3153_v11, 6.0  ;;  %v3162_v44 = vmax.f32 %v2349_v6, 0.0  ;;  %13189 = vst [vmem:[#allocation25_spill] sm:$0xff] %v11470_v32  ;;  %v11472_v33 = vpop.f32.mrb[39].mxu1 }
 0x393   : > { %v3795_v40 = vmin.f32 %v3155_v5, 6.0  ;;  %13190 = vst [vmem:[#allocation38_spill] sm:$0xff] %v11472_v33  ;;  %v4645_v16 = vadd.f32 %v4644_v3, %v3792_v41  ;;  %v3164_v14 = vmax.f32 %v2702_v26, 0.0  ;;  %v3163_v28 = vmax.f32 %v2351_v18, 0.0  ;;  %v11474_v9 = vpop.f32.mrb[39].mxu0  ;;  %v13192_v11 = vld [vmem:[#allocation45_spill] sm:$0xff] }
 0x394   : > { %v3165_v12 = vmax.f32 %v2704_v7, 0.0  ;;  %13191 = vst [vmem:[#allocation42_spill] sm:$0xff] %v11474_v9  ;;  %v4671_v45 = vadd.f32 %v4670_v57, %v3794_v34  ;;  %v4658_v25 = vadd.f32 %v4657_v2, %v3793_v49  ;;  %v3802_v50 = vmin.f32 %v3162_v44, 6.0  ;;  %v13193_v32 = vld [vmem:[#allocation22_spill] sm:$0xff]  ;;  %v13194_v3 = vld [vmem:[#allocation35_spill] sm:$0xff]  ;;  %v13195_v26 = vld [vmem:[#allocation24_spill] sm:$0xff] }
 0x395   : > { %v4684_v30 = vadd.f32 %v4683_v62, %v3795_v40  ;;  %v3804_v47 = vmin.f32 %v3164_v14, 6.0  ;;  %v3803_v22 = vmin.f32 %v3163_v28, 6.0  ;;  %v2355_v5 = vadd.f32 %v13192_v11, %v10925_v1 }
 0x396   : > { %v3805_v10 = vmin.f32 %v3165_v12, 6.0  ;;  %v4646_v6 = vadd.f32 %v4645_v16, %v3802_v50  ;;  %v2708_v33 = vadd.f32 %v13193_v32, %v10919_v29  ;;  %v2357_v41 = vadd.f32 %v13194_v3, %v10932_v8  ;;  %v11484_v34 = vpop.f32.mrb[40].mxu1  ;;  %v13197_v50 = vld [vmem:[#allocation69_spill] sm:$0xff]  ;;  %v13200_v12 = vld [vmem:[#allocation40_spill] sm:$0xff] }
 0x397   : > { %v2710_v18 = vadd.f32 %v13195_v26, %v10928_v53  ;;  %v4672_v57 = vadd.f32 %v4671_v45, %v3804_v47  ;;  %v4659_v2 = vadd.f32 %v4658_v25, %v3803_v22  ;;  %v3172_v7 = vmax.f32 %v2355_v5, 0.0  ;;  %13196 = vst [vmem:[#allocation45_spill] sm:$0xff] %v11484_v34  ;;  %v11488_v14 = vpop.f32.mrb[40].mxu0  ;;  %v11490_v32 = vpop.f32.mrb[41].mxu1  ;;  %v13201_v47 = vld [vmem:[#allocation70_spill] sm:$0xff] }
 0x398   : > { %v4685_v62 = vadd.f32 %v4684_v30, %v3805_v10  ;;  %v3174_v49 = vmax.f32 %v2708_v33, 0.0  ;;  %v3173_v40 = vmax.f32 %v2357_v41, 0.0  ;;  %v2359_v16 = vadd.f32 %v13197_v50, %v10925_v1  ;;  %13198 = vst [vmem:[#allocation22_spill] sm:$0xff] %v11488_v14  ;;  %13199 = vst [vmem:[#allocation35_spill] sm:$0xff] %v11490_v32  ;;  %v13202_v45 = vld [vmem:[#allocation26_spill] sm:$0xff]  ;;  %v11498_v33 = vpop.f32.mrb[41].mxu0 }
 0x399   : > { %v3175_v44 = vmax.f32 %v2710_v18, 0.0  ;;  %v3812_v28 = vmin.f32 %v3172_v7, 6.0  ;;  %v2712_v11 = vadd.f32 %v13200_v12, %v10919_v29  ;;  %v2361_v30 = vadd.f32 %v13201_v47, %v10932_v8  ;;  %13203 = vst [vmem:[#allocation24_spill] sm:$0xff] %v11498_v33  ;;  %v11500_v25 = vpop.f32.mrb[42].mxu1  ;;  %v11502_v26 = vpop.f32.mrb[42].mxu0 }
 0x39a   : > { %v2714_v22 = vadd.f32 %v13202_v45, %v10928_v53  ;;  %13204 = vst [vmem:[#allocation69_spill] sm:$0xff] %v11500_v25  ;;  %v3814_v10 = vmin.f32 %v3174_v49, 6.0  ;;  %v3813_v5 = vmin.f32 %v3173_v40, 6.0  ;;  %v3182_v41 = vmax.f32 %v2359_v16, 0.0  ;;  %v11504_v18 = vpop.f32.mrb[43].mxu1  ;;  %v11506_v47 = vpop.f32.mrb[43].mxu0 }
 0x39b   : > { %v3815_v3 = vmin.f32 %v3175_v44, 6.0  ;;  %v4647_v7 = vadd.f32 %v4646_v6, %v3812_v28  ;;  %v3184_v50 = vmax.f32 %v2712_v11, 0.0  ;;  %v3183_v12 = vmax.f32 %v2361_v30, 0.0  ;;  %13205 = vst [vmem:[#allocation40_spill] sm:$0xff] %v11506_v47 }
 0x39c   : > { %v3185_v32 = vmax.f32 %v2714_v22, 0.0  ;;  %v4673_v14 = vadd.f32 %v4672_v57, %v3814_v10  ;;  %v4660_v45 = vadd.f32 %v4659_v2, %v3813_v5  ;;  %v3822_v33 = vmin.f32 %v3182_v41, 6.0 }
 0x39d   : > { %v4686_v34 = vadd.f32 %v4685_v62, %v3815_v3  ;;  %v3824_v9 = vmin.f32 %v3184_v50, 6.0  ;;  %v3823_v25 = vmin.f32 %v3183_v12, 6.0  ;;  %v2365_v40 = vadd.f32 %v11116_v13, %v10925_v1 }
 0x39e   : > { %v3825_v49 = vmin.f32 %v3185_v32, 6.0  ;;  %v4648_v44 = vadd.f32 %v4647_v7, %v3822_v33  ;;  %v2718_v16 = vadd.f32 %v11118_v48, %v10919_v29  ;;  %v2367_v6 = vadd.f32 %v11120_v54, %v10932_v8  ;;  %v11516_v30 = vpop.f32.mrb[44].mxu1 }
 0x39f   : > { %v2720_v28 = vadd.f32 %v11126_v58, %v10928_v53  ;;  %v4674_v57 = vadd.f32 %v4673_v14, %v3824_v9  ;;  %v4661_v2 = vadd.f32 %v4660_v45, %v3823_v25  ;;  %v3192_v11 = vmax.f32 %v2365_v40, 0.0  ;;  %13206 = vst [vmem:[#allocation70_spill] sm:$0xff] %v11516_v30  ;;  %v11520_v33 = vpop.f32.mrb[44].mxu0  ;;  %v11522_v48 = vpop.f32.mrb[45].mxu1  ;;  %v13209_v9 = vld [vmem:[#allocation58_spill] sm:$0xff]  ;;  %v13210_v14 = vld [vmem:[#allocation43_spill] sm:$0xff] }
 0x3a0   : > { %v4687_v62 = vadd.f32 %v4686_v34, %v3825_v49  ;;  %v3194_v32 = vmax.f32 %v2718_v16, 0.0  ;;  %v3193_v22 = vmax.f32 %v2367_v6, 0.0  ;;  %v2369_v13 = vadd.f32 %v11128_v21, %v10925_v1  ;;  %13207 = vst [vmem:[#allocation26_spill] sm:$0xff] %v11520_v33  ;;  %13208 = vst [vmem:[#allocation83_spill] sm:$0xff] %v11522_v48  ;;  %v11530_v5 = vpop.f32.mrb[45].mxu0  ;;  %v11532_v3 = vpop.f32.mrb[46].mxu1 }
 0x3a1   : > { %v3195_v10 = vmax.f32 %v2720_v28, 0.0  ;;  %v3832_v54 = vmin.f32 %v3192_v11, 6.0  ;;  %v2722_v58 = vadd.f32 %v11136_v23, %v10919_v29  ;;  %v2371_v34 = vadd.f32 %v13209_v9, %v10932_v8  ;;  %13211 = vst [vmem:[#allocation58_spill] sm:$0xff] %v11530_v5  ;;  %13212 = vst [vmem:[#allocation43_spill] sm:$0xff] %v11532_v3  ;;  %v11534_v12 = vpop.f32.mrb[46].mxu0  ;;  %v11536_v45 = vpop.f32.mrb[47].mxu1 }
 0x3a2   : > { %v2724_v25 = vadd.f32 %v13210_v14, %v10928_v53  ;;  %v3834_v41 = vmin.f32 %v3194_v32, 6.0  ;;  %v3833_v21 = vmin.f32 %v3193_v22, 6.0  ;;  %v3202_v50 = vmax.f32 %v2369_v13, 0.0  ;;  %13213 = vst [vmem:[#allocation84_spill] sm:$0xff] %v11534_v12  ;;  %13214 = vst [vmem:[#allocation85_spill] sm:$0xff] %v11536_v45  ;;  %v11538_v6 = vpop.f32.mrb[47].mxu0 }
 0x3a3   : > { %v3835_v7 = vmin.f32 %v3195_v10, 6.0  ;;  %v4649_v49 = vadd.f32 %v4648_v44, %v3832_v54  ;;  %v3204_v23 = vmax.f32 %v2722_v58, 0.0  ;;  %v3203_v40 = vmax.f32 %v2371_v34, 0.0  ;;  %13215 = vst [vmem:[#allocation86_spill] sm:$0xff] %v11538_v6  ;;  %v13216_v22 = vld [vmem:[#allocation49_spill] sm:$0xff]  ;;  %v13217_v12 = vld [vmem:[#allocation16_spill] sm:$0xff] }
 0x3a4   : > { %v3205_v16 = vmax.f32 %v2724_v25, 0.0  ;;  %v4675_v28 = vadd.f32 %v4674_v57, %v3834_v41  ;;  %v4662_v11 = vadd.f32 %v4661_v2, %v3833_v21  ;;  %v3842_v14 = vmin.f32 %v3202_v50, 6.0  ;;  %v13218_v44 = vld [vmem:[#allocation71_spill] sm:$0xff]  ;;  %v13219_v58 = vld [vmem:[#allocation72_spill] sm:$0xff] }
 0x3a5   : > { %v4688_v9 = vadd.f32 %v4687_v62, %v3835_v7  ;;  %v3844_v5 = vmin.f32 %v3204_v23, 6.0  ;;  %v3843_v3 = vmin.f32 %v3203_v40, 6.0  ;;  %v2375_v10 = vadd.f32 %v13216_v22, %v10925_v1 }
 0x3a6   : > { %v3845_v32 = vmin.f32 %v3205_v16, 6.0  ;;  %v4650_v13 = vadd.f32 %v4649_v49, %v3842_v14  ;;  %v2728_v45 = vadd.f32 %v13217_v12, %v10919_v29  ;;  %v2377_v54 = vadd.f32 %v13218_v44, %v10932_v8  ;;  %v11548_v41 = vpop.f32.mrb[48].mxu1 }
 0x3a7   : > { %v2730_v34 = vadd.f32 %v13219_v58, %v10928_v53  ;;  %v4676_v57 = vadd.f32 %v4675_v28, %v3844_v5  ;;  %v4663_v2 = vadd.f32 %v4662_v11, %v3843_v3  ;;  %v3212_v25 = vmax.f32 %v2375_v10, 0.0  ;;  %13220 = vst [vmem:[#allocation49_spill] sm:$0xff] %v11548_v41  ;;  %v11550_v49 = vpop.f32.mrb[48].mxu0  ;;  %v11552_v40 = vpop.f32.mrb[49].mxu1 }
 0x3a8   : > { %v4689_v62 = vadd.f32 %v4688_v9, %v3845_v32  ;;  %v4651_v21 = vrot.slane %v4650_v13, 4  ;;  %v3214_v7 = vmax.f32 %v2728_v45, 0.0  ;;  %v3213_v50 = vmax.f32 %v2377_v54, 0.0  ;;  %13221 = vst [vmem:[#allocation16_spill] sm:$0xff] %v11550_v49  ;;  %13222 = vst [vmem:[#allocation71_spill] sm:$0xff] %v11552_v40  ;;  %v11554_v44 = vpop.f32.mrb[49].mxu0 }
 0x3a9   : > { %v3215_v23 = vmax.f32 %v2730_v34, 0.0  ;;  %v4677_v12 = vrot.slane %v4676_v57, 4  ;;  %v4664_v16 = vrot.slane %v4663_v2, 4  ;;  %v3852_v22 = vmin.f32 %v3212_v25, 6.0  ;;  %13223 = vst [vmem:[#allocation72_spill] sm:$0xff] %v11554_v44  ;;  %v11556_v5 = vpop.f32.mrb[50].mxu1 }
 0x3aa   : > { %v4690_v14 = vrot.slane %v4689_v62, 4  ;;  %13224 = vst [vmem:[#allocation87_spill] sm:$0xff] %v11556_v5  ;;  %v4652_v3 = vadd.f32 %v4651_v21, %v4650_v13  ;;  %v3854_v28 = vmin.f32 %v3214_v7, 6.0  ;;  %v3853_v11 = vmin.f32 %v3213_v50, 6.0  ;;  %v11558_v32 = vpop.f32.mrb[50].mxu0  ;;  %v11560_v45 = vpop.f32.mrb[51].mxu1 }
 0x3ab   : > { %v3855_v9 = vmin.f32 %v3215_v23, 6.0  ;;  %13225 = vst [vmem:[#allocation88_spill] sm:$0xff] %v11558_v32  ;;  %13226 = vst [vmem:[#allocation89_spill] sm:$0xff] %v11560_v45  ;;  %v4678_v10 = vadd.f32 %v4677_v12, %v4676_v57  ;;  %v4665_v54 = vadd.f32 %v4664_v16, %v4663_v2  ;;  %v13227_v34 = vld [vmem:[#allocation73_spill] sm:$0xff]  ;;  %v11564_v49 = vpop.f32.mrb[51].mxu0  ;;  %v13230_v13 = vld [vmem:[#allocation46_spill] sm:$0xff] }
 0x3ac   : > { %v4691_v58 = vadd.f32 %v4690_v14, %v4689_v62  ;;  %v2379_v40 = vadd.f32 %v13227_v34, %v10925_v1  ;;  %13228 = vst [vmem:[#allocation73_spill] sm:$0xff] %v11564_v49  ;;  %v4653_v25 = vrot.slane %v4652_v3, 2  ;;  %v13229_v44 = vld [vmem:[#allocation41_spill] sm:$0xff]  ;;  %v2381_v21 = vadd.f32 %v13230_v13, %v10932_v8  ;;  %v13231_v7 = vld [vmem:[#allocation74_spill] sm:$0xff] }
 0x3ad   : > { %v2732_v5 = vadd.f32 %v13229_v44, %v10919_v29  ;;  %v2734_v50 = vadd.f32 %v13231_v7, %v10928_v53  ;;  %v4679_v23 = vrot.slane %v4678_v10, 2  ;;  %v4666_v45 = vrot.slane %v4665_v54, 2 }
 0x3ae   : > { %v4692_v57 = vrot.slane %v4691_v58, 2  ;;  %v3222_v2 = vmax.f32 %v2379_v40, 0.0  ;;  %v4654_v62 = vadd.f32 %v4653_v25, %v4652_v3  ;;  %v3223_v16 = vmax.f32 %v2381_v21, 0.0  ;;  %v11572_v6 = vpop.f32.mrb[52].mxu1 }
 0x3af   : > { %v3224_v12 = vmax.f32 %v2732_v5, 0.0  ;;  %v3225_v14 = vmax.f32 %v2734_v50, 0.0  ;;  %v4680_v34 = vadd.f32 %v4679_v23, %v4678_v10  ;;  %v4667_v49 = vadd.f32 %v4666_v45, %v4665_v54  ;;  %v11574_v30 = vpop.f32.mrb[52].mxu0  ;;  %v11576_v7 = vpop.f32.mrb[53].mxu1 }
 0x3b0   : > { %v4693_v32 = vadd.f32 %v4692_v57, %v4691_v58  ;;  %v3862_v41 = vmin.f32 %v3222_v2, 6.0  ;;  %v4655_v44 = vrot.slane %v4654_v62, 1  ;;  %v3863_v13 = vmin.f32 %v3223_v16, 6.0  ;;  %13232 = vst [vmem:[#allocation41_spill] sm:$0xff] %v11576_v7  ;;  %v11578_v25 = vpop.f32.mrb[53].mxu0  ;;  %v11580_v10 = vpop.f32.mrb[54].mxu1 }
 0x3b1   : > { %v3864_v48 = vmin.f32 %v3224_v12, 6.0  ;;  %v3865_v33 = vmin.f32 %v3225_v14, 6.0  ;;  %v4681_v47 = vrot.slane %v4680_v34, 1  ;;  %v4668_v40 = vrot.slane %v4667_v49, 1  ;;  %13233 = vst [vmem:[#allocation46_spill] sm:$0xff] %v11578_v25  ;;  %13234 = vst [vmem:[#allocation74_spill] sm:$0xff] %v11580_v10 }
 0x3b2   : > { %v4694_v3 = vrot.slane %v4693_v32, 1  ;;  %v4774_v5 = vadd.f32 %v3862_v41, %v3852_v22  ;;  %v4656_v45 = vadd.f32 %v4655_v44, %v4654_v62  ;;  %v4787_v58 = vadd.f32 %v3863_v13, %v3853_v11  ;;  %v11582_v50 = vpop.f32.mrb[54].mxu0  ;;  %v11584_v23 = vpop.f32.mrb[55].mxu1  ;;  %v13237_v16 = vld [vmem:[#allocation50_spill] sm:$0xff]  ;;  %v13241_v11 = vld [vmem:[#allocation51_spill] sm:$0xff] }
 0x3b3   : > { %v4800_v54 = vadd.f32 %v3864_v48, %v3854_v28  ;;  %v4813_v21 = vadd.f32 %v3865_v33, %v3855_v9  ;;  %13235 = vst [vmem:[#allocation90_spill] sm:$0xff] %v11582_v50  ;;  %13236 = vst [vmem:[#allocation91_spill] sm:$0xff] %v11584_v23  ;;  %v4682_v57 = vadd.f32 %v4681_v47, %v4680_v34  ;;  %v11588_v7 = vpop.f32.mrb[55].mxu0  ;;  %v13239_v48 = vld [vmem:[#allocation17_spill] sm:$0xff]  ;;  %v13242_v13 = vld [vmem:[#allocation75_spill] sm:$0xff] }
 0x3b4   : > { %v4669_v2 = vadd.f32 %v4668_v40, %v4667_v49  ;;  %v4695_v12 = vadd.f32 %v4694_v3, %v4693_v32  ;;  %v2385_v14 = vadd.f32 %v13237_v16, %v10925_v1  ;;  %13238 = vst [vmem:[#allocation50_spill] sm:$0xff] %v11588_v7  ;;  %v11592_v41 = vsel %vm5300_vm6, %v4656_v45, %v11432_v59  ;;  %v13240_v33 = vld [vmem:[#allocation37_spill] sm:$0xff]  ;;  %v13243_v45 = vld [vmem:[#allocation52_spill] sm:$0xff] }
 0x3b5   : > { %v2738_v22 = vadd.f32 %v13239_v48, %v10919_v29  ;;  %v2387_v28 = vadd.f32 %v13240_v33, %v10932_v8  ;;  %v2740_v47 = vadd.f32 %v13241_v11, %v10928_v53  ;;  %v11602_v49 = vsel %vm5300_vm6, %v4682_v57, %v11442_v17  ;;  %v13244_v57 = vld [vmem:[#allocation53_spill] sm:$0xff] }
 0x3b6   : > { %v11606_v9 = vsel %vm5300_vm6, %v4669_v2, %v11446_v56  ;;  %v11610_v59 = vsel %vm5300_vm6, %v4695_v12, %v11450_v39  ;;  %v3232_v32 = vmax.f32 %v2385_v14, 0.0  ;;  %v2389_v40 = vadd.f32 %v13242_v13, %v10925_v1  ;;  %v13245_v56 = vld [vmem:[#allocation39_spill] sm:$0xff]  ;;  %v11620_v48 = vpop.f32.mrb[56].mxu1 }
 0x3b7   : > { %v3234_v62 = vmax.f32 %v2738_v22, 0.0  ;;  %v3233_v34 = vmax.f32 %v2387_v28, 0.0  ;;  %v3235_v44 = vmax.f32 %v2740_v47, 0.0  ;;  %v2742_v17 = vadd.f32 %v13243_v45, %v10919_v29  ;;  %13246 = vst [vmem:[#allocation17_spill] sm:$0xff] %v11620_v48  ;;  %v11622_v33 = vpop.f32.mrb[56].mxu0  ;;  %v11624_v28 = vpop.f32.mrb[57].mxu1 }
 0x3b8   : > { %v3872_v3 = vmin.f32 %v3232_v32, 6.0  ;;  %v2391_v16 = vadd.f32 %v13244_v57, %v10932_v8  ;;  %v2744_v2 = vadd.f32 %v13245_v56, %v10928_v53  ;;  %v3242_v22 = vmax.f32 %v2389_v40, 0.0  ;;  %13247 = vst [vmem:[#allocation37_spill] sm:$0xff] %v11622_v33  ;;  %13248 = vst [vmem:[#allocation51_spill] sm:$0xff] %v11624_v28  ;;  %v11626_v45 = vpop.f32.mrb[57].mxu0  ;;  %v11628_v57 = vpop.f32.mrb[58].mxu1 }
 0x3b9   : > { %v3874_v39 = vmin.f32 %v3234_v62, 6.0  ;;  %v3873_v12 = vmin.f32 %v3233_v34, 6.0  ;;  %v3875_v14 = vmin.f32 %v3235_v44, 6.0  ;;  %v3244_v47 = vmax.f32 %v2742_v17, 0.0  ;;  %13249 = vst [vmem:[#allocation75_spill] sm:$0xff] %v11626_v45  ;;  %13250 = vst [vmem:[#allocation52_spill] sm:$0xff] %v11628_v57 }
 0x3ba   : > { %v4775_v11 = vadd.f32 %v4774_v5, %v3872_v3  ;;  %v3243_v32 = vmax.f32 %v2391_v16, 0.0  ;;  %v3245_v13 = vmax.f32 %v2744_v2, 0.0  ;;  %v3882_v48 = vmin.f32 %v3242_v22, 6.0  ;;  %v11630_v62 = vpop.f32.mrb[58].mxu0  ;;  %v11632_v34 = vpop.f32.mrb[59].mxu1  ;;  %v13253_v5 = vld [vmem:[#allocation18_spill] sm:$0xff] }
 0x3bb   : > { %v4801_v7 = vadd.f32 %v4800_v54, %v3874_v39  ;;  %v4788_v56 = vadd.f32 %v4787_v58, %v3873_v12  ;;  %v4814_v23 = vadd.f32 %v4813_v21, %v3875_v14  ;;  %13251 = vst [vmem:[#allocation53_spill] sm:$0xff] %v11630_v62  ;;  %13252 = vst [vmem:[#allocation39_spill] sm:$0xff] %v11632_v34  ;;  %v3884_v44 = vmin.f32 %v3244_v47, 6.0  ;;  %v11636_v17 = vpop.f32.mrb[59].mxu0  ;;  %v13255_v2 = vld [vmem:[#allocation13_spill] sm:$0xff]  ;;  %v13256_v54 = vld [vmem:[#allocation59_spill] sm:$0xff] }
 0x3bc   : > { %v3883_v40 = vmin.f32 %v3243_v32, 6.0  ;;  %v3885_v33 = vmin.f32 %v3245_v13, 6.0  ;;  %v2395_v3 = vadd.f32 %v13253_v5, %v10925_v1  ;;  %13254 = vst [vmem:[#allocation18_spill] sm:$0xff] %v11636_v17  ;;  %v4776_v16 = vadd.f32 %v4775_v11, %v3882_v48  ;;  %v13257_v21 = vld [vmem:[#allocation60_spill] sm:$0xff]  ;;  %v13258_v5 = vld [vmem:[#allocation27_spill] sm:$0xff]  ;;  %v13261_v45 = vld [vmem:[#allocation29_spill] sm:$0xff] }
 0x3bd   : > { %v2748_v57 = vadd.f32 %v13255_v2, %v10919_v29  ;;  %v2397_v58 = vadd.f32 %v13256_v54, %v10932_v8  ;;  %v2750_v39 = vadd.f32 %v13257_v21, %v10928_v53  ;;  %v4802_v12 = vadd.f32 %v4801_v7, %v3884_v44  ;;  %v13259_v11 = vld [vmem:[#allocation28_spill] sm:$0xff]  ;;  %v13260_v62 = vld [vmem:[#allocation47_spill] sm:$0xff] }
 0x3be   : > { %v4789_v14 = vadd.f32 %v4788_v56, %v3883_v40  ;;  %v4815_v22 = vadd.f32 %v4814_v23, %v3885_v33  ;;  %v3252_v47 = vmax.f32 %v2395_v3, 0.0  ;;  %v2399_v17 = vadd.f32 %v13258_v5, %v10925_v1 }
 0x3bf   : > { %v3254_v32 = vmax.f32 %v2748_v57, 0.0  ;;  %v3253_v13 = vmax.f32 %v2397_v58, 0.0  ;;  %v3255_v34 = vmax.f32 %v2750_v39, 0.0  ;;  %v2752_v2 = vadd.f32 %v13259_v11, %v10919_v29  ;;  %v11652_v7 = vpop.f32.mrb[60].mxu1  ;;  %v11654_v44 = vpop.f32.mrb[60].mxu0 }
 0x3c0   : > { %v3892_v48 = vmin.f32 %v3252_v47, 6.0  ;;  %v2401_v54 = vadd.f32 %v13260_v62, %v10932_v8  ;;  %v2754_v21 = vadd.f32 %v13261_v45, %v10928_v53  ;;  %13262 = vst [vmem:[#allocation13_spill] sm:$0xff] %v11652_v7  ;;  %v3262_v56 = vmax.f32 %v2399_v17, 0.0  ;;  %13263 = vst [vmem:[#allocation59_spill] sm:$0xff] %v11654_v44  ;;  %v11656_v40 = vpop.f32.mrb[61].mxu1  ;;  %v11658_v5 = vpop.f32.mrb[61].mxu0 }
 0x3c1   : > { %v3894_v23 = vmin.f32 %v3254_v32, 6.0  ;;  %v3893_v33 = vmin.f32 %v3253_v13, 6.0  ;;  %v3895_v57 = vmin.f32 %v3255_v34, 6.0  ;;  %13264 = vst [vmem:[#allocation60_spill] sm:$0xff] %v11656_v40  ;;  %v3264_v58 = vmax.f32 %v2752_v2, 0.0  ;;  %13265 = vst [vmem:[#allocation27_spill] sm:$0xff] %v11658_v5 }
 0x3c2   : > { %v4777_v3 = vadd.f32 %v4776_v16, %v3892_v48  ;;  %v3263_v39 = vmax.f32 %v2401_v54, 0.0  ;;  %v3265_v47 = vmax.f32 %v2754_v21, 0.0  ;;  %v11660_v62 = vpop.f32.mrb[62].mxu1  ;;  %v3902_v7 = vmin.f32 %v3262_v56, 6.0  ;;  %v11662_v32 = vpop.f32.mrb[62].mxu0  ;;  %v13269_v16 = vld [vmem:[#allocation30_spill] sm:$0xff] }
 0x3c3   : > { %13266 = vst [vmem:[#allocation28_spill] sm:$0xff] %v11660_v62  ;;  %v4803_v11 = vadd.f32 %v4802_v12, %v3894_v23  ;;  %v4790_v45 = vadd.f32 %v4789_v14, %v3893_v33  ;;  %v4816_v28 = vadd.f32 %v4815_v22, %v3895_v57  ;;  %13267 = vst [vmem:[#allocation47_spill] sm:$0xff] %v11662_v32  ;;  %v11664_v34 = vpop.f32.mrb[63].mxu1  ;;  %v3904_v17 = vmin.f32 %v3264_v58, 6.0  ;;  %v11668_v2 = vpop.f32.mrb[63].mxu0  ;;  %v13271_v21 = vld [vmem:[#allocation15_spill] sm:$0xff] }
 0x3c4   : > { %13268 = vst [vmem:[#allocation29_spill] sm:$0xff] %v11664_v34  ;;  %v3903_v13 = vmin.f32 %v3263_v39, 6.0  ;;  %v3905_v44 = vmin.f32 %v3265_v47, 6.0  ;;  %v2405_v48 = vadd.f32 %v13269_v16, %v10925_v1  ;;  %13270 = vst [vmem:[#allocation30_spill] sm:$0xff] %v11668_v2  ;;  %v4778_v54 = vadd.f32 %v4777_v3, %v3902_v7  ;;  %v13272_v12 = vld [vmem:[#allocation48_spill] sm:$0xff]  ;;  %v13275_v3 = vld [vmem:[#allocation77_spill] sm:$0xff] }
 0x3c5   : > { %v2758_v62 = vadd.f32 %v13271_v21, %v10919_v29  ;;  %v2407_v14 = vadd.f32 %v13272_v12, %v10932_v8  ;;  %v13273_v22 = vld [vmem:[#allocation12_spill] sm:$0xff]  ;;  %v4804_v33 = vadd.f32 %v4803_v11, %v3904_v17  ;;  %v2762_v21 = vadd.f32 %v13275_v3, %v10919_v29  ;;  %v13276_v32 = vld [vmem:[#allocation78_spill] sm:$0xff] }
 0x3c6   : > { %v2760_v23 = vadd.f32 %v13273_v22, %v10928_v53  ;;  %v4791_v57 = vadd.f32 %v4790_v45, %v3903_v13  ;;  %v4817_v56 = vadd.f32 %v4816_v28, %v3905_v44  ;;  %v3272_v58 = vmax.f32 %v2405_v48, 0.0  ;;  %v13274_v16 = vld [vmem:[#allocation76_spill] sm:$0xff] }
 0x3c7   : > { %v3274_v39 = vmax.f32 %v2758_v62, 0.0  ;;  %v3273_v47 = vmax.f32 %v2407_v14, 0.0  ;;  %v2409_v2 = vadd.f32 %v13274_v16, %v10925_v1  ;;  %v2411_v12 = vadd.f32 %v13276_v32, %v10932_v8 }
 0x3c8   : > { %v3275_v34 = vmax.f32 %v2760_v23, 0.0  ;;  %v3912_v7 = vmin.f32 %v3272_v58, 6.0  ;;  %v2764_v22 = vadd.f32 %v11266_v63, %v10928_v53  ;;  %v3284_v17 = vmax.f32 %v2762_v21, 0.0 }
 0x3c9   : > { %v3914_v11 = vmin.f32 %v3274_v39, 6.0  ;;  %v3913_v45 = vmin.f32 %v3273_v47, 6.0  ;;  %v3282_v44 = vmax.f32 %v2409_v2, 0.0  ;;  %v3283_v13 = vmax.f32 %v2411_v12, 0.0  ;;  %v13277_v2 = vld [vmem:[#allocation32_spill] sm:$0xff] }
 0x3ca   : > { %v3915_v28 = vmin.f32 %v3275_v34, 6.0  ;;  %v4779_v62 = vadd.f32 %v4778_v54, %v3912_v7  ;;  %v3285_v48 = vmax.f32 %v2764_v22, 0.0  ;;  %v3924_v5 = vmin.f32 %v3284_v17, 6.0 }
 0x3cb   : > { %v4805_v14 = vadd.f32 %v4804_v33, %v3914_v11  ;;  %v4792_v23 = vadd.f32 %v4791_v57, %v3913_v45  ;;  %v3922_v16 = vmin.f32 %v3282_v44, 6.0  ;;  %v3923_v3 = vmin.f32 %v3283_v13, 6.0 }
 0x3cc   : > { %v4818_v58 = vadd.f32 %v4817_v56, %v3915_v28  ;;  %v3925_v40 = vmin.f32 %v3285_v48, 6.0  ;;  %v2415_v32 = vadd.f32 %v11270_v35, %v10925_v1  ;;  %v2768_v63 = vadd.f32 %v11282_v42, %v10919_v29 }
 0x3cd   : > { %v4780_v50 = vadd.f32 %v4779_v62, %v3922_v16  ;;  %v2417_v34 = vadd.f32 %v11284_v55, %v10932_v8  ;;  %v2770_v54 = vadd.f32 %v13277_v2, %v10928_v53  ;;  %v4806_v33 = vadd.f32 %v4805_v14, %v3924_v5  ;;  %v13278_v5 = vld [vmem:[#allocation31_spill] sm:$0xff] }
 0x3ce   : > { %v4793_v57 = vadd.f32 %v4792_v23, %v3923_v3  ;;  %v4819_v56 = vadd.f32 %v4818_v58, %v3925_v40  ;;  %v3292_v39 = vmax.f32 %v2415_v32, 0.0  ;;  %v3294_v7 = vmax.f32 %v2768_v63, 0.0  ;;  %v13279_v14 = vld [vmem:[#allocation55_spill] sm:$0xff]  ;;  %v13280_v58 = vld [vmem:[#allocation33_spill] sm:$0xff] }
 0x3cf   : > { %v4781_v47 = vrot.slane %v4780_v50, 4  ;;  %v3293_v21 = vmax.f32 %v2417_v34, 0.0  ;;  %v3295_v12 = vmax.f32 %v2770_v54, 0.0  ;;  %v4807_v22 = vrot.slane %v4806_v33, 4 }
 0x3d0   : > { %v4794_v35 = vrot.slane %v4793_v57, 4  ;;  %v4820_v11 = vrot.slane %v4819_v56, 4  ;;  %v3932_v45 = vmin.f32 %v3292_v39, 6.0  ;;  %v3934_v42 = vmin.f32 %v3294_v7, 6.0 }
 0x3d1   : > { %v4782_v28 = vadd.f32 %v4781_v47, %v4780_v50  ;;  %v3933_v44 = vmin.f32 %v3293_v21, 6.0  ;;  %v3935_v62 = vmin.f32 %v3295_v12, 6.0  ;;  %v4808_v55 = vadd.f32 %v4807_v22, %v4806_v33 }
 0x3d2   : > { %v4795_v17 = vadd.f32 %v4794_v35, %v4793_v57  ;;  %v4821_v13 = vadd.f32 %v4820_v11, %v4819_v56  ;;  %v2419_v48 = vadd.f32 %v13278_v5, %v10925_v1  ;;  %v2772_v23 = vadd.f32 %v13279_v14, %v10919_v29 }
 0x3d3   : > { %v4783_v40 = vrot.slane %v4782_v28, 2  ;;  %v2421_v16 = vadd.f32 %v13280_v58, %v10932_v8  ;;  %v2774_v3 = vadd.f32 %v11314_v31, %v10928_v53  ;;  %v4809_v50 = vrot.slane %v4808_v55, 2 }
 0x3d4   : > { %v4796_v32 = vrot.slane %v4795_v17, 2  ;;  %v4822_v63 = vrot.slane %v4821_v13, 2  ;;  %v3302_v34 = vmax.f32 %v2419_v48, 0.0  ;;  %v3304_v54 = vmax.f32 %v2772_v23, 0.0 }
 0x3d5   : > { %v4784_v2 = vadd.f32 %v4783_v40, %v4782_v28  ;;  %v3303_v33 = vmax.f32 %v2421_v16, 0.0  ;;  %v3305_v57 = vmax.f32 %v2774_v3, 0.0  ;;  %v4810_v56 = vadd.f32 %v4809_v50, %v4808_v55 }
 0x3d6   : > { %v4797_v39 = vadd.f32 %v4796_v32, %v4795_v17  ;;  %v4823_v47 = vadd.f32 %v4822_v63, %v4821_v13  ;;  %v3942_v7 = vmin.f32 %v3302_v34, 6.0  ;;  %v3944_v12 = vmin.f32 %v3304_v54, 6.0  ;;  %v13282_v32 = vld [vmem:[#allocation62_spill] sm:$0xff]  ;;  %v13283_v63 = vld [vmem:[#allocation63_spill] sm:$0xff] }
 0x3d7   : > { %v4785_v21 = vrot.slane %v4784_v2, 1  ;;  %v3943_v22 = vmin.f32 %v3303_v33, 6.0  ;;  %v3945_v35 = vmin.f32 %v3305_v57, 6.0  ;;  %v4811_v11 = vrot.slane %v4810_v56, 1 }
 0x3d8   : > { %v4798_v5 = vrot.slane %v4797_v39, 1  ;;  %v4824_v14 = vrot.slane %v4823_v47, 1  ;;  %v4904_v31 = vadd.f32 %v3942_v7, %v3932_v45  ;;  %v4930_v10 = vadd.f32 %v3944_v12, %v3934_v42 }
 0x3d9   : > { %v4786_v58 = vadd.f32 %v4785_v21, %v4784_v2  ;;  %v4917_v25 = vadd.f32 %v3943_v22, %v3933_v44  ;;  %v4943_v48 = vadd.f32 %v3945_v35, %v3935_v62  ;;  %v4812_v28 = vadd.f32 %v4811_v11, %v4810_v56 }
 0x3da   : > { %v4799_v40 = vadd.f32 %v4798_v5, %v4797_v39  ;;  %v4825_v23 = vadd.f32 %v4824_v14, %v4823_v47  ;;  %v2425_v55 = vadd.f32 %v11318_v24, %v10925_v1  ;;  %v2778_v13 = vadd.f32 %v11326_v61, %v10919_v29 }
 0x3db   : > { %v11704_v17 = vsel %vm5302_vm7, %v4786_v58, %v11592_v41  ;;  %v2427_v45 = vadd.f32 %v11328_v20, %v10932_v8  ;;  %v2780_v42 = vadd.f32 %v11330_v51, %v10928_v53  ;;  %v11714_v44 = vsel %vm5302_vm7, %v4812_v28, %v11602_v49  ;;  %v13281_v20 = vld [vmem:[#allocation61_spill] sm:$0xff] }
 0x3dc   : > { %v11718_v24 = vsel %vm5302_vm7, %v4799_v40, %v11606_v9  ;;  %v11722_v41 = vsel %vm5302_vm7, %v4825_v23, %v11610_v59  ;;  %v3312_v62 = vmax.f32 %v2425_v55, 0.0  ;;  %v3314_v61 = vmax.f32 %v2778_v13, 0.0 }
 0x3dd   : > { %v3313_v16 = vmax.f32 %v2427_v45, 0.0  ;;  %v3315_v3 = vmax.f32 %v2780_v42, 0.0  ;;  %v2429_v50 = vadd.f32 %v13281_v20, %v10925_v1  ;;  %v2782_v49 = vadd.f32 %v13282_v32, %v10919_v29 }
 0x3de   : > { %v3952_v51 = vmin.f32 %v3312_v62, 6.0  ;;  %v2431_v34 = vadd.f32 %v13283_v63, %v10932_v8  ;;  %v2784_v9 = vadd.f32 %v11346_v43, %v10928_v53  ;;  %v3954_v2 = vmin.f32 %v3314_v61, 6.0 }
 0x3df   : > { %v3953_v59 = vmin.f32 %v3313_v16, 6.0  ;;  %v3955_v54 = vmin.f32 %v3315_v3, 6.0  ;;  %v3322_v33 = vmax.f32 %v2429_v50, 0.0  ;;  %v3324_v56 = vmax.f32 %v2782_v49, 0.0 }
 0x3e0   : > { %v4905_v57 = vadd.f32 %v4904_v31, %v3952_v51  ;;  %v3323_v39 = vmax.f32 %v2431_v34, 0.0  ;;  %v3325_v47 = vmax.f32 %v2784_v9, 0.0  ;;  %v4931_v7 = vadd.f32 %v4930_v10, %v3954_v2 }
 0x3e1   : > { %v4918_v21 = vadd.f32 %v4917_v25, %v3953_v59  ;;  %v4944_v12 = vadd.f32 %v4943_v48, %v3955_v54  ;;  %v3962_v22 = vmin.f32 %v3322_v33, 6.0  ;;  %v3964_v35 = vmin.f32 %v3324_v56, 6.0  ;;  %v13286_v33 = vld [vmem:[#allocation57_spill] sm:$0xff] }
 0x3e2   : > { %v3963_v11 = vmin.f32 %v3323_v39, 6.0  ;;  %v3965_v5 = vmin.f32 %v3325_v47, 6.0  ;;  %v2435_v14 = vadd.f32 %v11350_v15, %v10925_v1  ;;  %v2788_v43 = vadd.f32 %v11358_v0, %v10919_v29  ;;  %v13287_v56 = vld [vmem:[#allocation65_spill] sm:$0xff] }
 0x3e3   : > { %v4906_v58 = vadd.f32 %v4905_v57, %v3962_v22  ;;  %v2437_v31 = vadd.f32 %v11360_v60, %v10932_v8  ;;  %v2790_v28 = vadd.f32 %v11362_v19, %v10928_v53  ;;  %v4932_v10 = vadd.f32 %v4931_v7, %v3964_v35 }
 0x3e4   : > { %v4919_v25 = vadd.f32 %v4918_v21, %v3963_v11  ;;  %v4945_v48 = vadd.f32 %v4944_v12, %v3965_v5  ;;  %v3332_v40 = vmax.f32 %v2435_v14, 0.0  ;;  %v3334_v23 = vmax.f32 %v2788_v43, 0.0  ;;  %v13288_v5 = vld [vmem:[#allocation34_spill] sm:$0xff]  ;;  %v13289_v43 = vld [vmem:[#allocation79_spill] sm:$0xff] }
 0x3e5   : > { %v3333_v55 = vmax.f32 %v2437_v31, 0.0  ;;  %v3335_v13 = vmax.f32 %v2790_v28, 0.0  ;;  %v2439_v15 = vadd.f32 %v11364_v46, %v10925_v1  ;;  %v2792_v0 = vadd.f32 %v11368_v37, %v10919_v29  ;;  %v13290_v28 = vld [vmem:[#allocation80_spill] sm:$0xff] }
 0x3e6   : > { %v3972_v45 = vmin.f32 %v3332_v40, 6.0  ;;  %v2441_v60 = vadd.f32 %v11370_v4, %v10932_v8  ;;  %v2794_v19 = vadd.f32 %v11378_v27, %v10928_v53  ;;  %v3974_v42 = vmin.f32 %v3334_v23, 6.0  ;;  %v13284_v4 = vld [vmem:[#allocation64_spill] sm:$0xff] }
 0x3e7   : > { %v3973_v62 = vmin.f32 %v3333_v55, 6.0  ;;  %v3975_v61 = vmin.f32 %v3335_v13, 6.0  ;;  %v3342_v16 = vmax.f32 %v2439_v15, 0.0  ;;  %v3344_v20 = vmax.f32 %v2792_v0, 0.0  ;;  %v13285_v27 = vld [vmem:[#allocation56_spill] sm:$0xff] }
 0x3e8   : > { %v4907_v3 = vadd.f32 %v4906_v58, %v3972_v45  ;;  %v3343_v50 = vmax.f32 %v2441_v60, 0.0  ;;  %v3345_v51 = vmax.f32 %v2794_v19, 0.0  ;;  %v4933_v32 = vadd.f32 %v4932_v10, %v3974_v42 }
 0x3e9   : > { %v4920_v46 = vadd.f32 %v4919_v25, %v3973_v62  ;;  %v4946_v49 = vadd.f32 %v4945_v48, %v3975_v61  ;;  %v3982_v63 = vmin.f32 %v3342_v16, 6.0  ;;  %v3984_v34 = vmin.f32 %v3344_v20, 6.0  ;;  %v13291_v25 = vld [vmem:[#allocation81_spill] sm:$0xff] }
 0x3ea   : > { %v3983_v37 = vmin.f32 %v3343_v50, 6.0  ;;  %v3985_v9 = vmin.f32 %v3345_v51, 6.0  ;;  %v2445_v2 = vadd.f32 %v13284_v4, %v10925_v1  ;;  %v2798_v54 = vadd.f32 %v13285_v27, %v10919_v29  ;;  %v13292_v50 = vld [vmem:[#allocation19_spill] sm:$0xff] }
 0x3eb   : > { %v4908_v59 = vadd.f32 %v4907_v3, %v3982_v63  ;;  %v2447_v57 = vadd.f32 %v13286_v33, %v10932_v8  ;;  %v2800_v39 = vadd.f32 %v13287_v56, %v10928_v53  ;;  %v4934_v47 = vadd.f32 %v4933_v32, %v3984_v34 }
 0x3ec   : > { %v4921_v7 = vadd.f32 %v4920_v46, %v3983_v37  ;;  %v4947_v21 = vadd.f32 %v4946_v49, %v3985_v9  ;;  %v3352_v12 = vmax.f32 %v2445_v2, 0.0  ;;  %v3354_v22 = vmax.f32 %v2798_v54, 0.0  ;;  %v13293_v49 = vld [vmem:[#allocation66_spill] sm:$0xff] }
 0x3ed   : > { %v3353_v35 = vmax.f32 %v2447_v57, 0.0  ;;  %v3355_v11 = vmax.f32 %v2800_v39, 0.0  ;;  %v2449_v14 = vadd.f32 %v13288_v5, %v10925_v1  ;;  %v2802_v31 = vadd.f32 %v13289_v43, %v10919_v29 }
 0x3ee   : > { %v3992_v58 = vmin.f32 %v3352_v12, 6.0  ;;  %v2451_v10 = vadd.f32 %v13290_v28, %v10932_v8  ;;  %v2804_v48 = vadd.f32 %v13291_v25, %v10928_v53  ;;  %v3994_v40 = vmin.f32 %v3354_v22, 6.0 }
 0x3ef   : > { %v3993_v23 = vmin.f32 %v3353_v35, 6.0  ;;  %v3995_v55 = vmin.f32 %v3355_v11, 6.0  ;;  %v3362_v13 = vmax.f32 %v2449_v14, 0.0  ;;  %v3364_v45 = vmax.f32 %v2802_v31, 0.0  ;;  %v13296_v31 = vld [vmem:[#allocation82_spill] sm:$0xff] }
 0x3f0   : > { %v4909_v15 = vadd.f32 %v4908_v59, %v3992_v58  ;;  %v3363_v0 = vmax.f32 %v2451_v10, 0.0  ;;  %v3365_v60 = vmax.f32 %v2804_v48, 0.0  ;;  %v4935_v19 = vadd.f32 %v4934_v47, %v3994_v40  ;;  %v13295_v58 = vld [vmem:[#allocation68_spill] sm:$0xff] }
 0x3f1   : > { %v4922_v42 = vadd.f32 %v4921_v7, %v3993_v23  ;;  %v4948_v62 = vadd.f32 %v4947_v21, %v3995_v55  ;;  %v4002_v61 = vmin.f32 %v3362_v13, 6.0  ;;  %v4004_v16 = vmin.f32 %v3364_v45, 6.0 }
 0x3f2   : > { %v4003_v3 = vmin.f32 %v3363_v0, 6.0  ;;  %v4005_v20 = vmin.f32 %v3365_v60, 6.0  ;;  %v2455_v51 = vadd.f32 %v13292_v50, %v10925_v1  ;;  %v2808_v46 = vadd.f32 %v11414_v38, %v10919_v29 }
 0x3f3   : > { %v4910_v32 = vadd.f32 %v4909_v15, %v4002_v61  ;;  %v2457_v63 = vadd.f32 %v13293_v49, %v10932_v8  ;;  %v2810_v34 = vadd.f32 %v11418_v52, %v10928_v53  ;;  %v4936_v37 = vadd.f32 %v4935_v19, %v4004_v16  ;;  %v13294_v52 = vld [vmem:[#allocation67_spill] sm:$0xff] }
 0x3f4   : > { %v4923_v9 = vadd.f32 %v4922_v42, %v4003_v3  ;;  %v4949_v4 = vadd.f32 %v4948_v62, %v4005_v20  ;;  %v3372_v2 = vmax.f32 %v2455_v51, 0.0  ;;  %v3374_v27 = vmax.f32 %v2808_v46, 0.0 }
 0x3f5   : > { %v4911_v59 = vrot.slane %v4910_v32, 4  ;;  %v3373_v54 = vmax.f32 %v2457_v63, 0.0  ;;  %v3375_v33 = vmax.f32 %v2810_v34, 0.0  ;;  %v4937_v57 = vrot.slane %v4936_v37, 4 }
 0x3f6   : > { %v4924_v56 = vrot.slane %v4923_v9, 4  ;;  %v4950_v39 = vrot.slane %v4949_v4, 4  ;;  %v4012_v47 = vmin.f32 %v3372_v2, 6.0  ;;  %v4014_v38 = vmin.f32 %v3374_v27, 6.0  ;;  %v13298_v27 = vld [vmem:[#allocation21_spill] sm:$0xff] }
 0x3f7   : > { %v4912_v7 = vadd.f32 %v4911_v59, %v4910_v32  ;;  %v4013_v21 = vmin.f32 %v3373_v54, 6.0  ;;  %v4015_v12 = vmin.f32 %v3375_v33, 6.0  ;;  %v4938_v22 = vadd.f32 %v4937_v57, %v4936_v37  ;;  %v13299_v33 = vld [vmem:[#allocation23_spill] sm:$0xff] }
 0x3f8   : > { %v4925_v35 = vadd.f32 %v4924_v56, %v4923_v9  ;;  %v4951_v11 = vadd.f32 %v4950_v39, %v4949_v4  ;;  %v2459_v5 = vadd.f32 %v13294_v52, %v10925_v1  ;;  %v2812_v43 = vadd.f32 %v13295_v58, %v10919_v29  ;;  %v13297_v4 = vld [vmem:[#allocation36_spill] sm:$0xff] }
 0x3f9   : > { %v4913_v14 = vrot.slane %v4912_v7, 2  ;;  %v2461_v28 = vadd.f32 %v13296_v31, %v10932_v8  ;;  %v2814_v10 = vadd.f32 %v11426_v36, %v10928_v53  ;;  %v4939_v25 = vrot.slane %v4938_v22, 2  ;;  %v13300_v56 = vld [vmem:[#allocation20_spill] sm:$0xff] }
 0x3fa   : > { %v4926_v48 = vrot.slane %v4925_v35, 2  ;;  %v4952_v40 = vrot.slane %v4951_v11, 2  ;;  %v3382_v23 = vmax.f32 %v2459_v5, 0.0  ;;  %v3384_v13 = vmax.f32 %v2812_v43, 0.0  ;;  %v13302_v5 = vld [vmem:[#allocation25_spill] sm:$0xff] }
 0x3fb   : > { %v4914_v55 = vadd.f32 %v4913_v14, %v4912_v7  ;;  %v3383_v15 = vmax.f32 %v2461_v28, 0.0  ;;  %v3385_v45 = vmax.f32 %v2814_v10, 0.0  ;;  %v4940_v0 = vadd.f32 %v4939_v25, %v4938_v22  ;;  %v13303_v14 = vld [vmem:[#allocation38_spill] sm:$0xff] }
 0x3fc   : > { %v4927_v60 = vadd.f32 %v4926_v48, %v4925_v35  ;;  %v4953_v19 = vadd.f32 %v4952_v40, %v4951_v11  ;;  %v4022_v42 = vmin.f32 %v3382_v23, 6.0  ;;  %v4024_v61 = vmin.f32 %v3384_v13, 6.0  ;;  %v13301_v35 = vld [vmem:[#allocation54_spill] sm:$0xff] }
 0x3fd   : > { %v4915_v62 = vrot.slane %v4914_v55, 1  ;;  %v4023_v16 = vmin.f32 %v3383_v15, 6.0  ;;  %v4025_v3 = vmin.f32 %v3385_v45, 6.0  ;;  %v4941_v20 = vrot.slane %v4940_v0, 1 }
 0x3fe   : > { %v4928_v50 = vrot.slane %v4927_v60, 1  ;;  %v4954_v51 = vrot.slane %v4953_v19, 1  ;;  %v5034_v36 = vadd.f32 %v4022_v42, %v4012_v47  ;;  %v5060_v46 = vadd.f32 %v4024_v61, %v4014_v38  ;;  %v13305_v42 = vld [vmem:[#allocation45_spill] sm:$0xff] }
 0x3ff   : > { %v4916_v32 = vadd.f32 %v4915_v62, %v4914_v55  ;;  %v5047_v49 = vadd.f32 %v4023_v16, %v4013_v21  ;;  %v5073_v63 = vadd.f32 %v4025_v3, %v4015_v12  ;;  %v4942_v34 = vadd.f32 %v4941_v20, %v4940_v0  ;;  %v13306_v16 = vld [vmem:[#allocation22_spill] sm:$0xff]  ;;  %v13307_v20 = vld [vmem:[#allocation35_spill] sm:$0xff] }
 0x400   : > { %v4929_v37 = vadd.f32 %v4928_v50, %v4927_v60  ;;  %v4955_v9 = vadd.f32 %v4954_v51, %v4953_v19  ;;  %v2465_v2 = vadd.f32 %v13297_v4, %v10925_v1  ;;  %v2818_v54 = vadd.f32 %v13298_v27, %v10919_v29  ;;  %v13308_v51 = vld [vmem:[#allocation24_spill] sm:$0xff]  ;;  %v13309_v4 = vld [vmem:[#allocation69_spill] sm:$0xff] }
 0x401   : > { %v11784_v59 = vsel %vm5304_vm8, %v4916_v32, %v11704_v17  ;;  %v2467_v57 = vadd.f32 %v13299_v33, %v10932_v8  ;;  %v2820_v39 = vadd.f32 %v13300_v56, %v10928_v53  ;;  %v11794_v47 = vsel %vm5304_vm8, %v4942_v34, %v11714_v44 }
 0x402   : > { %v11798_v7 = vsel %vm5304_vm8, %v4929_v37, %v11718_v24  ;;  %v11802_v17 = vsel %vm5304_vm8, %v4955_v9, %v11722_v41  ;;  %v3392_v38 = vmax.f32 %v2465_v2, 0.0  ;;  %v3394_v21 = vmax.f32 %v2818_v54, 0.0  ;;  %v13304_v24 = vld [vmem:[#allocation42_spill] sm:$0xff] }
 0x403   : > { %v3393_v12 = vmax.f32 %v2467_v57, 0.0  ;;  %v3395_v22 = vmax.f32 %v2820_v39, 0.0  ;;  %v2469_v11 = vadd.f32 %v13301_v35, %v10925_v1  ;;  %v2822_v44 = vadd.f32 %v13302_v5, %v10919_v29  ;;  %v13310_v57 = vld [vmem:[#allocation40_spill] sm:$0xff] }
 0x404   : > { %v4032_v52 = vmin.f32 %v3392_v38, 6.0  ;;  %v2471_v58 = vadd.f32 %v13303_v14, %v10932_v8  ;;  %v2824_v43 = vadd.f32 %v13304_v24, %v10928_v53  ;;  %v4034_v31 = vmin.f32 %v3394_v21, 6.0 }
 0x405   : > { %v4033_v41 = vmin.f32 %v3393_v12, 6.0  ;;  %v4035_v28 = vmin.f32 %v3395_v22, 6.0  ;;  %v3402_v10 = vmax.f32 %v2469_v11, 0.0  ;;  %v3404_v48 = vmax.f32 %v2822_v44, 0.0 }
 0x406   : > { %v5035_v25 = vadd.f32 %v5034_v36, %v4032_v52  ;;  %v3403_v40 = vmax.f32 %v2471_v58, 0.0  ;;  %v3405_v23 = vmax.f32 %v2824_v43, 0.0  ;;  %v5061_v55 = vadd.f32 %v5060_v46, %v4034_v31 }
 0x407   : > { %v5048_v13 = vadd.f32 %v5047_v49, %v4033_v41  ;;  %v5074_v15 = vadd.f32 %v5073_v63, %v4035_v28  ;;  %v4042_v45 = vmin.f32 %v3402_v10, 6.0  ;;  %v4044_v0 = vmin.f32 %v3404_v48, 6.0  ;;  %v13312_v28 = vld [vmem:[#allocation26_spill] sm:$0xff] }
 0x408   : > { %v4043_v60 = vmin.f32 %v3403_v40, 6.0  ;;  %v4045_v19 = vmin.f32 %v3405_v23, 6.0  ;;  %v2475_v62 = vadd.f32 %v13305_v42, %v10925_v1  ;;  %v2828_v3 = vadd.f32 %v13306_v16, %v10919_v29  ;;  %v13314_v40 = vld [vmem:[#allocation58_spill] sm:$0xff]  ;;  %v13315_v42 = vld [vmem:[#allocation43_spill] sm:$0xff]  ;;  %v13316_v16 = vld [vmem:[#allocation84_spill] sm:$0xff] }
 0x409   : > { %v5036_v61 = vadd.f32 %v5035_v25, %v4042_v45  ;;  %v2477_v50 = vadd.f32 %v13307_v20, %v10932_v8  ;;  %v2830_v36 = vadd.f32 %v13308_v51, %v10928_v53  ;;  %v5062_v32 = vadd.f32 %v5061_v55, %v4044_v0  ;;  %v13313_v25 = vld [vmem:[#allocation83_spill] sm:$0xff]  ;;  %v13317_v20 = vld [vmem:[#allocation85_spill] sm:$0xff]  ;;  %v13318_v51 = vld [vmem:[#allocation86_spill] sm:$0xff] }
 0x40a   : > { %v5049_v46 = vadd.f32 %v5048_v13, %v4043_v60  ;;  %v5075_v49 = vadd.f32 %v5074_v15, %v4045_v19  ;;  %v3412_v63 = vmax.f32 %v2475_v62, 0.0  ;;  %v3414_v34 = vmax.f32 %v2828_v3, 0.0 }
 0x40b   : > { %v3413_v37 = vmax.f32 %v2477_v50, 0.0  ;;  %v3415_v9 = vmax.f32 %v2830_v36, 0.0  ;;  %v2479_v2 = vadd.f32 %v13309_v4, %v10925_v1  ;;  %v2832_v54 = vadd.f32 %v11502_v26, %v10919_v29 }
 0x40c   : > { %v4052_v27 = vmin.f32 %v3412_v63, 6.0  ;;  %v2481_v33 = vadd.f32 %v11504_v18, %v10932_v8  ;;  %v2834_v56 = vadd.f32 %v13310_v57, %v10928_v53  ;;  %v4054_v39 = vmin.f32 %v3414_v34, 6.0  ;;  %v13311_v18 = vld [vmem:[#allocation70_spill] sm:$0xff] }
 0x40d   : > { %v4053_v38 = vmin.f32 %v3413_v37, 6.0  ;;  %v4055_v21 = vmin.f32 %v3415_v9, 6.0  ;;  %v3422_v12 = vmax.f32 %v2479_v2, 0.0  ;;  %v3424_v35 = vmax.f32 %v2832_v54, 0.0 }
 0x40e   : > { %v5037_v22 = vadd.f32 %v5036_v61, %v4052_v27  ;;  %v3423_v11 = vmax.f32 %v2481_v33, 0.0  ;;  %v3425_v52 = vmax.f32 %v2834_v56, 0.0  ;;  %v5063_v5 = vadd.f32 %v5062_v32, %v4054_v39 }
 0x40f   : > { %v5050_v44 = vadd.f32 %v5049_v46, %v4053_v38  ;;  %v5076_v14 = vadd.f32 %v5075_v49, %v4055_v21  ;;  %v4062_v58 = vmin.f32 %v3422_v12, 6.0  ;;  %v4064_v24 = vmin.f32 %v3424_v35, 6.0  ;;  %v13319_v38 = vld [vmem:[#allocation49_spill] sm:$0xff] }
 0x410   : > { %v4063_v26 = vmin.f32 %v3423_v11, 6.0  ;;  %v4065_v43 = vmin.f32 %v3425_v52, 6.0  ;;  %v2485_v31 = vadd.f32 %v13311_v18, %v10925_v1  ;;  %v2838_v10 = vadd.f32 %v13312_v28, %v10919_v29  ;;  %v13321_v11 = vld [vmem:[#allocation71_spill] sm:$0xff] }
 0x411   : > { %v5038_v41 = vadd.f32 %v5037_v22, %v4062_v58  ;;  %v2487_v48 = vadd.f32 %v13313_v25, %v10932_v8  ;;  %v2840_v23 = vadd.f32 %v13314_v40, %v10928_v53  ;;  %v5064_v55 = vadd.f32 %v5063_v5, %v4064_v24  ;;  %v13320_v22 = vld [vmem:[#allocation16_spill] sm:$0xff] }
 0x412   : > { %v5051_v13 = vadd.f32 %v5050_v44, %v4063_v26  ;;  %v5077_v15 = vadd.f32 %v5076_v14, %v4065_v43  ;;  %v3432_v45 = vmax.f32 %v2485_v31, 0.0  ;;  %v3434_v0 = vmax.f32 %v2838_v10, 0.0  ;;  %v13322_v5 = vld [vmem:[#allocation72_spill] sm:$0xff] }
 0x413   : > { %v3433_v60 = vmax.f32 %v2487_v48, 0.0  ;;  %v3435_v19 = vmax.f32 %v2840_v23, 0.0  ;;  %v2489_v62 = vadd.f32 %v13315_v42, %v10925_v1  ;;  %v2842_v3 = vadd.f32 %v13316_v16, %v10919_v29  ;;  %v13325_v16 = vld [vmem:[#allocation89_spill] sm:$0xff] }
 0x414   : > { %v4072_v61 = vmin.f32 %v3432_v45, 6.0  ;;  %v2491_v50 = vadd.f32 %v13317_v20, %v10932_v8  ;;  %v2844_v36 = vadd.f32 %v13318_v51, %v10928_v53  ;;  %v4074_v32 = vmin.f32 %v3434_v0, 6.0  ;;  %v13326_v20 = vld [vmem:[#allocation73_spill] sm:$0xff] }
 0x415   : > { %v4073_v46 = vmin.f32 %v3433_v60, 6.0  ;;  %v4075_v49 = vmin.f32 %v3435_v19, 6.0  ;;  %v3442_v63 = vmax.f32 %v2489_v62, 0.0  ;;  %v3444_v37 = vmax.f32 %v2842_v3, 0.0  ;;  %v13323_v60 = vld [vmem:[#allocation87_spill] sm:$0xff]  ;;  %v13324_v62 = vld [vmem:[#allocation88_spill] sm:$0xff] }
 0x416   : > { %v5039_v34 = vadd.f32 %v5038_v41, %v4072_v61  ;;  %v3443_v9 = vmax.f32 %v2491_v50, 0.0  ;;  %v3445_v4 = vmax.f32 %v2844_v36, 0.0  ;;  %v5065_v2 = vadd.f32 %v5064_v55, %v4074_v32 }
 0x417   : > { %v5052_v27 = vadd.f32 %v5051_v13, %v4073_v46  ;;  %v5078_v54 = vadd.f32 %v5077_v15, %v4075_v49  ;;  %v4082_v33 = vmin.f32 %v3442_v63, 6.0  ;;  %v4084_v57 = vmin.f32 %v3444_v37, 6.0 }
 0x418   : > { %v4083_v56 = vmin.f32 %v3443_v9, 6.0  ;;  %v4085_v39 = vmin.f32 %v3445_v4, 6.0  ;;  %v2495_v21 = vadd.f32 %v13319_v38, %v10925_v1  ;;  %v2848_v35 = vadd.f32 %v13320_v22, %v10919_v29 }
 0x419   : > { %v5040_v12 = vadd.f32 %v5039_v34, %v4082_v33  ;;  %v2497_v52 = vadd.f32 %v13321_v11, %v10932_v8  ;;  %v2850_v44 = vadd.f32 %v13322_v5, %v10928_v53  ;;  %v5066_v14 = vadd.f32 %v5065_v2, %v4084_v57 }
 0x41a   : > { %v5053_v58 = vadd.f32 %v5052_v27, %v4083_v56  ;;  %v5079_v24 = vadd.f32 %v5078_v54, %v4085_v39  ;;  %v3452_v26 = vmax.f32 %v2495_v21, 0.0  ;;  %v3454_v18 = vmax.f32 %v2848_v35, 0.0 }
 0x41b   : > { %v5041_v43 = vrot.slane %v5040_v12, 4  ;;  %v3453_v31 = vmax.f32 %v2497_v52, 0.0  ;;  %v3455_v41 = vmax.f32 %v2850_v44, 0.0  ;;  %v5067_v28 = vrot.slane %v5066_v14, 4 }
 0x41c   : > { %v5054_v10 = vrot.slane %v5053_v58, 4  ;;  %v5080_v25 = vrot.slane %v5079_v24, 4  ;;  %v4092_v48 = vmin.f32 %v3452_v26, 6.0  ;;  %v4094_v23 = vmin.f32 %v3454_v18, 6.0 }
 0x41d   : > { %v5042_v40 = vadd.f32 %v5041_v43, %v5040_v12  ;;  %v4093_v55 = vmin.f32 %v3453_v31, 6.0  ;;  %v4095_v13 = vmin.f32 %v3455_v41, 6.0  ;;  %v5068_v15 = vadd.f32 %v5067_v28, %v5066_v14  ;;  %v13327_v43 = vld [vmem:[#allocation41_spill] sm:$0xff]  ;;  %v13328_v31 = vld [vmem:[#allocation46_spill] sm:$0xff] }
 0x41e   : > { %v5055_v45 = vadd.f32 %v5054_v10, %v5053_v58  ;;  %v5081_v0 = vadd.f32 %v5080_v25, %v5079_v24  ;;  %v2499_v19 = vadd.f32 %v13323_v60, %v10925_v1  ;;  %v2852_v61 = vadd.f32 %v13324_v62, %v10919_v29 }
 0x41f   : > { %v5043_v42 = vrot.slane %v5042_v40, 2  ;;  %v2501_v3 = vadd.f32 %v13325_v16, %v10932_v8  ;;  %v2854_v50 = vadd.f32 %v13326_v20, %v10928_v53  ;;  %v5069_v51 = vrot.slane %v5068_v15, 2 }
 0x420   : > { %v5056_v36 = vrot.slane %v5055_v45, 2  ;;  %v5082_v32 = vrot.slane %v5081_v0, 2  ;;  %v3462_v46 = vmax.f32 %v2499_v19, 0.0  ;;  %v3464_v63 = vmax.f32 %v2852_v61, 0.0 }
 0x421   : > { %v5044_v49 = vadd.f32 %v5043_v42, %v5042_v40  ;;  %v3463_v34 = vmax.f32 %v2501_v3, 0.0  ;;  %v3465_v37 = vmax.f32 %v2854_v50, 0.0  ;;  %v5070_v9 = vadd.f32 %v5069_v51, %v5068_v15  ;;  %v13329_v40 = vld [vmem:[#allocation74_spill] sm:$0xff]  ;;  %v13331_v15 = vld [vmem:[#allocation91_spill] sm:$0xff] }
 0x422   : > { %v5057_v4 = vadd.f32 %v5056_v36, %v5055_v45  ;;  %v5083_v2 = vadd.f32 %v5082_v32, %v5081_v0  ;;  %v4102_v27 = vmin.f32 %v3462_v46, 6.0  ;;  %v4104_v33 = vmin.f32 %v3464_v63, 6.0  ;;  %v13333_v63 = vld [vmem:[#allocation17_spill] sm:$0xff] }
 0x423   : > { %v5045_v54 = vrot.slane %v5044_v49, 1  ;;  %v4103_v57 = vmin.f32 %v3463_v34, 6.0  ;;  %v4105_v56 = vmin.f32 %v3465_v37, 6.0  ;;  %v5071_v39 = vrot.slane %v5070_v9, 1 }
 0x424   : > { %v5058_v38 = vrot.slane %v5057_v4, 1  ;;  %v5084_v21 = vrot.slane %v5083_v2, 1  ;;  %v5164_v12 = vadd.f32 %v4102_v27, %v4092_v48  ;;  %v5190_v35 = vadd.f32 %v4104_v33, %v4094_v23 }
 0x425   : > { %v5046_v22 = vadd.f32 %v5045_v54, %v5044_v49  ;;  %v5177_v11 = vadd.f32 %v4103_v57, %v4093_v55  ;;  %v5203_v52 = vadd.f32 %v4105_v56, %v4095_v13  ;;  %v5072_v5 = vadd.f32 %v5071_v39, %v5070_v9  ;;  %v13330_v13 = vld [vmem:[#allocation90_spill] sm:$0xff]  ;;  %v13334_v9 = vld [vmem:[#allocation37_spill] sm:$0xff]  ;;  %v13336_v54 = vld [vmem:[#allocation75_spill] sm:$0xff] }
 0x426   : > { %v5059_v44 = vadd.f32 %v5058_v38, %v5057_v4  ;;  %v5085_v14 = vadd.f32 %v5084_v21, %v5083_v2  ;;  %v2505_v58 = vadd.f32 %v11572_v6, %v10925_v1  ;;  %v2858_v26 = vadd.f32 %v11574_v30, %v10919_v29  ;;  %v13335_v2 = vld [vmem:[#allocation51_spill] sm:$0xff] }
 0x427   : > { %v11864_v24 = vsel %vm5306_vm9, %v5046_v22, %v11784_v59  ;;  %v2507_v18 = vadd.f32 %v13327_v43, %v10932_v8  ;;  %v2860_v41 = vadd.f32 %v13328_v31, %v10928_v53  ;;  %v11874_v28 = vsel %vm5306_vm9, %v5072_v5, %v11794_v47  ;;  %v13338_v5 = vld [vmem:[#allocation53_spill] sm:$0xff] }
 0x428   : > { %v11878_v6 = vsel %vm5306_vm9, %v5059_v44, %v11798_v7  ;;  %v11882_v59 = vsel %vm5306_vm9, %v5085_v14, %v11802_v17  ;;  %v3472_v10 = vmax.f32 %v2505_v58, 0.0  ;;  %v3474_v30 = vmax.f32 %v2858_v26, 0.0  ;;  %v13332_v7 = vld [vmem:[#allocation50_spill] sm:$0xff]  ;;  %v13339_v14 = vld [vmem:[#allocation39_spill] sm:$0xff] }
 0x429   : > { %v3473_v25 = vmax.f32 %v2507_v18, 0.0  ;;  %v3475_v48 = vmax.f32 %v2860_v41, 0.0  ;;  %v2509_v23 = vadd.f32 %v13329_v40, %v10925_v1  ;;  %v2862_v47 = vadd.f32 %v13330_v13, %v10919_v29  ;;  %v13340_v26 = vld [vmem:[#allocation18_spill] sm:$0xff] }
 0x42a   : > { %v4112_v55 = vmin.f32 %v3472_v10, 6.0  ;;  %v2511_v45 = vadd.f32 %v13331_v15, %v10932_v8  ;;  %v2864_v0 = vadd.f32 %v13332_v7, %v10928_v53  ;;  %v4114_v60 = vmin.f32 %v3474_v30, 6.0 }
 0x42b   : > { %v4113_v17 = vmin.f32 %v3473_v25, 6.0  ;;  %v4115_v19 = vmin.f32 %v3475_v48, 6.0  ;;  %v3482_v42 = vmax.f32 %v2509_v23, 0.0  ;;  %v3484_v61 = vmax.f32 %v2862_v47, 0.0 }
 0x42c   : > { %v5165_v62 = vadd.f32 %v5164_v12, %v4112_v55  ;;  %v3483_v16 = vmax.f32 %v2511_v45, 0.0  ;;  %v3485_v3 = vmax.f32 %v2864_v0, 0.0  ;;  %v5191_v20 = vadd.f32 %v5190_v35, %v4114_v60  ;;  %v13337_v35 = vld [vmem:[#allocation52_spill] sm:$0xff]  ;;  %v13341_v0 = vld [vmem:[#allocation13_spill] sm:$0xff] }
 0x42d   : > { %v5178_v50 = vadd.f32 %v5177_v11, %v4113_v17  ;;  %v5204_v51 = vadd.f32 %v5203_v52, %v4115_v19  ;;  %v4122_v36 = vmin.f32 %v3482_v42, 6.0  ;;  %v4124_v32 = vmin.f32 %v3484_v61, 6.0  ;;  %v13342_v19 = vld [vmem:[#allocation59_spill] sm:$0xff] }
 0x42e   : > { %v4123_v46 = vmin.f32 %v3483_v16, 6.0  ;;  %v4125_v49 = vmin.f32 %v3485_v3, 6.0  ;;  %v2515_v34 = vadd.f32 %v13333_v63, %v10925_v1  ;;  %v2868_v4 = vadd.f32 %v13334_v9, %v10919_v29  ;;  %v13344_v16 = vld [vmem:[#allocation27_spill] sm:$0xff]  ;;  %v13345_v63 = vld [vmem:[#allocation28_spill] sm:$0xff] }
 0x42f   : > { %v5166_v37 = vadd.f32 %v5165_v62, %v4122_v36  ;;  %v2517_v27 = vadd.f32 %v13335_v2, %v10932_v8  ;;  %v2870_v33 = vadd.f32 %v13336_v54, %v10928_v53  ;;  %v5192_v57 = vadd.f32 %v5191_v20, %v4124_v32  ;;  %v13343_v62 = vld [vmem:[#allocation60_spill] sm:$0xff]  ;;  %v13346_v9 = vld [vmem:[#allocation47_spill] sm:$0xff]  ;;  %v13347_v2 = vld [vmem:[#allocation29_spill] sm:$0xff] }
 0x430   : > { %v5179_v56 = vadd.f32 %v5178_v50, %v4123_v46  ;;  %v5205_v39 = vadd.f32 %v5204_v51, %v4125_v49  ;;  %v3492_v38 = vmax.f32 %v2515_v34, 0.0  ;;  %v3494_v21 = vmax.f32 %v2868_v4, 0.0  ;;  %v13348_v54 = vld [vmem:[#allocation30_spill] sm:$0xff] }
 0x431   : > { %v3493_v12 = vmax.f32 %v2517_v27, 0.0  ;;  %v3495_v22 = vmax.f32 %v2870_v33, 0.0  ;;  %v2519_v11 = vadd.f32 %v13337_v35, %v10925_v1  ;;  %v2872_v44 = vadd.f32 %v13338_v5, %v10919_v29 }
 0x432   : > { %v4132_v52 = vmin.f32 %v3492_v38, 6.0  ;;  %v2521_v58 = vadd.f32 %v13339_v14, %v10932_v8  ;;  %v2874_v43 = vadd.f32 %v13340_v26, %v10928_v53  ;;  %v4134_v18 = vmin.f32 %v3494_v21, 6.0 }
 0x433   : > { %v4133_v31 = vmin.f32 %v3493_v12, 6.0  ;;  %v4135_v41 = vmin.f32 %v3495_v22, 6.0  ;;  %v3502_v10 = vmax.f32 %v2519_v11, 0.0  ;;  %v3504_v25 = vmax.f32 %v2872_v44, 0.0 }
 0x434   : > { %v5167_v30 = vadd.f32 %v5166_v37, %v4132_v52  ;;  %v3503_v48 = vmax.f32 %v2521_v58, 0.0  ;;  %v3505_v40 = vmax.f32 %v2874_v43, 0.0  ;;  %v5193_v23 = vadd.f32 %v5192_v57, %v4134_v18 }
 0x435   : > { %v5180_v55 = vadd.f32 %v5179_v56, %v4133_v31  ;;  %v5206_v13 = vadd.f32 %v5205_v39, %v4135_v41  ;;  %v4142_v47 = vmin.f32 %v3502_v10, 6.0  ;;  %v4144_v15 = vmin.f32 %v3504_v25, 6.0 }
 0x436   : > { %v4143_v45 = vmin.f32 %v3503_v48, 6.0  ;;  %v4145_v7 = vmin.f32 %v3505_v40, 6.0  ;;  %v2525_v60 = vadd.f32 %v13341_v0, %v10925_v1  ;;  %v2878_v42 = vadd.f32 %v13342_v19, %v10919_v29 }
 0x437   : > { %v5168_v17 = vadd.f32 %v5167_v30, %v4142_v47  ;;  %v2527_v61 = vadd.f32 %v13343_v62, %v10932_v8  ;;  %v2880_v3 = vadd.f32 %v13344_v16, %v10928_v53  ;;  %v5194_v20 = vadd.f32 %v5193_v23, %v4144_v15 }
 0x438   : > { %v5181_v50 = vadd.f32 %v5180_v55, %v4143_v45  ;;  %v5207_v51 = vadd.f32 %v5206_v13, %v4145_v7  ;;  %v3512_v36 = vmax.f32 %v2525_v60, 0.0  ;;  %v3514_v32 = vmax.f32 %v2878_v42, 0.0  ;;  %v4172_v42 = vld [vmem:[#allocation2 + $0x30] sm:$0xff] }
 0x439   : > { %v3513_v46 = vmax.f32 %v2527_v61, 0.0  ;;  %v3515_v49 = vmax.f32 %v2880_v3, 0.0  ;;  %v2529_v34 = vadd.f32 %v13345_v63, %v10925_v1  ;;  %v2882_v4 = vadd.f32 %v13346_v9, %v10919_v29  ;;  %v4174_v61 = vld [vmem:[#allocation2 + $0x40] sm:$0xff]  ;;  %v4173_v3 = vld [vmem:[#allocation2 + $0x38] sm:$0xff] }
 0x43a   : > { %v4152_v37 = vmin.f32 %v3512_v36, 6.0  ;;  %v2531_v27 = vadd.f32 %v13347_v2, %v10932_v8  ;;  %v2884_v33 = vadd.f32 %v13348_v54, %v10928_v53  ;;  %v4154_v57 = vmin.f32 %v3514_v32, 6.0  ;;  %v7417_v2 = vld [vmem:[%s12605_s3 + $0x214] ss:$8 sps:$4 sm:$0xff] (!%p7061_p4)   ;;  %v7420_v54 = vld [vmem:[%s12605_s3 + $0x210] ss:$8 sps:$4 sm:$0xff] (!%p7061_p4)  }
 0x43b   : > { %v4153_v56 = vmin.f32 %v3513_v46, 6.0  ;;  %v4155_v39 = vmin.f32 %v3515_v49, 6.0  ;;  %v3522_v38 = vmax.f32 %v2529_v34, 0.0  ;;  %v3524_v12 = vmax.f32 %v2882_v4, 0.0  ;;  %v7415_v4 = vld [vmem:[%s12605_s3 + $0x14] ss:$8 sps:$4 sm:$0xff] (!%p7061_p4)  }
 0x43c   : > { %v5169_v21 = vadd.f32 %v5168_v17, %v4152_v37  ;;  %v3523_v22 = vmax.f32 %v2531_v27, 0.0  ;;  %v3525_v35 = vmax.f32 %v2884_v33, 0.0  ;;  %v5195_v11 = vadd.f32 %v5194_v20, %v4154_v57  ;;  %v7419_v27 = vld [vmem:[%s12605_s3 + $0x10] ss:$8 sps:$4 sm:$0xff] (!%p7061_p4)   ;;  %v7421_v33 = vld [vmem:[%s12605_s3 + $0x24] ss:$8 sps:$4 sm:$0xff] (!%p7061_p4)  }
 0x43d   : > { %v5182_v1 = vadd.f32 %v5181_v50, %v4153_v56  ;;  %v5208_v52 = vadd.f32 %v5207_v51, %v4155_v39  ;;  %v4162_v5 = vmin.f32 %v3522_v38, 6.0  ;;  %v4164_v44 = vmin.f32 %v3524_v12, 6.0  ;;  %v4175_v50 = vld [vmem:[#allocation2 + $0x48] sm:$0xff]  ;;  %v7427_v38 = vld [vmem:[%s12605_s3 + $0x34] ss:$8 sps:$4 sm:$0xff] (!%p7061_p4)  }
 0x43e   : > { %v4163_v29 = vmin.f32 %v3523_v22, 6.0  ;;  %v4165_v14 = vmin.f32 %v3525_v35, 6.0  ;;  %v7423_v57 = vld [vmem:[%s12605_s3 + $0x224] ss:$8 sps:$4 sm:$0xff] (!%p7061_p4)   ;;  %v7425_v56 = vld [vmem:[%s12605_s3 + $0x20] ss:$8 sps:$4 sm:$0xff] (!%p7061_p4)  }
 0x43f   : > { %v5170_v58 = vadd.f32 %v5169_v21, %v4162_v5  ;;  %v5196_v8 = vadd.f32 %v5195_v11, %v4164_v44  ;;  %v7426_v39 = vld [vmem:[%s12605_s3 + $0x220] ss:$8 sps:$4 sm:$0xff] (!%p7061_p4)   ;;  %v7429_v21 = vld [vmem:[%s12605_s3 + $0x234] ss:$8 sps:$4 sm:$0xff] (!%p7061_p4)   ;;  %v7431_v12 = vld [vmem:[%s12605_s3 + $0x30] ss:$8 sps:$4 sm:$0xff] (!%p7061_p4)  }
 0x440   : > { %v5183_v26 = vadd.f32 %v5182_v1, %v4163_v29  ;;  %v5209_v43 = vadd.f32 %v5208_v52, %v4165_v14  ;;  %v7432_v22 = vld [vmem:[%s12605_s3 + $0x230] ss:$8 sps:$4 sm:$0xff] (!%p7061_p4)   ;;  %v7433_v35 = vld [vmem:[%s12605_s3 + $0x44] ss:$8 sps:$4 sm:$0xff] (!%p7061_p4)   ;;  %v7437_v1 = vld [vmem:[%s12605_s3 + $0x40] ss:$8 sps:$4 sm:$0xff] (!%p7061_p4)  }
 0x441   : > { %v5171_v53 = vrot.slane %v5170_v58, 4  ;;  %v5197_v18 = vrot.slane %v5196_v8, 4  ;;  %v7435_v11 = vld [vmem:[%s12605_s3 + $0x244] ss:$8 sps:$4 sm:$0xff] (!%p7061_p4)   ;;  %v7438_v52 = vld [vmem:[%s12605_s3 + $0x240] ss:$8 sps:$4 sm:$0xff] (!%p7061_p4)  }
 0x442   : > { %v5184_v31 = vrot.slane %v5183_v26, 4  ;;  %v5210_v41 = vrot.slane %v5209_v43, 4  ;;  %v7439_v5 = vld [vmem:[%s12605_s3 + $0x54] ss:$8 sps:$4 sm:$0xff] (!%p7061_p4)   ;;  %v7443_v29 = vld [vmem:[%s12605_s3 + $0x50] ss:$8 sps:$4 sm:$0xff] (!%p7061_p4)  }
 0x443   : > { %v5172_v10 = vadd.f32 %v5171_v53, %v5170_v58  ;;  %v5198_v30 = vadd.f32 %v5197_v18, %v5196_v8  ;;  %v7441_v44 = vld [vmem:[%s12605_s3 + $0x254] ss:$8 sps:$4 sm:$0xff] (!%p7061_p4)   ;;  %v7444_v14 = vld [vmem:[%s12605_s3 + $0x250] ss:$8 sps:$4 sm:$0xff] (!%p7061_p4)   ;;  %v7445_v58 = vld [vmem:[%s12605_s3 + $0x64] ss:$8 sps:$4 sm:$0xff] (!%p7061_p4)  }
 0x444   : > { %v5185_v25 = vadd.f32 %v5184_v31, %v5183_v26  ;;  %v5211_v48 = vadd.f32 %v5210_v41, %v5209_v43  ;;  %v7447_v8 = vld [vmem:[%s12605_s3 + $0x264] ss:$8 sps:$4 sm:$0xff] (!%p7061_p4)   ;;  %v7449_v26 = vld [vmem:[%s12605_s3 + $0x60] ss:$8 sps:$4 sm:$0xff] (!%p7061_p4)   ;;  %v7451_v53 = vld [vmem:[%s12605_s3 + $0x74] ss:$8 sps:$4 sm:$0xff] (!%p7061_p4)  }
 0x445   : > { %v5173_v40 = vrot.slane %v5172_v10, 2  ;;  %v5199_v23 = vrot.slane %v5198_v30, 2  ;;  %v7450_v43 = vld [vmem:[%s12605_s3 + $0x260] ss:$8 sps:$4 sm:$0xff] (!%p7061_p4)   ;;  %v7453_v18 = vld [vmem:[%s12605_s3 + $0x274] ss:$8 sps:$4 sm:$0xff] (!%p7061_p4)  }
 0x446   : > { %v5186_v55 = vrot.slane %v5185_v25, 2  ;;  %v5212_v13 = vrot.slane %v5211_v48, 2  ;;  %v7455_v31 = vld [vmem:[%s12605_s3 + $0x70] ss:$8 sps:$4 sm:$0xff] (!%p7061_p4)  }
 0x447   : > { %v5174_v47 = vadd.f32 %v5173_v40, %v5172_v10  ;;  %v5200_v15 = vadd.f32 %v5199_v23, %v5198_v30  ;;  %v7456_v41 = vld [vmem:[%s12605_s3 + $0x270] ss:$8 sps:$4 sm:$0xff] (!%p7061_p4)   ;;  %v7457_v10 = vld [vmem:[%s12605_s3 + $0x84] ss:$8 sps:$4 sm:$0xff] (!%p7061_p4)   ;;  %v7463_v40 = vld [vmem:[%s12605_s3 + $0x94] ss:$8 sps:$4 sm:$0xff] (!%p7061_p4)  }
 0x448   : > { %v5187_v45 = vadd.f32 %v5186_v55, %v5185_v25  ;;  %v5213_v7 = vadd.f32 %v5212_v13, %v5211_v48  ;;  %v7459_v30 = vld [vmem:[%s12605_s3 + $0x284] ss:$8 sps:$4 sm:$0xff] (!%p7061_p4)   ;;  %v7461_v25 = vld [vmem:[%s12605_s3 + $0x80] ss:$8 sps:$4 sm:$0xff] (!%p7061_p4)   ;;  %v7465_v23 = vld [vmem:[%s12605_s3 + $0x294] ss:$8 sps:$4 sm:$0xff] (!%p7061_p4)  }
 0x449   : > { %v5175_v0 = vrot.slane %v5174_v47, 1  ;;  %v5201_v60 = vrot.slane %v5200_v15, 1  ;;  %v7462_v48 = vld [vmem:[%s12605_s3 + $0x280] ss:$8 sps:$4 sm:$0xff] (!%p7061_p4)   ;;  %v7467_v55 = vld [vmem:[%s12605_s3 + $0x90] ss:$8 sps:$4 sm:$0xff] (!%p7061_p4)  }
 0x44a   : > { %v5188_v17 = vrot.slane %v5187_v45, 1  ;;  %v5214_v19 = vrot.slane %v5213_v7, 1  ;;  %v7468_v13 = vld [vmem:[%s12605_s3 + $0x290] ss:$8 sps:$4 sm:$0xff] (!%p7061_p4)  }
 0x44b   : > { %v5176_v62 = vadd.f32 %v5175_v0, %v5174_v47  ;;  %v5202_v16 = vadd.f32 %v5201_v60, %v5200_v15  ;;  %5406 = sbr.rel (%p7061_p4) target bundleno = 1949 (0x79d), region = 106  ;;  %v7469_v47 = vld [vmem:[%s12605_s3 + $0xa4] ss:$8 sps:$4 sm:$0xff] (!%p7061_p4)   ;;  %v7475_v0 = vld [vmem:[%s12605_s3 + $0xb4] ss:$8 sps:$4 sm:$0xff] (!%p7061_p4)  }
 0x44c   : > { %v5189_v20 = vadd.f32 %v5188_v17, %v5187_v45  ;;  %v5215_v51 = vadd.f32 %v5214_v19, %v5213_v7  ;;  %v7471_v15 = vld [vmem:[%s12605_s3 + $0x2a4] ss:$8 sps:$4 sm:$0xff] (!%p7061_p4)   ;;  %v7473_v45 = vld [vmem:[%s12605_s3 + $0xa0] ss:$8 sps:$4 sm:$0xff] (!%p7061_p4)   ;;  %v7477_v60 = vld [vmem:[%s12605_s3 + $0x2b4] ss:$8 sps:$4 sm:$0xff] (!%p7061_p4)  }
 0x44d   : > { %v5351_v36 = vsel %vm5308_vm10, %v5176_v62, %v11864_v24  ;;  %v5365_v46 = vsel %vm5308_vm10, %v5202_v16, %v11874_v28  ;;  %v7409_v24 = vld [vmem:[%s12605_s3 + $0x4] ss:$8 sps:$4 sm:$0xff] (!%p7061_p4)   ;;  %v7474_v7 = vld [vmem:[%s12605_s3 + $0x2a0] ss:$8 sps:$4 sm:$0xff] (!%p7061_p4)   ;;  %v7479_v19 = vld [vmem:[%s12605_s3 + $0xb0] ss:$8 sps:$4 sm:$0xff] (!%p7061_p4)  }
 0x44e   : > { %v5389_v32 = vadd.f32 %v5351_v36, %v4172_v42  ;;  %v5358_v49 = vsel %vm5308_vm10, %v5189_v20, %v11878_v6  ;;  %v5372_v63 = vsel %vm5308_vm10, %v5215_v51, %v11882_v59  ;;  %v5391_v34 = vadd.f32 %v5365_v46, %v4174_v61  ;;  %v7411_v28 = vld [vmem:[%s12605_s3 + $0x204] ss:$8 sps:$4 sm:$0xff] (!%p7061_p4)   ;;  %6397 = vmatprep.subr.bf16.mxu1 (!%p7061_p4), %v7409_v24  ;;  %v7413_v6 = vld [vmem:[%s12605_s3] ss:$8 sps:$4 sm:$0xff] (!%p7061_p4)   ;;  %v7480_v62 = vld [vmem:[%s12605_s3 + $0x2b0] ss:$8 sps:$4 sm:$0xff] (!%p7061_p4)  }
 0x44f   : > { %v5390_v37 = vadd.f32 %v5358_v49, %v4173_v3  ;;  %v5392_v9 = vadd.f32 %v5372_v63, %v4175_v50  ;;  %v7414_v59 = vld [vmem:[%s12605_s3 + $0x200] ss:$8 sps:$4 sm:$0xff] (!%p7061_p4)   ;;  %6479 = vmatprep.subr.bf16.mxu0 (!%p7061_p4), %v7411_v28  ;;  %6398 = vmatpush1.bf16.msra.mxu1 (!%p7061_p4), %v7413_v6  ;;  %v7481_v16 = vld [vmem:[%s12605_s3 + $0xc4] ss:$8 sps:$4 sm:$0xff] (!%p7061_p4)   ;;  %v7487_v46 = vld [vmem:[%s12605_s3 + $0xd4] ss:$8 sps:$4 sm:$0xff] (!%p7061_p4)  }
 0x450   : > { %5399 = vst [vmem:[#allocation2 + $0x30] sm:$0xff] %v5389_v32  ;;  %5401 = vst [vmem:[#allocation2 + $0x40] sm:$0xff] %v5391_v34  ;;  %6480 = vmatpush1.bf16.msra.mxu0 (!%p7061_p4), %v7414_v59  ;;  %6399 = vmatprep.subr.bf16.mxu1 (!%p7061_p4), %v7415_v4  ;;  %v5408_v17 = vld [vmem:[#allocation2 + $0x8] sm:$0xff] (!%p7061_p4)  ;;  %v7489_v49 = vld [vmem:[%s12605_s3 + $0x2d4] ss:$8 sps:$4 sm:$0xff] (!%p7061_p4)  }
 0x451   : > { %5400 = vst [vmem:[#allocation2 + $0x38] sm:$0xff] %v5390_v37  ;;  %5402 = vst [vmem:[#allocation2 + $0x48] sm:$0xff] %v5392_v9  ;;  %6481 = vmatprep.subr.bf16.mxu0 (!%p7061_p4), %v7417_v2  ;;  %v5418_v42 = vmul.f32 (!%p7061_p4), 0.00390625, %v5408_v17  ;;  %v5412_v61 = vld [vmem:[#allocation2 + $0x28] sm:$0xff] (!%p7061_p4)  ;;  %v7491_v63 = vld [vmem:[%s12605_s3 + $0xd0] ss:$8 sps:$4 sm:$0xff] (!%p7061_p4)  }
 0x452   : > { %v7483_v3 = vld [vmem:[%s12605_s3 + $0x2c4] ss:$8 sps:$4 sm:$0xff]   ;;  %v5422_v50 = vmul.f32 0.00390625, %v5412_v61  ;;  %v7485_v51 = vld [vmem:[%s12605_s3 + $0xc0] ss:$8 sps:$4 sm:$0xff]  }
 0x453   : > { %6400 = vmatpush1.bf16.msra.mxu1 %v7419_v27  ;;  %v5428_v20 = vpack.c.bf16 %v5418_v42, %v5418_v42  ;;  %v7486_v32 = vld [vmem:[%s12605_s3 + $0x2c0] ss:$8 sps:$4 sm:$0xff]   ;;  %v7492_v34 = vld [vmem:[%s12605_s3 + $0x2d0] ss:$8 sps:$4 sm:$0xff]   ;;  %v7493_v37 = vld [vmem:[%s12605_s3 + $0xe4] ss:$8 sps:$4 sm:$0xff]  }
 0x454   : > { %6482 = vmatpush1.bf16.msra.mxu0 %v7420_v54  ;;  %6401 = vmatprep.subr.bf16.mxu1 %v7421_v33  ;;  %v5432_v36 = vpack.c.bf16 %v5422_v50, %v5422_v50  ;;  %v7495_v9 = vld [vmem:[%s12605_s3 + $0x2e4] ss:$8 sps:$4 sm:$0xff]   ;;  %v7497_v24 = vld [vmem:[%s12605_s3 + $0xe0] ss:$8 sps:$4 sm:$0xff]   ;;  %v7499_v6 = vld [vmem:[%s12605_s3 + $0xf4] ss:$8 sps:$4 sm:$0xff]  }
 0x455   : > { %6483 = vmatprep.subr.bf16.mxu0 %v7423_v57  ;;  %6429 = vmatprep.mubr.bf16.mxu1 %v5428_v20  ;;  %v7498_v28 = vld [vmem:[%s12605_s3 + $0x2e0] ss:$8 sps:$4 sm:$0xff]   ;;  %v7501_v2 = vld [vmem:[%s12605_s3 + $0x2f4] ss:$8 sps:$4 sm:$0xff]   ;;  %v7503_v27 = vld [vmem:[%s12605_s3 + $0xf0] ss:$8 sps:$4 sm:$0xff]  }
 0x456   : > { %6511 = vmatprep.mubr.bf16.mxu0 %v5432_v36  ;;  %v5407_v59 = vld [vmem:[#allocation2] sm:$0xff]  ;;  %v7504_v54 = vld [vmem:[%s12605_s3 + $0x2f0] ss:$8 sps:$4 sm:$0xff]   ;;  %v7561_v50 = vld [vmem:[%s12605_s3 + $0x194] ss:$8 sps:$4 sm:$0xff]  }
 0x457   : > { %6402 = vmatpush1.bf16.msra.mxu1 %v7425_v56  ;;  %v5411_v4 = vld [vmem:[#allocation2 + $0x20] sm:$0xff]  ;;  %v5417_v33 = vmul.f32 0.00390625, %v5407_v59  ;;  %v7547_v42 = vld [vmem:[%s12605_s3 + $0x170] ss:$8 sps:$4 sm:$0xff]  }
 0x458   : > { %6484 = vmatpush1.bf16.msra.mxu0 %v7426_v39  ;;  %6403 = vmatprep.subr.bf16.mxu1 %v7427_v38  ;;  %v5421_v57 = vmul.f32 0.00390625, %v5411_v4  ;;  %v7507_v56 = vld [vmem:[%s12605_s3 + $0x104] ss:$8 sps:$4 sm:$0xff]   ;;  %v7505_v38 = vld [vmem:[%s12605_s3 + $0x100] ss:$8 sps:$4 sm:$0xff]  }
 0x459   : > { %6485 = vmatprep.subr.bf16.mxu0 %v7429_v21  ;;  %v7510_v39 = vld [vmem:[%s12605_s3 + $0x304] ss:$8 sps:$4 sm:$0xff]   ;;  %v7508_v21 = vld [vmem:[%s12605_s3 + $0x300] ss:$8 sps:$4 sm:$0xff]   ;;  %v7559_v36 = vld [vmem:[%s12605_s3 + $0x190] ss:$8 sps:$4 sm:$0xff]  }
 0x45a   : > { %v7555_v61 = vld [vmem:[%s12605_s3 + $0x184] ss:$8 sps:$4 sm:$0xff]   ;;  %v7556_v20 = vld [vmem:[%s12605_s3 + $0x380] ss:$8 sps:$4 sm:$0xff]  }
 0x45b   : > { %6404 = vmatpush1.bf16.msra.mxu1 %v7431_v12  ;;  %v5427_v12 = vpack.c.bf16 %v5417_v33, %v5417_v33  ;;  %v7582_v59 = vld [vmem:[%s12605_s3 + $0x3c4] ss:$8 sps:$4 sm:$0xff]   ;;  %v7577_v4 = vld [vmem:[%s12605_s3 + $0x1c0] ss:$8 sps:$4 sm:$0xff]   ;;  %v7583_v33 = vld [vmem:[%s12605_s3 + $0x1d0] ss:$8 sps:$4 sm:$0xff]  }
 0x45c   : > { %6486 = vmatpush1.bf16.msra.mxu0 %v7432_v22  ;;  %6405 = vmatprep.subr.bf16.mxu1 %v7433_v35  ;;  %v5431_v22 = vpack.c.bf16 %v5421_v57, %v5421_v57  ;;  %v7513_v35 = vld [vmem:[%s12605_s3 + $0x114] ss:$8 sps:$4 sm:$0xff]   ;;  %v7586_v57 = vld [vmem:[%s12605_s3 + $0x3d0] ss:$8 sps:$4 sm:$0xff]  }
 0x45d   : > { %6487 = vmatprep.subr.bf16.mxu0 %v7435_v11  ;;  %v7516_v11 = vld [vmem:[%s12605_s3 + $0x314] ss:$8 sps:$4 sm:$0xff]  }
 0x45f   : > { %6406 = vmatpush1.bf16.msra.mxu1 %v7437_v1  ;;  %v7511_v1 = vld [vmem:[%s12605_s3 + $0x110] ss:$8 sps:$4 sm:$0xff]  }
 0x460   : > { %6488 = vmatpush1.bf16.msra.mxu0 %v7438_v52  ;;  %6407 = vmatprep.subr.bf16.mxu1 %v7439_v5  ;;  %v7514_v52 = vld [vmem:[%s12605_s3 + $0x310] ss:$8 sps:$4 sm:$0xff]   ;;  %v7519_v5 = vld [vmem:[%s12605_s3 + $0x124] ss:$8 sps:$4 sm:$0xff]  }
 0x461   : > { %6489 = vmatprep.subr.bf16.mxu0 %v7441_v44  ;;  %v7522_v44 = vld [vmem:[%s12605_s3 + $0x324] ss:$8 sps:$4 sm:$0xff]  }
 0x463   : > { %6408 = vmatpush1.bf16.msra.mxu1 %v7443_v29  ;;  %v7517_v29 = vld [vmem:[%s12605_s3 + $0x120] ss:$8 sps:$4 sm:$0xff]  }
 0x464   : > { %6490 = vmatpush1.bf16.msra.mxu0 %v7444_v14  ;;  %6409 = vmatprep.subr.bf16.mxu1 %v7445_v58  ;;  %v7520_v14 = vld [vmem:[%s12605_s3 + $0x320] ss:$8 sps:$4 sm:$0xff]   ;;  %v7525_v58 = vld [vmem:[%s12605_s3 + $0x134] ss:$8 sps:$4 sm:$0xff]  }
 0x465   : > { %6491 = vmatprep.subr.bf16.mxu0 %v7447_v8  ;;  %v7528_v8 = vld [vmem:[%s12605_s3 + $0x334] ss:$8 sps:$4 sm:$0xff]  }
 0x467   : > { %6410 = vmatpush1.bf16.msra.mxu1 %v7449_v26  ;;  %v7523_v26 = vld [vmem:[%s12605_s3 + $0x130] ss:$8 sps:$4 sm:$0xff]  }
 0x468   : > { %6492 = vmatpush1.bf16.msra.mxu0 %v7450_v43  ;;  %6411 = vmatprep.subr.bf16.mxu1 %v7451_v53  ;;  %v7526_v43 = vld [vmem:[%s12605_s3 + $0x330] ss:$8 sps:$4 sm:$0xff]   ;;  %v7531_v53 = vld [vmem:[%s12605_s3 + $0x144] ss:$8 sps:$4 sm:$0xff]  }
 0x469   : > { %6493 = vmatprep.subr.bf16.mxu0 %v7453_v18  ;;  %v7534_v18 = vld [vmem:[%s12605_s3 + $0x344] ss:$8 sps:$4 sm:$0xff]  }
 0x46b   : > { %6412 = vmatpush1.bf16.msra.mxu1 %v7455_v31  ;;  %v7529_v31 = vld [vmem:[%s12605_s3 + $0x140] ss:$8 sps:$4 sm:$0xff]  }
 0x46c   : > { %6494 = vmatpush1.bf16.msra.mxu0 %v7456_v41  ;;  %6413 = vmatprep.subr.bf16.mxu1 %v7457_v10  ;;  %v7532_v41 = vld [vmem:[%s12605_s3 + $0x340] ss:$8 sps:$4 sm:$0xff]   ;;  %v7537_v10 = vld [vmem:[%s12605_s3 + $0x154] ss:$8 sps:$4 sm:$0xff]  }
 0x46d   : > { %6495 = vmatprep.subr.bf16.mxu0 %v7459_v30  ;;  %v7540_v30 = vld [vmem:[%s12605_s3 + $0x354] ss:$8 sps:$4 sm:$0xff]  }
 0x46f   : > { %6414 = vmatpush1.bf16.msra.mxu1 %v7461_v25  ;;  %v7535_v25 = vld [vmem:[%s12605_s3 + $0x150] ss:$8 sps:$4 sm:$0xff]  }
 0x470   : > { %6496 = vmatpush1.bf16.msra.mxu0 %v7462_v48  ;;  %6415 = vmatprep.subr.bf16.mxu1 %v7463_v40  ;;  %v7538_v48 = vld [vmem:[%s12605_s3 + $0x350] ss:$8 sps:$4 sm:$0xff]   ;;  %v7543_v40 = vld [vmem:[%s12605_s3 + $0x164] ss:$8 sps:$4 sm:$0xff]  }
 0x471   : > { %6497 = vmatprep.subr.bf16.mxu0 %v7465_v23  ;;  %v7546_v23 = vld [vmem:[%s12605_s3 + $0x364] ss:$8 sps:$4 sm:$0xff]  }
 0x473   : > { %6416 = vmatpush1.bf16.msra.mxu1 %v7467_v55  ;;  %v5410_v55 = vld [vmem:[#allocation2 + $0x18] sm:$0xff] }
 0x474   : > { %6498 = vmatpush1.bf16.msra.mxu0 %v7468_v13  ;;  %6417 = vmatprep.subr.bf16.mxu1 %v7469_v47  ;;  %v7541_v13 = vld [vmem:[%s12605_s3 + $0x160] ss:$8 sps:$4 sm:$0xff]   ;;  %v5420_v47 = vmul.f32 0.00390625, %v5410_v55  ;;  %v7616_v55 = vld [vmem:[%s12605_s3 + $0x450] ss:$8 sps:$4 sm:$0xff]  }
 0x475   : > { %6499 = vmatprep.subr.bf16.mxu0 %v7471_v15  ;;  %v5414_v15 = vld [vmem:[#allocation2 + $0x38] sm:$0xff] }
 0x476   : > { %v5430_v17 = vpack.c.bf16 %v5420_v47, %v5420_v47  ;;  %v7619_v47 = vld [vmem:[%s12605_s3 + $0x460] ss:$8 sps:$4 sm:$0xff]  }
 0x477   : > { %6418 = vmatpush1.bf16.msra.mxu1 %v7473_v45  ;;  %v7544_v45 = vld [vmem:[%s12605_s3 + $0x360] ss:$8 sps:$4 sm:$0xff]  }
 0x478   : > { %6500 = vmatpush1.bf16.msra.mxu0 %v7474_v7  ;;  %6419 = vmatprep.subr.bf16.mxu1 %v7475_v0  ;;  %v7549_v7 = vld [vmem:[%s12605_s3 + $0x174] ss:$8 sps:$4 sm:$0xff]   ;;  %v5424_v0 = vmul.f32 0.00390625, %v5414_v15 }
 0x479   : > { %6501 = vmatprep.subr.bf16.mxu0 %v7477_v60  ;;  %v7552_v60 = vld [vmem:[%s12605_s3 + $0x374] ss:$8 sps:$4 sm:$0xff]  }
 0x47a   : > { %v7624_v15 = vld [vmem:[%s12605_s3 + $0x474] ss:$8 sps:$4 sm:$0xff]  }
 0x47b   : > { %6420 = vmatpush1.bf16.msra.mxu1 %v7479_v19  ;;  %v5434_v19 = vpack.c.bf16 %v5424_v0, %v5424_v0  ;;  %v7625_v0 = vld [vmem:[%s12605_s3 + $0x480] ss:$8 sps:$4 sm:$0xff]  }
 0x47c   : > { %6502 = vmatpush1.bf16.msra.mxu0 %v7480_v62  ;;  %6421 = vmatprep.subr.bf16.mxu1 %v7481_v16  ;;  %v7550_v62 = vld [vmem:[%s12605_s3 + $0x370] ss:$8 sps:$4 sm:$0xff]   ;;  %v7558_v16 = vld [vmem:[%s12605_s3 + $0x384] ss:$8 sps:$4 sm:$0xff]  }
 0x47d   : > { %6503 = vmatprep.subr.bf16.mxu0 %v7483_v3  ;;  %v7553_v3 = vld [vmem:[%s12605_s3 + $0x180] ss:$8 sps:$4 sm:$0xff]  }
 0x47f   : > { %6422 = vmatpush1.bf16.msra.mxu1 %v7485_v51  ;;  %v7564_v51 = vld [vmem:[%s12605_s3 + $0x394] ss:$8 sps:$4 sm:$0xff]  }
 0x480   : > { %6504 = vmatpush1.bf16.msra.mxu0 %v7486_v32  ;;  %6423 = vmatprep.subr.bf16.mxu1 %v7487_v46  ;;  %v7562_v32 = vld [vmem:[%s12605_s3 + $0x390] ss:$8 sps:$4 sm:$0xff]   ;;  %v7567_v46 = vld [vmem:[%s12605_s3 + $0x1a4] ss:$8 sps:$4 sm:$0xff]  }
 0x481   : > { %6505 = vmatprep.subr.bf16.mxu0 %v7489_v49  ;;  %v7570_v49 = vld [vmem:[%s12605_s3 + $0x3a4] ss:$8 sps:$4 sm:$0xff]  }
 0x483   : > { %6424 = vmatpush1.bf16.msra.mxu1 %v7491_v63  ;;  %v7565_v63 = vld [vmem:[%s12605_s3 + $0x1a0] ss:$8 sps:$4 sm:$0xff]  }
 0x484   : > { %6506 = vmatpush1.bf16.msra.mxu0 %v7492_v34  ;;  %6425 = vmatprep.subr.bf16.mxu1 %v7493_v37  ;;  %v7568_v34 = vld [vmem:[%s12605_s3 + $0x3a0] ss:$8 sps:$4 sm:$0xff]   ;;  %v7573_v37 = vld [vmem:[%s12605_s3 + $0x1b4] ss:$8 sps:$4 sm:$0xff]  }
 0x485   : > { %6507 = vmatprep.subr.bf16.mxu0 %v7495_v9  ;;  %v7576_v9 = vld [vmem:[%s12605_s3 + $0x3b4] ss:$8 sps:$4 sm:$0xff]  }
 0x487   : > { %6426 = vmatpush1.bf16.msra.mxu1 %v7497_v24  ;;  %v7571_v24 = vld [vmem:[%s12605_s3 + $0x1b0] ss:$8 sps:$4 sm:$0xff]  }
 0x488   : > { %6508 = vmatpush1.bf16.msra.mxu0 %v7498_v28  ;;  %6427 = vmatprep.subr.bf16.mxu1 %v7499_v6  ;;  %v7574_v28 = vld [vmem:[%s12605_s3 + $0x3b0] ss:$8 sps:$4 sm:$0xff]   ;;  %v7579_v6 = vld [vmem:[%s12605_s3 + $0x1c4] ss:$8 sps:$4 sm:$0xff]  }
 0x489   : > { %6509 = vmatprep.subr.bf16.mxu0 %v7501_v2  ;;  %v7580_v2 = vld [vmem:[%s12605_s3 + $0x3c0] ss:$8 sps:$4 sm:$0xff]  }
 0x48b   : > { %6428 = vmatpush1.bf16.msra.mxu1 %v7503_v27  ;;  %v7585_v27 = vld [vmem:[%s12605_s3 + $0x1d4] ss:$8 sps:$4 sm:$0xff]  }
 0x48c   : > { %6510 = vmatpush1.bf16.msra.mxu0 %v7504_v54  ;;  %6438 = vmatprep.subr.bf16.mxu1 %v7507_v56  ;;  %v7588_v54 = vld [vmem:[%s12605_s3 + $0x3d4] ss:$8 sps:$4 sm:$0xff]   ;;  %v7591_v56 = vld [vmem:[%s12605_s3 + $0x1e4] ss:$8 sps:$4 sm:$0xff]  }
 0x48d   : > { %6520 = vmatprep.subr.bf16.mxu0 %v7510_v39  ;;  %v7594_v39 = vld [vmem:[%s12605_s3 + $0x3e4] ss:$8 sps:$4 sm:$0xff]  }
 0x48e   : > { %6430 = vmatmul.mubr.bf16.vlgmr.msra.gmra.mrb[0].mxu1 %v5427_v12  ;;  %v5409_v12 = vld [vmem:[#allocation2 + $0x10] sm:$0xff] }
 0x48f   : > { %6512 = vmatmul.mubr.bf16.vlgmr.msra.gmra.mrb[0].mxu0 %v5431_v22  ;;  %6439 = vmatpush1.bf16.msra.mxu1 %v7505_v38  ;;  %v7589_v38 = vld [vmem:[%s12605_s3 + $0x1e0] ss:$8 sps:$4 sm:$0xff]   ;;  %v5413_v22 = vld [vmem:[#allocation2 + $0x30] sm:$0xff] }
 0x490   : > { %6521 = vmatpush1.bf16.msra.mxu0 %v7508_v21  ;;  %6440 = vmatprep.subr.bf16.mxu1 %v7513_v35  ;;  %v7592_v21 = vld [vmem:[%s12605_s3 + $0x3e0] ss:$8 sps:$4 sm:$0xff]   ;;  %v7597_v35 = vld [vmem:[%s12605_s3 + $0x1f4] ss:$8 sps:$4 sm:$0xff]  }
 0x491   : > { %6522 = vmatprep.subr.bf16.mxu0 %v7516_v11  ;;  %6470 = vmatprep.mubr.bf16.mxu1 %v5430_v17  ;;  %v7600_v11 = vld [vmem:[%s12605_s3 + $0x3f4] ss:$8 sps:$4 sm:$0xff]   ;;  %v7628_v17 = vld [vmem:[%s12605_s3 + $0x490] ss:$8 sps:$4 sm:$0xff]  }
 0x492   : > { %6552 = vmatprep.mubr.bf16.mxu0 %v5434_v19  ;;  %v7633_v19 = vld [vmem:[%s12605_s3 + $0x4a4] ss:$8 sps:$4 sm:$0xff]  }
 0x493   : > { %6441 = vmatpush1.bf16.msra.mxu1 %v7511_v1  ;;  %v5416_v1 = vld [vmem:[#allocation2 + $0x48] sm:$0xff] }
 0x494   : > { %6523 = vmatpush1.bf16.msra.mxu0 %v7514_v52  ;;  %6442 = vmatprep.subr.bf16.mxu1 %v7519_v5  ;;  %v5419_v52 = vmul.f32 0.00390625, %v5409_v12  ;;  %v5423_v5 = vmul.f32 0.00390625, %v5413_v22  ;;  %v6632_v22 = vld [vmem:[%s12608_s6] sm:$0x3] }
 0x495   : > { %6524 = vmatprep.subr.bf16.mxu0 %v7522_v44  ;;  %v7595_v44 = vld [vmem:[%s12605_s3 + $0x1f0] ss:$8 sps:$4 sm:$0xff]  }
 0x497   : > { %6443 = vmatpush1.bf16.msra.mxu1 %v7517_v29  ;;  %v7598_v29 = vld [vmem:[%s12605_s3 + $0x3f0] ss:$8 sps:$4 sm:$0xff]  }
 0x498   : > { %6525 = vmatpush1.bf16.msra.mxu0 %v7520_v14  ;;  %6444 = vmatprep.subr.bf16.mxu1 %v7525_v58  ;;  %v5426_v14 = vmul.f32 0.00390625, %v5416_v1  ;;  %v7603_v58 = vld [vmem:[%s12605_s3 + $0x404] ss:$8 sps:$4 sm:$0xff]  }
 0x499   : > { %6526 = vmatprep.subr.bf16.mxu0 %v7528_v8  ;;  %v5429_v8 = vpack.c.bf16 %v5419_v52, %v5419_v52 }
 0x49b   : > { %6445 = vmatpush1.bf16.msra.mxu1 %v7523_v26  ;;  %v5433_v26 = vpack.c.bf16 %v5423_v5, %v5423_v5 }
 0x49c   : > { %6527 = vmatpush1.bf16.msra.mxu0 %v7526_v43  ;;  %6446 = vmatprep.subr.bf16.mxu1 %v7531_v53  ;;  %v7601_v43 = vld [vmem:[%s12605_s3 + $0x400] ss:$8 sps:$4 sm:$0xff]   ;;  %v5436_v53 = vpack.c.bf16 %v5426_v14, %v5426_v14 }
 0x49d   : > { %6528 = vmatprep.subr.bf16.mxu0 %v7534_v18  ;;  %v7606_v18 = vld [vmem:[%s12605_s3 + $0x414] ss:$8 sps:$4 sm:$0xff]  }
 0x49f   : > { %6447 = vmatpush1.bf16.msra.mxu1 %v7529_v31  ;;  %v7604_v31 = vld [vmem:[%s12605_s3 + $0x410] ss:$8 sps:$4 sm:$0xff]  }
 0x4a0   : > { %6529 = vmatpush1.bf16.msra.mxu0 %v7532_v41  ;;  %6448 = vmatprep.subr.bf16.mxu1 %v7537_v10  ;;  %v7609_v41 = vld [vmem:[%s12605_s3 + $0x424] ss:$8 sps:$4 sm:$0xff]   ;;  %v7607_v10 = vld [vmem:[%s12605_s3 + $0x420] ss:$8 sps:$4 sm:$0xff]  }
 0x4a1   : > { %6530 = vmatprep.subr.bf16.mxu0 %v7540_v30  ;;  %v7612_v30 = vld [vmem:[%s12605_s3 + $0x434] ss:$8 sps:$4 sm:$0xff]  }
 0x4a3   : > { %6449 = vmatpush1.bf16.msra.mxu1 %v7535_v25  ;;  %v7610_v25 = vld [vmem:[%s12605_s3 + $0x430] ss:$8 sps:$4 sm:$0xff]  }
 0x4a4   : > { %6531 = vmatpush1.bf16.msra.mxu0 %v7538_v48  ;;  %6450 = vmatprep.subr.bf16.mxu1 %v7543_v40  ;;  %v7615_v48 = vld [vmem:[%s12605_s3 + $0x444] ss:$8 sps:$4 sm:$0xff]   ;;  %v7613_v40 = vld [vmem:[%s12605_s3 + $0x440] ss:$8 sps:$4 sm:$0xff]  }
 0x4a5   : > { %6532 = vmatprep.subr.bf16.mxu0 %v7546_v23  ;;  %v7618_v23 = vld [vmem:[%s12605_s3 + $0x454] ss:$8 sps:$4 sm:$0xff]  }
 0x4a7   : > { %6451 = vmatpush1.bf16.msra.mxu1 %v7541_v13  ;;  %v7621_v13 = vld [vmem:[%s12605_s3 + $0x464] ss:$8 sps:$4 sm:$0xff]  }
 0x4a8   : > { %6533 = vmatpush1.bf16.msra.mxu0 %v7544_v45  ;;  %6452 = vmatprep.subr.bf16.mxu1 %v7549_v7  ;;  %v7622_v45 = vld [vmem:[%s12605_s3 + $0x470] ss:$8 sps:$4 sm:$0xff]   ;;  %v7627_v7 = vld [vmem:[%s12605_s3 + $0x484] ss:$8 sps:$4 sm:$0xff]  }
 0x4a9   : > { %6534 = vmatprep.subr.bf16.mxu0 %v7552_v60  ;;  %v7630_v60 = vld [vmem:[%s12605_s3 + $0x494] ss:$8 sps:$4 sm:$0xff]  }
 0x4ab   : > { %6453 = vmatpush1.bf16.msra.mxu1 %v7547_v42  ;;  %v7631_v42 = vld [vmem:[%s12605_s3 + $0x4a0] ss:$8 sps:$4 sm:$0xff]  }
 0x4ac   : > { %6535 = vmatpush1.bf16.msra.mxu0 %v7550_v62  ;;  %6454 = vmatprep.subr.bf16.mxu1 %v7555_v61  ;;  %v7636_v62 = vld [vmem:[%s12605_s3 + $0x4b4] ss:$8 sps:$4 sm:$0xff]   ;;  %v7634_v61 = vld [vmem:[%s12605_s3 + $0x4b0] ss:$8 sps:$4 sm:$0xff]  }
 0x4ad   : > { %6536 = vmatprep.subr.bf16.mxu0 %v7558_v16  ;;  %v7639_v16 = vld [vmem:[%s12605_s3 + $0x4c4] ss:$8 sps:$4 sm:$0xff]  }
 0x4af   : > { %6455 = vmatpush1.bf16.msra.mxu1 %v7553_v3  ;;  %v7637_v3 = vld [vmem:[%s12605_s3 + $0x4c0] ss:$8 sps:$4 sm:$0xff]  }
 0x4b0   : > { %6537 = vmatpush1.bf16.msra.mxu0 %v7556_v20  ;;  %6456 = vmatprep.subr.bf16.mxu1 %v7561_v50  ;;  %v7642_v20 = vld [vmem:[%s12605_s3 + $0x4d4] ss:$8 sps:$4 sm:$0xff]   ;;  %v7640_v50 = vld [vmem:[%s12605_s3 + $0x4d0] ss:$8 sps:$4 sm:$0xff]  }
 0x4b1   : > { %6538 = vmatprep.subr.bf16.mxu0 %v7564_v51  ;;  %v7645_v51 = vld [vmem:[%s12605_s3 + $0x4e4] ss:$8 sps:$4 sm:$0xff]  }
 0x4b3   : > { %6457 = vmatpush1.bf16.msra.mxu1 %v7559_v36  ;;  %v7643_v36 = vld [vmem:[%s12605_s3 + $0x4e0] ss:$8 sps:$4 sm:$0xff]  }
 0x4b4   : > { %6539 = vmatpush1.bf16.msra.mxu0 %v7562_v32  ;;  %6458 = vmatprep.subr.bf16.mxu1 %v7567_v46  ;;  %v5415_v32 = vld [vmem:[#allocation2 + $0x40] sm:$0xff]  ;;  %v7648_v46 = vld [vmem:[%s12605_s3 + $0x4f4] ss:$8 sps:$4 sm:$0xff]  }
 0x4b5   : > { %6540 = vmatprep.subr.bf16.mxu0 %v7570_v49  ;;  %v5425_v49 = vmul.f32 0.00390625, %v5415_v32  ;;  %v6709_v32 = vld [vmem:[%s12610_s8 + $0xd0] sm:$0xff] }
 0x4b7   : > { %6459 = vmatpush1.bf16.msra.mxu1 %v7565_v63  ;;  %v7646_v63 = vld [vmem:[%s12605_s3 + $0x4f0] ss:$8 sps:$4 sm:$0xff]  }
 0x4b8   : > { %6541 = vmatpush1.bf16.msra.mxu0 %v7568_v34  ;;  %6460 = vmatprep.subr.bf16.mxu1 %v7573_v37  ;;  %v5435_v34 = vpack.c.bf16 %v5425_v49, %v5425_v49 }
 0x4b9   : > { %6542 = vmatprep.subr.bf16.mxu0 %v7576_v9 }
 0x4bb   : > { %6461 = vmatpush1.bf16.msra.mxu1 %v7571_v24 }
 0x4bc   : > { %6543 = vmatpush1.bf16.msra.mxu0 %v7574_v28  ;;  %6462 = vmatprep.subr.bf16.mxu1 %v7579_v6  ;;  %v6602_v6 = vld [vmem:[%s12606_s4] sm:$0x3] }
 0x4bd   : > { %6544 = vmatprep.subr.bf16.mxu0 %v7582_v59  ;;  %v6616_v59 = vld [vmem:[%s12607_s5] sm:$0x3] }
 0x4bf   : > { %6463 = vmatpush1.bf16.msra.mxu1 %v7577_v4  ;;  %v13349_v4 = vld [vmem:[#allocation14_spill] sm:$0xff] }
 0x4c0   : > { %6545 = vmatpush1.bf16.msra.mxu0 %v7580_v2  ;;  %6464 = vmatprep.subr.bf16.mxu1 %v7585_v27  ;;  %v6607_v2 = vrot.slane %v6602_v6, %v13349_v4  ;;  %v6637_v5 = vrot.slane %v6632_v22, %v13349_v4 }
 0x4c1   : > { %6546 = vmatprep.subr.bf16.mxu0 %v7588_v54  ;;  %v13350_v54 = vld [vmem:[#allocation44_spill] sm:$0xff] }
 0x4c2   : > { %v6625_v12 = vrot.slane %v6616_v59, %v13350_v54 }
 0x4c3   : > { %6465 = vmatpush1.bf16.msra.mxu1 %v7583_v33  ;;  %v6611_v33 = vrot.slane %v6602_v6, %v13350_v54 }
 0x4c4   : > { %6547 = vmatpush1.bf16.msra.mxu0 %v7586_v57  ;;  %6466 = vmatprep.subr.bf16.mxu1 %v7591_v56 }
 0x4c5   : > { %6548 = vmatprep.subr.bf16.mxu0 %v7594_v39  ;;  %v6621_v39 = vrot.slane %v6616_v59, %v13349_v4  ;;  %v6695_v59 = vld [vmem:[%s12610_s8 + $0x60] sm:$0xff]  ;;  %v6696_v4 = vld [vmem:[%s12610_s8 + $0x68] sm:$0xff] }
 0x4c7   : > { %6467 = vmatpush1.bf16.msra.mxu1 %v7589_v38 }
 0x4c8   : > { %6549 = vmatpush1.bf16.msra.mxu0 %v7592_v21  ;;  %6468 = vmatprep.subr.bf16.mxu1 %v7597_v35 }
 0x4c9   : > { %6550 = vmatprep.subr.bf16.mxu0 %v7600_v11 }
 0x4cb   : > { %6469 = vmatpush1.bf16.msra.mxu1 %v7595_v44 }
 0x4cc   : > { %6551 = vmatpush1.bf16.msra.mxu0 %v7598_v29  ;;  %v6641_v29 = vrot.slane %v6632_v22, %v13350_v54  ;;  %v7286_v54 = vpack.c.bf16 %v6696_v4, %v6695_v59 }
 0x4cd   : > { %6561 = vmatprep.subr.bf16.mxu0 %v7603_v58 }
 0x4ce   : > { %6471 = vmatmul.mubr.bf16.vlgmr.msra.gmra.mrb[0].mxu1 %v5429_v8 }
 0x4cf   : > { %6553 = vmatmul.mubr.bf16.vlgmr.msra.gmra.mrb[0].mxu0 %v5433_v26 }
 0x4d0   : > { %6562 = vmatpush1.bf16.msra.mxu0 %v7601_v43  ;;  %6593 = vmatprep.mubr.bf16.mxu0 %v5436_v53  ;;  %v6699_v53 = vld [vmem:[%s12610_s8 + $0x80] sm:$0xff] }
 0x4d1   : > { %6563 = vmatprep.subr.bf16.mxu0 %v7606_v18  ;;  %v6700_v18 = vld [vmem:[%s12610_s8 + $0x88] sm:$0xff] }
 0x4d4   : > { %6564 = vmatpush1.bf16.msra.mxu0 %v7604_v31  ;;  %v6683_v31 = vld [vmem:[%s12610_s8] sm:$0xff] }
 0x4d5   : > { %6565 = vmatprep.subr.bf16.mxu0 %v7609_v41  ;;  %v7260_v41 = vpack.c.bf16 %v6700_v18, %v6699_v53 }
 0x4d7   : > { %7261 = vmatprep.subr.bf16.mxu1 %v7260_v41 }
 0x4d8   : > { %6566 = vmatpush1.bf16.msra.mxu0 %v7607_v10  ;;  %v6684_v10 = vld [vmem:[%s12610_s8 + $0x8] sm:$0xff] }
 0x4d9   : > { %6567 = vmatprep.subr.bf16.mxu0 %v7612_v30  ;;  %v6701_v30 = vld [vmem:[%s12610_s8 + $0x90] sm:$0xff] }
 0x4dc   : > { %6568 = vmatpush1.bf16.msra.mxu0 %v7610_v25  ;;  %v6702_v25 = vld [vmem:[%s12610_s8 + $0x98] sm:$0xff] }
 0x4dd   : > { %6569 = vmatprep.subr.bf16.mxu0 %v7615_v48  ;;  %v7262_v48 = vpack.c.bf16 %v6684_v10, %v6683_v31 }
 0x4df   : > { %7263 = vmatpush3.bf16.msra.mxu1 %v7262_v48 }
 0x4e0   : > { %6570 = vmatpush1.bf16.msra.mxu0 %v7613_v40  ;;  %v7264_v40 = vpack.c.bf16 %v6702_v25, %v6701_v30 }
 0x4e1   : > { %6571 = vmatprep.subr.bf16.mxu0 %v7618_v23  ;;  %v6685_v23 = vld [vmem:[%s12610_s8 + $0x10] sm:$0xff] }
 0x4e2   : > { %7265 = vmatprep.subr.bf16.mxu1 %v7264_v40 }
 0x4e4   : > { %6572 = vmatpush1.bf16.msra.mxu0 %v7616_v55  ;;  %v6686_v55 = vld [vmem:[%s12610_s8 + $0x18] sm:$0xff] }
 0x4e5   : > { %6573 = vmatprep.subr.bf16.mxu0 %v7621_v13  ;;  %v6703_v13 = vld [vmem:[%s12610_s8 + $0xa0] sm:$0xff] }
 0x4e8   : > { %6574 = vmatpush1.bf16.msra.mxu0 %v7619_v47  ;;  %v6704_v47 = vld [vmem:[%s12610_s8 + $0xa8] sm:$0xff] }
 0x4e9   : > { %6575 = vmatprep.subr.bf16.mxu0 %v7624_v15  ;;  %v7266_v15 = vpack.c.bf16 %v6686_v55, %v6685_v23 }
 0x4eb   : > { %7267 = vmatpush3.bf16.msra.mxu1 %v7266_v15 }
 0x4ec   : > { %6576 = vmatpush1.bf16.msra.mxu0 %v7622_v45  ;;  %v7268_v45 = vpack.c.bf16 %v6704_v47, %v6703_v13 }
 0x4ed   : > { %6577 = vmatprep.subr.bf16.mxu0 %v7627_v7  ;;  %v6687_v7 = vld [vmem:[%s12610_s8 + $0x20] sm:$0xff] }
 0x4ee   : > { %7269 = vmatprep.subr.bf16.mxu1 %v7268_v45 }
 0x4f0   : > { %6578 = vmatpush1.bf16.msra.mxu0 %v7625_v0  ;;  %v6688_v0 = vld [vmem:[%s12610_s8 + $0x28] sm:$0xff] }
 0x4f1   : > { %6579 = vmatprep.subr.bf16.mxu0 %v7630_v60  ;;  %v6705_v60 = vld [vmem:[%s12610_s8 + $0xb0] sm:$0xff] }
 0x4f4   : > { %6580 = vmatpush1.bf16.msra.mxu0 %v7628_v17  ;;  %v6706_v17 = vld [vmem:[%s12610_s8 + $0xb8] sm:$0xff] }
 0x4f5   : > { %6581 = vmatprep.subr.bf16.mxu0 %v7633_v19  ;;  %v7270_v19 = vpack.c.bf16 %v6688_v0, %v6687_v7 }
 0x4f7   : > { %7271 = vmatpush3.bf16.msra.mxu1 %v7270_v19 }
 0x4f8   : > { %6582 = vmatpush1.bf16.msra.mxu0 %v7631_v42  ;;  %v7272_v42 = vpack.c.bf16 %v6706_v17, %v6705_v60 }
 0x4f9   : > { %6583 = vmatprep.subr.bf16.mxu0 %v7636_v62  ;;  %v6689_v62 = vld [vmem:[%s12610_s8 + $0x30] sm:$0xff] }
 0x4fa   : > { %7273 = vmatprep.subr.bf16.mxu1 %v7272_v42 }
 0x4fc   : > { %6584 = vmatpush1.bf16.msra.mxu0 %v7634_v61  ;;  %v6690_v61 = vld [vmem:[%s12610_s8 + $0x38] sm:$0xff] }
 0x4fd   : > { %6585 = vmatprep.subr.bf16.mxu0 %v7639_v16  ;;  %v6707_v16 = vld [vmem:[%s12610_s8 + $0xc0] sm:$0xff] }
 0x500   : > { %6586 = vmatpush1.bf16.msra.mxu0 %v7637_v3  ;;  %v6708_v3 = vld [vmem:[%s12610_s8 + $0xc8] sm:$0xff] }
 0x501   : > { %6587 = vmatprep.subr.bf16.mxu0 %v7642_v20  ;;  %v7274_v20 = vpack.c.bf16 %v6690_v61, %v6689_v62 }
 0x503   : > { %7275 = vmatpush3.bf16.msra.mxu1 %v7274_v20 }
 0x504   : > { %6588 = vmatpush1.bf16.msra.mxu0 %v7640_v50  ;;  %v7276_v50 = vpack.c.bf16 %v6708_v3, %v6707_v16 }
 0x505   : > { %6589 = vmatprep.subr.bf16.mxu0 %v7645_v51  ;;  %v6691_v51 = vld [vmem:[%s12610_s8 + $0x40] sm:$0xff] }
 0x506   : > { %7277 = vmatprep.subr.bf16.mxu1 %v7276_v50 }
 0x508   : > { %6590 = vmatpush1.bf16.msra.mxu0 %v7643_v36  ;;  %v6692_v36 = vld [vmem:[%s12610_s8 + $0x48] sm:$0xff] }
 0x509   : > { %6591 = vmatprep.subr.bf16.mxu0 %v7648_v46  ;;  %v6710_v46 = vld [vmem:[%s12610_s8 + $0xd8] sm:$0xff]  ;;  %v7278_v49 = vpack.c.bf16 %v6692_v36, %v6691_v51 }
 0x50b   : > { %7279 = vmatpush3.bf16.msra.mxu1 %v7278_v49 }
 0x50c   : > { %6592 = vmatpush1.bf16.msra.mxu0 %v7646_v63  ;;  %v7280_v63 = vpack.c.bf16 %v6710_v46, %v6709_v32 }
 0x50e   : > { %7281 = vmatprep.subr.bf16.mxu1 %v7280_v63 }
 0x50f   : > { %6594 = vmatmul.mubr.bf16.vlgmr.msra.gmra.mrb[0].mxu0 %v5435_v34  ;;  %v6693_v34 = vld [vmem:[%s12610_s8 + $0x50] sm:$0xff] }
 0x5a1   : > { %v6472_v37 = vpop.f32.mrb[0].mxu1 }
 0x5a2   : > { %v6474_v9 = vpop.f32.mrb[1].mxu1 }
 0x5a3   : > { %v6476_v24 = vpop.f32.mrb[2].mxu1 }
 0x5a4   : > { %v6477_v28 = vpop.f32.mrb[3].mxu1  ;;  %v6712_v24 = vld [vmem:[%s12610_s8 + $0xe8] sm:$0xff] }
 0x5e2   : > { %v6595_v27 = vpop.f32.mrb[0].mxu0 }
 0x5e3   : > { %v7294_v57 = vadd.f32 %v6595_v27, %v6472_v37  ;;  %v6597_v56 = vpop.f32.mrb[1].mxu0  ;;  %v6694_v37 = vld [vmem:[%s12610_s8 + $0x58] sm:$0xff] }
 0x5e4   : > { %v7295_v38 = vadd.f32 %v6597_v56, %v6474_v9  ;;  %v6599_v21 = vpop.f32.mrb[2].mxu0  ;;  %v6711_v9 = vld [vmem:[%s12610_s8 + $0xe0] sm:$0xff]  ;;  %v7282_v28 = vpack.c.bf16 %v6694_v37, %v6693_v34  ;;  %v6714_v27 = vld [vmem:[%s12610_s8 + $0xf8] sm:$0xff] }
 0x5e5   : > { %v6614_v35 = vmul.f32 %v7294_v57, %v6607_v2  ;;  %v6600_v11 = vpop.f32.mrb[3].mxu0  ;;  %v7284_v6 = vpack.c.bf16 %v6712_v24, %v6711_v9  ;;  %v6713_v2 = vld [vmem:[%s12610_s8 + $0xf0] sm:$0xff]  ;;  %v6698_v56 = vld [vmem:[%s12610_s8 + $0x78] sm:$0xff] }
 0x5e6   : > { %v6615_v1 = vmul.f32 %v7295_v38, %v6611_v33  ;;  %7283 = vmatpush3.bf16.msra.mxu1 %v7282_v28  ;;  %v7288_v33 = vpack.c.bf16 %v6714_v27, %v6713_v2  ;;  %v6697_v57 = vld [vmem:[%s12610_s8 + $0x70] sm:$0xff]  ;;  %v6650_v38 = vstv %s6649_s26 }
 0x5e7   : > { %v12426_v52 = vadd.f32 %v6621_v39, %v6614_v35  ;;  %7285 = vmatprep.subr.bf16.mxu1 %v7284_v6  ;;  %v7290_v39 = vpack.c.bf16 %v6698_v56, %v6697_v57 }
 0x5e8   : > { %v12429_v44 = vadd.f32 %v6625_v12, %v6615_v1 }
 0x5e9   : > { %v6630_v14 = vmax.f32 %v12426_v52, 0.0  ;;  %v6715_v52 = vld [vmem:[%s12611_s9] sm:$0x1] }
 0x5ea   : > { %v6631_v58 = vmax.f32 %v12429_v44, 0.0  ;;  %7287 = vmatpush3.bf16.msra.mxu1 %v7286_v54 }
 0x5eb   : > { %v6644_v8 = vmul.f32 %v6637_v5, %v6630_v14  ;;  %7289 = vmatprep.subr.bf16.mxu1 %v7288_v33 }
 0x5ec   : > { %v6645_v26 = vmul.f32 %v6641_v29, %v6631_v58 }
 0x5ee   : > { %v6646_v43 = vadd.f32 %v6645_v26, %v6644_v8  ;;  %7291 = vmatpush3.bf16.msra.mxu1 %v7290_v39 }
 0x5f0   : > { %6647 = vadd.xlane.f32.xlu0 %v6646_v43 }
 0x67d   : > { %v6648_v21 = vpop.xlane.xlu0 %6647 }
 0x67e   : > { %v6651_v12 = vadd.f32 %v6650_v38, %v6648_v21 }
 0x680   : > { %v6652_v22 = vrot.slane %v6651_v12, 4 }
 0x682   : > { %v6653_v35 = vmax.f32 %v6651_v12, %v6652_v22 }
 0x684   : > { %v6654_v11 = vrot.slane %v6653_v35, 2 }
 0x686   : > { %v6655_v1 = vmax.f32 %v6653_v35, %v6654_v11 }
 0x688   : > { %v6656_v5 = vrot.slane %v6655_v1, 1 }
 0x68a   : > { %v6657_v29 = vmax.f32 %v6655_v1, %v6656_v5 }
 0x68c   : > { %v6658_v8 = vsub.f32 %v6651_v12, %v6657_v29 }
 0x68e   : > { %v6659_v26 = vmul.f32 1.442695, %v6658_v8 }
 0x690   : > { %7649 = vpow2.f32 %v6659_v26 }
 0x69a   : > { %v7650_v43 = vpop.eup %7649 }
 0x69b   : > { %v6661_v53 = vrot.slane %v7650_v43, 4 }
 0x69d   : > { %v6662_v18 = vadd.f32 %v7650_v43, %v6661_v53 }
 0x69f   : > { %v6663_v31 = vrot.slane %v6662_v18, 2 }
 0x6a1   : > { %v6664_v41 = vadd.f32 %v6663_v31, %v6662_v18 }
 0x6a3   : > { %v6665_v10 = vrot.slane %v6664_v41, 1 }
 0x6a5   : > { %v6666_v30 = vadd.f32 %v6665_v10, %v6664_v41 }
 0x6a7   : > { %7651 = vrcp.f32 %v6666_v30 }
 0x6b1   : > { %v7652_v25 = vpop.eup %7651 }
 0x6b2   : > { %v6668_v48 = vmul.f32 %v7652_v25, %v7650_v43 }
 0x6b4   : > { %v6670_v40 = vmul.f32 %v6668_v48, %v6631_v58  ;;  %v6669_v23 = vmul.f32 %v6668_v48, %v6630_v14 }
 0x6b6   : > { %v6677_v55 = vrot.slane %v6670_v40, 4  ;;  %v6671_v13 = vrot.slane %v6669_v23, 4 }
 0x6b8   : > { %v6678_v47 = vadd.f32 %v6677_v55, %v6670_v40  ;;  %v6672_v15 = vadd.f32 %v6671_v13, %v6669_v23 }
 0x6ba   : > { %v6679_v45 = vrot.slane %v6678_v47, 2  ;;  %v6673_v7 = vrot.slane %v6672_v15, 2 }
 0x6bc   : > { %v6680_v0 = vadd.f32 %v6679_v45, %v6678_v47  ;;  %v6674_v60 = vadd.f32 %v6673_v7, %v6672_v15 }
 0x6be   : > { %v6681_v17 = vrot.slane %v6680_v0, 1  ;;  %v6675_v19 = vrot.slane %v6674_v60, 1 }
 0x6c0   : > { %v6682_v42 = vadd.f32 %v6681_v17, %v6680_v0  ;;  %v6676_v62 = vadd.f32 %v6675_v19, %v6674_v60 }
 0x6c2   : > { %6780 = vmatprep.mubr.f32.mxu1 %v6682_v42 }
 0x6c3   : > { %6781 = vmatmul.mubr.f32.vlgmr.msra.gmra.mrb[4].mxu1 %v6676_v62 }
 0x796   : > { %v7257_v44 = vpop.f32.mrb[4].mxu1 }
 0x797   : > { %v7258_v14 = vpop.f32.mrb[5].mxu1 }
 0x798   : > { %v7259_v58 = vadd.f32 %v7258_v14, %v7257_v44 }
 0x79a   : > { %v6783_v61 = vadd.f32 %v7259_v58, %v6715_v52 }
 0x79c   : > { %6786 = vst [vmem:[%s8065_s29] sm:$0x1] %v6783_v61 }
 0x79d PF: > { %s7222_s27 = sshll.u32 %s7751_s21, 4  ;;  %s13351_s18 = sld [smem:[#allocation94_spill]] }
 0x79e   : > { %s6800_s11 = sshll.u32 %s8065_s29, 4  ;;  %s13353_s28 = sand.u32 1, %s7731_s16   ;;  %s6801_s11 = int_to_ptr.vmem [resolvable:$true] %s6800_s11 }
 0x79f   : > { %s6788_s26 = scalar_lea.sflag [#allocation6], %s13353_s28  ;;  %s7653_s30 = scalar_lea.vmem %s6801_s11, 16 }
 0x7a0   : > { %p7654_p5 = scmp.ne.s32.totalorder %s6801_s11, %s7653_s30  ;;  %s7767_s15 = smov [#allocation5]  }
 0x7a1   : > { %s7657_s0 = sshll.u32 %s7767_s15, 4  ;;  %s7658_s0 = int_to_ptr.vmem [resolvable:$false] %s7657_s0 }
 0x7a2   : > { %p7655_p6 = pnand %p7654_p5, %p7898_p7  ;;  %s7659_s1 = scalar_lea.vmem %s7658_s0, 32 }
 0x7a3   : > { %s13352_s13 = smov %s13351_s18  ;;  %s12546_s14 = scalar_lea.hbm %s13351_s18, %s7222_s27 }
 0x7a4   : > { %p7656_p8 = pneg %p7655_p6  ;;  %p7660_p9 = scmp.lt.s32.totalorder %s6801_s11, %s7658_s0 }
 0x7a5   : > { %p7661_p10 = scmp.lt.s32.totalorder %s7659_s1, %s7653_s30 }
 0x7a7   : > { %p7662_p11 = por %p7661_p10, %p7660_p9 }
 0x7a9   : > { %p7663_p13 = pnand %p7662_p11, %p7656_p8 }
 0x7ab   : > { %7666 = shalt.err (!%p7663_p13)
}
 0x7ac   : > { %s7667_s21 = scalar_lea.hbm %s12546_s14, 16  ;;  %s7671_s20 = scalar_lea.hbm %s13352_s13, 32 }
 0x7ad   : > { %p7668_p0 = scmp.ne.s32.totalorder %s12546_s14, %s7667_s21  ;;  %p7672_p3 = scmp.lt.u32.totalorder %s12546_s14, %s13352_s13 }
 0x7ae   : > { %p7673_p4 = scmp.lt.u32.totalorder %s7671_s20, %s7667_s21  ;;  %p7675_p6 = scmp.lt.u32.totalorder %s7667_s21, %s12546_s14 }
 0x7af   : > { %p7669_p1 = pnand %p7668_p0, %p7898_p7 }
 0x7b0   : > { %p7674_p5 = por %p7673_p4, %p7672_p3 }
 0x7b1   : > { %p7670_p2 = pneg %p7669_p1 }
 0x7b2   : > { %p7676_p8 = por %p7675_p6, %p7674_p5 }
 0x7b4   : > { %p7677_p9 = pnand %p7676_p8, %p7670_p2 }
 0x7b6   : > { %7680 = shalt.err (!%p7677_p9)
}
 0x7b7   : > { %7308 = dma.vmem_to_hbm [thread:$0]  (%p7898_p7), %s6801_s11, 16, %s12546_s14, %s6788_s26  }
 0x7b8 PF: > { %s13354_s1 = sld [smem:[#allocation8_spill]]  ;;  %p7314_p10 = scmp.ge.s32.totalorder %s7763_s7, 2 }
 0x7ba   : > { %p7311_p11 = pnand %p7314_p10, %p7906_p12 }
 0x7be   : > { %s6812_s28 = sand.u32 1, %s13354_s1  }
 0x7bf   : > { %s6813_s30 = scalar_lea.sflag [#allocation6], %s6812_s28 }
 0x7c0   : > { %7722 = dma.done.wait (!%p7311_p11), %s6813_s30, 16  }
 0x7c1   : > { %7724 = vsyncadd (!%p7311_p11), %s6813_s30, 4294967280  ;;  %s24_s7 = sadd.s32 1, %s7763_s7   ;;  %s13356_s12 = sld [smem:[#allocation9_spill]] }
 0x7c2   : > { %p21_p13 = scmp.ge.s32.totalorder %s24_s7, 10   ;;  %s13357_s14 = sld [smem:[#allocation10_spill]] }
 0x7c3   : > { %s13358_s15 = smov %s7731_s16  ;;  %s13359_s16 = smov %s7735_s17 }
 0x7c4   : > { %s13360_s17 = smov %s7911_s10  ;;  %s13361_s18 = smov %s7743_s19 }
 0x7c5   : > { %s13362_s19 = smov %s7914_s24  ;;  %s13363_s20 = smov %s7755_s22 }
 0x7c6   : > { %s13364_s21 = smov %s7759_s23  ;;  %23 = sbr.rel (!%p21_p13) target bundleno = 11 (0xb), region = 146 }
 0x7c7   : > { %s13365_s22 = smov %s13356_s12 }
 0x7c8   : > { %s13366_s23 = smov %s13357_s14 }
 0x7cd   :  { %6817 = vsyncpa [#allocation6], 1 }
 0x7ce   :  { %6819 = vsyncpa [#allocation6 + $0x1], 1 }

</bundles_post_ra>
